<compile_context>
chip_gen: v6e
topology: v6e:2x2x1
jax: 0.10.0
libtpu: 0.0.40
codegen_flags: <defaults>
</compile_context>

<pallas_src>
import functools

import numpy as np
import jax
import jax.numpy as jnp
from jax import lax
from jax.experimental import pallas as pl
from jax.experimental.pallas import tpu as pltpu


LANE = 128
VMEM_LIMIT = 32 * 1024 * 1024   # safe for v5e/v6e (128 MiB phys) and v7x (64 MiB phys)
LEAKY_SLOPE = 0.2


def _round_up(x, m):
    return (x + m - 1) // m * m


# ----------------------------------------------------------------------------
# Pallas kernels
# ----------------------------------------------------------------------------
def _gemm_bias_act_kernel(x_ref, w_ref, b_ref, o_ref, *, act):
    """One (bm, K) x (K, N) tile: o = act(x @ w + b).

    x / w arrive pre-cast to bf16 (MXU, f32 accumulation); bias and activation
    math stays f32 on the VPU.
    """
    y = jnp.dot(x_ref[...], w_ref[...], preferred_element_type=jnp.float32)
    y = y + b_ref[...]
    if act == "relu":
        y = jnp.maximum(y, 0.0)
    elif act == "leaky_relu":
        y = jnp.where(y > 0.0, y, LEAKY_SLOPE * y)
    elif act != "none":
        raise ValueError(f"unknown act {act}")
    o_ref[...] = y.astype(o_ref.dtype)


def _pick_bm(m):
    """Big M-tiles (few grid steps) but grid >= 2 on large-M layers so
    dimension_semantics=('parallel',) can shard across v7x's two TensorCores."""
    if m <= 256 or m % 8 != 0:
        return m
    bm = (min(1024, m // 2) // 8) * 8
    while bm > 8 and m % bm != 0:
        bm -= 8
    return bm


def matmul_bias_act(x, w, b, act):
    """M-tiled GEMM + bias + activation; K and N are full (true-size) blocks."""
    M, K = x.shape
    K2, N = w.shape
    assert K == K2, (K, K2)
    bm = _pick_bm(M)
    kernel = functools.partial(_gemm_bias_act_kernel, act=act)
    return pl.pallas_call(
        kernel,
        out_shape=jax.ShapeDtypeStruct((M, N), jnp.bfloat16),
        grid=(M // bm,),
        in_specs=[
            pl.BlockSpec((bm, K), lambda i: (i, 0)),
            pl.BlockSpec((K, N), lambda i: (0, 0)),
            pl.BlockSpec((1, N), lambda i: (0, 0)),
        ],
        out_specs=pl.BlockSpec((bm, N), lambda i: (i, 0)),
        compiler_params=pltpu.CompilerParams(
            dimension_semantics=("parallel",),
            vmem_limit_bytes=VMEM_LIMIT),
    )(x, w, b)


def _tail_kernel(x_ref, u4_ref, b4_ref, u5_ref, b5_ref,
                 w1_ref, b1_ref, w2_ref, b2_ref, w3_ref, b3_ref,
                 o_ref, *, n_classes):
    """Fused conv4 (unrolled, ReLU) -> enc_conv1 (unrolled, LeakyReLU)
    -> fc1 -> fc2 -> linear -> log_softmax(dim=1). Everything VMEM-resident."""
    def leaky(v):
        return jnp.where(v > 0.0, v, LEAKY_SLOPE * v)

    def mm(a, w_ref_):
        return jnp.dot(a, w_ref_[...], preferred_element_type=jnp.float32)

    h = jnp.maximum(mm(x_ref[...], u4_ref) + b4_ref[...], 0.0)      # conv4 + ReLU
    h = leaky(mm(h.astype(jnp.bfloat16), u5_ref) + b5_ref[...])     # enc_conv1 + LeakyReLU
    h = leaky(mm(h.astype(jnp.bfloat16), w1_ref) + b1_ref[...])     # fc1
    h = leaky(mm(h.astype(jnp.bfloat16), w2_ref) + b2_ref[...])     # fc2
    logits = mm(h.astype(jnp.bfloat16), w3_ref) + b3_ref[...]       # linear (pad cols: -1e30 bias)
    m = jnp.max(logits, axis=-1, keepdims=True)
    z = logits - m
    lse = jnp.log(jnp.sum(jnp.exp(z), axis=-1, keepdims=True))
    o_ref[...] = (z - lse)[:, :n_classes].astype(o_ref.dtype)


def fused_tail(x, tail):
    B = x.shape[0]
    n_classes = tail["n_classes"]
    ops = [x, tail["u4"], tail["b4"], tail["u5"], tail["b5"],
           tail["w1"], tail["b1"], tail["w2"], tail["b2"],
           tail["w3"], tail["b3"]]
    in_specs = [pl.BlockSpec(op.shape, lambda i: (0, 0)) for op in ops]
    kernel = functools.partial(_tail_kernel, n_classes=n_classes)
    return pl.pallas_call(
        kernel,
        out_shape=jax.ShapeDtypeStruct((B, n_classes), jnp.float32),
        grid=(1,),
        in_specs=in_specs,
        out_specs=pl.BlockSpec((B, n_classes), lambda i: (0, 0)),
        compiler_params=pltpu.CompilerParams(
            dimension_semantics=("arbitrary",),
            vmem_limit_bytes=VMEM_LIMIT),
    )(*ops)


# ----------------------------------------------------------------------------
# Conv layer: NHWC im2col (XLA glue, true channel count) feeding the Pallas GEMM
# ----------------------------------------------------------------------------
def conv2d_nhwc(x, layer):
    """x: (B, H, W, C) NHWC bf16 with TRUE channel count; layer['w'] is the
    (kh*kw*C, OC) bf16 GEMM weight (tap-major, channel-minor rows)."""
    kh, kw = layer["k"]
    s, p = layer["stride"], layer["pad"]
    B, H, W, C = x.shape
    OH = (H + 2 * p - kh) // s + 1
    OW = (W + 2 * p - kw) // s + 1
    # TODO(synk): patch extraction (im2col) still runs as XLA pad/strided-slice/concat
    #   glue; folding the tap accumulation into the Pallas kernel would remove this
    #   activation HBM round trip for conv1-conv3.
    xp = jnp.pad(x, ((0, 0), (p, p), (p, p), (0, 0)))
    taps = [xp[:, i:i + s * (OH - 1) + 1:s, j:j + s * (OW - 1) + 1:s, :]
            for i in range(kh) for j in range(kw)]
    patches = jnp.concatenate(taps, axis=-1).reshape(B * OH * OW, kh * kw * C)
    y = matmul_bias_act(patches, layer["w"], layer["b"], act=layer["act"])
    return y.reshape(B, OH, OW, layer["w"].shape[1])


# ----------------------------------------------------------------------------
# Weight preprocessing
# ----------------------------------------------------------------------------
def _conv_weight_to_gemm(w_oihw, b):
    """(OC, IC, KH, KW) PyTorch weight -> (KH*KW*IC, OC) bf16 GEMM weight with
    tap-major / channel-minor rows (matches im2col feature order). No K padding."""
    OC, IC, KH, KW = w_oihw.shape
    w = jnp.transpose(w_oihw, (2, 3, 1, 0)).reshape(KH * KW * IC, OC)
    return w.astype(jnp.bfloat16), jnp.asarray(b, jnp.float32).reshape(1, OC)


def _unroll_conv(w_oihw, b, in_hw, stride, pad, out_order):
    """Dense 'unrolled conv' matrix for a fixed (tiny) spatial size:
        y_flat = x_flat @ U + b_u,  x_flat in NHWC-flat order,
    out_order selects the output flat order ('nhwc' or 'nchw' = PyTorch view order)."""
    w = np.asarray(w_oihw, np.float32)
    b = np.asarray(b, np.float32)
    OC, IC, KH, KW = w.shape
    H, W = in_hw
    OH = (H + 2 * pad - KH) // stride + 1
    OW = (W + 2 * pad - KW) // stride + 1
    wt = np.transpose(w, (2, 3, 1, 0))                    # (KH, KW, IC, OC)
    U = np.zeros((H * W * IC, OH * OW * OC), np.float32)
    for oh in range(OH):
        for ow in range(OW):
            for i in range(KH):
                for j in range(KW):
                    h = stride * oh + i - pad
                    wc = stride * ow + j - pad
                    if not (0 <= h < H and 0 <= wc < W):
                        continue
                    r0 = (h * W + wc) * IC
                    if out_order == "nhwc":
                        c0 = (oh * OW + ow) * OC
                        U[r0:r0 + IC, c0:c0 + OC] = wt[i, j]
                    else:  # "nchw" -- channel-major flatten (PyTorch .view(B, -1))
                        U[r0:r0 + IC, (oh * OW + ow)::(OH * OW)] = wt[i, j]
    b_u = np.tile(b, OH * OW) if out_order == "nhwc" else np.repeat(b, OH * OW)
    return (jnp.asarray(U, jnp.bfloat16),
            jnp.asarray(b_u, jnp.float32).reshape(1, -1),
            (OH, OW, OC))


# ----------------------------------------------------------------------------
# Parameters (deterministic, synthetic)
# ----------------------------------------------------------------------------
def init_params(key, in_ch=3, n_blocks=4, nz_feat=100, n_classes=10,
                input_hw=(64, 64)):
    ks = iter(jax.random.split(key, 16))

    def norm(shape, scale=0.05):
        return scale * jax.random.normal(next(ks), shape, jnp.float32)

    params = {"convs": []}
    chans = [in_ch, 8, 16, 32, 64]
    h, w = input_hw
    for i in range(n_blocks):
        params["convs"].append((norm((chans[i + 1], chans[i], 3, 3)),
                                norm((chans[i + 1],))))
        h = (h + 2 - 3) // 2 + 1
        w = (w + 2 - 3) // 2 + 1
    # enc_conv1: 64 -> 32 channels, k=4, s=2, p=1 (LeakyReLU)
    params["enc_conv1"] = (norm((32, 64, 4, 4)), norm((32,)))
    h = (h + 2 - 4) // 2 + 1
    w = (w + 2 - 4) // 2 + 1
    nc_input = 32 * h * w
    params["fc1"] = (norm((nc_input, nz_feat)), norm((nz_feat,)))
    params["fc2"] = (norm((nz_feat, nz_feat)), norm((nz_feat,)))
    params["linear"] = (norm((nz_feat, n_classes)), norm((n_classes,)))
    params["meta"] = dict(nz_feat=nz_feat, n_classes=n_classes, input_hw=input_hw)
    return params


def prepare_params(params):
    """One-time preprocessing: bf16 GEMM weights with TRUE-channel K, unrolled
    matrices for the two tiny tail convolutions, lane-padded fc/classifier."""
    meta = params["meta"]
    h, w = meta["input_hw"]
    prep = {"convs": []}
    # conv1..conv3: im2col (XLA) + tiled Pallas GEMM
    for (wc, bc) in params["convs"][:-1]:
        kh, kw = wc.shape[2], wc.shape[3]
        wg, bg = _conv_weight_to_gemm(wc, bc)
        prep["convs"].append({"w": wg, "b": bg, "k": (kh, kw),
                              "stride": 2, "pad": 1, "act": "relu"})
        h = (h + 2 - kh) // 2 + 1
        w = (w + 2 - kw) // 2 + 1
    # conv4 + enc_conv1 are folded into the fused tail as dense linear maps
    # (their spatial extent is fixed and tiny: 8x8 -> 4x4 -> 2x2).
    w4, b4 = params["convs"][-1]
    u4, b4u, (h4, w4s, _) = _unroll_conv(w4, b4, (h, w), 2, 1, "nhwc")
    we, be = params["enc_conv1"]
    u5, b5u, (he, wes, oce) = _unroll_conv(we, be, (h4, w4s), 2, 1, "nchw")

    nz = meta["nz_feat"]
    nzp = _round_up(nz, LANE)
    ncls = meta["n_classes"]
    nclsp = _round_up(ncls, LANE)
    w1, b1 = params["fc1"]
    w2, b2 = params["fc2"]
    w3, b3 = params["linear"]
    assert w1.shape[0] == he * wes * oce, (w1.shape, he, wes, oce)
    # nz_feat padding is exactly zero through LeakyReLU (zero weight cols + zero bias);
    # classifier padding uses zero weights + -1e30 bias so the 128-lane log_softmax
    # reduction ignores the padded columns.
    w1p = jnp.pad(w1, ((0, 0), (0, nzp - nz))).astype(jnp.bfloat16)
    b1p = jnp.pad(b1, (0, nzp - nz)).astype(jnp.float32).reshape(1, nzp)
    w2p = jnp.pad(w2, ((0, nzp - nz), (0, nzp - nz))).astype(jnp.bfloat16)
    b2p = jnp.pad(b2, (0, nzp - nz)).astype(jnp.float32).reshape(1, nzp)
    w3p = jnp.pad(w3, ((0, nzp - nz), (0, nclsp - ncls))).astype(jnp.bfloat16)
    b3p = jnp.pad(b3, (0, nclsp - ncls),
                  constant_values=-1e30).astype(jnp.float32).reshape(1, nclsp)
    prep["tail"] = {"u4": u4, "b4": b4u, "u5": u5, "b5": b5u,
                    "w1": w1p, "b1": b1p, "w2": w2p, "b2": b2p,
                    "w3": w3p, "b3": b3p, "n_classes": ncls}
    return prep


# ----------------------------------------------------------------------------
# Forward pass
# ----------------------------------------------------------------------------
def classifier_forward(prep, img):
    # NCHW -> NHWC once; activations stay NHWC bf16 with TRUE channel counts.
    x = jnp.transpose(img, (0, 2, 3, 1)).astype(jnp.bfloat16)
    for layer in prep["convs"]:
        x = conv2d_nhwc(x, layer)
    x = x.reshape(x.shape[0], -1)             # (B, 8*8*32) NHWC-flat, bf16
    # Fused conv4 + enc_conv1 + fc1 + fc2 + linear + log_softmax (one Pallas call).
    return fused_tail(x, prep["tail"])        # (B, n_classes) f32 log-probs


# Pure-JAX f32 reference (independent path: lax conv + dense ops) for validation.
def reference_forward(params, img):
    x = img.astype(jnp.float32)
    for (wc, bc) in params["convs"]:
        x = lax.conv_general_dilated(x, wc, (2, 2), [(1, 1), (1, 1)],
                                     dimension_numbers=("NCHW", "OIHW", "NCHW"))
        x = jnp.maximum(x + bc[None, :, None, None], 0.0)
    we, be = params["enc_conv1"]
    x = lax.conv_general_dilated(x, we, (2, 2), [(1, 1), (1, 1)],
                                 dimension_numbers=("NCHW", "OIHW", "NCHW"))
    x = x + be[None, :, None, None]
    x = jnp.where(x > 0, x, LEAKY_SLOPE * x)
    x = x.reshape(x.shape[0], -1)
    for name in ("fc1", "fc2"):
        wf, bf = params[name]
        x = x @ wf + bf
        x = jnp.where(x > 0, x, LEAKY_SLOPE * x)
    wl, bl = params["linear"]
    return jax.nn.log_softmax(x @ wl + bl, axis=1)


if __name__ == "__main__":
    key = jax.random.PRNGKey(0)
    pkey, xkey = jax.random.split(key)

    n_classes = 10
    params = init_params(pkey, in_ch=3, n_blocks=4, nz_feat=100,
                         n_classes=n_classes, input_hw=(64, 64))
    prep = prepare_params(params)
    img = jax.random.normal(xkey, (2, 3, 64, 64), jnp.float32)

    fwd = jax.jit(lambda im: classifier_forward(prep, im))
    out = jax.block_until_ready(fwd(img))

    assert out.shape == (2, n_classes), out.shape
    # log_softmax rows must exponentiate to ~1
    row_sums = jnp.sum(jnp.exp(out), axis=1)
    assert bool(jnp.all(jnp.abs(row_sums - 1.0) < 1e-3)), row_sums
    # loose check against the independent f32 reference (bf16 MXU path)
    ref = reference_forward(params, img)
    max_err = float(jnp.max(jnp.abs(out - ref)))
    assert max_err < 0.1, max_err

    print("KERNEL_OK")
</pallas_src>

<mosaic_0001>
module attributes {stable_mosaic.version = 11 : i64} {
  func.func @_gemm_bias_act_kernel(%arg0: i32, %arg1: memref<1024x27xbf16, #tpu.memory_space<vmem>>, %arg2: memref<27x8xbf16, #tpu.memory_space<vmem>>, %arg3: memref<1x8xf32, #tpu.memory_space<vmem>>, %arg4: memref<1024x8xbf16, #tpu.memory_space<vmem>>) attributes {dimension_semantics = [#tpu.dimension_semantics<parallel>], iteration_bounds = array<i64: 2>, scalar_prefetch = 0 : i64, scratch_operands = 0 : i64, tpu.core_type = #tpu.core_type<tc>, window_params = [{transform_indices = @transform_0, window_bounds = array<i64: 1024, 27>}, {pipeline_mode = #tpu.pipeline_mode<synchronous>, transform_indices = @transform_1, window_bounds = array<i64: 27, 8>}, {pipeline_mode = #tpu.pipeline_mode<synchronous>, transform_indices = @transform_2, window_bounds = array<i64: 1, 8>}, {transform_indices = @transform_3, window_bounds = array<i64: 1024, 8>}]} {
    %c0 = arith.constant 0 : index
    %c0_0 = arith.constant 0 : index
    %0 = vector.load %arg1[%c0, %c0_0] : memref<1024x27xbf16, #tpu.memory_space<vmem>>, vector<1024x27xbf16>
    %c0_1 = arith.constant 0 : index
    %c0_2 = arith.constant 0 : index
    %1 = vector.load %arg2[%c0_1, %c0_2] : memref<27x8xbf16, #tpu.memory_space<vmem>>, vector<27x8xbf16>
    %cst = arith.constant dense<0.000000e+00> : vector<1024x8xf32>
    %2 = tpu.matmul %0, %1, %cst {dimension_numbers = #tpu.dot_dimension_numbers<[1], [0], [0], [1], [0, 0, 1, 1], [], []>} : vector<1024x27xbf16>, vector<27x8xbf16>, vector<1024x8xf32> -> vector<1024x8xf32>
    %c0_3 = arith.constant 0 : index
    %c0_4 = arith.constant 0 : index
    %3 = vector.load %arg3[%c0_3, %c0_4] : memref<1x8xf32, #tpu.memory_space<vmem>>, vector<1x8xf32>
    %4 = vector.broadcast %3 : vector<1x8xf32> to vector<1024x8xf32>
    %5 = arith.addf %2, %4 : vector<1024x8xf32>
    %cst_5 = arith.constant 0.000000e+00 : f32
    %6 = vector.broadcast %cst_5 : f32 to vector<1024x8xf32>
    %7 = arith.maximumf %5, %6 : vector<1024x8xf32>
    %8 = arith.truncf %7 : vector<1024x8xf32> to vector<1024x8xbf16>
    %c0_6 = arith.constant 0 : index
    %c0_7 = arith.constant 0 : index
    %9 = vector.load %arg4[%c0_6, %c0_7] : memref<1024x8xbf16, #tpu.memory_space<vmem>>, vector<1024x8xbf16>
    tpu.vector_store %arg4[%c0_6, %c0_7], %8 {strides = array<i32>} : memref<1024x8xbf16, #tpu.memory_space<vmem>>, vector<1024x8xbf16>,
    return
  }
  func.func @transform_0(%arg0: i32) -> (i32, i32) {
    %c0_i32 = arith.constant 0 : i32
    %c0_i32_0 = arith.constant 0 : i32
    return %arg0, %c0_i32 : i32, i32
  }
  func.func @transform_1(%arg0: i32) -> (i32, i32) {
    %c0_i32 = arith.constant 0 : i32
    %c0_i32_0 = arith.constant 0 : i32
    %c0_i32_1 = arith.constant 0 : i32
    return %c0_i32, %c0_i32_0 : i32, i32
  }
  func.func @transform_2(%arg0: i32) -> (i32, i32) {
    %c0_i32 = arith.constant 0 : i32
    %c0_i32_0 = arith.constant 0 : i32
    %c0_i32_1 = arith.constant 0 : i32
    return %c0_i32, %c0_i32_0 : i32, i32
  }
  func.func @transform_3(%arg0: i32) -> (i32, i32) {
    %c0_i32 = arith.constant 0 : i32
    %c0_i32_0 = arith.constant 0 : i32
    return %arg0, %c0_i32 : i32, i32
  }
}

module attributes {stable_mosaic.version = 11 : i64} {
  func.func @_gemm_bias_act_kernel(%arg0: i32, %arg1: memref<256x72xbf16, #tpu.memory_space<vmem>>, %arg2: memref<72x16xbf16, #tpu.memory_space<vmem>>, %arg3: memref<1x16xf32, #tpu.memory_space<vmem>>, %arg4: memref<256x16xbf16, #tpu.memory_space<vmem>>) attributes {dimension_semantics = [#tpu.dimension_semantics<parallel>], iteration_bounds = array<i64: 2>, scalar_prefetch = 0 : i64, scratch_operands = 0 : i64, tpu.core_type = #tpu.core_type<tc>, window_params = [{transform_indices = @transform_0, window_bounds = array<i64: 256, 72>}, {pipeline_mode = #tpu.pipeline_mode<synchronous>, transform_indices = @transform_1, window_bounds = array<i64: 72, 16>}, {pipeline_mode = #tpu.pipeline_mode<synchronous>, transform_indices = @transform_2, window_bounds = array<i64: 1, 16>}, {transform_indices = @transform_3, window_bounds = array<i64: 256, 16>}]} {
    %c0 = arith.constant 0 : index
    %c0_0 = arith.constant 0 : index
    %0 = vector.load %arg1[%c0, %c0_0] : memref<256x72xbf16, #tpu.memory_space<vmem>>, vector<256x72xbf16>
    %c0_1 = arith.constant 0 : index
    %c0_2 = arith.constant 0 : index
    %1 = vector.load %arg2[%c0_1, %c0_2] : memref<72x16xbf16, #tpu.memory_space<vmem>>, vector<72x16xbf16>
    %cst = arith.constant dense<0.000000e+00> : vector<256x16xf32>
    %2 = tpu.matmul %0, %1, %cst {dimension_numbers = #tpu.dot_dimension_numbers<[1], [0], [0], [1], [0, 0, 1, 1], [], []>} : vector<256x72xbf16>, vector<72x16xbf16>, vector<256x16xf32> -> vector<256x16xf32>
    %c0_3 = arith.constant 0 : index
    %c0_4 = arith.constant 0 : index
    %3 = vector.load %arg3[%c0_3, %c0_4] : memref<1x16xf32, #tpu.memory_space<vmem>>, vector<1x16xf32>
    %4 = vector.broadcast %3 : vector<1x16xf32> to vector<256x16xf32>
    %5 = arith.addf %2, %4 : vector<256x16xf32>
    %cst_5 = arith.constant 0.000000e+00 : f32
    %6 = vector.broadcast %cst_5 : f32 to vector<256x16xf32>
    %7 = arith.maximumf %5, %6 : vector<256x16xf32>
    %8 = arith.truncf %7 : vector<256x16xf32> to vector<256x16xbf16>
    %c0_6 = arith.constant 0 : index
    %c0_7 = arith.constant 0 : index
    %9 = vector.load %arg4[%c0_6, %c0_7] : memref<256x16xbf16, #tpu.memory_space<vmem>>, vector<256x16xbf16>
    tpu.vector_store %arg4[%c0_6, %c0_7], %8 {strides = array<i32>} : memref<256x16xbf16, #tpu.memory_space<vmem>>, vector<256x16xbf16>,
    return
  }
  func.func @transform_0(%arg0: i32) -> (i32, i32) {
    %c0_i32 = arith.constant 0 : i32
    %c0_i32_0 = arith.constant 0 : i32
    return %arg0, %c0_i32 : i32, i32
  }
  func.func @transform_1(%arg0: i32) -> (i32, i32) {
    %c0_i32 = arith.constant 0 : i32
    %c0_i32_0 = arith.constant 0 : i32
    %c0_i32_1 = arith.constant 0 : i32
    return %c0_i32, %c0_i32_0 : i32, i32
  }
  func.func @transform_2(%arg0: i32) -> (i32, i32) {
    %c0_i32 = arith.constant 0 : i32
    %c0_i32_0 = arith.constant 0 : i32
    %c0_i32_1 = arith.constant 0 : i32
    return %c0_i32, %c0_i32_0 : i32, i32
  }
  func.func @transform_3(%arg0: i32) -> (i32, i32) {
    %c0_i32 = arith.constant 0 : i32
    %c0_i32_0 = arith.constant 0 : i32
    return %arg0, %c0_i32 : i32, i32
  }
}

module attributes {stable_mosaic.version = 11 : i64} {
  func.func @_gemm_bias_act_kernel(%arg0: i32, %arg1: memref<128x144xbf16, #tpu.memory_space<vmem>>, %arg2: memref<144x32xbf16, #tpu.memory_space<vmem>>, %arg3: memref<1x32xf32, #tpu.memory_space<vmem>>, %arg4: memref<128x32xbf16, #tpu.memory_space<vmem>>) attributes {dimension_semantics = [#tpu.dimension_semantics<parallel>], iteration_bounds = array<i64: 1>, scalar_prefetch = 0 : i64, scratch_operands = 0 : i64, tpu.core_type = #tpu.core_type<tc>, window_params = [{transform_indices = @transform_0, window_bounds = array<i64: 128, 144>}, {pipeline_mode = #tpu.pipeline_mode<synchronous>, transform_indices = @transform_1, window_bounds = array<i64: 144, 32>}, {pipeline_mode = #tpu.pipeline_mode<synchronous>, transform_indices = @transform_2, window_bounds = array<i64: 1, 32>}, {transform_indices = @transform_3, window_bounds = array<i64: 128, 32>}]} {
    %c0 = arith.constant 0 : index
    %c0_0 = arith.constant 0 : index
    %0 = vector.load %arg1[%c0, %c0_0] : memref<128x144xbf16, #tpu.memory_space<vmem>>, vector<128x144xbf16>
    %c0_1 = arith.constant 0 : index
    %c0_2 = arith.constant 0 : index
    %1 = vector.load %arg2[%c0_1, %c0_2] : memref<144x32xbf16, #tpu.memory_space<vmem>>, vector<144x32xbf16>
    %cst = arith.constant dense<0.000000e+00> : vector<128x32xf32>
    %2 = tpu.matmul %0, %1, %cst {dimension_numbers = #tpu.dot_dimension_numbers<[1], [0], [0], [1], [0, 0, 1, 1], [], []>} : vector<128x144xbf16>, vector<144x32xbf16>, vector<128x32xf32> -> vector<128x32xf32>
    %c0_3 = arith.constant 0 : index
    %c0_4 = arith.constant 0 : index
    %3 = vector.load %arg3[%c0_3, %c0_4] : memref<1x32xf32, #tpu.memory_space<vmem>>, vector<1x32xf32>
    %4 = vector.broadcast %3 : vector<1x32xf32> to vector<128x32xf32>
    %5 = arith.addf %2, %4 : vector<128x32xf32>
    %cst_5 = arith.constant 0.000000e+00 : f32
    %6 = vector.broadcast %cst_5 : f32 to vector<128x32xf32>
    %7 = arith.maximumf %5, %6 : vector<128x32xf32>
    %8 = arith.truncf %7 : vector<128x32xf32> to vector<128x32xbf16>
    %c0_6 = arith.constant 0 : index
    %c0_7 = arith.constant 0 : index
    %9 = vector.load %arg4[%c0_6, %c0_7] : memref<128x32xbf16, #tpu.memory_space<vmem>>, vector<128x32xbf16>
    tpu.vector_store %arg4[%c0_6, %c0_7], %8 {strides = array<i32>} : memref<128x32xbf16, #tpu.memory_space<vmem>>, vector<128x32xbf16>,
    return
  }
  func.func @transform_0(%arg0: i32) -> (i32, i32) {
    %c0_i32 = arith.constant 0 : i32
    %c0_i32_0 = arith.constant 0 : i32
    return %arg0, %c0_i32 : i32, i32
  }
  func.func @transform_1(%arg0: i32) -> (i32, i32) {
    %c0_i32 = arith.constant 0 : i32
    %c0_i32_0 = arith.constant 0 : i32
    %c0_i32_1 = arith.constant 0 : i32
    return %c0_i32, %c0_i32_0 : i32, i32
  }
  func.func @transform_2(%arg0: i32) -> (i32, i32) {
    %c0_i32 = arith.constant 0 : i32
    %c0_i32_0 = arith.constant 0 : i32
    %c0_i32_1 = arith.constant 0 : i32
    return %c0_i32, %c0_i32_0 : i32, i32
  }
  func.func @transform_3(%arg0: i32) -> (i32, i32) {
    %c0_i32 = arith.constant 0 : i32
    %c0_i32_0 = arith.constant 0 : i32
    return %arg0, %c0_i32 : i32, i32
  }
}

module attributes {stable_mosaic.version = 11 : i64} {
  func.func @_tail_kernel(%arg0: i32, %arg1: memref<2x2048xbf16, #tpu.memory_space<vmem>>, %arg2: memref<2048x1024xbf16, #tpu.memory_space<vmem>>, %arg3: memref<1x1024xf32, #tpu.memory_space<vmem>>, %arg4: memref<1024x128xbf16, #tpu.memory_space<vmem>>, %arg5: memref<1x128xf32, #tpu.memory_space<vmem>>, %arg6: memref<128x128xbf16, #tpu.memory_space<vmem>>, %arg7: memref<1x128xf32, #tpu.memory_space<vmem>>, %arg8: memref<128x128xbf16, #tpu.memory_space<vmem>>, %arg9: memref<1x128xf32, #tpu.memory_space<vmem>>, %arg10: memref<128x128xbf16, #tpu.memory_space<vmem>>, %arg11: memref<1x128xf32, #tpu.memory_space<vmem>>, %arg12: memref<2x10xf32, #tpu.memory_space<vmem>>) attributes {dimension_semantics = [#tpu.dimension_semantics<arbitrary>], iteration_bounds = array<i64: 1>, scalar_prefetch = 0 : i64, scratch_operands = 0 : i64, tpu.core_type = #tpu.core_type<tc>, window_params = [{pipeline_mode = #tpu.pipeline_mode<synchronous>, transform_indices = @transform_0, window_bounds = array<i64: 2, 2048>}, {pipeline_mode = #tpu.pipeline_mode<synchronous>, transform_indices = @transform_1, window_bounds = array<i64: 2048, 1024>}, {pipeline_mode = #tpu.pipeline_mode<synchronous>, transform_indices = @transform_2, window_bounds = array<i64: 1, 1024>}, {pipeline_mode = #tpu.pipeline_mode<synchronous>, transform_indices = @transform_3, window_bounds = array<i64: 1024, 128>}, {pipeline_mode = #tpu.pipeline_mode<synchronous>, transform_indices = @transform_4, window_bounds = array<i64: 1, 128>}, {pipeline_mode = #tpu.pipeline_mode<synchronous>, transform_indices = @transform_5, window_bounds = array<i64: 128, 128>}, {pipeline_mode = #tpu.pipeline_mode<synchronous>, transform_indices = @transform_6, window_bounds = array<i64: 1, 128>}, {pipeline_mode = #tpu.pipeline_mode<synchronous>, transform_indices = @transform_7, window_bounds = array<i64: 128, 128>}, {pipeline_mode = #tpu.pipeline_mode<synchronous>, transform_indices = @transform_8, window_bounds = array<i64: 1, 128>}, {pipeline_mode = #tpu.pipeline_mode<synchronous>, transform_indices = @transform_9, window_bounds = array<i64: 128, 128>}, {pipeline_mode = #tpu.pipeline_mode<synchronous>, transform_indices = @transform_10, window_bounds = array<i64: 1, 128>}, {pipeline_mode = #tpu.pipeline_mode<synchronous>, transform_indices = @transform_11, window_bounds = array<i64: 2, 10>}]} {
    %c0 = arith.constant 0 : index
    %c0_0 = arith.constant 0 : index
    %0 = vector.load %arg1[%c0, %c0_0] : memref<2x2048xbf16, #tpu.memory_space<vmem>>, vector<2x2048xbf16>
    %c0_1 = arith.constant 0 : index
    %c0_2 = arith.constant 0 : index
    %1 = vector.load %arg2[%c0_1, %c0_2] : memref<2048x1024xbf16, #tpu.memory_space<vmem>>, vector<2048x1024xbf16>
    %cst = arith.constant dense<0.000000e+00> : vector<2x1024xf32>
    %2 = tpu.matmul %0, %1, %cst {dimension_numbers = #tpu.dot_dimension_numbers<[1], [0], [0], [1], [0, 0, 1, 1], [], []>} : vector<2x2048xbf16>, vector<2048x1024xbf16>, vector<2x1024xf32> -> vector<2x1024xf32>
    %c0_3 = arith.constant 0 : index
    %c0_4 = arith.constant 0 : index
    %3 = vector.load %arg3[%c0_3, %c0_4] : memref<1x1024xf32, #tpu.memory_space<vmem>>, vector<1x1024xf32>
    %4 = vector.broadcast %3 : vector<1x1024xf32> to vector<2x1024xf32>
    %5 = arith.addf %2, %4 : vector<2x1024xf32>
    %cst_5 = arith.constant 0.000000e+00 : f32
    %6 = vector.broadcast %cst_5 : f32 to vector<2x1024xf32>
    %7 = arith.maximumf %5, %6 : vector<2x1024xf32>
    %8 = arith.truncf %7 : vector<2x1024xf32> to vector<2x1024xbf16>
    %c0_6 = arith.constant 0 : index
    %c0_7 = arith.constant 0 : index
    %9 = vector.load %arg4[%c0_6, %c0_7] : memref<1024x128xbf16, #tpu.memory_space<vmem>>, vector<1024x128xbf16>
    %cst_8 = arith.constant dense<0.000000e+00> : vector<2x128xf32>
    %10 = tpu.matmul %8, %9, %cst_8 {dimension_numbers = #tpu.dot_dimension_numbers<[1], [0], [0], [1], [0, 0, 1, 1], [], []>} : vector<2x1024xbf16>, vector<1024x128xbf16>, vector<2x128xf32> -> vector<2x128xf32>
    %c0_9 = arith.constant 0 : index
    %c0_10 = arith.constant 0 : index
    %11 = vector.load %arg5[%c0_9, %c0_10] : memref<1x128xf32, #tpu.memory_space<vmem>>, vector<1x128xf32>
    %12 = vector.broadcast %11 : vector<1x128xf32> to vector<2x128xf32>
    %13 = arith.addf %10, %12 : vector<2x128xf32>
    %cst_11 = arith.constant 0.000000e+00 : f32
    %14 = vector.broadcast %cst_11 : f32 to vector<2x128xf32>
    %15 = arith.cmpf ogt, %13, %14 : vector<2x128xf32>
    %cst_12 = arith.constant 2.000000e-01 : f32
    %16 = vector.broadcast %cst_12 : f32 to vector<2x128xf32>
    %17 = arith.mulf %16, %13 : vector<2x128xf32>
    %18 = arith.select %15, %13, %17 : vector<2x128xi1>, vector<2x128xf32>
    %19 = arith.truncf %18 : vector<2x128xf32> to vector<2x128xbf16>
    %c0_13 = arith.constant 0 : index
    %c0_14 = arith.constant 0 : index
    %20 = vector.load %arg6[%c0_13, %c0_14] : memref<128x128xbf16, #tpu.memory_space<vmem>>, vector<128x128xbf16>
    %cst_15 = arith.constant dense<0.000000e+00> : vector<2x128xf32>
    %21 = tpu.matmul %19, %20, %cst_15 {dimension_numbers = #tpu.dot_dimension_numbers<[1], [0], [0], [1], [0, 0, 1, 1], [], []>} : vector<2x128xbf16>, vector<128x128xbf16>, vector<2x128xf32> -> vector<2x128xf32>
    %c0_16 = arith.constant 0 : index
    %c0_17 = arith.constant 0 : index
    %22 = vector.load %arg7[%c0_16, %c0_17] : memref<1x128xf32, #tpu.memory_space<vmem>>, vector<1x128xf32>
    %23 = vector.broadcast %22 : vector<1x128xf32> to vector<2x128xf32>
    %24 = arith.addf %21, %23 : vector<2x128xf32>
    %cst_18 = arith.constant 0.000000e+00 : f32
    %25 = vector.broadcast %cst_18 : f32 to vector<2x128xf32>
    %26 = arith.cmpf ogt, %24, %25 : vector<2x128xf32>
    %cst_19 = arith.constant 2.000000e-01 : f32
    %27 = vector.broadcast %cst_19 : f32 to vector<2x128xf32>
    %28 = arith.mulf %27, %24 : vector<2x128xf32>
    %29 = arith.select %26, %24, %28 : vector<2x128xi1>, vector<2x128xf32>
    %30 = arith.truncf %29 : vector<2x128xf32> to vector<2x128xbf16>
    %c0_20 = arith.constant 0 : index
    %c0_21 = arith.constant 0 : index
    %31 = vector.load %arg8[%c0_20, %c0_21] : memref<128x128xbf16, #tpu.memory_space<vmem>>, vector<128x128xbf16>
    %cst_22 = arith.constant dense<0.000000e+00> : vector<2x128xf32>
    %32 = tpu.matmul %30, %31, %cst_22 {dimension_numbers = #tpu.dot_dimension_numbers<[1], [0], [0], [1], [0, 0, 1, 1], [], []>} : vector<2x128xbf16>, vector<128x128xbf16>, vector<2x128xf32> -> vector<2x128xf32>
    %c0_23 = arith.constant 0 : index
    %c0_24 = arith.constant 0 : index
    %33 = vector.load %arg9[%c0_23, %c0_24] : memref<1x128xf32, #tpu.memory_space<vmem>>, vector<1x128xf32>
    %34 = vector.broadcast %33 : vector<1x128xf32> to vector<2x128xf32>
    %35 = arith.addf %32, %34 : vector<2x128xf32>
    %cst_25 = arith.constant 0.000000e+00 : f32
    %36 = vector.broadcast %cst_25 : f32 to vector<2x128xf32>
    %37 = arith.cmpf ogt, %35, %36 : vector<2x128xf32>
    %cst_26 = arith.constant 2.000000e-01 : f32
    %38 = vector.broadcast %cst_26 : f32 to vector<2x128xf32>
    %39 = arith.mulf %38, %35 : vector<2x128xf32>
    %40 = arith.select %37, %35, %39 : vector<2x128xi1>, vector<2x128xf32>
    %41 = arith.truncf %40 : vector<2x128xf32> to vector<2x128xbf16>
    %c0_27 = arith.constant 0 : index
    %c0_28 = arith.constant 0 : index
    %42 = vector.load %arg10[%c0_27, %c0_28] : memref<128x128xbf16, #tpu.memory_space<vmem>>, vector<128x128xbf16>
    %cst_29 = arith.constant dense<0.000000e+00> : vector<2x128xf32>
    %43 = tpu.matmul %41, %42, %cst_29 {dimension_numbers = #tpu.dot_dimension_numbers<[1], [0], [0], [1], [0, 0, 1, 1], [], []>} : vector<2x128xbf16>, vector<128x128xbf16>, vector<2x128xf32> -> vector<2x128xf32>
    %c0_30 = arith.constant 0 : index
    %c0_31 = arith.constant 0 : index
    %44 = vector.load %arg11[%c0_30, %c0_31] : memref<1x128xf32, #tpu.memory_space<vmem>>, vector<1x128xf32>
    %45 = vector.broadcast %44 : vector<1x128xf32> to vector<2x128xf32>
    %46 = arith.addf %43, %45 : vector<2x128xf32>
    %cst_32 = arith.constant dense<0xFF800000> : vector<2xf32>
    %47 = vector.multi_reduction <maximumf>, %46, %cst_32 [1] : vector<2x128xf32> to vector<2xf32>
    %48 = vector.shape_cast %47 : vector<2xf32> to vector<2x1xf32>
    %49 = vector.broadcast %48 : vector<2x1xf32> to vector<2x128xf32>
    %50 = arith.subf %46, %49 : vector<2x128xf32>
    %51 = math.exp %50 : vector<2x128xf32>
    %cst_33 = arith.constant dense<0.000000e+00> : vector<2xf32>
    %52 = vector.multi_reduction <add>, %51, %cst_33 [1] : vector<2x128xf32> to vector<2xf32>
    %53 = vector.shape_cast %52 : vector<2xf32> to vector<2x1xf32>
    %54 = math.log %53 : vector<2x1xf32>
    %55 = vector.broadcast %54 : vector<2x1xf32> to vector<2x128xf32>
    %56 = arith.subf %50, %55 : vector<2x128xf32>
    %57 = vector.extract_strided_slice %56 {offsets = [0, 0], sizes = [2, 10], strides = [1, 1]} : vector<2x128xf32> to vector<2x10xf32>
    %c0_34 = arith.constant 0 : index
    %c0_35 = arith.constant 0 : index
    %58 = vector.load %arg12[%c0_34, %c0_35] : memref<2x10xf32, #tpu.memory_space<vmem>>, vector<2x10xf32>
    tpu.vector_store %arg12[%c0_34, %c0_35], %57 {strides = array<i32>} : memref<2x10xf32, #tpu.memory_space<vmem>>, vector<2x10xf32>,
    return
  }
  func.func @transform_0(%arg0: i32) -> (i32, i32) {
    %c0_i32 = arith.constant 0 : i32
    %c0_i32_0 = arith.constant 0 : i32
    %c0_i32_1 = arith.constant 0 : i32
    return %c0_i32, %c0_i32_0 : i32, i32
  }
  func.func @transform_1(%arg0: i32) -> (i32, i32) {
    %c0_i32 = arith.constant 0 : i32
    %c0_i32_0 = arith.constant 0 : i32
    %c0_i32_1 = arith.constant 0 : i32
    return %c0_i32, %c0_i32_0 : i32, i32
  }
  func.func @transform_2(%arg0: i32) -> (i32, i32) {
    %c0_i32 = arith.constant 0 : i32
    %c0_i32_0 = arith.constant 0 : i32
    %c0_i32_1 = arith.constant 0 : i32
    return %c0_i32, %c0_i32_0 : i32, i32
  }
  func.func @transform_3(%arg0: i32) -> (i32, i32) {
    %c0_i32 = arith.constant 0 : i32
    %c0_i32_0 = arith.constant 0 : i32
    %c0_i32_1 = arith.constant 0 : i32
    return %c0_i32, %c0_i32_0 : i32, i32
  }
  func.func @transform_4(%arg0: i32) -> (i32, i32) {
    %c0_i32 = arith.constant 0 : i32
    %c0_i32_0 = arith.constant 0 : i32
    %c0_i32_1 = arith.constant 0 : i32
    return %c0_i32, %c0_i32_0 : i32, i32
  }
  func.func @transform_5(%arg0: i32) -> (i32, i32) {
    %c0_i32 = arith.constant 0 : i32
    %c0_i32_0 = arith.constant 0 : i32
    %c0_i32_1 = arith.constant 0 : i32
    return %c0_i32, %c0_i32_0 : i32, i32
  }
  func.func @transform_6(%arg0: i32) -> (i32, i32) {
    %c0_i32 = arith.constant 0 : i32
    %c0_i32_0 = arith.constant 0 : i32
    %c0_i32_1 = arith.constant 0 : i32
    return %c0_i32, %c0_i32_0 : i32, i32
  }
  func.func @transform_7(%arg0: i32) -> (i32, i32) {
    %c0_i32 = arith.constant 0 : i32
    %c0_i32_0 = arith.constant 0 : i32
    %c0_i32_1 = arith.constant 0 : i32
    return %c0_i32, %c0_i32_0 : i32, i32
  }
  func.func @transform_8(%arg0: i32) -> (i32, i32) {
    %c0_i32 = arith.constant 0 : i32
    %c0_i32_0 = arith.constant 0 : i32
    %c0_i32_1 = arith.constant 0 : i32
    return %c0_i32, %c0_i32_0 : i32, i32
  }
  func.func @transform_9(%arg0: i32) -> (i32, i32) {
    %c0_i32 = arith.constant 0 : i32
    %c0_i32_0 = arith.constant 0 : i32
    %c0_i32_1 = arith.constant 0 : i32
    return %c0_i32, %c0_i32_0 : i32, i32
  }
  func.func @transform_10(%arg0: i32) -> (i32, i32) {
    %c0_i32 = arith.constant 0 : i32
    %c0_i32_0 = arith.constant 0 : i32
    %c0_i32_1 = arith.constant 0 : i32
    return %c0_i32, %c0_i32_0 : i32, i32
  }
  func.func @transform_11(%arg0: i32) -> (i32, i32) {
    %c0_i32 = arith.constant 0 : i32
    %c0_i32_0 = arith.constant 0 : i32
    %c0_i32_1 = arith.constant 0 : i32
    return %c0_i32, %c0_i32_0 : i32, i32
  }
}

</mosaic_0001>

<bundles_post_ra>
// kernel: _lambda_.4
= control target key start
LH: loop header
LB: loop body
LE: loop exit
PB: predicated region body
PF: predicated region fallthrough
CT: control target
= control target key end

     0   :  { %8 = vsyncpa [#allocation3], 0  ;;  %s3653_s0 = inlined_call_operand.vmem [shape: bf16[2048,27], index: 0, kind: input, shape index: {}]   ;;  %s3654_s1 = inlined_call_operand.hbm [shape: bf16[27,8], index: 1, kind: input, shape index: {}]   ;;  %s3655_s2 = inlined_call_operand.hbm [shape: f32[1,8], index: 2, kind: input, shape index: {}]   ;;  %s3656_s3 = inlined_call_operand.vmem [shape: bf16[2048,8], index: 3, kind: output, shape index: {}]  }
   0x1   :  { %9 = vsyncpa [#allocation5], 0  ;;  %s3061_s12 = smov 0  }
   0x2 LB: > { %s2265_s13 = sadd.s32 4294967295, %s3034_s12   ;;  %p2267_p0 = scmp.ge.s32.totalorder %s3034_s12, 1  ;;  %s3034_s12 = sphi %s3061_s12, %s15_s12  }
   0x3   : > { %p114_p1 = scmp.lt.s32.totalorder %s3034_s12, 3  ;;  %s3036_s14 = smov [#allocation2]  }
   0x4   : > { %s126_s15 = sshll.u32 %s3036_s14, 4  ;;  %p3075_p3 = scmp.eq.s32.totalorder %s2265_s13, 0  ;;  %s127_s15 = int_to_ptr.vmem [resolvable:$true] %s126_s15 }
   0x5   : > { %p3069_p2 = pnand %p2267_p0, %p114_p1  ;;  %s3037_s18 = smov [#allocation4]  }
   0x6   : > { %s140_s19 = sshll.u32 %s3037_s18, 4  ;;  %s2979_s21 = scalar_lea.vmem %s127_s15, 256  ;;  %s141_s19 = int_to_ptr.vmem [resolvable:$true] %s140_s19 }
   0x7   : > { %p2877_p4 = pneg %p3069_p2  ;;  %p2980_p7 = scmp.ne.s32.totalorder %s127_s15, %s2979_s21 }
   0x8   : > { %p2987_p10 = scmp.lt.s32.totalorder %s127_s15, %s127_s15  ;;  %p2988_p11 = scmp.lt.s32.totalorder %s2979_s21, %s2979_s21 }
   0x9   : > { %p3083_p5 = pnand %p3075_p3, %p2877_p4 }
   0xa   : > { %p2989_p12 = por %p2988_p11, %p2987_p10 }
   0xb   : > { %p2970_p6 = pneg %p3083_p5 }
   0xd   : > { %p2982_p8 = pnand %p2980_p7, %p2970_p6 }
   0xf   : > { %p2983_p9 = pneg %p2982_p8 }
  0x11   : > { %p2990_p13 = pnand %p2989_p12, %p2983_p9 }
  0x13   : > { %2993 = shalt.err (!%p2990_p13)
}
  0x14   : > { %s3038_s22 = smov 64   ;;  %s3039_s23 = smov 4  }
  0x15   : > { %2880 = dma.hbm_to_vmem [thread:$0]  (!%p3083_p5), %s3654_s1, 256, %s127_s15, [#allocation3], %s3038_s22, %s3038_s22, %s3039_s23  }
  0x16   : > { %s3005_s26 = scalar_lea.vmem %s141_s19, 16  ;;  %s3012_s27 = scalar_lea.vmem %s141_s19, 32 }
  0x17   : > { %p3006_p0 = scmp.ne.s32.totalorder %s141_s19, %s3005_s26  ;;  %p3013_p7 = scmp.lt.s32.totalorder %s141_s19, %s141_s19 }
  0x18   : > { %p3014_p8 = scmp.lt.s32.totalorder %s3012_s27, %s3005_s26 }
  0x19   : > { %p3008_p1 = pnand %p3006_p0, %p2970_p6 }
  0x1a   : > { %p3015_p9 = por %p3014_p8, %p3013_p7 }
  0x1b   : > { %p3009_p4 = pneg %p3008_p1 }
  0x1d   : > { %p3016_p10 = pnand %p3015_p9, %p3009_p4 }
  0x1f   : > { %3019 = shalt.err (!%p3016_p10)
}
  0x20   : > { %2883 = dma.hbm_to_vmem [thread:$0]  (!%p3083_p5), %s3655_s2, 16, %s141_s19, [#allocation5]  }
  0x21   : > { %162 = sbr.rel (%p3069_p2) target bundleno = 381 (0x17d), region = 32 }
  0x26   : > { %3025 = dma.done.wait (%p3075_p3), [#allocation3], 256  }
  0x27   : > { %3027 = vsyncadd (%p3075_p3), [#allocation3], 4294967040 }
  0x28   : > { %3029 = dma.done.wait (%p3075_p3), [#allocation5], 16  }
  0x29   : > { %3031 = vsyncadd (%p3075_p3), [#allocation5], 4294967280  ;;  %vm866_vm0 = vcmask 1044480   ;;  %s2274_s30 = sshll.u32 %s2265_s13, 7  ;;  %vm867_vm1 = vcmask 1045504   ;;  %v3040_v0 = vmov 65535  }
  0x2a   : > { %p191_p5 = scmp.lt.s32.totalorder %s2274_s30, 255  ;;  %v868_v1 = vsel %vm866_vm0, 4294967295, %v3040_v0  ;;  %v2901_v3 = vld [vmem:[#allocation2 + $0x8] sm:$0x3f]   ;;  %v2902_v4 = vld [vmem:[#allocation2] sm:$0xff]   ;;  %vm673_vm2 = vcmask 220160  }
  0x2b   : > { %v869_v2 = vsel %vm867_vm1, %v868_v1, 0  ;;  %vm2058_vm3 = vcmask 60416  }
  0x2c   : > { %s3661_s30 = smov (!%p191_p5, %s2274_s30), 255  ;;  %v871_v5 = vand.u32 %v2901_v3, %v869_v2 }
  0x2d   : > { %s2275_s4 = sshll.u32 %s3661_s30, 2 }
  0x2e   : > { %s3125_s7 = scalar_lea.vmem %s3653_s0, %s2275_s4  ;;  %2733 = vmatprep.subr.bf16.mxu0 %v871_v5  ;;  %2865 = vmatprep.subr.bf16.mxu1 %v871_v5  ;;  %s3266_s10 = scalar_lea.vmem %s3656_s3, %s2275_s4 }
  0x2f   : > { %v2903_v6 = vld [vmem:[%s3125_s7] sm:$0xff]   ;;  %2734 = vmatpush3.bf16.msra.mxu0 %v871_v5  ;;  %2867 = vmatpush3.bf16.msra.mxu1 %v871_v5  ;;  %v2905_v8 = vld [vmem:[%s3125_s7 + $0x8] sm:$0xff]   ;;  %v2907_v10 = vld [vmem:[%s3125_s7 + $0x10] sm:$0xff]  }
  0x30   : > { %v2904_v7 = vld [vmem:[%s3125_s7 + $0x100] sm:$0xff]   ;;  %2735 = vmatprep.subr.bf16.mxu0 %v2902_v4  ;;  %2866 = vmatprep.subr.bf16.mxu1 %v2902_v4  ;;  %v2906_v9 = vld [vmem:[%s3125_s7 + $0x108] sm:$0xff]   ;;  %v2908_v11 = vld [vmem:[%s3125_s7 + $0x110] sm:$0xff]  }
  0x31   : > { %2737 = vmatprep.mubr.msk.bf16.mxu0 %vm673_vm2, %v2903_v6  ;;  %2801 = vmatprep.mubr.msk.bf16.mxu1 %vm673_vm2, %v2904_v7  ;;  %v2909_v12 = vld [vmem:[%s3125_s7 + $0x18] sm:$0xff]   ;;  %v2911_v14 = vld [vmem:[%s3125_s7 + $0x20] sm:$0xff]   ;;  %v2913_v16 = vld [vmem:[%s3125_s7 + $0x28] sm:$0xff]  }
  0x32   : > { %v2910_v13 = vld [vmem:[%s3125_s7 + $0x118] sm:$0xff]   ;;  %v2912_v15 = vld [vmem:[%s3125_s7 + $0x120] sm:$0xff]   ;;  %v2914_v17 = vld [vmem:[%s3125_s7 + $0x128] sm:$0xff]  }
  0x33   : > { %2736 = vmatpush3.bf16.msra.mxu0 %v2902_v4  ;;  %2868 = vmatpush3.bf16.msra.mxu1 %v2902_v4  ;;  %v2915_v18 = vld [vmem:[%s3125_s7 + $0x30] sm:$0xff]   ;;  %v2917_v20 = vld [vmem:[%s3125_s7 + $0x38] sm:$0xff]   ;;  %v2919_v22 = vld [vmem:[%s3125_s7 + $0x40] sm:$0xff]  }
  0x34   : > { %v2916_v19 = vld [vmem:[%s3125_s7 + $0x130] sm:$0xff]   ;;  %v2918_v21 = vld [vmem:[%s3125_s7 + $0x138] sm:$0xff]   ;;  %v2920_v23 = vld [vmem:[%s3125_s7 + $0x140] sm:$0xff]  }
  0x35   : > { %v2921_v24 = vld [vmem:[%s3125_s7 + $0x48] sm:$0xff]   ;;  %v2923_v26 = vld [vmem:[%s3125_s7 + $0x50] sm:$0xff]   ;;  %v2925_v28 = vld [vmem:[%s3125_s7 + $0x58] sm:$0xff]  }
  0x36   : > { %2738 = vmatmul.mubr.msk.bf16.vlgmr.msra.gmra.mxu0 %vm673_vm2, %v2905_v8  ;;  %2802 = vmatmul.mubr.msk.bf16.vlgmr.msra.gmra.mxu1 %vm673_vm2, %v2906_v9  ;;  %v2922_v25 = vld [vmem:[%s3125_s7 + $0x148] sm:$0xff]   ;;  %v2924_v27 = vld [vmem:[%s3125_s7 + $0x150] sm:$0xff]   ;;  %v2926_v29 = vld [vmem:[%s3125_s7 + $0x158] sm:$0xff]  }
  0x37   : > { %2741 = vmatprep.mubr.msk.bf16.mxu0 %vm673_vm2, %v2907_v10  ;;  %2805 = vmatprep.mubr.msk.bf16.mxu1 %vm673_vm2, %v2908_v11  ;;  %v2927_v30 = vld [vmem:[%s3125_s7 + $0x60] sm:$0xff]   ;;  %v2929_v32 = vld [vmem:[%s3125_s7 + $0x68] sm:$0xff]   ;;  %v2931_v34 = vld [vmem:[%s3125_s7 + $0x70] sm:$0xff]  }
  0x38   : > { %v2928_v31 = vld [vmem:[%s3125_s7 + $0x160] sm:$0xff]   ;;  %v2930_v33 = vld [vmem:[%s3125_s7 + $0x168] sm:$0xff]   ;;  %v2932_v35 = vld [vmem:[%s3125_s7 + $0x170] sm:$0xff]  }
  0x39   : > { %v2933_v36 = vld [vmem:[%s3125_s7 + $0x78] sm:$0xff]   ;;  %v2935_v38 = vld [vmem:[%s3125_s7 + $0x80] sm:$0xff]   ;;  %v2937_v40 = vld [vmem:[%s3125_s7 + $0x88] sm:$0xff]  }
  0x3a   : > { %v2934_v37 = vld [vmem:[%s3125_s7 + $0x178] sm:$0xff]   ;;  %v2936_v39 = vld [vmem:[%s3125_s7 + $0x180] sm:$0xff]   ;;  %v2938_v41 = vld [vmem:[%s3125_s7 + $0x188] sm:$0xff]  }
  0x3b   : > { %v2939_v42 = vld [vmem:[%s3125_s7 + $0x90] sm:$0xff]   ;;  %v2941_v44 = vld [vmem:[%s3125_s7 + $0x98] sm:$0xff]   ;;  %v2943_v46 = vld [vmem:[%s3125_s7 + $0xa0] sm:$0xff]  }
  0x3c   : > { %v2940_v43 = vld [vmem:[%s3125_s7 + $0x190] sm:$0xff]   ;;  %v2942_v45 = vld [vmem:[%s3125_s7 + $0x198] sm:$0xff]   ;;  %v2944_v47 = vld [vmem:[%s3125_s7 + $0x1a0] sm:$0xff]  }
  0x3d   : > { %v2945_v48 = vld [vmem:[%s3125_s7 + $0xa8] sm:$0xff]   ;;  %v2947_v50 = vld [vmem:[%s3125_s7 + $0xb0] sm:$0xff]   ;;  %v2949_v52 = vld [vmem:[%s3125_s7 + $0xb8] sm:$0xff]  }
  0x3e   : > { %2742 = vmatmul.mubr.msk.bf16.gmra.mxu0 %vm673_vm2, %v2909_v12  ;;  %2806 = vmatmul.mubr.msk.bf16.gmra.mxu1 %vm673_vm2, %v2910_v13  ;;  %v2946_v49 = vld [vmem:[%s3125_s7 + $0x1a8] sm:$0xff]   ;;  %v2948_v51 = vld [vmem:[%s3125_s7 + $0x1b0] sm:$0xff]   ;;  %v2950_v53 = vld [vmem:[%s3125_s7 + $0x1b8] sm:$0xff]  }
  0x3f   : > { %2745 = vmatprep.mubr.msk.bf16.mxu0 %vm673_vm2, %v2911_v14  ;;  %2809 = vmatprep.mubr.msk.bf16.mxu1 %vm673_vm2, %v2912_v15  ;;  %v2951_v54 = vld [vmem:[%s3125_s7 + $0xc0] sm:$0xff]   ;;  %v2953_v56 = vld [vmem:[%s3125_s7 + $0xc8] sm:$0xff]   ;;  %v2955_v58 = vld [vmem:[%s3125_s7 + $0xd0] sm:$0xff]  }
  0x40   : > { %v2952_v55 = vld [vmem:[%s3125_s7 + $0x1c0] sm:$0xff]   ;;  %v2954_v57 = vld [vmem:[%s3125_s7 + $0x1c8] sm:$0xff]   ;;  %v2956_v59 = vld [vmem:[%s3125_s7 + $0x1d0] sm:$0xff]  }
  0x41   : > { %v2957_v60 = vld [vmem:[%s3125_s7 + $0xd8] sm:$0xff]   ;;  %v2959_v62 = vld [vmem:[%s3125_s7 + $0xe0] sm:$0xff]   ;;  %v2961_v0 = vld [vmem:[%s3125_s7 + $0xe8] sm:$0xff]  }
  0x42   : > { %v2958_v61 = vld [vmem:[%s3125_s7 + $0x1d8] sm:$0xff]   ;;  %v2960_v63 = vld [vmem:[%s3125_s7 + $0x1e0] sm:$0xff]   ;;  %v2962_v1 = vld [vmem:[%s3125_s7 + $0x1e8] sm:$0xff]  }
  0x43   : > { %v2963_v2 = vld [vmem:[%s3125_s7 + $0xf0] sm:$0xff]   ;;  %v2965_v4 = vld [vmem:[%s3125_s7 + $0xf8] sm:$0xff]  }
  0x44   : > { %v2964_v3 = vld [vmem:[%s3125_s7 + $0x1f0] sm:$0xff]   ;;  %v2966_v5 = vld [vmem:[%s3125_s7 + $0x1f8] sm:$0xff]  }
  0x45   : > { %v3255_v6 = vld [vmem:[#allocation4] ss:$0 sm:$0xff] }
  0x46   : > { %2746 = vmatmul.mubr.msk.bf16.gmra.mxu0 %vm673_vm2, %v2913_v16  ;;  %2810 = vmatmul.mubr.msk.bf16.gmra.mxu1 %vm673_vm2, %v2914_v17 }
  0x47   : > { %2749 = vmatprep.mubr.msk.bf16.mxu0 %vm673_vm2, %v2915_v18  ;;  %2813 = vmatprep.mubr.msk.bf16.mxu1 %vm673_vm2, %v2916_v19 }
  0x4e   : > { %2750 = vmatmul.mubr.msk.bf16.gmra.mxu0 %vm673_vm2, %v2917_v20  ;;  %2814 = vmatmul.mubr.msk.bf16.gmra.mxu1 %vm673_vm2, %v2918_v21 }
  0x4f   : > { %2753 = vmatprep.mubr.msk.bf16.mxu0 %vm673_vm2, %v2919_v22  ;;  %2817 = vmatprep.mubr.msk.bf16.mxu1 %vm673_vm2, %v2920_v23 }
  0x56   : > { %2754 = vmatmul.mubr.msk.bf16.gmra.mxu0 %vm673_vm2, %v2921_v24  ;;  %2818 = vmatmul.mubr.msk.bf16.gmra.mxu1 %vm673_vm2, %v2922_v25 }
  0x57   : > { %2757 = vmatprep.mubr.msk.bf16.mxu0 %vm673_vm2, %v2923_v26  ;;  %2821 = vmatprep.mubr.msk.bf16.mxu1 %vm673_vm2, %v2924_v27 }
  0x5e   : > { %2758 = vmatmul.mubr.msk.bf16.gmra.mxu0 %vm673_vm2, %v2925_v28  ;;  %2822 = vmatmul.mubr.msk.bf16.gmra.mxu1 %vm673_vm2, %v2926_v29 }
  0x5f   : > { %2761 = vmatprep.mubr.msk.bf16.mxu0 %vm673_vm2, %v2927_v30  ;;  %2825 = vmatprep.mubr.msk.bf16.mxu1 %vm673_vm2, %v2928_v31 }
  0x66   : > { %2762 = vmatmul.mubr.msk.bf16.gmra.mxu0 %vm673_vm2, %v2929_v32  ;;  %2826 = vmatmul.mubr.msk.bf16.gmra.mxu1 %vm673_vm2, %v2930_v33 }
  0x67   : > { %2765 = vmatprep.mubr.msk.bf16.mxu0 %vm673_vm2, %v2931_v34  ;;  %2829 = vmatprep.mubr.msk.bf16.mxu1 %vm673_vm2, %v2932_v35 }
  0x6e   : > { %2766 = vmatmul.mubr.msk.bf16.gmra.mxu0 %vm673_vm2, %v2933_v36  ;;  %2830 = vmatmul.mubr.msk.bf16.gmra.mxu1 %vm673_vm2, %v2934_v37 }
  0x6f   : > { %2769 = vmatprep.mubr.msk.bf16.mxu0 %vm673_vm2, %v2935_v38  ;;  %2833 = vmatprep.mubr.msk.bf16.mxu1 %vm673_vm2, %v2936_v39 }
  0x76   : > { %2770 = vmatmul.mubr.msk.bf16.gmra.mxu0 %vm673_vm2, %v2937_v40  ;;  %2834 = vmatmul.mubr.msk.bf16.gmra.mxu1 %vm673_vm2, %v2938_v41 }
  0x77   : > { %2773 = vmatprep.mubr.msk.bf16.mxu0 %vm673_vm2, %v2939_v42  ;;  %2837 = vmatprep.mubr.msk.bf16.mxu1 %vm673_vm2, %v2940_v43 }
  0x7e   : > { %2774 = vmatmul.mubr.msk.bf16.gmra.mxu0 %vm673_vm2, %v2941_v44  ;;  %2838 = vmatmul.mubr.msk.bf16.gmra.mxu1 %vm673_vm2, %v2942_v45 }
  0x7f   : > { %2777 = vmatprep.mubr.msk.bf16.mxu0 %vm673_vm2, %v2943_v46  ;;  %2841 = vmatprep.mubr.msk.bf16.mxu1 %vm673_vm2, %v2944_v47 }
  0x86   : > { %2778 = vmatmul.mubr.msk.bf16.gmra.mxu0 %vm673_vm2, %v2945_v48  ;;  %2842 = vmatmul.mubr.msk.bf16.gmra.mxu1 %vm673_vm2, %v2946_v49 }
  0x87   : > { %2781 = vmatprep.mubr.msk.bf16.mxu0 %vm673_vm2, %v2947_v50  ;;  %2845 = vmatprep.mubr.msk.bf16.mxu1 %vm673_vm2, %v2948_v51 }
  0x8e   : > { %2782 = vmatmul.mubr.msk.bf16.gmra.mxu0 %vm673_vm2, %v2949_v52  ;;  %2846 = vmatmul.mubr.msk.bf16.gmra.mxu1 %vm673_vm2, %v2950_v53 }
  0x8f   : > { %2785 = vmatprep.mubr.msk.bf16.mxu0 %vm673_vm2, %v2951_v54  ;;  %2849 = vmatprep.mubr.msk.bf16.mxu1 %vm673_vm2, %v2952_v55 }
  0x96   : > { %2786 = vmatmul.mubr.msk.bf16.gmra.mxu0 %vm673_vm2, %v2953_v56  ;;  %2850 = vmatmul.mubr.msk.bf16.gmra.mxu1 %vm673_vm2, %v2954_v57 }
  0x97   : > { %2789 = vmatprep.mubr.msk.bf16.mxu0 %vm673_vm2, %v2955_v58  ;;  %2853 = vmatprep.mubr.msk.bf16.mxu1 %vm673_vm2, %v2956_v59 }
  0x9e   : > { %2790 = vmatmul.mubr.msk.bf16.gmra.mxu0 %vm673_vm2, %v2957_v60  ;;  %2854 = vmatmul.mubr.msk.bf16.gmra.mxu1 %vm673_vm2, %v2958_v61 }
  0x9f   : > { %2793 = vmatprep.mubr.msk.bf16.mxu0 %vm673_vm2, %v2959_v62  ;;  %2857 = vmatprep.mubr.msk.bf16.mxu1 %vm673_vm2, %v2960_v63 }
  0xa6   : > { %2794 = vmatmul.mubr.msk.bf16.gmra.mxu0 %vm673_vm2, %v2961_v0  ;;  %2858 = vmatmul.mubr.msk.bf16.gmra.mxu1 %vm673_vm2, %v2962_v1 }
  0xa7   : > { %2797 = vmatprep.mubr.msk.bf16.mxu0 %vm673_vm2, %v2963_v2  ;;  %2861 = vmatprep.mubr.msk.bf16.mxu1 %vm673_vm2, %v2964_v3 }
  0xae   : > { %2798 = vmatmul.mubr.msk.bf16.gmra.mxu0 %vm673_vm2, %v2965_v4  ;;  %2862 = vmatmul.mubr.msk.bf16.gmra.mxu1 %vm673_vm2, %v2966_v5 }
  0xf6   : > { %v2739_v7 = vpop.f32.mrf.mxu0  ;;  %v2803_v8 = vpop.f32.mrf.mxu1 }
  0xf7   : > { %v916_v9 = vadd.f32 %v2739_v7, %v3255_v6  ;;  %v1172_v10 = vadd.f32 %v2803_v8, %v3255_v6 }
  0xf8   : > { %v907_v11 = vpop.f32.mrf.mxu0  ;;  %v1163_v12 = vpop.f32.mrf.mxu1 }
  0xf9   : > { %v1420_v13 = vmax.f32 %v916_v9, 0.0  ;;  %v1484_v14 = vmax.f32 %v1172_v10, 0.0  ;;  %v908_v15 = vadd.f32 %v3255_v6, %v907_v11  ;;  %v1164_v16 = vadd.f32 %v3255_v6, %v1163_v12 }
  0xfa   : > { %v2740_v17 = vpop.f32.mrf.mxu0  ;;  %v2804_v18 = vpop.f32.mrf.mxu1 }
  0xfb   : > { %v2541_v19 = vpack.c.bf16 %v1420_v13, %v1420_v13  ;;  %v2605_v20 = vpack.c.bf16 %v1484_v14, %v1484_v14  ;;  %v1418_v21 = vmax.f32 %v908_v15, 0.0  ;;  %v1482_v22 = vmax.f32 %v1164_v16, 0.0 }
  0xfc   : > { %v919_v23 = vadd.f32 %v2740_v17, %v3255_v6  ;;  %v1175_v24 = vadd.f32 %v2804_v18, %v3255_v6  ;;  %v910_v25 = vpop.f32.mrf.mxu0  ;;  %v1166_v26 = vpop.f32.mrf.mxu1 }
  0xfd   : > { %2061 = vst.msk [vmem:[%s3266_s10 + $0x8] sm:$0xf] %vm2058_vm3, %v2541_v19  ;;  %2125 = vst.msk [vmem:[%s3266_s10 + $0x108] sm:$0xf] %vm2058_vm3, %v2605_v20  ;;  %v2539_v27 = vpack.c.bf16 %v1418_v21, %v1418_v21  ;;  %v2603_v28 = vpack.c.bf16 %v1482_v22, %v1482_v22  ;;  %v911_v29 = vadd.f32 %v3255_v6, %v910_v25 }
  0xfe   : > { %v1167_v30 = vadd.f32 %v3255_v6, %v1166_v26  ;;  %v1421_v31 = vmax.f32 %v919_v23, 0.0  ;;  %v1485_v32 = vmax.f32 %v1175_v24, 0.0  ;;  %v2743_v33 = vpop.f32.mrf.mxu0  ;;  %v2807_v34 = vpop.f32.mrf.mxu1 }
  0xff   : > { %2059 = vst.msk [vmem:[%s3266_s10] sm:$0xf] %vm2058_vm3, %v2539_v27  ;;  %2123 = vst.msk [vmem:[%s3266_s10 + $0x100] sm:$0xf] %vm2058_vm3, %v2603_v28  ;;  %v1419_v35 = vmax.f32 %v911_v29, 0.0  ;;  %v932_v37 = vadd.f32 %v2743_v33, %v3255_v6  ;;  %v1188_v38 = vadd.f32 %v2807_v34, %v3255_v6 }
 0x100   : > { %v1483_v36 = vmax.f32 %v1167_v30, 0.0  ;;  %v2542_v39 = vpack.c.bf16 %v1421_v31, %v1421_v31  ;;  %v2606_v40 = vpack.c.bf16 %v1485_v32, %v1485_v32  ;;  %v923_v41 = vpop.f32.mrf.mxu0  ;;  %v1179_v42 = vpop.f32.mrf.mxu1 }
 0x101   : > { %v2540_v43 = vpack.c.bf16 %v1419_v35, %v1419_v35  ;;  %v1424_v45 = vmax.f32 %v932_v37, 0.0  ;;  %v1488_v46 = vmax.f32 %v1188_v38, 0.0  ;;  %v924_v47 = vadd.f32 %v3255_v6, %v923_v41 }
 0x102   : > { %v2604_v44 = vpack.c.bf16 %v1483_v36, %v1483_v36  ;;  %2062 = vst.msk [vmem:[%s3266_s10 + $0xc] sm:$0xf] %vm2058_vm3, %v2542_v39  ;;  %2126 = vst.msk [vmem:[%s3266_s10 + $0x10c] sm:$0xf] %vm2058_vm3, %v2606_v40  ;;  %v1180_v48 = vadd.f32 %v3255_v6, %v1179_v42  ;;  %v2744_v49 = vpop.f32.mrf.mxu0  ;;  %v2808_v50 = vpop.f32.mrf.mxu1 }
 0x103   : > { %2060 = vst.msk [vmem:[%s3266_s10 + $0x4] sm:$0xf] %vm2058_vm3, %v2540_v43  ;;  %v2545_v51 = vpack.c.bf16 %v1424_v45, %v1424_v45  ;;  %v2609_v52 = vpack.c.bf16 %v1488_v46, %v1488_v46  ;;  %v935_v53 = vadd.f32 %v2744_v49, %v3255_v6  ;;  %v1191_v54 = vadd.f32 %v2808_v50, %v3255_v6 }
 0x104   : > { %2124 = vst.msk [vmem:[%s3266_s10 + $0x104] sm:$0xf] %vm2058_vm3, %v2604_v44  ;;  %v1422_v55 = vmax.f32 %v924_v47, 0.0  ;;  %v1486_v56 = vmax.f32 %v1180_v48, 0.0  ;;  %v926_v57 = vpop.f32.mrf.mxu0  ;;  %v1182_v58 = vpop.f32.mrf.mxu1 }
 0x105   : > { %2065 = vst.msk [vmem:[%s3266_s10 + $0x18] sm:$0xf] %vm2058_vm3, %v2545_v51  ;;  %2129 = vst.msk [vmem:[%s3266_s10 + $0x118] sm:$0xf] %vm2058_vm3, %v2609_v52  ;;  %v1425_v59 = vmax.f32 %v935_v53, 0.0  ;;  %v1489_v60 = vmax.f32 %v1191_v54, 0.0  ;;  %v927_v61 = vadd.f32 %v3255_v6, %v926_v57  ;;  %v1183_v62 = vadd.f32 %v3255_v6, %v1182_v58 }
 0x106   : > { %v2543_v63 = vpack.c.bf16 %v1422_v55, %v1422_v55  ;;  %v2607_v0 = vpack.c.bf16 %v1486_v56, %v1486_v56  ;;  %v2747_v1 = vpop.f32.mrf.mxu0  ;;  %v2811_v2 = vpop.f32.mrf.mxu1 }
 0x107   : > { %v2546_v3 = vpack.c.bf16 %v1425_v59, %v1425_v59  ;;  %v2610_v4 = vpack.c.bf16 %v1489_v60, %v1489_v60  ;;  %v1423_v5 = vmax.f32 %v927_v61, 0.0  ;;  %v1487_v7 = vmax.f32 %v1183_v62, 0.0 }
 0x108   : > { %2063 = vst.msk [vmem:[%s3266_s10 + $0x10] sm:$0xf] %vm2058_vm3, %v2543_v63  ;;  %2127 = vst.msk [vmem:[%s3266_s10 + $0x110] sm:$0xf] %vm2058_vm3, %v2607_v0  ;;  %v948_v8 = vadd.f32 %v2747_v1, %v3255_v6  ;;  %v1204_v9 = vadd.f32 %v2811_v2, %v3255_v6  ;;  %v939_v10 = vpop.f32.mrf.mxu0  ;;  %v1195_v11 = vpop.f32.mrf.mxu1 }
 0x109   : > { %2066 = vst.msk [vmem:[%s3266_s10 + $0x1c] sm:$0xf] %vm2058_vm3, %v2546_v3  ;;  %2130 = vst.msk [vmem:[%s3266_s10 + $0x11c] sm:$0xf] %vm2058_vm3, %v2610_v4  ;;  %v2544_v12 = vpack.c.bf16 %v1423_v5, %v1423_v5  ;;  %v2608_v13 = vpack.c.bf16 %v1487_v7, %v1487_v7  ;;  %v940_v14 = vadd.f32 %v3255_v6, %v939_v10 }
 0x10a   : > { %v1196_v15 = vadd.f32 %v3255_v6, %v1195_v11  ;;  %v1428_v16 = vmax.f32 %v948_v8, 0.0  ;;  %v1492_v17 = vmax.f32 %v1204_v9, 0.0  ;;  %v2748_v18 = vpop.f32.mrf.mxu0  ;;  %v2812_v19 = vpop.f32.mrf.mxu1 }
 0x10b   : > { %2064 = vst.msk [vmem:[%s3266_s10 + $0x14] sm:$0xf] %vm2058_vm3, %v2544_v12  ;;  %2128 = vst.msk [vmem:[%s3266_s10 + $0x114] sm:$0xf] %vm2058_vm3, %v2608_v13  ;;  %v1426_v20 = vmax.f32 %v940_v14, 0.0  ;;  %v951_v22 = vadd.f32 %v2748_v18, %v3255_v6  ;;  %v1207_v23 = vadd.f32 %v2812_v19, %v3255_v6 }
 0x10c   : > { %v1490_v21 = vmax.f32 %v1196_v15, 0.0  ;;  %v2549_v24 = vpack.c.bf16 %v1428_v16, %v1428_v16  ;;  %v2613_v25 = vpack.c.bf16 %v1492_v17, %v1492_v17  ;;  %v942_v26 = vpop.f32.mrf.mxu0  ;;  %v1198_v27 = vpop.f32.mrf.mxu1 }
 0x10d   : > { %v2547_v28 = vpack.c.bf16 %v1426_v20, %v1426_v20  ;;  %v1429_v30 = vmax.f32 %v951_v22, 0.0  ;;  %v1493_v31 = vmax.f32 %v1207_v23, 0.0  ;;  %v943_v32 = vadd.f32 %v3255_v6, %v942_v26 }
 0x10e   : > { %v2611_v29 = vpack.c.bf16 %v1490_v21, %v1490_v21  ;;  %2069 = vst.msk [vmem:[%s3266_s10 + $0x28] sm:$0xf] %vm2058_vm3, %v2549_v24  ;;  %2133 = vst.msk [vmem:[%s3266_s10 + $0x128] sm:$0xf] %vm2058_vm3, %v2613_v25  ;;  %v1199_v33 = vadd.f32 %v3255_v6, %v1198_v27  ;;  %v2751_v34 = vpop.f32.mrf.mxu0  ;;  %v2815_v35 = vpop.f32.mrf.mxu1 }
 0x10f   : > { %2067 = vst.msk [vmem:[%s3266_s10 + $0x20] sm:$0xf] %vm2058_vm3, %v2547_v28  ;;  %v2550_v36 = vpack.c.bf16 %v1429_v30, %v1429_v30  ;;  %v2614_v37 = vpack.c.bf16 %v1493_v31, %v1493_v31  ;;  %v964_v38 = vadd.f32 %v2751_v34, %v3255_v6  ;;  %v1220_v39 = vadd.f32 %v2815_v35, %v3255_v6 }
 0x110   : > { %2131 = vst.msk [vmem:[%s3266_s10 + $0x120] sm:$0xf] %vm2058_vm3, %v2611_v29  ;;  %v1427_v40 = vmax.f32 %v943_v32, 0.0  ;;  %v1491_v41 = vmax.f32 %v1199_v33, 0.0  ;;  %v955_v42 = vpop.f32.mrf.mxu0  ;;  %v1211_v43 = vpop.f32.mrf.mxu1 }
 0x111   : > { %2070 = vst.msk [vmem:[%s3266_s10 + $0x2c] sm:$0xf] %vm2058_vm3, %v2550_v36  ;;  %2134 = vst.msk [vmem:[%s3266_s10 + $0x12c] sm:$0xf] %vm2058_vm3, %v2614_v37  ;;  %v1432_v44 = vmax.f32 %v964_v38, 0.0  ;;  %v1496_v45 = vmax.f32 %v1220_v39, 0.0  ;;  %v956_v46 = vadd.f32 %v3255_v6, %v955_v42  ;;  %v1212_v47 = vadd.f32 %v3255_v6, %v1211_v43 }
 0x112   : > { %v2548_v48 = vpack.c.bf16 %v1427_v40, %v1427_v40  ;;  %v2612_v49 = vpack.c.bf16 %v1491_v41, %v1491_v41  ;;  %v2752_v50 = vpop.f32.mrf.mxu0  ;;  %v2816_v51 = vpop.f32.mrf.mxu1 }
 0x113   : > { %v2553_v52 = vpack.c.bf16 %v1432_v44, %v1432_v44  ;;  %v2617_v53 = vpack.c.bf16 %v1496_v45, %v1496_v45  ;;  %v1430_v54 = vmax.f32 %v956_v46, 0.0  ;;  %v1494_v55 = vmax.f32 %v1212_v47, 0.0 }
 0x114   : > { %2068 = vst.msk [vmem:[%s3266_s10 + $0x24] sm:$0xf] %vm2058_vm3, %v2548_v48  ;;  %2132 = vst.msk [vmem:[%s3266_s10 + $0x124] sm:$0xf] %vm2058_vm3, %v2612_v49  ;;  %v967_v56 = vadd.f32 %v2752_v50, %v3255_v6  ;;  %v1223_v57 = vadd.f32 %v2816_v51, %v3255_v6  ;;  %v958_v58 = vpop.f32.mrf.mxu0  ;;  %v1214_v59 = vpop.f32.mrf.mxu1 }
 0x115   : > { %2073 = vst.msk [vmem:[%s3266_s10 + $0x38] sm:$0xf] %vm2058_vm3, %v2553_v52  ;;  %2137 = vst.msk [vmem:[%s3266_s10 + $0x138] sm:$0xf] %vm2058_vm3, %v2617_v53  ;;  %v2551_v60 = vpack.c.bf16 %v1430_v54, %v1430_v54  ;;  %v2615_v61 = vpack.c.bf16 %v1494_v55, %v1494_v55  ;;  %v959_v62 = vadd.f32 %v3255_v6, %v958_v58 }
 0x116   : > { %v1215_v63 = vadd.f32 %v3255_v6, %v1214_v59  ;;  %v1433_v0 = vmax.f32 %v967_v56, 0.0  ;;  %v1497_v1 = vmax.f32 %v1223_v57, 0.0  ;;  %v2755_v2 = vpop.f32.mrf.mxu0  ;;  %v2819_v3 = vpop.f32.mrf.mxu1 }
 0x117   : > { %2071 = vst.msk [vmem:[%s3266_s10 + $0x30] sm:$0xf] %vm2058_vm3, %v2551_v60  ;;  %2135 = vst.msk [vmem:[%s3266_s10 + $0x130] sm:$0xf] %vm2058_vm3, %v2615_v61  ;;  %v1431_v4 = vmax.f32 %v959_v62, 0.0  ;;  %v980_v7 = vadd.f32 %v2755_v2, %v3255_v6  ;;  %v1236_v8 = vadd.f32 %v2819_v3, %v3255_v6 }
 0x118   : > { %v1495_v5 = vmax.f32 %v1215_v63, 0.0  ;;  %v2554_v9 = vpack.c.bf16 %v1433_v0, %v1433_v0  ;;  %v2618_v10 = vpack.c.bf16 %v1497_v1, %v1497_v1  ;;  %v971_v11 = vpop.f32.mrf.mxu0  ;;  %v1227_v12 = vpop.f32.mrf.mxu1 }
 0x119   : > { %v2552_v13 = vpack.c.bf16 %v1431_v4, %v1431_v4  ;;  %v1436_v15 = vmax.f32 %v980_v7, 0.0  ;;  %v1500_v16 = vmax.f32 %v1236_v8, 0.0  ;;  %v972_v17 = vadd.f32 %v3255_v6, %v971_v11 }
 0x11a   : > { %v2616_v14 = vpack.c.bf16 %v1495_v5, %v1495_v5  ;;  %2074 = vst.msk [vmem:[%s3266_s10 + $0x3c] sm:$0xf] %vm2058_vm3, %v2554_v9  ;;  %2138 = vst.msk [vmem:[%s3266_s10 + $0x13c] sm:$0xf] %vm2058_vm3, %v2618_v10  ;;  %v1228_v18 = vadd.f32 %v3255_v6, %v1227_v12  ;;  %v2756_v19 = vpop.f32.mrf.mxu0  ;;  %v2820_v20 = vpop.f32.mrf.mxu1 }
 0x11b   : > { %2072 = vst.msk [vmem:[%s3266_s10 + $0x34] sm:$0xf] %vm2058_vm3, %v2552_v13  ;;  %v2557_v21 = vpack.c.bf16 %v1436_v15, %v1436_v15  ;;  %v2621_v22 = vpack.c.bf16 %v1500_v16, %v1500_v16  ;;  %v983_v23 = vadd.f32 %v2756_v19, %v3255_v6  ;;  %v1239_v24 = vadd.f32 %v2820_v20, %v3255_v6 }
 0x11c   : > { %2136 = vst.msk [vmem:[%s3266_s10 + $0x134] sm:$0xf] %vm2058_vm3, %v2616_v14  ;;  %v1434_v25 = vmax.f32 %v972_v17, 0.0  ;;  %v1498_v26 = vmax.f32 %v1228_v18, 0.0  ;;  %v974_v27 = vpop.f32.mrf.mxu0  ;;  %v1230_v28 = vpop.f32.mrf.mxu1 }
 0x11d   : > { %2077 = vst.msk [vmem:[%s3266_s10 + $0x48] sm:$0xf] %vm2058_vm3, %v2557_v21  ;;  %2141 = vst.msk [vmem:[%s3266_s10 + $0x148] sm:$0xf] %vm2058_vm3, %v2621_v22  ;;  %v1437_v29 = vmax.f32 %v983_v23, 0.0  ;;  %v1501_v30 = vmax.f32 %v1239_v24, 0.0  ;;  %v975_v31 = vadd.f32 %v3255_v6, %v974_v27  ;;  %v1231_v32 = vadd.f32 %v3255_v6, %v1230_v28 }
 0x11e   : > { %v2555_v33 = vpack.c.bf16 %v1434_v25, %v1434_v25  ;;  %v2619_v34 = vpack.c.bf16 %v1498_v26, %v1498_v26  ;;  %v2759_v35 = vpop.f32.mrf.mxu0  ;;  %v2823_v36 = vpop.f32.mrf.mxu1 }
 0x11f   : > { %v2558_v37 = vpack.c.bf16 %v1437_v29, %v1437_v29  ;;  %v2622_v38 = vpack.c.bf16 %v1501_v30, %v1501_v30  ;;  %v1435_v39 = vmax.f32 %v975_v31, 0.0  ;;  %v1499_v40 = vmax.f32 %v1231_v32, 0.0 }
 0x120   : > { %2075 = vst.msk [vmem:[%s3266_s10 + $0x40] sm:$0xf] %vm2058_vm3, %v2555_v33  ;;  %2139 = vst.msk [vmem:[%s3266_s10 + $0x140] sm:$0xf] %vm2058_vm3, %v2619_v34  ;;  %v996_v41 = vadd.f32 %v2759_v35, %v3255_v6  ;;  %v1252_v42 = vadd.f32 %v2823_v36, %v3255_v6  ;;  %v987_v43 = vpop.f32.mrf.mxu0  ;;  %v1243_v44 = vpop.f32.mrf.mxu1 }
 0x121   : > { %2078 = vst.msk [vmem:[%s3266_s10 + $0x4c] sm:$0xf] %vm2058_vm3, %v2558_v37  ;;  %2142 = vst.msk [vmem:[%s3266_s10 + $0x14c] sm:$0xf] %vm2058_vm3, %v2622_v38  ;;  %v2556_v45 = vpack.c.bf16 %v1435_v39, %v1435_v39  ;;  %v2620_v46 = vpack.c.bf16 %v1499_v40, %v1499_v40  ;;  %v988_v47 = vadd.f32 %v3255_v6, %v987_v43 }
 0x122   : > { %v1244_v48 = vadd.f32 %v3255_v6, %v1243_v44  ;;  %v1440_v49 = vmax.f32 %v996_v41, 0.0  ;;  %v1504_v50 = vmax.f32 %v1252_v42, 0.0  ;;  %v2760_v51 = vpop.f32.mrf.mxu0  ;;  %v2824_v52 = vpop.f32.mrf.mxu1 }
 0x123   : > { %2076 = vst.msk [vmem:[%s3266_s10 + $0x44] sm:$0xf] %vm2058_vm3, %v2556_v45  ;;  %2140 = vst.msk [vmem:[%s3266_s10 + $0x144] sm:$0xf] %vm2058_vm3, %v2620_v46  ;;  %v1438_v53 = vmax.f32 %v988_v47, 0.0  ;;  %v999_v55 = vadd.f32 %v2760_v51, %v3255_v6  ;;  %v1255_v56 = vadd.f32 %v2824_v52, %v3255_v6 }
 0x124   : > { %v1502_v54 = vmax.f32 %v1244_v48, 0.0  ;;  %v2561_v57 = vpack.c.bf16 %v1440_v49, %v1440_v49  ;;  %v2625_v58 = vpack.c.bf16 %v1504_v50, %v1504_v50  ;;  %v990_v59 = vpop.f32.mrf.mxu0  ;;  %v1246_v60 = vpop.f32.mrf.mxu1 }
 0x125   : > { %v2559_v61 = vpack.c.bf16 %v1438_v53, %v1438_v53  ;;  %v1441_v63 = vmax.f32 %v999_v55, 0.0  ;;  %v1505_v0 = vmax.f32 %v1255_v56, 0.0  ;;  %v991_v1 = vadd.f32 %v3255_v6, %v990_v59 }
 0x126   : > { %v2623_v62 = vpack.c.bf16 %v1502_v54, %v1502_v54  ;;  %2081 = vst.msk [vmem:[%s3266_s10 + $0x58] sm:$0xf] %vm2058_vm3, %v2561_v57  ;;  %2145 = vst.msk [vmem:[%s3266_s10 + $0x158] sm:$0xf] %vm2058_vm3, %v2625_v58  ;;  %v1247_v2 = vadd.f32 %v3255_v6, %v1246_v60  ;;  %v2763_v3 = vpop.f32.mrf.mxu0  ;;  %v2827_v4 = vpop.f32.mrf.mxu1 }
 0x127   : > { %2079 = vst.msk [vmem:[%s3266_s10 + $0x50] sm:$0xf] %vm2058_vm3, %v2559_v61  ;;  %v2562_v5 = vpack.c.bf16 %v1441_v63, %v1441_v63  ;;  %v2626_v7 = vpack.c.bf16 %v1505_v0, %v1505_v0  ;;  %v1012_v8 = vadd.f32 %v2763_v3, %v3255_v6  ;;  %v1268_v9 = vadd.f32 %v2827_v4, %v3255_v6 }
 0x128   : > { %2143 = vst.msk [vmem:[%s3266_s10 + $0x150] sm:$0xf] %vm2058_vm3, %v2623_v62  ;;  %v1439_v10 = vmax.f32 %v991_v1, 0.0  ;;  %v1503_v11 = vmax.f32 %v1247_v2, 0.0  ;;  %v1003_v12 = vpop.f32.mrf.mxu0  ;;  %v1259_v13 = vpop.f32.mrf.mxu1 }
 0x129   : > { %2082 = vst.msk [vmem:[%s3266_s10 + $0x5c] sm:$0xf] %vm2058_vm3, %v2562_v5  ;;  %2146 = vst.msk [vmem:[%s3266_s10 + $0x15c] sm:$0xf] %vm2058_vm3, %v2626_v7  ;;  %v1444_v14 = vmax.f32 %v1012_v8, 0.0  ;;  %v1508_v15 = vmax.f32 %v1268_v9, 0.0  ;;  %v1004_v16 = vadd.f32 %v3255_v6, %v1003_v12  ;;  %v1260_v17 = vadd.f32 %v3255_v6, %v1259_v13 }
 0x12a   : > { %v2560_v18 = vpack.c.bf16 %v1439_v10, %v1439_v10  ;;  %v2624_v19 = vpack.c.bf16 %v1503_v11, %v1503_v11  ;;  %v2764_v20 = vpop.f32.mrf.mxu0  ;;  %v2828_v21 = vpop.f32.mrf.mxu1 }
 0x12b   : > { %v2565_v22 = vpack.c.bf16 %v1444_v14, %v1444_v14  ;;  %v2629_v23 = vpack.c.bf16 %v1508_v15, %v1508_v15  ;;  %v1442_v24 = vmax.f32 %v1004_v16, 0.0  ;;  %v1506_v25 = vmax.f32 %v1260_v17, 0.0 }
 0x12c   : > { %2080 = vst.msk [vmem:[%s3266_s10 + $0x54] sm:$0xf] %vm2058_vm3, %v2560_v18  ;;  %2144 = vst.msk [vmem:[%s3266_s10 + $0x154] sm:$0xf] %vm2058_vm3, %v2624_v19  ;;  %v1015_v26 = vadd.f32 %v2764_v20, %v3255_v6  ;;  %v1271_v27 = vadd.f32 %v2828_v21, %v3255_v6  ;;  %v1006_v28 = vpop.f32.mrf.mxu0  ;;  %v1262_v29 = vpop.f32.mrf.mxu1 }
 0x12d   : > { %2085 = vst.msk [vmem:[%s3266_s10 + $0x68] sm:$0xf] %vm2058_vm3, %v2565_v22  ;;  %2149 = vst.msk [vmem:[%s3266_s10 + $0x168] sm:$0xf] %vm2058_vm3, %v2629_v23  ;;  %v2563_v30 = vpack.c.bf16 %v1442_v24, %v1442_v24  ;;  %v2627_v31 = vpack.c.bf16 %v1506_v25, %v1506_v25  ;;  %v1007_v32 = vadd.f32 %v3255_v6, %v1006_v28 }
 0x12e   : > { %v1263_v33 = vadd.f32 %v3255_v6, %v1262_v29  ;;  %v1445_v34 = vmax.f32 %v1015_v26, 0.0  ;;  %v1509_v35 = vmax.f32 %v1271_v27, 0.0  ;;  %v2767_v36 = vpop.f32.mrf.mxu0  ;;  %v2831_v37 = vpop.f32.mrf.mxu1 }
 0x12f   : > { %2083 = vst.msk [vmem:[%s3266_s10 + $0x60] sm:$0xf] %vm2058_vm3, %v2563_v30  ;;  %2147 = vst.msk [vmem:[%s3266_s10 + $0x160] sm:$0xf] %vm2058_vm3, %v2627_v31  ;;  %v1443_v38 = vmax.f32 %v1007_v32, 0.0  ;;  %v1028_v40 = vadd.f32 %v2767_v36, %v3255_v6  ;;  %v1284_v41 = vadd.f32 %v2831_v37, %v3255_v6 }
 0x130   : > { %v1507_v39 = vmax.f32 %v1263_v33, 0.0  ;;  %v2566_v42 = vpack.c.bf16 %v1445_v34, %v1445_v34  ;;  %v2630_v43 = vpack.c.bf16 %v1509_v35, %v1509_v35  ;;  %v1019_v44 = vpop.f32.mrf.mxu0  ;;  %v1275_v45 = vpop.f32.mrf.mxu1 }
 0x131   : > { %v2564_v46 = vpack.c.bf16 %v1443_v38, %v1443_v38  ;;  %v1448_v48 = vmax.f32 %v1028_v40, 0.0  ;;  %v1512_v49 = vmax.f32 %v1284_v41, 0.0  ;;  %v1020_v50 = vadd.f32 %v3255_v6, %v1019_v44 }
 0x132   : > { %v2628_v47 = vpack.c.bf16 %v1507_v39, %v1507_v39  ;;  %2086 = vst.msk [vmem:[%s3266_s10 + $0x6c] sm:$0xf] %vm2058_vm3, %v2566_v42  ;;  %2150 = vst.msk [vmem:[%s3266_s10 + $0x16c] sm:$0xf] %vm2058_vm3, %v2630_v43  ;;  %v1276_v51 = vadd.f32 %v3255_v6, %v1275_v45  ;;  %v2768_v52 = vpop.f32.mrf.mxu0  ;;  %v2832_v53 = vpop.f32.mrf.mxu1 }
 0x133   : > { %2084 = vst.msk [vmem:[%s3266_s10 + $0x64] sm:$0xf] %vm2058_vm3, %v2564_v46  ;;  %v2569_v54 = vpack.c.bf16 %v1448_v48, %v1448_v48  ;;  %v2633_v55 = vpack.c.bf16 %v1512_v49, %v1512_v49  ;;  %v1031_v56 = vadd.f32 %v2768_v52, %v3255_v6  ;;  %v1287_v57 = vadd.f32 %v2832_v53, %v3255_v6 }
 0x134   : > { %2148 = vst.msk [vmem:[%s3266_s10 + $0x164] sm:$0xf] %vm2058_vm3, %v2628_v47  ;;  %v1446_v58 = vmax.f32 %v1020_v50, 0.0  ;;  %v1510_v59 = vmax.f32 %v1276_v51, 0.0  ;;  %v1022_v60 = vpop.f32.mrf.mxu0  ;;  %v1278_v61 = vpop.f32.mrf.mxu1 }
 0x135   : > { %2089 = vst.msk [vmem:[%s3266_s10 + $0x78] sm:$0xf] %vm2058_vm3, %v2569_v54  ;;  %2153 = vst.msk [vmem:[%s3266_s10 + $0x178] sm:$0xf] %vm2058_vm3, %v2633_v55  ;;  %v1449_v62 = vmax.f32 %v1031_v56, 0.0  ;;  %v1513_v63 = vmax.f32 %v1287_v57, 0.0  ;;  %v1023_v0 = vadd.f32 %v3255_v6, %v1022_v60  ;;  %v1279_v1 = vadd.f32 %v3255_v6, %v1278_v61 }
 0x136   : > { %v2567_v2 = vpack.c.bf16 %v1446_v58, %v1446_v58  ;;  %v2631_v3 = vpack.c.bf16 %v1510_v59, %v1510_v59  ;;  %v2771_v4 = vpop.f32.mrf.mxu0  ;;  %v2835_v5 = vpop.f32.mrf.mxu1 }
 0x137   : > { %v2570_v7 = vpack.c.bf16 %v1449_v62, %v1449_v62  ;;  %v2634_v8 = vpack.c.bf16 %v1513_v63, %v1513_v63  ;;  %v1447_v9 = vmax.f32 %v1023_v0, 0.0  ;;  %v1511_v10 = vmax.f32 %v1279_v1, 0.0 }
 0x138   : > { %2087 = vst.msk [vmem:[%s3266_s10 + $0x70] sm:$0xf] %vm2058_vm3, %v2567_v2  ;;  %2151 = vst.msk [vmem:[%s3266_s10 + $0x170] sm:$0xf] %vm2058_vm3, %v2631_v3  ;;  %v1044_v11 = vadd.f32 %v2771_v4, %v3255_v6  ;;  %v1300_v12 = vadd.f32 %v2835_v5, %v3255_v6  ;;  %v1035_v13 = vpop.f32.mrf.mxu0  ;;  %v1291_v14 = vpop.f32.mrf.mxu1 }
 0x139   : > { %2090 = vst.msk [vmem:[%s3266_s10 + $0x7c] sm:$0xf] %vm2058_vm3, %v2570_v7  ;;  %2154 = vst.msk [vmem:[%s3266_s10 + $0x17c] sm:$0xf] %vm2058_vm3, %v2634_v8  ;;  %v2568_v15 = vpack.c.bf16 %v1447_v9, %v1447_v9  ;;  %v2632_v16 = vpack.c.bf16 %v1511_v10, %v1511_v10  ;;  %v1036_v17 = vadd.f32 %v3255_v6, %v1035_v13 }
 0x13a   : > { %v1292_v18 = vadd.f32 %v3255_v6, %v1291_v14  ;;  %v1452_v19 = vmax.f32 %v1044_v11, 0.0  ;;  %v1516_v20 = vmax.f32 %v1300_v12, 0.0  ;;  %v2772_v21 = vpop.f32.mrf.mxu0  ;;  %v2836_v22 = vpop.f32.mrf.mxu1 }
 0x13b   : > { %2088 = vst.msk [vmem:[%s3266_s10 + $0x74] sm:$0xf] %vm2058_vm3, %v2568_v15  ;;  %2152 = vst.msk [vmem:[%s3266_s10 + $0x174] sm:$0xf] %vm2058_vm3, %v2632_v16  ;;  %v1450_v23 = vmax.f32 %v1036_v17, 0.0  ;;  %v1047_v25 = vadd.f32 %v2772_v21, %v3255_v6  ;;  %v1303_v26 = vadd.f32 %v2836_v22, %v3255_v6 }
 0x13c   : > { %v1514_v24 = vmax.f32 %v1292_v18, 0.0  ;;  %v2573_v27 = vpack.c.bf16 %v1452_v19, %v1452_v19  ;;  %v2637_v28 = vpack.c.bf16 %v1516_v20, %v1516_v20  ;;  %v1038_v29 = vpop.f32.mrf.mxu0  ;;  %v1294_v30 = vpop.f32.mrf.mxu1 }
 0x13d   : > { %v2571_v31 = vpack.c.bf16 %v1450_v23, %v1450_v23  ;;  %v1453_v33 = vmax.f32 %v1047_v25, 0.0  ;;  %v1517_v34 = vmax.f32 %v1303_v26, 0.0  ;;  %v1039_v35 = vadd.f32 %v3255_v6, %v1038_v29 }
 0x13e   : > { %v2635_v32 = vpack.c.bf16 %v1514_v24, %v1514_v24  ;;  %2093 = vst.msk [vmem:[%s3266_s10 + $0x88] sm:$0xf] %vm2058_vm3, %v2573_v27  ;;  %2157 = vst.msk [vmem:[%s3266_s10 + $0x188] sm:$0xf] %vm2058_vm3, %v2637_v28  ;;  %v1295_v36 = vadd.f32 %v3255_v6, %v1294_v30  ;;  %v2775_v37 = vpop.f32.mrf.mxu0  ;;  %v2839_v38 = vpop.f32.mrf.mxu1 }
 0x13f   : > { %2091 = vst.msk [vmem:[%s3266_s10 + $0x80] sm:$0xf] %vm2058_vm3, %v2571_v31  ;;  %v2574_v39 = vpack.c.bf16 %v1453_v33, %v1453_v33  ;;  %v2638_v40 = vpack.c.bf16 %v1517_v34, %v1517_v34  ;;  %v1060_v41 = vadd.f32 %v2775_v37, %v3255_v6  ;;  %v1316_v42 = vadd.f32 %v2839_v38, %v3255_v6 }
 0x140   : > { %2155 = vst.msk [vmem:[%s3266_s10 + $0x180] sm:$0xf] %vm2058_vm3, %v2635_v32  ;;  %v1451_v43 = vmax.f32 %v1039_v35, 0.0  ;;  %v1515_v44 = vmax.f32 %v1295_v36, 0.0  ;;  %v1051_v45 = vpop.f32.mrf.mxu0  ;;  %v1307_v46 = vpop.f32.mrf.mxu1 }
 0x141   : > { %2094 = vst.msk [vmem:[%s3266_s10 + $0x8c] sm:$0xf] %vm2058_vm3, %v2574_v39  ;;  %2158 = vst.msk [vmem:[%s3266_s10 + $0x18c] sm:$0xf] %vm2058_vm3, %v2638_v40  ;;  %v1456_v47 = vmax.f32 %v1060_v41, 0.0  ;;  %v1520_v48 = vmax.f32 %v1316_v42, 0.0  ;;  %v1052_v49 = vadd.f32 %v3255_v6, %v1051_v45  ;;  %v1308_v50 = vadd.f32 %v3255_v6, %v1307_v46 }
 0x142   : > { %v2572_v51 = vpack.c.bf16 %v1451_v43, %v1451_v43  ;;  %v2636_v52 = vpack.c.bf16 %v1515_v44, %v1515_v44  ;;  %v2776_v53 = vpop.f32.mrf.mxu0  ;;  %v2840_v54 = vpop.f32.mrf.mxu1 }
 0x143   : > { %v2577_v55 = vpack.c.bf16 %v1456_v47, %v1456_v47  ;;  %v2641_v56 = vpack.c.bf16 %v1520_v48, %v1520_v48  ;;  %v1454_v57 = vmax.f32 %v1052_v49, 0.0  ;;  %v1518_v58 = vmax.f32 %v1308_v50, 0.0 }
 0x144   : > { %2092 = vst.msk [vmem:[%s3266_s10 + $0x84] sm:$0xf] %vm2058_vm3, %v2572_v51  ;;  %2156 = vst.msk [vmem:[%s3266_s10 + $0x184] sm:$0xf] %vm2058_vm3, %v2636_v52  ;;  %v1063_v59 = vadd.f32 %v2776_v53, %v3255_v6  ;;  %v1319_v60 = vadd.f32 %v2840_v54, %v3255_v6  ;;  %v1054_v61 = vpop.f32.mrf.mxu0  ;;  %v1310_v62 = vpop.f32.mrf.mxu1 }
 0x145   : > { %2097 = vst.msk [vmem:[%s3266_s10 + $0x98] sm:$0xf] %vm2058_vm3, %v2577_v55  ;;  %2161 = vst.msk [vmem:[%s3266_s10 + $0x198] sm:$0xf] %vm2058_vm3, %v2641_v56  ;;  %v2575_v63 = vpack.c.bf16 %v1454_v57, %v1454_v57  ;;  %v2639_v0 = vpack.c.bf16 %v1518_v58, %v1518_v58  ;;  %v1055_v1 = vadd.f32 %v3255_v6, %v1054_v61 }
 0x146   : > { %v1311_v2 = vadd.f32 %v3255_v6, %v1310_v62  ;;  %v1457_v3 = vmax.f32 %v1063_v59, 0.0  ;;  %v1521_v4 = vmax.f32 %v1319_v60, 0.0  ;;  %v2779_v5 = vpop.f32.mrf.mxu0  ;;  %v2843_v7 = vpop.f32.mrf.mxu1 }
 0x147   : > { %2095 = vst.msk [vmem:[%s3266_s10 + $0x90] sm:$0xf] %vm2058_vm3, %v2575_v63  ;;  %2159 = vst.msk [vmem:[%s3266_s10 + $0x190] sm:$0xf] %vm2058_vm3, %v2639_v0  ;;  %v1455_v8 = vmax.f32 %v1055_v1, 0.0  ;;  %v1076_v10 = vadd.f32 %v2779_v5, %v3255_v6  ;;  %v1332_v11 = vadd.f32 %v2843_v7, %v3255_v6 }
 0x148   : > { %v1519_v9 = vmax.f32 %v1311_v2, 0.0  ;;  %v2578_v12 = vpack.c.bf16 %v1457_v3, %v1457_v3  ;;  %v2642_v13 = vpack.c.bf16 %v1521_v4, %v1521_v4  ;;  %v1067_v14 = vpop.f32.mrf.mxu0  ;;  %v1323_v15 = vpop.f32.mrf.mxu1 }
 0x149   : > { %v2576_v16 = vpack.c.bf16 %v1455_v8, %v1455_v8  ;;  %v1460_v18 = vmax.f32 %v1076_v10, 0.0  ;;  %v1524_v19 = vmax.f32 %v1332_v11, 0.0  ;;  %v1068_v20 = vadd.f32 %v3255_v6, %v1067_v14 }
 0x14a   : > { %v2640_v17 = vpack.c.bf16 %v1519_v9, %v1519_v9  ;;  %2098 = vst.msk [vmem:[%s3266_s10 + $0x9c] sm:$0xf] %vm2058_vm3, %v2578_v12  ;;  %2162 = vst.msk [vmem:[%s3266_s10 + $0x19c] sm:$0xf] %vm2058_vm3, %v2642_v13  ;;  %v1324_v21 = vadd.f32 %v3255_v6, %v1323_v15  ;;  %v2780_v22 = vpop.f32.mrf.mxu0  ;;  %v2844_v23 = vpop.f32.mrf.mxu1 }
 0x14b   : > { %2096 = vst.msk [vmem:[%s3266_s10 + $0x94] sm:$0xf] %vm2058_vm3, %v2576_v16  ;;  %v2581_v24 = vpack.c.bf16 %v1460_v18, %v1460_v18  ;;  %v2645_v25 = vpack.c.bf16 %v1524_v19, %v1524_v19  ;;  %v1079_v26 = vadd.f32 %v2780_v22, %v3255_v6  ;;  %v1335_v27 = vadd.f32 %v2844_v23, %v3255_v6 }
 0x14c   : > { %2160 = vst.msk [vmem:[%s3266_s10 + $0x194] sm:$0xf] %vm2058_vm3, %v2640_v17  ;;  %v1458_v28 = vmax.f32 %v1068_v20, 0.0  ;;  %v1522_v29 = vmax.f32 %v1324_v21, 0.0  ;;  %v1070_v30 = vpop.f32.mrf.mxu0  ;;  %v1326_v31 = vpop.f32.mrf.mxu1 }
 0x14d   : > { %2101 = vst.msk [vmem:[%s3266_s10 + $0xa8] sm:$0xf] %vm2058_vm3, %v2581_v24  ;;  %2165 = vst.msk [vmem:[%s3266_s10 + $0x1a8] sm:$0xf] %vm2058_vm3, %v2645_v25  ;;  %v1461_v32 = vmax.f32 %v1079_v26, 0.0  ;;  %v1525_v33 = vmax.f32 %v1335_v27, 0.0  ;;  %v1071_v34 = vadd.f32 %v3255_v6, %v1070_v30  ;;  %v1327_v35 = vadd.f32 %v3255_v6, %v1326_v31 }
 0x14e   : > { %v2579_v36 = vpack.c.bf16 %v1458_v28, %v1458_v28  ;;  %v2643_v37 = vpack.c.bf16 %v1522_v29, %v1522_v29  ;;  %v2783_v38 = vpop.f32.mrf.mxu0  ;;  %v2847_v39 = vpop.f32.mrf.mxu1 }
 0x14f   : > { %v2582_v40 = vpack.c.bf16 %v1461_v32, %v1461_v32  ;;  %v2646_v41 = vpack.c.bf16 %v1525_v33, %v1525_v33  ;;  %v1459_v42 = vmax.f32 %v1071_v34, 0.0  ;;  %v1523_v43 = vmax.f32 %v1327_v35, 0.0 }
 0x150   : > { %2099 = vst.msk [vmem:[%s3266_s10 + $0xa0] sm:$0xf] %vm2058_vm3, %v2579_v36  ;;  %2163 = vst.msk [vmem:[%s3266_s10 + $0x1a0] sm:$0xf] %vm2058_vm3, %v2643_v37  ;;  %v1092_v44 = vadd.f32 %v2783_v38, %v3255_v6  ;;  %v1348_v45 = vadd.f32 %v2847_v39, %v3255_v6  ;;  %v1083_v46 = vpop.f32.mrf.mxu0  ;;  %v1339_v47 = vpop.f32.mrf.mxu1 }
 0x151   : > { %2102 = vst.msk [vmem:[%s3266_s10 + $0xac] sm:$0xf] %vm2058_vm3, %v2582_v40  ;;  %2166 = vst.msk [vmem:[%s3266_s10 + $0x1ac] sm:$0xf] %vm2058_vm3, %v2646_v41  ;;  %v2580_v48 = vpack.c.bf16 %v1459_v42, %v1459_v42  ;;  %v2644_v49 = vpack.c.bf16 %v1523_v43, %v1523_v43  ;;  %v1084_v50 = vadd.f32 %v3255_v6, %v1083_v46  ;;  %v3568_v43 = vld [vmem:[#allocation4] ss:$0 sm:$0xff] }
 0x152   : > { %v1340_v51 = vadd.f32 %v3255_v6, %v1339_v47  ;;  %v1464_v52 = vmax.f32 %v1092_v44, 0.0  ;;  %v1528_v53 = vmax.f32 %v1348_v45, 0.0  ;;  %v2784_v54 = vpop.f32.mrf.mxu0  ;;  %v2848_v55 = vpop.f32.mrf.mxu1 }
 0x153   : > { %2100 = vst.msk [vmem:[%s3266_s10 + $0xa4] sm:$0xf] %vm2058_vm3, %v2580_v48  ;;  %2164 = vst.msk [vmem:[%s3266_s10 + $0x1a4] sm:$0xf] %vm2058_vm3, %v2644_v49  ;;  %v1462_v56 = vmax.f32 %v1084_v50, 0.0  ;;  %v1095_v58 = vadd.f32 %v2784_v54, %v3255_v6  ;;  %v1351_v59 = vadd.f32 %v2848_v55, %v3255_v6 }
 0x154   : > { %v1526_v57 = vmax.f32 %v1340_v51, 0.0  ;;  %v2585_v60 = vpack.c.bf16 %v1464_v52, %v1464_v52  ;;  %v2649_v61 = vpack.c.bf16 %v1528_v53, %v1528_v53  ;;  %v1086_v62 = vpop.f32.mrf.mxu0  ;;  %v1342_v63 = vpop.f32.mrf.mxu1 }
 0x155   : > { %v2583_v0 = vpack.c.bf16 %v1462_v56, %v1462_v56  ;;  %v1465_v2 = vmax.f32 %v1095_v58, 0.0  ;;  %v1529_v3 = vmax.f32 %v1351_v59, 0.0  ;;  %v1087_v4 = vadd.f32 %v3255_v6, %v1086_v62 }
 0x156   : > { %v2647_v1 = vpack.c.bf16 %v1526_v57, %v1526_v57  ;;  %2105 = vst.msk [vmem:[%s3266_s10 + $0xb8] sm:$0xf] %vm2058_vm3, %v2585_v60  ;;  %2169 = vst.msk [vmem:[%s3266_s10 + $0x1b8] sm:$0xf] %vm2058_vm3, %v2649_v61  ;;  %v1343_v5 = vadd.f32 %v3255_v6, %v1342_v63  ;;  %v2787_v7 = vpop.f32.mrf.mxu0  ;;  %v2851_v8 = vpop.f32.mrf.mxu1 }
 0x157   : > { %2103 = vst.msk [vmem:[%s3266_s10 + $0xb0] sm:$0xf] %vm2058_vm3, %v2583_v0  ;;  %v2586_v9 = vpack.c.bf16 %v1465_v2, %v1465_v2  ;;  %v2650_v10 = vpack.c.bf16 %v1529_v3, %v1529_v3  ;;  %v1108_v11 = vadd.f32 %v2787_v7, %v3255_v6  ;;  %v1364_v12 = vadd.f32 %v2851_v8, %v3255_v6 }
 0x158   : > { %2167 = vst.msk [vmem:[%s3266_s10 + $0x1b0] sm:$0xf] %vm2058_vm3, %v2647_v1  ;;  %v1463_v13 = vmax.f32 %v1087_v4, 0.0  ;;  %v1527_v14 = vmax.f32 %v1343_v5, 0.0  ;;  %v1099_v15 = vpop.f32.mrf.mxu0  ;;  %v1355_v16 = vpop.f32.mrf.mxu1 }
 0x159   : > { %2106 = vst.msk [vmem:[%s3266_s10 + $0xbc] sm:$0xf] %vm2058_vm3, %v2586_v9  ;;  %2170 = vst.msk [vmem:[%s3266_s10 + $0x1bc] sm:$0xf] %vm2058_vm3, %v2650_v10  ;;  %v1468_v17 = vmax.f32 %v1108_v11, 0.0  ;;  %v1532_v18 = vmax.f32 %v1364_v12, 0.0  ;;  %v1100_v19 = vadd.f32 %v3255_v6, %v1099_v15  ;;  %v1356_v20 = vadd.f32 %v3255_v6, %v1355_v16 }
 0x15a   : > { %v2584_v21 = vpack.c.bf16 %v1463_v13, %v1463_v13  ;;  %v2648_v22 = vpack.c.bf16 %v1527_v14, %v1527_v14  ;;  %v2788_v23 = vpop.f32.mrf.mxu0  ;;  %v2852_v24 = vpop.f32.mrf.mxu1 }
 0x15b   : > { %v2589_v25 = vpack.c.bf16 %v1468_v17, %v1468_v17  ;;  %v2653_v26 = vpack.c.bf16 %v1532_v18, %v1532_v18  ;;  %v1466_v27 = vmax.f32 %v1100_v19, 0.0  ;;  %v1530_v28 = vmax.f32 %v1356_v20, 0.0 }
 0x15c   : > { %2104 = vst.msk [vmem:[%s3266_s10 + $0xb4] sm:$0xf] %vm2058_vm3, %v2584_v21  ;;  %2168 = vst.msk [vmem:[%s3266_s10 + $0x1b4] sm:$0xf] %vm2058_vm3, %v2648_v22  ;;  %v1111_v29 = vadd.f32 %v2788_v23, %v3255_v6  ;;  %v1367_v30 = vadd.f32 %v2852_v24, %v3255_v6  ;;  %v1102_v31 = vpop.f32.mrf.mxu0  ;;  %v1358_v32 = vpop.f32.mrf.mxu1 }
 0x15d   : > { %2109 = vst.msk [vmem:[%s3266_s10 + $0xc8] sm:$0xf] %vm2058_vm3, %v2589_v25  ;;  %2173 = vst.msk [vmem:[%s3266_s10 + $0x1c8] sm:$0xf] %vm2058_vm3, %v2653_v26  ;;  %v2587_v33 = vpack.c.bf16 %v1466_v27, %v1466_v27  ;;  %v2651_v34 = vpack.c.bf16 %v1530_v28, %v1530_v28  ;;  %v1103_v35 = vadd.f32 %v3255_v6, %v1102_v31 }
 0x15e   : > { %v1359_v36 = vadd.f32 %v3255_v6, %v1358_v32  ;;  %v1469_v37 = vmax.f32 %v1111_v29, 0.0  ;;  %v1533_v38 = vmax.f32 %v1367_v30, 0.0  ;;  %v2791_v39 = vpop.f32.mrf.mxu0  ;;  %v2855_v40 = vpop.f32.mrf.mxu1 }
 0x15f   : > { %2107 = vst.msk [vmem:[%s3266_s10 + $0xc0] sm:$0xf] %vm2058_vm3, %v2587_v33  ;;  %2171 = vst.msk [vmem:[%s3266_s10 + $0x1c0] sm:$0xf] %vm2058_vm3, %v2651_v34  ;;  %v1467_v41 = vmax.f32 %v1103_v35, 0.0  ;;  %v1124_v44 = vadd.f32 %v3568_v43, %v2791_v39  ;;  %v1380_v45 = vadd.f32 %v3568_v43, %v2855_v40 }
 0x160   : > { %v1531_v42 = vmax.f32 %v1359_v36, 0.0  ;;  %v2590_v6 = vpack.c.bf16 %v1469_v37, %v1469_v37  ;;  %v2654_v46 = vpack.c.bf16 %v1533_v38, %v1533_v38  ;;  %v1115_v47 = vpop.f32.mrf.mxu0  ;;  %v1371_v48 = vpop.f32.mrf.mxu1 }
 0x161   : > { %v2588_v49 = vpack.c.bf16 %v1467_v41, %v1467_v41  ;;  %v1472_v51 = vmax.f32 %v1124_v44, 0.0  ;;  %v1536_v52 = vmax.f32 %v1380_v45, 0.0  ;;  %v1116_v53 = vadd.f32 %v3568_v43, %v1115_v47 }
 0x162   : > { %v2652_v50 = vpack.c.bf16 %v1531_v42, %v1531_v42  ;;  %2110 = vst.msk [vmem:[%s3266_s10 + $0xcc] sm:$0xf] %vm2058_vm3, %v2590_v6  ;;  %2174 = vst.msk [vmem:[%s3266_s10 + $0x1cc] sm:$0xf] %vm2058_vm3, %v2654_v46  ;;  %v1372_v54 = vadd.f32 %v3568_v43, %v1371_v48  ;;  %v2792_v55 = vpop.f32.mrf.mxu0  ;;  %v2856_v56 = vpop.f32.mrf.mxu1 }
 0x163   : > { %2108 = vst.msk [vmem:[%s3266_s10 + $0xc4] sm:$0xf] %vm2058_vm3, %v2588_v49  ;;  %v2593_v57 = vpack.c.bf16 %v1472_v51, %v1472_v51  ;;  %v2657_v58 = vpack.c.bf16 %v1536_v52, %v1536_v52  ;;  %v1127_v59 = vadd.f32 %v3568_v43, %v2792_v55  ;;  %v1383_v60 = vadd.f32 %v3568_v43, %v2856_v56 }
 0x164   : > { %2172 = vst.msk [vmem:[%s3266_s10 + $0x1c4] sm:$0xf] %vm2058_vm3, %v2652_v50  ;;  %v1470_v61 = vmax.f32 %v1116_v53, 0.0  ;;  %v1534_v62 = vmax.f32 %v1372_v54, 0.0  ;;  %v1118_v63 = vpop.f32.mrf.mxu0  ;;  %v1374_v0 = vpop.f32.mrf.mxu1 }
 0x165   : > { %2113 = vst.msk [vmem:[%s3266_s10 + $0xd8] sm:$0xf] %vm2058_vm3, %v2593_v57  ;;  %2177 = vst.msk [vmem:[%s3266_s10 + $0x1d8] sm:$0xf] %vm2058_vm3, %v2657_v58  ;;  %v1473_v1 = vmax.f32 %v1127_v59, 0.0  ;;  %v1537_v2 = vmax.f32 %v1383_v60, 0.0  ;;  %v1119_v3 = vadd.f32 %v3568_v43, %v1118_v63  ;;  %v1375_v4 = vadd.f32 %v3568_v43, %v1374_v0 }
 0x166   : > { %v2591_v5 = vpack.c.bf16 %v1470_v61, %v1470_v61  ;;  %v2655_v7 = vpack.c.bf16 %v1534_v62, %v1534_v62  ;;  %v2795_v8 = vpop.f32.mrf.mxu0  ;;  %v2859_v9 = vpop.f32.mrf.mxu1 }
 0x167   : > { %v2594_v10 = vpack.c.bf16 %v1473_v1, %v1473_v1  ;;  %v2658_v11 = vpack.c.bf16 %v1537_v2, %v1537_v2  ;;  %v1471_v12 = vmax.f32 %v1119_v3, 0.0  ;;  %v1535_v13 = vmax.f32 %v1375_v4, 0.0 }
 0x168   : > { %2111 = vst.msk [vmem:[%s3266_s10 + $0xd0] sm:$0xf] %vm2058_vm3, %v2591_v5  ;;  %2175 = vst.msk [vmem:[%s3266_s10 + $0x1d0] sm:$0xf] %vm2058_vm3, %v2655_v7  ;;  %v1140_v14 = vadd.f32 %v3568_v43, %v2795_v8  ;;  %v1396_v15 = vadd.f32 %v3568_v43, %v2859_v9  ;;  %v1131_v16 = vpop.f32.mrf.mxu0  ;;  %v1387_v17 = vpop.f32.mrf.mxu1 }
 0x169   : > { %2114 = vst.msk [vmem:[%s3266_s10 + $0xdc] sm:$0xf] %vm2058_vm3, %v2594_v10  ;;  %2178 = vst.msk [vmem:[%s3266_s10 + $0x1dc] sm:$0xf] %vm2058_vm3, %v2658_v11  ;;  %v2592_v18 = vpack.c.bf16 %v1471_v12, %v1471_v12  ;;  %v2656_v19 = vpack.c.bf16 %v1535_v13, %v1535_v13  ;;  %v1132_v20 = vadd.f32 %v3568_v43, %v1131_v16 }
 0x16a   : > { %v1388_v21 = vadd.f32 %v3568_v43, %v1387_v17  ;;  %v1476_v22 = vmax.f32 %v1140_v14, 0.0  ;;  %v1540_v23 = vmax.f32 %v1396_v15, 0.0  ;;  %v2796_v24 = vpop.f32.mrf.mxu0  ;;  %v2860_v25 = vpop.f32.mrf.mxu1 }
 0x16b   : > { %2112 = vst.msk [vmem:[%s3266_s10 + $0xd4] sm:$0xf] %vm2058_vm3, %v2592_v18  ;;  %2176 = vst.msk [vmem:[%s3266_s10 + $0x1d4] sm:$0xf] %vm2058_vm3, %v2656_v19  ;;  %v1474_v26 = vmax.f32 %v1132_v20, 0.0  ;;  %v1143_v28 = vadd.f32 %v3568_v43, %v2796_v24  ;;  %v1399_v29 = vadd.f32 %v3568_v43, %v2860_v25 }
 0x16c   : > { %v1538_v27 = vmax.f32 %v1388_v21, 0.0  ;;  %v2597_v30 = vpack.c.bf16 %v1476_v22, %v1476_v22  ;;  %v2661_v31 = vpack.c.bf16 %v1540_v23, %v1540_v23  ;;  %v1134_v32 = vpop.f32.mrf.mxu0  ;;  %v1390_v33 = vpop.f32.mrf.mxu1 }
 0x16d   : > { %v2595_v34 = vpack.c.bf16 %v1474_v26, %v1474_v26  ;;  %v1477_v36 = vmax.f32 %v1143_v28, 0.0  ;;  %v1541_v37 = vmax.f32 %v1399_v29, 0.0  ;;  %v1135_v38 = vadd.f32 %v3568_v43, %v1134_v32 }
 0x16e   : > { %v2659_v35 = vpack.c.bf16 %v1538_v27, %v1538_v27  ;;  %2117 = vst.msk [vmem:[%s3266_s10 + $0xe8] sm:$0xf] %vm2058_vm3, %v2597_v30  ;;  %2181 = vst.msk [vmem:[%s3266_s10 + $0x1e8] sm:$0xf] %vm2058_vm3, %v2661_v31  ;;  %v1391_v39 = vadd.f32 %v3568_v43, %v1390_v33  ;;  %v2799_v40 = vpop.f32.mrf.mxu0  ;;  %v2863_v41 = vpop.f32.mrf.mxu1 }
 0x16f   : > { %2115 = vst.msk [vmem:[%s3266_s10 + $0xe0] sm:$0xf] %vm2058_vm3, %v2595_v34  ;;  %v2598_v42 = vpack.c.bf16 %v1477_v36, %v1477_v36  ;;  %v2662_v44 = vpack.c.bf16 %v1541_v37, %v1541_v37  ;;  %v1156_v45 = vadd.f32 %v3568_v43, %v2799_v40  ;;  %v1412_v6 = vadd.f32 %v3568_v43, %v2863_v41 }
 0x170   : > { %2179 = vst.msk [vmem:[%s3266_s10 + $0x1e0] sm:$0xf] %vm2058_vm3, %v2659_v35  ;;  %v1475_v46 = vmax.f32 %v1135_v38, 0.0  ;;  %v1539_v47 = vmax.f32 %v1391_v39, 0.0  ;;  %v1147_v48 = vpop.f32.mrf.mxu0  ;;  %v1403_v49 = vpop.f32.mrf.mxu1 }
 0x171   : > { %2118 = vst.msk [vmem:[%s3266_s10 + $0xec] sm:$0xf] %vm2058_vm3, %v2598_v42  ;;  %2182 = vst.msk [vmem:[%s3266_s10 + $0x1ec] sm:$0xf] %vm2058_vm3, %v2662_v44  ;;  %v1480_v50 = vmax.f32 %v1156_v45, 0.0  ;;  %v1544_v51 = vmax.f32 %v1412_v6, 0.0  ;;  %v1148_v52 = vadd.f32 %v3568_v43, %v1147_v48  ;;  %v1404_v53 = vadd.f32 %v3568_v43, %v1403_v49 }
 0x172   : > { %v2596_v54 = vpack.c.bf16 %v1475_v46, %v1475_v46  ;;  %v2660_v55 = vpack.c.bf16 %v1539_v47, %v1539_v47  ;;  %v2800_v56 = vpop.f32.mrf.mxu0  ;;  %v2864_v57 = vpop.f32.mrf.mxu1 }
 0x173   : > { %v2601_v58 = vpack.c.bf16 %v1480_v50, %v1480_v50  ;;  %v2665_v59 = vpack.c.bf16 %v1544_v51, %v1544_v51  ;;  %v1478_v60 = vmax.f32 %v1148_v52, 0.0  ;;  %v1542_v61 = vmax.f32 %v1404_v53, 0.0 }
 0x174   : > { %2116 = vst.msk [vmem:[%s3266_s10 + $0xe4] sm:$0xf] %vm2058_vm3, %v2596_v54  ;;  %2180 = vst.msk [vmem:[%s3266_s10 + $0x1e4] sm:$0xf] %vm2058_vm3, %v2660_v55  ;;  %v1159_v62 = vadd.f32 %v3568_v43, %v2800_v56  ;;  %v1415_v63 = vadd.f32 %v3568_v43, %v2864_v57  ;;  %v1150_v0 = vpop.f32.mrf.mxu0  ;;  %v1406_v1 = vpop.f32.mrf.mxu1 }
 0x175   : > { %2121 = vst.msk [vmem:[%s3266_s10 + $0xf8] sm:$0xf] %vm2058_vm3, %v2601_v58  ;;  %2185 = vst.msk [vmem:[%s3266_s10 + $0x1f8] sm:$0xf] %vm2058_vm3, %v2665_v59  ;;  %v2599_v2 = vpack.c.bf16 %v1478_v60, %v1478_v60  ;;  %v2663_v3 = vpack.c.bf16 %v1542_v61, %v1542_v61  ;;  %v1151_v4 = vadd.f32 %v3568_v43, %v1150_v0 }
 0x176   : > { %v1407_v5 = vadd.f32 %v3568_v43, %v1406_v1  ;;  %v1481_v7 = vmax.f32 %v1159_v62, 0.0  ;;  %v1545_v8 = vmax.f32 %v1415_v63, 0.0 }
 0x177   : > { %2119 = vst.msk [vmem:[%s3266_s10 + $0xf0] sm:$0xf] %vm2058_vm3, %v2599_v2  ;;  %2183 = vst.msk [vmem:[%s3266_s10 + $0x1f0] sm:$0xf] %vm2058_vm3, %v2663_v3  ;;  %v1479_v9 = vmax.f32 %v1151_v4, 0.0 }
 0x178   : > { %v1543_v10 = vmax.f32 %v1407_v5, 0.0  ;;  %v2602_v11 = vpack.c.bf16 %v1481_v7, %v1481_v7  ;;  %v2666_v12 = vpack.c.bf16 %v1545_v8, %v1545_v8 }
 0x179   : > { %v2600_v13 = vpack.c.bf16 %v1479_v9, %v1479_v9 }
 0x17a   : > { %v2664_v14 = vpack.c.bf16 %v1543_v10, %v1543_v10  ;;  %2122 = vst.msk [vmem:[%s3266_s10 + $0xfc] sm:$0xf] %vm2058_vm3, %v2602_v11  ;;  %2186 = vst.msk [vmem:[%s3266_s10 + $0x1fc] sm:$0xf] %vm2058_vm3, %v2666_v12 }
 0x17b   : > { %2120 = vst.msk [vmem:[%s3266_s10 + $0xf4] sm:$0xf] %vm2058_vm3, %v2600_v13 }
 0x17c   : > { %2184 = vst.msk [vmem:[%s3266_s10 + $0x1f4] sm:$0xf] %vm2058_vm3, %v2664_v14 }
 0x17d PF: > { %s15_s12 = sadd.s32 1, %s3034_s12  }
 0x17e   : > { %p12_p2 = scmp.ge.s32.totalorder %s15_s12, 4  }
 0x180   :  { %14 = sbr.rel (!%p12_p2) target bundleno = 2 (0x2), region = 71 }
 0x185   :  { %2209 = vsyncpa [#allocation3], 1 }
 0x186   :  { %2211 = vsyncpa [#allocation3 + $0x1], 1 }
 0x187   :  { %2212 = vsyncpa [#allocation5], 1 }

// kernel: _lambda_.5
= control target key start
LH: loop header
LB: loop body
LE: loop exit
PB: predicated region body
PF: predicated region fallthrough
CT: control target
= control target key end

     0   :  { %s1038_s12 = smov 0   ;;  %s1214_s0 = inlined_call_operand.vmem [shape: bf16[512,72], index: 0, kind: input, shape index: {}]   ;;  %s1215_s1 = inlined_call_operand.vmem [shape: bf16[72,16], index: 1, kind: input, shape index: {}]   ;;  %s1216_s2 = inlined_call_operand.vmem [shape: f32[1,16], index: 2, kind: input, shape index: {}]   ;;  %s1217_s3 = inlined_call_operand.vmem [shape: bf16[512,16], index: 3, kind: output, shape index: {}]  }
   0x1 LB: > { %s793_s13 = sadd.s32 4294967295, %s1016_s12   ;;  %p797_p0 = scmp.ge.s32.totalorder %s1016_s12, 1  ;;  %s1016_s12 = sphi %s1038_s12, %s13_s12  }
   0x2   : > { %p138_p1 = scmp.lt.s32.totalorder %s1016_s12, 3 }
   0x4   : > { %p139_p2 = pnand %p797_p0, %p138_p1 }
   0x5   : > { %s798_s18 = sshll.u32 (!%p139_p2), %s793_s13, 5 }
   0x6   : > { %142 = sbr.rel (%p139_p2) target bundleno = 263 (0x107), region = 32  ;;  %p163_p3 = scmp.lt.s32.totalorder (!%p139_p2), %s798_s18, 63 }
   0xb   : > { %v989_v0 = vld [vmem:[%s1215_s1 + $0x20] ss:$0 sps:$4 sm:$0xff]   ;;  %vm379_vm0 = vcmask 1043456   ;;  %v990_v1 = vld [vmem:[%s1215_s1 + $0x18] sm:$0xff]   ;;  %v991_v3 = vld [vmem:[%s1215_s1 + $0x10] sm:$0xff]   ;;  %s1219_s18 = smov (!%p163_p3, %s798_s18), 63 }
   0xc   : > { %979 = vmatprep.subr.msk.bf16.mxu0 %vm379_vm0, %v989_v0  ;;  %980 = vmatprep.subr.msk.bf16.mxu1 %vm379_vm0, %v989_v0  ;;  %v381_v2 = vsel %vm379_vm0, %v989_v0, 0  ;;  %v992_v4 = vld [vmem:[%s1215_s1 + $0x8] sm:$0xff]   ;;  %s799_s23 = sshll.u32 %s1219_s18, 2  ;;  %vm330_vm1 = vcmask 588800   ;;  %v993_v7 = vld [vmem:[%s1215_s1] sm:$0xff]   ;;  %vm704_vm2 = vcmask 125952  }
   0xd   : > { %928 = vmatpush3.bf16.msra.mxu0 %v381_v2  ;;  %974 = vmatpush3.bf16.msra.mxu1 %v381_v2  ;;  %s1066_s26 = scalar_lea.vmem %s1214_s0, %s799_s23  ;;  %v1106_v22 = vld [vmem:[%s1216_s2] ss:$0 sm:$0xff]  ;;  %s1117_s6 = scalar_lea.vmem %s1217_s3, %s799_s23 }
   0xe   : > { %929 = vmatprep.subr.bf16.mxu0 %v990_v1  ;;  %970 = vmatprep.subr.bf16.mxu1 %v990_v1  ;;  %v994_v5 = vld [vmem:[%s1066_s26] sm:$0xff]   ;;  %v996_v8 = vld [vmem:[%s1066_s26 + $0x8] sm:$0xff]   ;;  %v998_v10 = vld [vmem:[%s1066_s26 + $0x10] sm:$0xff]  }
   0xf   : > { %v995_v6 = vld [vmem:[%s1066_s26 + $0x40] sm:$0xff]   ;;  %937 = vmatprep.mubr.msk.bf16.mxu0 %vm330_vm1, %v994_v5  ;;  %v997_v9 = vld [vmem:[%s1066_s26 + $0x48] sm:$0xff]   ;;  %v999_v11 = vld [vmem:[%s1066_s26 + $0x50] sm:$0xff]  }
  0x10   : > { %953 = vmatprep.mubr.msk.bf16.mxu1 %vm330_vm1, %v995_v6  ;;  %v1000_v12 = vld [vmem:[%s1066_s26 + $0x18] sm:$0xff]   ;;  %v1002_v14 = vld [vmem:[%s1066_s26 + $0x20] sm:$0xff]   ;;  %v1004_v16 = vld [vmem:[%s1066_s26 + $0x28] sm:$0xff]  }
  0x11   : > { %930 = vmatpush3.bf16.msra.mxu0 %v990_v1  ;;  %975 = vmatpush3.bf16.msra.mxu1 %v990_v1  ;;  %v1001_v13 = vld [vmem:[%s1066_s26 + $0x58] sm:$0xff]   ;;  %v1003_v15 = vld [vmem:[%s1066_s26 + $0x60] sm:$0xff]   ;;  %v1005_v17 = vld [vmem:[%s1066_s26 + $0x68] sm:$0xff]  }
  0x12   : > { %931 = vmatprep.subr.bf16.mxu0 %v991_v3  ;;  %971 = vmatprep.subr.bf16.mxu1 %v991_v3  ;;  %v1006_v18 = vld [vmem:[%s1066_s26 + $0x30] sm:$0xff]   ;;  %v1008_v20 = vld [vmem:[%s1066_s26 + $0x38] sm:$0xff]  }
  0x13   : > { %v1007_v19 = vld [vmem:[%s1066_s26 + $0x70] sm:$0xff]   ;;  %v1009_v21 = vld [vmem:[%s1066_s26 + $0x78] sm:$0xff]  }
  0x15   : > { %932 = vmatpush3.bf16.msra.mxu0 %v991_v3  ;;  %976 = vmatpush3.bf16.msra.mxu1 %v991_v3 }
  0x16   : > { %933 = vmatprep.subr.bf16.mxu0 %v992_v4  ;;  %972 = vmatprep.subr.bf16.mxu1 %v992_v4 }
  0x19   : > { %934 = vmatpush3.bf16.msra.mxu0 %v992_v4  ;;  %977 = vmatpush3.bf16.msra.mxu1 %v992_v4 }
  0x1a   : > { %935 = vmatprep.subr.bf16.mxu0 %v993_v7  ;;  %973 = vmatprep.subr.bf16.mxu1 %v993_v7 }
  0x1d   : > { %936 = vmatpush3.bf16.msra.mxu0 %v993_v7  ;;  %978 = vmatpush3.bf16.msra.mxu1 %v993_v7 }
  0x20   : > { %938 = vmatmul.mubr.msk.bf16.vlgmr.msra.gmra.mxu0 %vm330_vm1, %v996_v8  ;;  %954 = vmatmul.mubr.msk.bf16.vlgmr.msra.gmra.mxu1 %vm330_vm1, %v997_v9 }
  0x21   : > { %941 = vmatprep.mubr.msk.bf16.mxu0 %vm330_vm1, %v998_v10  ;;  %957 = vmatprep.mubr.msk.bf16.mxu1 %vm330_vm1, %v999_v11 }
  0x28   : > { %942 = vmatmul.mubr.msk.bf16.gmra.mxu0 %vm330_vm1, %v1000_v12  ;;  %958 = vmatmul.mubr.msk.bf16.gmra.mxu1 %vm330_vm1, %v1001_v13 }
  0x29   : > { %945 = vmatprep.mubr.msk.bf16.mxu0 %vm330_vm1, %v1002_v14  ;;  %961 = vmatprep.mubr.msk.bf16.mxu1 %vm330_vm1, %v1003_v15 }
  0x30   : > { %946 = vmatmul.mubr.msk.bf16.gmra.mxu0 %vm330_vm1, %v1004_v16  ;;  %962 = vmatmul.mubr.msk.bf16.gmra.mxu1 %vm330_vm1, %v1005_v17 }
  0x31   : > { %949 = vmatprep.mubr.msk.bf16.mxu0 %vm330_vm1, %v1006_v18  ;;  %965 = vmatprep.mubr.msk.bf16.mxu1 %vm330_vm1, %v1007_v19 }
  0x38   : > { %950 = vmatmul.mubr.msk.bf16.gmra.mxu0 %vm330_vm1, %v1008_v20  ;;  %966 = vmatmul.mubr.msk.bf16.gmra.mxu1 %vm330_vm1, %v1009_v21 }
  0xe0   : > { %v939_v23 = vpop.f32.mrf.mxu0  ;;  %v955_v24 = vpop.f32.mrf.mxu1 }
  0xe1   : > { %v426_v25 = vadd.f32 %v939_v23, %v1106_v22  ;;  %v490_v26 = vadd.f32 %v955_v24, %v1106_v22 }
  0xe2   : > { %v417_v27 = vpop.f32.mrf.mxu0  ;;  %v481_v28 = vpop.f32.mrf.mxu1 }
  0xe3   : > { %v546_v29 = vmax.f32 %v426_v25, 0.0  ;;  %v562_v30 = vmax.f32 %v490_v26, 0.0  ;;  %v418_v31 = vadd.f32 %v1106_v22, %v417_v27  ;;  %v482_v32 = vadd.f32 %v1106_v22, %v481_v28 }
  0xe4   : > { %v940_v33 = vpop.f32.mrf.mxu0  ;;  %v956_v34 = vpop.f32.mrf.mxu1 }
  0xe5   : > { %v876_v35 = vpack.c.bf16 %v546_v29, %v546_v29  ;;  %v892_v36 = vpack.c.bf16 %v562_v30, %v562_v30  ;;  %v544_v37 = vmax.f32 %v418_v31, 0.0  ;;  %v560_v38 = vmax.f32 %v482_v32, 0.0 }
  0xe6   : > { %v429_v39 = vadd.f32 %v940_v33, %v1106_v22  ;;  %v493_v40 = vadd.f32 %v956_v34, %v1106_v22  ;;  %v420_v41 = vpop.f32.mrf.mxu0  ;;  %v484_v42 = vpop.f32.mrf.mxu1 }
  0xe7   : > { %707 = vst.msk [vmem:[%s1117_s6 + $0x8] sm:$0xf] %vm704_vm2, %v876_v35  ;;  %723 = vst.msk [vmem:[%s1117_s6 + $0x48] sm:$0xf] %vm704_vm2, %v892_v36  ;;  %v874_v43 = vpack.c.bf16 %v544_v37, %v544_v37  ;;  %v890_v44 = vpack.c.bf16 %v560_v38, %v560_v38  ;;  %v421_v45 = vadd.f32 %v1106_v22, %v420_v41 }
  0xe8   : > { %v485_v46 = vadd.f32 %v1106_v22, %v484_v42  ;;  %v547_v47 = vmax.f32 %v429_v39, 0.0  ;;  %v563_v48 = vmax.f32 %v493_v40, 0.0  ;;  %v943_v49 = vpop.f32.mrf.mxu0  ;;  %v959_v50 = vpop.f32.mrf.mxu1 }
  0xe9   : > { %705 = vst.msk [vmem:[%s1117_s6] sm:$0xf] %vm704_vm2, %v874_v43  ;;  %721 = vst.msk [vmem:[%s1117_s6 + $0x40] sm:$0xf] %vm704_vm2, %v890_v44  ;;  %v545_v51 = vmax.f32 %v421_v45, 0.0  ;;  %v442_v53 = vadd.f32 %v943_v49, %v1106_v22  ;;  %v506_v54 = vadd.f32 %v959_v50, %v1106_v22 }
  0xea   : > { %v561_v52 = vmax.f32 %v485_v46, 0.0  ;;  %v877_v55 = vpack.c.bf16 %v547_v47, %v547_v47  ;;  %v893_v56 = vpack.c.bf16 %v563_v48, %v563_v48  ;;  %v433_v57 = vpop.f32.mrf.mxu0  ;;  %v497_v58 = vpop.f32.mrf.mxu1 }
  0xeb   : > { %v875_v59 = vpack.c.bf16 %v545_v51, %v545_v51  ;;  %v550_v61 = vmax.f32 %v442_v53, 0.0  ;;  %v566_v62 = vmax.f32 %v506_v54, 0.0  ;;  %v434_v63 = vadd.f32 %v1106_v22, %v433_v57 }
  0xec   : > { %v891_v60 = vpack.c.bf16 %v561_v52, %v561_v52  ;;  %708 = vst.msk [vmem:[%s1117_s6 + $0xc] sm:$0xf] %vm704_vm2, %v877_v55  ;;  %724 = vst.msk [vmem:[%s1117_s6 + $0x4c] sm:$0xf] %vm704_vm2, %v893_v56  ;;  %v498_v0 = vadd.f32 %v1106_v22, %v497_v58  ;;  %v944_v1 = vpop.f32.mrf.mxu0  ;;  %v960_v2 = vpop.f32.mrf.mxu1 }
  0xed   : > { %706 = vst.msk [vmem:[%s1117_s6 + $0x4] sm:$0xf] %vm704_vm2, %v875_v59  ;;  %v880_v3 = vpack.c.bf16 %v550_v61, %v550_v61  ;;  %v896_v4 = vpack.c.bf16 %v566_v62, %v566_v62  ;;  %v445_v5 = vadd.f32 %v944_v1, %v1106_v22  ;;  %v509_v6 = vadd.f32 %v960_v2, %v1106_v22 }
  0xee   : > { %722 = vst.msk [vmem:[%s1117_s6 + $0x44] sm:$0xf] %vm704_vm2, %v891_v60  ;;  %v548_v7 = vmax.f32 %v434_v63, 0.0  ;;  %v564_v8 = vmax.f32 %v498_v0, 0.0  ;;  %v436_v9 = vpop.f32.mrf.mxu0  ;;  %v500_v10 = vpop.f32.mrf.mxu1 }
  0xef   : > { %711 = vst.msk [vmem:[%s1117_s6 + $0x18] sm:$0xf] %vm704_vm2, %v880_v3  ;;  %727 = vst.msk [vmem:[%s1117_s6 + $0x58] sm:$0xf] %vm704_vm2, %v896_v4  ;;  %v551_v11 = vmax.f32 %v445_v5, 0.0  ;;  %v567_v12 = vmax.f32 %v509_v6, 0.0  ;;  %v437_v13 = vadd.f32 %v1106_v22, %v436_v9  ;;  %v501_v14 = vadd.f32 %v1106_v22, %v500_v10 }
  0xf0   : > { %v878_v15 = vpack.c.bf16 %v548_v7, %v548_v7  ;;  %v894_v16 = vpack.c.bf16 %v564_v8, %v564_v8  ;;  %v947_v17 = vpop.f32.mrf.mxu0  ;;  %v963_v18 = vpop.f32.mrf.mxu1 }
  0xf1   : > { %v881_v19 = vpack.c.bf16 %v551_v11, %v551_v11  ;;  %v897_v20 = vpack.c.bf16 %v567_v12, %v567_v12  ;;  %v549_v21 = vmax.f32 %v437_v13, 0.0  ;;  %v565_v23 = vmax.f32 %v501_v14, 0.0 }
  0xf2   : > { %709 = vst.msk [vmem:[%s1117_s6 + $0x10] sm:$0xf] %vm704_vm2, %v878_v15  ;;  %725 = vst.msk [vmem:[%s1117_s6 + $0x50] sm:$0xf] %vm704_vm2, %v894_v16  ;;  %v458_v24 = vadd.f32 %v947_v17, %v1106_v22  ;;  %v522_v25 = vadd.f32 %v963_v18, %v1106_v22  ;;  %v449_v26 = vpop.f32.mrf.mxu0  ;;  %v513_v27 = vpop.f32.mrf.mxu1 }
  0xf3   : > { %712 = vst.msk [vmem:[%s1117_s6 + $0x1c] sm:$0xf] %vm704_vm2, %v881_v19  ;;  %728 = vst.msk [vmem:[%s1117_s6 + $0x5c] sm:$0xf] %vm704_vm2, %v897_v20  ;;  %v879_v28 = vpack.c.bf16 %v549_v21, %v549_v21  ;;  %v895_v29 = vpack.c.bf16 %v565_v23, %v565_v23  ;;  %v450_v30 = vadd.f32 %v1106_v22, %v449_v26 }
  0xf4   : > { %v514_v31 = vadd.f32 %v1106_v22, %v513_v27  ;;  %v554_v32 = vmax.f32 %v458_v24, 0.0  ;;  %v570_v33 = vmax.f32 %v522_v25, 0.0  ;;  %v948_v34 = vpop.f32.mrf.mxu0  ;;  %v964_v35 = vpop.f32.mrf.mxu1 }
  0xf5   : > { %710 = vst.msk [vmem:[%s1117_s6 + $0x14] sm:$0xf] %vm704_vm2, %v879_v28  ;;  %726 = vst.msk [vmem:[%s1117_s6 + $0x54] sm:$0xf] %vm704_vm2, %v895_v29  ;;  %v552_v36 = vmax.f32 %v450_v30, 0.0  ;;  %v461_v38 = vadd.f32 %v948_v34, %v1106_v22  ;;  %v525_v39 = vadd.f32 %v964_v35, %v1106_v22 }
  0xf6   : > { %v568_v37 = vmax.f32 %v514_v31, 0.0  ;;  %v884_v40 = vpack.c.bf16 %v554_v32, %v554_v32  ;;  %v900_v41 = vpack.c.bf16 %v570_v33, %v570_v33  ;;  %v452_v42 = vpop.f32.mrf.mxu0  ;;  %v516_v43 = vpop.f32.mrf.mxu1 }
  0xf7   : > { %v882_v44 = vpack.c.bf16 %v552_v36, %v552_v36  ;;  %v555_v46 = vmax.f32 %v461_v38, 0.0  ;;  %v571_v47 = vmax.f32 %v525_v39, 0.0  ;;  %v453_v48 = vadd.f32 %v1106_v22, %v452_v42 }
  0xf8   : > { %v898_v45 = vpack.c.bf16 %v568_v37, %v568_v37  ;;  %715 = vst.msk [vmem:[%s1117_s6 + $0x28] sm:$0xf] %vm704_vm2, %v884_v40  ;;  %731 = vst.msk [vmem:[%s1117_s6 + $0x68] sm:$0xf] %vm704_vm2, %v900_v41  ;;  %v517_v49 = vadd.f32 %v1106_v22, %v516_v43  ;;  %v951_v50 = vpop.f32.mrf.mxu0  ;;  %v967_v51 = vpop.f32.mrf.mxu1 }
  0xf9   : > { %713 = vst.msk [vmem:[%s1117_s6 + $0x20] sm:$0xf] %vm704_vm2, %v882_v44  ;;  %v885_v52 = vpack.c.bf16 %v555_v46, %v555_v46  ;;  %v901_v53 = vpack.c.bf16 %v571_v47, %v571_v47  ;;  %v474_v54 = vadd.f32 %v951_v50, %v1106_v22  ;;  %v538_v55 = vadd.f32 %v967_v51, %v1106_v22 }
  0xfa   : > { %729 = vst.msk [vmem:[%s1117_s6 + $0x60] sm:$0xf] %vm704_vm2, %v898_v45  ;;  %v553_v56 = vmax.f32 %v453_v48, 0.0  ;;  %v569_v57 = vmax.f32 %v517_v49, 0.0  ;;  %v465_v58 = vpop.f32.mrf.mxu0  ;;  %v529_v59 = vpop.f32.mrf.mxu1 }
  0xfb   : > { %716 = vst.msk [vmem:[%s1117_s6 + $0x2c] sm:$0xf] %vm704_vm2, %v885_v52  ;;  %732 = vst.msk [vmem:[%s1117_s6 + $0x6c] sm:$0xf] %vm704_vm2, %v901_v53  ;;  %v558_v60 = vmax.f32 %v474_v54, 0.0  ;;  %v574_v61 = vmax.f32 %v538_v55, 0.0  ;;  %v466_v62 = vadd.f32 %v1106_v22, %v465_v58  ;;  %v530_v63 = vadd.f32 %v1106_v22, %v529_v59 }
  0xfc   : > { %v883_v0 = vpack.c.bf16 %v553_v56, %v553_v56  ;;  %v899_v1 = vpack.c.bf16 %v569_v57, %v569_v57  ;;  %v952_v2 = vpop.f32.mrf.mxu0  ;;  %v968_v3 = vpop.f32.mrf.mxu1 }
  0xfd   : > { %v888_v4 = vpack.c.bf16 %v558_v60, %v558_v60  ;;  %v904_v5 = vpack.c.bf16 %v574_v61, %v574_v61  ;;  %v556_v6 = vmax.f32 %v466_v62, 0.0  ;;  %v572_v7 = vmax.f32 %v530_v63, 0.0 }
  0xfe   : > { %714 = vst.msk [vmem:[%s1117_s6 + $0x24] sm:$0xf] %vm704_vm2, %v883_v0  ;;  %730 = vst.msk [vmem:[%s1117_s6 + $0x64] sm:$0xf] %vm704_vm2, %v899_v1  ;;  %v477_v8 = vadd.f32 %v952_v2, %v1106_v22  ;;  %v541_v9 = vadd.f32 %v968_v3, %v1106_v22  ;;  %v468_v10 = vpop.f32.mrf.mxu0  ;;  %v532_v11 = vpop.f32.mrf.mxu1 }
  0xff   : > { %719 = vst.msk [vmem:[%s1117_s6 + $0x38] sm:$0xf] %vm704_vm2, %v888_v4  ;;  %735 = vst.msk [vmem:[%s1117_s6 + $0x78] sm:$0xf] %vm704_vm2, %v904_v5  ;;  %v886_v12 = vpack.c.bf16 %v556_v6, %v556_v6  ;;  %v902_v13 = vpack.c.bf16 %v572_v7, %v572_v7  ;;  %v469_v14 = vadd.f32 %v1106_v22, %v468_v10 }
 0x100   : > { %v533_v15 = vadd.f32 %v1106_v22, %v532_v11  ;;  %v559_v16 = vmax.f32 %v477_v8, 0.0  ;;  %v575_v17 = vmax.f32 %v541_v9, 0.0 }
 0x101   : > { %717 = vst.msk [vmem:[%s1117_s6 + $0x30] sm:$0xf] %vm704_vm2, %v886_v12  ;;  %733 = vst.msk [vmem:[%s1117_s6 + $0x70] sm:$0xf] %vm704_vm2, %v902_v13  ;;  %v557_v18 = vmax.f32 %v469_v14, 0.0 }
 0x102   : > { %v573_v19 = vmax.f32 %v533_v15, 0.0  ;;  %v889_v20 = vpack.c.bf16 %v559_v16, %v559_v16  ;;  %v905_v21 = vpack.c.bf16 %v575_v17, %v575_v17 }
 0x103   : > { %v887_v23 = vpack.c.bf16 %v557_v18, %v557_v18 }
 0x104   : > { %v903_v24 = vpack.c.bf16 %v573_v19, %v573_v19  ;;  %720 = vst.msk [vmem:[%s1117_s6 + $0x3c] sm:$0xf] %vm704_vm2, %v889_v20  ;;  %736 = vst.msk [vmem:[%s1117_s6 + $0x7c] sm:$0xf] %vm704_vm2, %v905_v21 }
 0x105   : > { %718 = vst.msk [vmem:[%s1117_s6 + $0x34] sm:$0xf] %vm704_vm2, %v887_v23 }
 0x106   : > { %734 = vst.msk [vmem:[%s1117_s6 + $0x74] sm:$0xf] %vm704_vm2, %v903_v24 }
 0x107 PF: > { %s13_s12 = sadd.s32 1, %s1016_s12  }
 0x108   : > { %p10_p4 = scmp.ge.s32.totalorder %s13_s12, 4  }
 0x10a   :  { %12 = sbr.rel (!%p10_p4) target bundleno = 1 (0x1), region = 62 }

// kernel: _lambda_.6
= control target key start
LH: loop header
LB: loop body
LE: loop exit
PB: predicated region body
PF: predicated region fallthrough
CT: control target
= control target key end

     0   :  { %v523_v0 = vmov 0   ;;  %vm182_vm0 = vcmask 130048   ;;  %vm384_vm1 = vcmask 257024   ;;  %s712_s1 = inlined_call_operand.vmem [shape: bf16[144,32], index: 1, kind: input, shape index: {}]   ;;  %s713_s0 = inlined_call_operand.vmem [shape: bf16[128,144], index: 0, kind: input, shape index: {}]   ;;  %s714_s2 = inlined_call_operand.vmem [shape: f32[1,32], index: 2, kind: input, shape index: {}]   ;;  %s715_s3 = inlined_call_operand.vmem [shape: bf16[128,32], index: 3, kind: output, shape index: {}]  }
   0x1   :  { %207 = vmatprep.subr.bf16.mxu0 %v523_v0  ;;  %471 = vmatprep.subr.bf16.mxu1 %v523_v0  ;;  %v490_v1 = vld [vmem:[%s712_s1 + $0x38] sm:$0xff]   ;;  %v491_v2 = vld [vmem:[%s712_s1 + $0x30] sm:$0xff]   ;;  %v492_v3 = vld [vmem:[%s712_s1 + $0x28] sm:$0xff]  }
   0x2   :  { %208 = vmatpush1.bf16.msra.mxu0 %v490_v1  ;;  %480 = vmatpush1.bf16.msra.mxu1 %v490_v1  ;;  %v493_v4 = vld [vmem:[%s712_s1 + $0x20] sm:$0xff]   ;;  %v494_v7 = vld [vmem:[%s712_s1 + $0x18] sm:$0xff]   ;;  %v495_v8 = vld [vmem:[%s712_s1 + $0x10] sm:$0xff]  }
   0x3   :  { %209 = vmatprep.subr.bf16.mxu0 %v523_v0  ;;  %472 = vmatprep.subr.bf16.mxu1 %v523_v0  ;;  %v501_v5 = vld [vmem:[%s713_s0 + $0x4] ss:$8 sps:$4 sm:$0xff]   ;;  %v499_v12 = vld [vmem:[%s713_s0] ss:$8 sps:$4 sm:$0xff]   ;;  %v505_v14 = vld [vmem:[%s713_s0 + $0x14] ss:$8 sps:$4 sm:$0xff]  }
   0x4   :  { %v504_v6 = vld [vmem:[%s713_s0 + $0x44] ss:$8 sps:$4 sm:$0xff]   ;;  %431 = vmatprep.mubr.msk.bf16.mxu0 %vm182_vm0, %v501_v5  ;;  %v502_v13 = vld [vmem:[%s713_s0 + $0x40] ss:$8 sps:$4 sm:$0xff]   ;;  %v507_v15 = vld [vmem:[%s713_s0 + $0x54] ss:$8 sps:$4 sm:$0xff]  }
   0x5   :  { %435 = vmatprep.mubr.msk.bf16.mxu1 %vm182_vm0, %v504_v6  ;;  %v496_v9 = vld [vmem:[%s712_s1 + $0x8] sm:$0xff]   ;;  %v497_v10 = vld [vmem:[%s712_s1] sm:$0xff]   ;;  %v509_v16 = vld [vmem:[%s713_s0 + $0x10] ss:$8 sps:$4 sm:$0xff]  }
   0x6   :  { %210 = vmatpush1.bf16.msra.mxu0 %v491_v2  ;;  %481 = vmatpush1.bf16.msra.mxu1 %v491_v2  ;;  %v498_v11 = vld [vmem:[%s712_s1 + $0x40] sm:$0xff]   ;;  %v510_v17 = vld [vmem:[%s713_s0 + $0x50] ss:$8 sps:$4 sm:$0xff]   ;;  %v517_v22 = vld [vmem:[%s713_s0 + $0x34] ss:$8 sps:$4 sm:$0xff]  }
   0x7   :  { %211 = vmatprep.subr.bf16.mxu0 %v523_v0  ;;  %473 = vmatprep.subr.bf16.mxu1 %v523_v0  ;;  %v511_v18 = vld [vmem:[%s713_s0 + $0x24] ss:$8 sps:$4 sm:$0xff]   ;;  %v515_v20 = vld [vmem:[%s713_s0 + $0x20] ss:$8 sps:$4 sm:$0xff]   ;;  %v519_v23 = vld [vmem:[%s713_s0 + $0x74] ss:$8 sps:$4 sm:$0xff]  }
   0x8   :  { %v513_v19 = vld [vmem:[%s713_s0 + $0x64] ss:$8 sps:$4 sm:$0xff]   ;;  %v516_v21 = vld [vmem:[%s713_s0 + $0x60] ss:$8 sps:$4 sm:$0xff]   ;;  %v521_v24 = vld [vmem:[%s713_s0 + $0x30] ss:$8 sps:$4 sm:$0xff]  }
   0x9   :  { %v522_v25 = vld [vmem:[%s713_s0 + $0x70] ss:$8 sps:$4 sm:$0xff]   ;;  %v630_v26 = vld [vmem:[%s714_s2] ss:$0 sm:$0xff] }
   0xa   :  { %212 = vmatpush1.bf16.msra.mxu0 %v492_v3  ;;  %482 = vmatpush1.bf16.msra.mxu1 %v492_v3 }
   0xb   :  { %213 = vmatprep.subr.bf16.mxu0 %v523_v0  ;;  %474 = vmatprep.subr.bf16.mxu1 %v523_v0 }
   0xe   :  { %214 = vmatpush1.bf16.msra.mxu0 %v493_v4  ;;  %483 = vmatpush1.bf16.msra.mxu1 %v493_v4 }
   0xf   :  { %215 = vmatprep.subr.bf16.mxu0 %v523_v0  ;;  %475 = vmatprep.subr.bf16.mxu1 %v523_v0 }
  0x12   :  { %216 = vmatpush1.bf16.msra.mxu0 %v494_v7  ;;  %484 = vmatpush1.bf16.msra.mxu1 %v494_v7 }
  0x13   :  { %217 = vmatprep.subr.bf16.mxu0 %v523_v0  ;;  %476 = vmatprep.subr.bf16.mxu1 %v523_v0 }
  0x16   :  { %218 = vmatpush1.bf16.msra.mxu0 %v495_v8  ;;  %485 = vmatpush1.bf16.msra.mxu1 %v495_v8 }
  0x17   :  { %219 = vmatprep.subr.bf16.mxu0 %v523_v0  ;;  %477 = vmatprep.subr.bf16.mxu1 %v523_v0 }
  0x1a   :  { %220 = vmatpush1.bf16.msra.mxu0 %v496_v9  ;;  %486 = vmatpush1.bf16.msra.mxu1 %v496_v9 }
  0x1b   :  { %221 = vmatprep.subr.bf16.mxu0 %v523_v0  ;;  %478 = vmatprep.subr.bf16.mxu1 %v523_v0 }
  0x1e   :  { %222 = vmatpush1.bf16.msra.mxu0 %v497_v10  ;;  %487 = vmatpush1.bf16.msra.mxu1 %v497_v10 }
  0x1f   :  { %237 = vmatprep.subr.bf16.mxu0 %v523_v0  ;;  %479 = vmatprep.subr.bf16.mxu1 %v523_v0 }
  0x22   :  { %238 = vmatpush2.bf16.msra.mxu0 %v498_v11  ;;  %488 = vmatpush2.bf16.msra.mxu1 %v498_v11 }
  0x25   :  { %240 = vmatmul.mubr.bf16.vlgmr.msra.gmra.mxu0 %v499_v12  ;;  %272 = vmatmul.mubr.bf16.vlgmr.msra.gmra.mxu1 %v502_v13 }
  0x26   :  { %432 = vmatprep.mubr.msk.bf16.mxu0 %vm182_vm0, %v505_v14  ;;  %436 = vmatprep.mubr.msk.bf16.mxu1 %vm182_vm0, %v507_v15 }
  0x2d   :  { %248 = vmatmul.mubr.bf16.gmra.mxu0 %v509_v16  ;;  %280 = vmatmul.mubr.bf16.gmra.mxu1 %v510_v17 }
  0x2e   :  { %433 = vmatprep.mubr.msk.bf16.mxu0 %vm182_vm0, %v511_v18  ;;  %437 = vmatprep.mubr.msk.bf16.mxu1 %vm182_vm0, %v513_v19 }
  0x35   :  { %256 = vmatmul.mubr.bf16.gmra.mxu0 %v515_v20  ;;  %288 = vmatmul.mubr.bf16.gmra.mxu1 %v516_v21 }
  0x36   :  { %434 = vmatprep.mubr.msk.bf16.mxu0 %vm182_vm0, %v517_v22  ;;  %438 = vmatprep.mubr.msk.bf16.mxu1 %vm182_vm0, %v519_v23 }
  0x3d   :  { %264 = vmatmul.mubr.bf16.gmra.mxu0 %v521_v24  ;;  %296 = vmatmul.mubr.bf16.gmra.mxu1 %v522_v25 }
  0xe5   :  { %v241_v27 = vpop.f32.mrf.mxu0  ;;  %v273_v28 = vpop.f32.mrf.mxu1 }
  0xe6   :  { %v242_v29 = vadd.f32 %v630_v26, %v241_v27  ;;  %v274_v30 = vadd.f32 %v630_v26, %v273_v28 }
  0xe7   :  { %v243_v31 = vpop.f32.mrf.mxu0  ;;  %v275_v32 = vpop.f32.mrf.mxu1 }
  0xe8   :  { %v304_v33 = vmax.f32 %v242_v29, 0.0  ;;  %v312_v34 = vmax.f32 %v274_v30, 0.0 }
  0xe9   :  { %v244_v35 = vpop.f32.mrf.mxu0  ;;  %v276_v36 = vpop.f32.mrf.mxu1 }
  0xea   :  { %v455_v37 = vpack.c.bf16 %v304_v33, %v304_v33  ;;  %v463_v38 = vpack.c.bf16 %v312_v34, %v312_v34  ;;  %v245_v39 = vadd.f32 %v630_v26, %v244_v35  ;;  %v277_v40 = vadd.f32 %v630_v26, %v276_v36 }
  0xeb   :  { %v246_v41 = vpop.f32.mrf.mxu0  ;;  %v278_v42 = vpop.f32.mrf.mxu1 }
  0xec   :  { %385 = vst.msk [vmem:[%s715_s3] sm:$0xf] %vm384_vm1, %v455_v37  ;;  %393 = vst.msk [vmem:[%s715_s3 + $0x20] sm:$0xf] %vm384_vm1, %v463_v38  ;;  %v305_v43 = vmax.f32 %v245_v39, 0.0  ;;  %v313_v44 = vmax.f32 %v277_v40, 0.0 }
  0xed   :  { %v249_v45 = vpop.f32.mrf.mxu0  ;;  %v281_v46 = vpop.f32.mrf.mxu1 }
  0xee   :  { %v456_v47 = vpack.c.bf16 %v305_v43, %v305_v43  ;;  %v464_v48 = vpack.c.bf16 %v313_v44, %v313_v44  ;;  %v250_v49 = vadd.f32 %v630_v26, %v249_v45  ;;  %v282_v50 = vadd.f32 %v630_v26, %v281_v46 }
  0xef   :  { %v251_v51 = vpop.f32.mrf.mxu0  ;;  %v283_v52 = vpop.f32.mrf.mxu1 }
  0xf0   :  { %386 = vst.msk [vmem:[%s715_s3 + $0x4] sm:$0xf] %vm384_vm1, %v456_v47  ;;  %394 = vst.msk [vmem:[%s715_s3 + $0x24] sm:$0xf] %vm384_vm1, %v464_v48  ;;  %v306_v53 = vmax.f32 %v250_v49, 0.0  ;;  %v314_v54 = vmax.f32 %v282_v50, 0.0 }
  0xf1   :  { %v252_v55 = vpop.f32.mrf.mxu0  ;;  %v284_v56 = vpop.f32.mrf.mxu1 }
  0xf2   :  { %v457_v57 = vpack.c.bf16 %v306_v53, %v306_v53  ;;  %v465_v58 = vpack.c.bf16 %v314_v54, %v314_v54  ;;  %v253_v59 = vadd.f32 %v630_v26, %v252_v55  ;;  %v285_v60 = vadd.f32 %v630_v26, %v284_v56 }
  0xf3   :  { %v254_v61 = vpop.f32.mrf.mxu0  ;;  %v286_v62 = vpop.f32.mrf.mxu1 }
  0xf4   :  { %387 = vst.msk [vmem:[%s715_s3 + $0x8] sm:$0xf] %vm384_vm1, %v457_v57  ;;  %395 = vst.msk [vmem:[%s715_s3 + $0x28] sm:$0xf] %vm384_vm1, %v465_v58  ;;  %v307_v63 = vmax.f32 %v253_v59, 0.0  ;;  %v315_v0 = vmax.f32 %v285_v60, 0.0 }
  0xf5   :  { %v257_v1 = vpop.f32.mrf.mxu0  ;;  %v289_v2 = vpop.f32.mrf.mxu1 }
  0xf6   :  { %v458_v3 = vpack.c.bf16 %v307_v63, %v307_v63  ;;  %v466_v4 = vpack.c.bf16 %v315_v0, %v315_v0  ;;  %v258_v5 = vadd.f32 %v630_v26, %v257_v1  ;;  %v290_v6 = vadd.f32 %v630_v26, %v289_v2 }
  0xf7   :  { %v259_v7 = vpop.f32.mrf.mxu0  ;;  %v291_v8 = vpop.f32.mrf.mxu1 }
  0xf8   :  { %388 = vst.msk [vmem:[%s715_s3 + $0xc] sm:$0xf] %vm384_vm1, %v458_v3  ;;  %396 = vst.msk [vmem:[%s715_s3 + $0x2c] sm:$0xf] %vm384_vm1, %v466_v4  ;;  %v308_v9 = vmax.f32 %v258_v5, 0.0  ;;  %v316_v10 = vmax.f32 %v290_v6, 0.0 }
  0xf9   :  { %v260_v11 = vpop.f32.mrf.mxu0  ;;  %v292_v12 = vpop.f32.mrf.mxu1 }
  0xfa   :  { %v459_v13 = vpack.c.bf16 %v308_v9, %v308_v9  ;;  %v467_v14 = vpack.c.bf16 %v316_v10, %v316_v10  ;;  %v261_v15 = vadd.f32 %v630_v26, %v260_v11  ;;  %v293_v16 = vadd.f32 %v630_v26, %v292_v12 }
  0xfb   :  { %v262_v17 = vpop.f32.mrf.mxu0  ;;  %v294_v18 = vpop.f32.mrf.mxu1 }
  0xfc   :  { %389 = vst.msk [vmem:[%s715_s3 + $0x10] sm:$0xf] %vm384_vm1, %v459_v13  ;;  %397 = vst.msk [vmem:[%s715_s3 + $0x30] sm:$0xf] %vm384_vm1, %v467_v14  ;;  %v309_v19 = vmax.f32 %v261_v15, 0.0  ;;  %v317_v20 = vmax.f32 %v293_v16, 0.0 }
  0xfd   :  { %v265_v21 = vpop.f32.mrf.mxu0  ;;  %v297_v22 = vpop.f32.mrf.mxu1 }
  0xfe   :  { %v460_v23 = vpack.c.bf16 %v309_v19, %v309_v19  ;;  %v468_v24 = vpack.c.bf16 %v317_v20, %v317_v20  ;;  %v266_v25 = vadd.f32 %v630_v26, %v265_v21  ;;  %v298_v27 = vadd.f32 %v630_v26, %v297_v22 }
  0xff   :  { %v267_v28 = vpop.f32.mrf.mxu0  ;;  %v299_v29 = vpop.f32.mrf.mxu1 }
 0x100   :  { %390 = vst.msk [vmem:[%s715_s3 + $0x14] sm:$0xf] %vm384_vm1, %v460_v23  ;;  %398 = vst.msk [vmem:[%s715_s3 + $0x34] sm:$0xf] %vm384_vm1, %v468_v24  ;;  %v310_v30 = vmax.f32 %v266_v25, 0.0  ;;  %v318_v31 = vmax.f32 %v298_v27, 0.0 }
 0x101   :  { %v268_v32 = vpop.f32.mrf.mxu0  ;;  %v300_v33 = vpop.f32.mrf.mxu1 }
 0x102   :  { %v461_v34 = vpack.c.bf16 %v310_v30, %v310_v30  ;;  %v469_v35 = vpack.c.bf16 %v318_v31, %v318_v31  ;;  %v269_v36 = vadd.f32 %v630_v26, %v268_v32  ;;  %v301_v37 = vadd.f32 %v630_v26, %v300_v33 }
 0x103   :  { %v270_v38 = vpop.f32.mrf.mxu0  ;;  %v302_v39 = vpop.f32.mrf.mxu1 }
 0x104   :  { %391 = vst.msk [vmem:[%s715_s3 + $0x18] sm:$0xf] %vm384_vm1, %v461_v34  ;;  %399 = vst.msk [vmem:[%s715_s3 + $0x38] sm:$0xf] %vm384_vm1, %v469_v35  ;;  %v311_v40 = vmax.f32 %v269_v36, 0.0  ;;  %v319_v41 = vmax.f32 %v301_v37, 0.0 }
 0x106   :  { %v462_v42 = vpack.c.bf16 %v311_v40, %v311_v40  ;;  %v470_v43 = vpack.c.bf16 %v319_v41, %v319_v41 }
 0x108   :  { %392 = vst.msk [vmem:[%s715_s3 + $0x1c] sm:$0xf] %vm384_vm1, %v462_v42  ;;  %400 = vst.msk [vmem:[%s715_s3 + $0x3c] sm:$0xf] %vm384_vm1, %v470_v43 }

// kernel: _lambda_.7
= control target key start
LH: loop header
LB: loop body
LE: loop exit
PB: predicated region body
PF: predicated region fallthrough
CT: control target
= control target key end

     0   :  { %v1068_v32 = vlaneseq  ;;  %v10139_v33 = vmov 1966171168   ;;  %s13847_s0 = inlined_call_operand.vmem [shape: bf16[2,2048], index: 0, kind: input, shape index: {}]   ;;  %s13848_s1 = inlined_call_operand.vmem [shape: bf16[2048,1024], index: 1, kind: input, shape index: {}]   ;;  %s13849_s2 = inlined_call_operand.vmem [shape: f32[1,1024], index: 2, kind: input, shape index: {}]   ;;  %s13850_s3 = inlined_call_operand.vmem [shape: bf16[1024,128], index: 3, kind: input, shape index: {}]   ;;  %s13851_s4 = inlined_call_operand.vmem [shape: f32[1,128], index: 4, kind: input, shape index: {}]   ;;  %s13852_s5 = inlined_call_operand.vmem [shape: bf16[128,128], index: 5, kind: input, shape index: {}]   ;;  %s13853_s6 = inlined_call_operand.vmem [shape: f32[1,128], index: 6, kind: input, shape index: {}]   ;;  %s13854_s7 = inlined_call_operand.vmem [shape: bf16[128,128], index: 7, kind: input, shape index: {}]   ;;  %s13855_s8 = inlined_call_operand.vmem [shape: f32[1,128], index: 8, kind: input, shape index: {}]   ;;  %s13856_s9 = inlined_call_operand.vmem [shape: bf16[128,128], index: 9, kind: input, shape index: {}]   ;;  %s13857_s10 = inlined_call_operand.vmem [shape: f32[1,128], index: 10, kind: input, shape index: {}]   ;;  %s13858_s11 = inlined_call_operand.hbm [shape: f32[2,10], index: 11, kind: output, shape index: {}]  }
   0x1   :  { %v98_v0 = vld [vmem:[%s13848_s1 + $0x1c0] sm:$0xff]  ;;  %v1112_v34 = vunpack.c.l.s4 %v10139_v33 }
   0x2   :  { %v102_v1 = vld [vmem:[%s13848_s1 + $0x1e0] sm:$0xff]  ;;  %v10269_v43 = vshrl.u32 %v1068_v32, 7 }
   0x3   :  { %v226_v2 = vld [vmem:[%s13848_s1 + $0x5c0] sm:$0xff]  ;;  %v8782_v3 = vcombine.high %v98_v0, %v102_v1  ;;  %v8781_v5 = vcombine.low %v98_v0, %v102_v1  ;;  %v1113_v44 = vunpack.c.0.s8 %v1112_v34 }
   0x4   :  { %v230_v4 = vld [vmem:[%s13848_s1 + $0x5e0] sm:$0xff] }
   0x5   :  { %v90_v6 = vld [vmem:[%s13848_s1 + $0x180] sm:$0xff]  ;;  %v8910_v8 = vcombine.high %v226_v2, %v230_v4  ;;  %v8909_v9 = vcombine.low %v226_v2, %v230_v4  ;;  %6344 = vmatprep.subr.bf16.mxu0 %v8782_v3  ;;  %v10284_v53 = vsub.s32 %v1113_v44, %v10269_v43 }
   0x6   :  { %v94_v7 = vld [vmem:[%s13848_s1 + $0x1a0] sm:$0xff]  ;;  %6345 = vmatpush1.bf16.msra.mxu0 %v8781_v5 }
   0x7   :  { %v8774_v10 = vcombine.high %v90_v6, %v94_v7  ;;  %v218_v11 = vld [vmem:[%s13848_s1 + $0x580] sm:$0xff]  ;;  %6385 = vmatprep.subr.bf16.mxu1 %v8910_v8  ;;  %v8773_v18 = vcombine.low %v90_v6, %v94_v7 }
   0x8   :  { %v222_v12 = vld [vmem:[%s13848_s1 + $0x5a0] sm:$0xff]  ;;  %6386 = vmatpush1.bf16.msra.mxu1 %v8909_v9 }
   0x9   :  { %v82_v13 = vld [vmem:[%s13848_s1 + $0x140] sm:$0xff]  ;;  %v8902_v14 = vcombine.high %v218_v11, %v222_v12  ;;  %6346 = vmatprep.subr.bf16.mxu0 %v8774_v10  ;;  %v8901_v19 = vcombine.low %v218_v11, %v222_v12 }
   0xa   :  { %v86_v15 = vld [vmem:[%s13848_s1 + $0x160] sm:$0xff]  ;;  %6347 = vmatpush1.bf16.msra.mxu0 %v8773_v18 }
   0xb   :  { %v210_v16 = vld [vmem:[%s13848_s1 + $0x540] sm:$0xff]  ;;  %v8766_v20 = vcombine.high %v82_v13, %v86_v15  ;;  %6387 = vmatprep.subr.bf16.mxu1 %v8902_v14  ;;  %v8765_v26 = vcombine.low %v82_v13, %v86_v15 }
   0xc   :  { %v214_v17 = vld [vmem:[%s13848_s1 + $0x560] sm:$0xff]  ;;  %6388 = vmatpush1.bf16.msra.mxu1 %v8901_v19 }
   0xd   :  { %v8894_v21 = vcombine.high %v210_v16, %v214_v17  ;;  %v74_v22 = vld [vmem:[%s13848_s1 + $0x100] sm:$0xff]  ;;  %6348 = vmatprep.subr.bf16.mxu0 %v8766_v20  ;;  %v8893_v27 = vcombine.low %v210_v16, %v214_v17 }
   0xe   :  { %v78_v23 = vld [vmem:[%s13848_s1 + $0x120] sm:$0xff]  ;;  %6349 = vmatpush1.bf16.msra.mxu0 %v8765_v26 }
   0xf   :  { %v202_v24 = vld [vmem:[%s13848_s1 + $0x500] sm:$0xff]  ;;  %v8758_v28 = vcombine.high %v74_v22, %v78_v23  ;;  %6389 = vmatprep.subr.bf16.mxu1 %v8894_v21  ;;  %v8757_v37 = vcombine.low %v74_v22, %v78_v23 }
  0x10   :  { %v206_v25 = vld [vmem:[%s13848_s1 + $0x520] sm:$0xff]  ;;  %6390 = vmatpush1.bf16.msra.mxu1 %v8893_v27 }
  0x11   :  { %v8886_v29 = vcombine.high %v202_v24, %v206_v25  ;;  %v66_v30 = vld [vmem:[%s13848_s1 + $0xc0] sm:$0xff]  ;;  %6350 = vmatprep.subr.bf16.mxu0 %v8758_v28  ;;  %v8885_v38 = vcombine.low %v202_v24, %v206_v25 }
  0x12   :  { %v70_v31 = vld [vmem:[%s13848_s1 + $0xe0] sm:$0xff]  ;;  %6351 = vmatpush1.bf16.msra.mxu0 %v8757_v37 }
  0x13   :  { %v194_v35 = vld [vmem:[%s13848_s1 + $0x4c0] sm:$0xff]  ;;  %v8750_v39 = vcombine.high %v66_v30, %v70_v31  ;;  %6391 = vmatprep.subr.bf16.mxu1 %v8886_v29  ;;  %v8749_v47 = vcombine.low %v66_v30, %v70_v31 }
  0x14   :  { %v198_v36 = vld [vmem:[%s13848_s1 + $0x4e0] sm:$0xff]  ;;  %6392 = vmatpush1.bf16.msra.mxu1 %v8885_v38 }
  0x15   :  { %v8878_v40 = vcombine.high %v194_v35, %v198_v36  ;;  %v58_v41 = vld [vmem:[%s13848_s1 + $0x80] sm:$0xff]  ;;  %6352 = vmatprep.subr.bf16.mxu0 %v8750_v39  ;;  %v8877_v48 = vcombine.low %v194_v35, %v198_v36 }
  0x16   :  { %v62_v42 = vld [vmem:[%s13848_s1 + $0xa0] sm:$0xff]  ;;  %6353 = vmatpush1.bf16.msra.mxu0 %v8749_v47 }
  0x17   :  { %v186_v45 = vld [vmem:[%s13848_s1 + $0x480] sm:$0xff]  ;;  %v8742_v49 = vcombine.high %v58_v41, %v62_v42  ;;  %6393 = vmatprep.subr.bf16.mxu1 %v8878_v40  ;;  %v8741_v56 = vcombine.low %v58_v41, %v62_v42 }
  0x18   :  { %v190_v46 = vld [vmem:[%s13848_s1 + $0x4a0] sm:$0xff]  ;;  %6394 = vmatpush1.bf16.msra.mxu1 %v8877_v48 }
  0x19   :  { %v8870_v50 = vcombine.high %v186_v45, %v190_v46  ;;  %v50_v51 = vld [vmem:[%s13848_s1 + $0x40] sm:$0xff]  ;;  %6354 = vmatprep.subr.bf16.mxu0 %v8742_v49  ;;  %v8869_v57 = vcombine.low %v186_v45, %v190_v46 }
  0x1a   :  { %v54_v52 = vld [vmem:[%s13848_s1 + $0x60] sm:$0xff]  ;;  %6355 = vmatpush1.bf16.msra.mxu0 %v8741_v56 }
  0x1b   :  { %v178_v54 = vld [vmem:[%s13848_s1 + $0x440] sm:$0xff]  ;;  %v8734_v58 = vcombine.high %v50_v51, %v54_v52  ;;  %6395 = vmatprep.subr.bf16.mxu1 %v8870_v50  ;;  %v8733_v2 = vcombine.low %v50_v51, %v54_v52 }
  0x1c   :  { %v182_v55 = vld [vmem:[%s13848_s1 + $0x460] sm:$0xff]  ;;  %6396 = vmatpush1.bf16.msra.mxu1 %v8869_v57 }
  0x1d   :  { %v10295_v59 = vld [vmem:[%s13847_s0] sm:$0xff]  ;;  %v8862_v60 = vcombine.high %v178_v54, %v182_v55  ;;  %6356 = vmatprep.subr.bf16.mxu0 %v8734_v58  ;;  %v8861_v4 = vcombine.low %v178_v54, %v182_v55 }
  0x1e   :  { %v42_v61 = vld [vmem:[%s13848_s1] sm:$0xff]  ;;  %v10305_v63 = vrot.slane %v10295_v59, %v10284_v53  ;;  %6357 = vmatpush1.bf16.msra.mxu0 %v8733_v2 }
  0x1f   :  { %v46_v62 = vld [vmem:[%s13848_s1 + $0x20] sm:$0xff]  ;;  %6397 = vmatprep.subr.bf16.mxu1 %v8862_v60 }
  0x20   :  { %v170_v0 = vld [vmem:[%s13848_s1 + $0x400] sm:$0xff]  ;;  %v1125_v3 = vcombine.high %v10305_v63, %v10305_v63  ;;  %v8726_v5 = vcombine.high %v42_v61, %v46_v62  ;;  %v8725_v12 = vcombine.low %v42_v61, %v46_v62  ;;  %6398 = vmatpush1.bf16.msra.mxu1 %v8861_v4 }
  0x21   :  { %v174_v1 = vld [vmem:[%s13848_s1 + $0x420] sm:$0xff] }
  0x22   :  { %v8854_v6 = vcombine.high %v170_v0, %v174_v1  ;;  %v162_v7 = vld [vmem:[%s13848_s1 + $0x3c0] sm:$0xff]  ;;  %v10322_v9 = vrot.slane %v1125_v3, %v10284_v53  ;;  %6358 = vmatprep.subr.bf16.mxu0 %v8726_v5  ;;  %v8853_v14 = vcombine.low %v170_v0, %v174_v1  ;;  %v1110_v1 = vcombine.high %v10295_v59, %v10295_v59 }
  0x23   :  { %v166_v8 = vld [vmem:[%s13848_s1 + $0x3e0] sm:$0xff]  ;;  %6359 = vmatpush1.bf16.msra.mxu0 %v8725_v12 }
  0x24   :  { %v290_v10 = vld [vmem:[%s13848_s1 + $0x7c0] sm:$0xff]  ;;  %6376 = vmatprep.mubr.bf16.mxu0 %v10322_v9  ;;  %v10333_v13 = vcombine.high %v10322_v9, %v10322_v9  ;;  %v8846_v15 = vcombine.high %v162_v7, %v166_v8  ;;  %6399 = vmatprep.subr.bf16.mxu1 %v8854_v6  ;;  %v8845_v21 = vcombine.low %v162_v7, %v166_v8 }
  0x25   :  { %v294_v11 = vld [vmem:[%s13848_s1 + $0x7e0] sm:$0xff]  ;;  %6400 = vmatpush1.bf16.msra.mxu1 %v8853_v14 }
  0x26   :  { %v8974_v16 = vcombine.high %v290_v10, %v294_v11  ;;  %v154_v17 = vld [vmem:[%s13848_s1 + $0x380] sm:$0xff]  ;;  %6417 = vmatprep.mubr.bf16.mxu1 %v10333_v13  ;;  %6360 = vmatprep.subr.bf16.mxu0 %v8846_v15  ;;  %v8973_v22 = vcombine.low %v290_v10, %v294_v11  ;;  %v10423_v10 = vrot.slane %v1110_v1, %v10284_v53 }
  0x27   :  { %v158_v18 = vld [vmem:[%s13848_s1 + $0x3a0] sm:$0xff]  ;;  %6361 = vmatpush2.bf16.msra.mxu0 %v8845_v21 }
  0x28   :  { %v282_v19 = vld [vmem:[%s13848_s1 + $0x780] sm:$0xff]  ;;  %v8838_v23 = vcombine.high %v154_v17, %v158_v18  ;;  %6401 = vmatprep.subr.bf16.mxu1 %v8974_v16  ;;  %v8837_v29 = vcombine.low %v154_v17, %v158_v18 }
  0x29   :  { %v286_v20 = vld [vmem:[%s13848_s1 + $0x7a0] sm:$0xff]  ;;  %6402 = vmatpush2.bf16.msra.mxu1 %v8973_v22  ;;  %v10441_v22 = vrot.slane %v10305_v63, %v10284_v53 }
  0x2a   :  { %v8966_v24 = vcombine.high %v282_v19, %v286_v20  ;;  %v146_v25 = vld [vmem:[%s13848_s1 + $0x340] sm:$0xff]  ;;  %6362 = vmatprep.subr.bf16.mxu0 %v8838_v23  ;;  %v8965_v30 = vcombine.low %v282_v19, %v286_v20  ;;  %v1126_v20 = vcombine.high %v10423_v10, %v10423_v10 }
  0x2b   :  { %v150_v26 = vld [vmem:[%s13848_s1 + $0x360] sm:$0xff]  ;;  %6363 = vmatpush2.bf16.msra.mxu0 %v8837_v29 }
  0x2c   :  { %v274_v27 = vld [vmem:[%s13848_s1 + $0x740] sm:$0xff]  ;;  %v8830_v31 = vcombine.high %v146_v25, %v150_v26  ;;  %6403 = vmatprep.subr.bf16.mxu1 %v8966_v24  ;;  %v8829_v37 = vcombine.low %v146_v25, %v150_v26  ;;  %v10456_v29 = vrot.slane %v1126_v20, %v10284_v53 }
  0x2d   :  { %v278_v28 = vld [vmem:[%s13848_s1 + $0x760] sm:$0xff]  ;;  %6404 = vmatpush2.bf16.msra.mxu1 %v8965_v30  ;;  %v10460_v30 = vcombine.high %v10441_v22, %v10441_v22 }
  0x2e   :  { %v8958_v32 = vcombine.high %v274_v27, %v278_v28  ;;  %v138_v33 = vld [vmem:[%s13848_s1 + $0x300] sm:$0xff]  ;;  %6364 = vmatprep.subr.bf16.mxu0 %v8830_v31  ;;  %v8957_v38 = vcombine.low %v274_v27, %v278_v28 }
  0x2f   :  { %v142_v34 = vld [vmem:[%s13848_s1 + $0x320] sm:$0xff]  ;;  %6365 = vmatpush2.bf16.msra.mxu0 %v8829_v37 }
  0x30   :  { %v266_v35 = vld [vmem:[%s13848_s1 + $0x700] sm:$0xff]  ;;  %v8822_v39 = vcombine.high %v138_v33, %v142_v34  ;;  %6405 = vmatprep.subr.bf16.mxu1 %v8958_v32  ;;  %v8821_v46 = vcombine.low %v138_v33, %v142_v34 }
  0x31   :  { %v270_v36 = vld [vmem:[%s13848_s1 + $0x720] sm:$0xff]  ;;  %6406 = vmatpush2.bf16.msra.mxu1 %v8957_v38 }
  0x32   :  { %v8950_v40 = vcombine.high %v266_v35, %v270_v36  ;;  %v130_v41 = vld [vmem:[%s13848_s1 + $0x2c0] sm:$0xff]  ;;  %6366 = vmatprep.subr.bf16.mxu0 %v8822_v39  ;;  %v8949_v47 = vcombine.low %v266_v35, %v270_v36  ;;  %v10477_v39 = vcombine.high %v10456_v29, %v10456_v29 }
  0x33   :  { %v134_v42 = vld [vmem:[%s13848_s1 + $0x2e0] sm:$0xff]  ;;  %6367 = vmatpush2.bf16.msra.mxu0 %v8821_v46 }
  0x34   :  { %v258_v44 = vld [vmem:[%s13848_s1 + $0x6c0] sm:$0xff]  ;;  %v8814_v48 = vcombine.high %v130_v41, %v134_v42  ;;  %6407 = vmatprep.subr.bf16.mxu1 %v8950_v40  ;;  %v8813_v55 = vcombine.low %v130_v41, %v134_v42 }
  0x35   :  { %v262_v45 = vld [vmem:[%s13848_s1 + $0x6e0] sm:$0xff]  ;;  %6408 = vmatpush2.bf16.msra.mxu1 %v8949_v47 }
  0x36   :  { %v8942_v49 = vcombine.high %v258_v44, %v262_v45  ;;  %v122_v50 = vld [vmem:[%s13848_s1 + $0x280] sm:$0xff]  ;;  %6368 = vmatprep.subr.bf16.mxu0 %v8814_v48  ;;  %v8941_v56 = vcombine.low %v258_v44, %v262_v45 }
  0x37   :  { %v126_v51 = vld [vmem:[%s13848_s1 + $0x2a0] sm:$0xff]  ;;  %6369 = vmatpush2.bf16.msra.mxu0 %v8813_v55 }
  0x38   :  { %v250_v52 = vld [vmem:[%s13848_s1 + $0x680] sm:$0xff]  ;;  %v8806_v57 = vcombine.high %v122_v50, %v126_v51  ;;  %6409 = vmatprep.subr.bf16.mxu1 %v8942_v49  ;;  %v8805_v2 = vcombine.low %v122_v50, %v126_v51 }
  0x39   :  { %v254_v54 = vld [vmem:[%s13848_s1 + $0x6a0] sm:$0xff]  ;;  %6410 = vmatpush2.bf16.msra.mxu1 %v8941_v56 }
  0x3a   :  { %v8934_v58 = vcombine.high %v250_v52, %v254_v54  ;;  %v114_v60 = vld [vmem:[%s13848_s1 + $0x240] sm:$0xff]  ;;  %6370 = vmatprep.subr.bf16.mxu0 %v8806_v57  ;;  %v8933_v3 = vcombine.low %v250_v52, %v254_v54 }
  0x3b   :  { %v118_v61 = vld [vmem:[%s13848_s1 + $0x260] sm:$0xff]  ;;  %6371 = vmatpush2.bf16.msra.mxu0 %v8805_v2 }
  0x3c   :  { %v242_v62 = vld [vmem:[%s13848_s1 + $0x640] sm:$0xff]  ;;  %v8798_v4 = vcombine.high %v114_v60, %v118_v61  ;;  %6411 = vmatprep.subr.bf16.mxu1 %v8934_v58  ;;  %v8797_v11 = vcombine.low %v114_v60, %v118_v61 }
  0x3d   :  { %v246_v0 = vld [vmem:[%s13848_s1 + $0x660] sm:$0xff]  ;;  %6412 = vmatpush2.bf16.msra.mxu1 %v8933_v3 }
  0x3e   :  { %v8926_v5 = vcombine.high %v242_v62, %v246_v0  ;;  %v106_v6 = vld [vmem:[%s13848_s1 + $0x200] sm:$0xff]  ;;  %6372 = vmatprep.subr.bf16.mxu0 %v8798_v4  ;;  %v8925_v12 = vcombine.low %v242_v62, %v246_v0 }
  0x3f   :  { %v110_v7 = vld [vmem:[%s13848_s1 + $0x220] sm:$0xff]  ;;  %6373 = vmatpush2.bf16.msra.mxu0 %v8797_v11 }
  0x40   :  { %v234_v59 = vld [vmem:[%s13848_s1 + $0x600] sm:$0xff]  ;;  %v8790_v14 = vcombine.high %v106_v6, %v110_v7  ;;  %6413 = vmatprep.subr.bf16.mxu1 %v8926_v5  ;;  %v8789_v21 = vcombine.low %v106_v6, %v110_v7 }
  0x41   :  { %v238_v8 = vld [vmem:[%s13848_s1 + $0x620] sm:$0xff]  ;;  %6414 = vmatpush2.bf16.msra.mxu1 %v8925_v12 }
  0x42   :  { %v8918_v15 = vcombine.high %v234_v59, %v238_v8  ;;  %v354_v16 = vld [vmem:[%s13848_s1 + $0x9c0] sm:$0xff]  ;;  %6374 = vmatprep.subr.bf16.mxu0 %v8790_v14  ;;  %v8917_v23 = vcombine.low %v234_v59, %v238_v8 }
  0x43   :  { %v358_v17 = vld [vmem:[%s13848_s1 + $0x9e0] sm:$0xff]  ;;  %6375 = vmatpush2.bf16.msra.mxu0 %v8789_v21 }
  0x44   :  { %v482_v18 = vld [vmem:[%s13848_s1 + $0xdc0] sm:$0xff]  ;;  %v9038_v24 = vcombine.high %v354_v16, %v358_v17  ;;  %6415 = vmatprep.subr.bf16.mxu1 %v8918_v15  ;;  %v9037_v31 = vcombine.low %v354_v16, %v358_v17 }
  0x45   :  { %v486_v19 = vld [vmem:[%s13848_s1 + $0xde0] sm:$0xff]  ;;  %6416 = vmatpush2.bf16.msra.mxu1 %v8917_v23 }
  0x46   :  { %v9166_v25 = vcombine.high %v482_v18, %v486_v19  ;;  %v346_v26 = vld [vmem:[%s13848_s1 + $0x980] sm:$0xff]  ;;  %6426 = vmatprep.subr.bf16.mxu0 %v9038_v24  ;;  %v9165_v32 = vcombine.low %v482_v18, %v486_v19  ;;  %6377 = vmatmul.mubr.bf16.vlgmr.msra.gmra.mxu0 %v10441_v22 }
  0x47   :  { %v350_v27 = vld [vmem:[%s13848_s1 + $0x9a0] sm:$0xff]  ;;  %6427 = vmatpush1.bf16.msra.mxu0 %v9037_v31  ;;  %6458 = vmatprep.mubr.bf16.mxu0 %v10456_v29 }
  0x48   :  { %v474_v28 = vld [vmem:[%s13848_s1 + $0xd80] sm:$0xff]  ;;  %v9030_v33 = vcombine.high %v346_v26, %v350_v27  ;;  %6467 = vmatprep.subr.bf16.mxu1 %v9166_v25  ;;  %6418 = vmatmul.mubr.bf16.vlgmr.msra.gmra.mxu1 %v10460_v30  ;;  %v9029_v40 = vcombine.low %v346_v26, %v350_v27 }
  0x49   :  { %v478_v63 = vld [vmem:[%s13848_s1 + $0xda0] sm:$0xff]  ;;  %6468 = vmatpush1.bf16.msra.mxu1 %v9165_v32  ;;  %6499 = vmatprep.mubr.bf16.mxu1 %v10477_v39 }
  0x4a   :  { %v338_v34 = vld [vmem:[%s13848_s1 + $0x940] sm:$0xff]  ;;  %v9158_v37 = vcombine.high %v474_v28, %v478_v63  ;;  %6428 = vmatprep.subr.bf16.mxu0 %v9030_v33  ;;  %v9157_v41 = vcombine.low %v474_v28, %v478_v63 }
  0x4b   :  { %v342_v35 = vld [vmem:[%s13848_s1 + $0x960] sm:$0xff]  ;;  %6429 = vmatpush1.bf16.msra.mxu0 %v9029_v40 }
  0x4c   :  { %v466_v36 = vld [vmem:[%s13848_s1 + $0xd40] sm:$0xff]  ;;  %v9022_v42 = vcombine.high %v338_v34, %v342_v35  ;;  %6469 = vmatprep.subr.bf16.mxu1 %v9158_v37  ;;  %v9021_v49 = vcombine.low %v338_v34, %v342_v35 }
  0x4d   :  { %v470_v38 = vld [vmem:[%s13848_s1 + $0xd60] sm:$0xff]  ;;  %6470 = vmatpush1.bf16.msra.mxu1 %v9157_v41 }
  0x4e   :  { %v330_v44 = vld [vmem:[%s13848_s1 + $0x900] sm:$0xff]  ;;  %v9150_v47 = vcombine.high %v466_v36, %v470_v38  ;;  %6430 = vmatprep.subr.bf16.mxu0 %v9022_v42  ;;  %v9149_v50 = vcombine.low %v466_v36, %v470_v38 }
  0x4f   :  { %v334_v45 = vld [vmem:[%s13848_s1 + $0x920] sm:$0xff]  ;;  %6431 = vmatpush1.bf16.msra.mxu0 %v9021_v49 }
  0x50   :  { %v458_v46 = vld [vmem:[%s13848_s1 + $0xd00] sm:$0xff]  ;;  %v9014_v51 = vcombine.high %v330_v44, %v334_v45  ;;  %6471 = vmatprep.subr.bf16.mxu1 %v9150_v47  ;;  %v9013_v58 = vcombine.low %v330_v44, %v334_v45 }
  0x51   :  { %v462_v48 = vld [vmem:[%s13848_s1 + $0xd20] sm:$0xff]  ;;  %6472 = vmatpush1.bf16.msra.mxu1 %v9149_v50 }
  0x52   :  { %v322_v52 = vld [vmem:[%s13848_s1 + $0x8c0] sm:$0xff]  ;;  %v9142_v56 = vcombine.high %v458_v46, %v462_v48  ;;  %6432 = vmatprep.subr.bf16.mxu0 %v9014_v51  ;;  %v9141_v60 = vcombine.low %v458_v46, %v462_v48 }
  0x53   :  { %v326_v54 = vld [vmem:[%s13848_s1 + $0x8e0] sm:$0xff]  ;;  %6433 = vmatpush1.bf16.msra.mxu0 %v9013_v58 }
  0x54   :  { %v450_v55 = vld [vmem:[%s13848_s1 + $0xcc0] sm:$0xff]  ;;  %v9006_v61 = vcombine.high %v322_v52, %v326_v54  ;;  %6473 = vmatprep.subr.bf16.mxu1 %v9142_v56  ;;  %v9005_v4 = vcombine.low %v322_v52, %v326_v54 }
  0x55   :  { %v454_v57 = vld [vmem:[%s13848_s1 + $0xce0] sm:$0xff]  ;;  %6474 = vmatpush1.bf16.msra.mxu1 %v9141_v60 }
  0x56   :  { %v314_v62 = vld [vmem:[%s13848_s1 + $0x880] sm:$0xff]  ;;  %v9134_v2 = vcombine.high %v450_v55, %v454_v57  ;;  %6434 = vmatprep.subr.bf16.mxu0 %v9006_v61  ;;  %v9133_v5 = vcombine.low %v450_v55, %v454_v57 }
  0x57   :  { %v318_v0 = vld [vmem:[%s13848_s1 + $0x8a0] sm:$0xff]  ;;  %6435 = vmatpush1.bf16.msra.mxu0 %v9005_v4 }
  0x58   :  { %v442_v1 = vld [vmem:[%s13848_s1 + $0xc80] sm:$0xff]  ;;  %v8998_v6 = vcombine.high %v314_v62, %v318_v0  ;;  %6475 = vmatprep.subr.bf16.mxu1 %v9134_v2  ;;  %v8997_v14 = vcombine.low %v314_v62, %v318_v0 }
  0x59   :  { %v446_v3 = vld [vmem:[%s13848_s1 + $0xca0] sm:$0xff]  ;;  %6476 = vmatpush1.bf16.msra.mxu1 %v9133_v5 }
  0x5a   :  { %v306_v7 = vld [vmem:[%s13848_s1 + $0x840] sm:$0xff]  ;;  %v9126_v11 = vcombine.high %v442_v1, %v446_v3  ;;  %6436 = vmatprep.subr.bf16.mxu0 %v8998_v6  ;;  %v9125_v15 = vcombine.low %v442_v1, %v446_v3 }
  0x5b   :  { %v310_v59 = vld [vmem:[%s13848_s1 + $0x860] sm:$0xff]  ;;  %6437 = vmatpush1.bf16.msra.mxu0 %v8997_v14 }
  0x5c   :  { %v434_v8 = vld [vmem:[%s13848_s1 + $0xc40] sm:$0xff]  ;;  %v8990_v16 = vcombine.high %v306_v7, %v310_v59  ;;  %6477 = vmatprep.subr.bf16.mxu1 %v9126_v11  ;;  %v8989_v23 = vcombine.low %v306_v7, %v310_v59 }
  0x5d   :  { %v438_v12 = vld [vmem:[%s13848_s1 + $0xc60] sm:$0xff]  ;;  %6478 = vmatpush1.bf16.msra.mxu1 %v9125_v15 }
  0x5e   :  { %v298_v17 = vld [vmem:[%s13848_s1 + $0x800] sm:$0xff]  ;;  %v9118_v20 = vcombine.high %v434_v8, %v438_v12  ;;  %6438 = vmatprep.subr.bf16.mxu0 %v8990_v16  ;;  %v9117_v24 = vcombine.low %v434_v8, %v438_v12 }
  0x5f   :  { %v302_v18 = vld [vmem:[%s13848_s1 + $0x820] sm:$0xff]  ;;  %6439 = vmatpush1.bf16.msra.mxu0 %v8989_v23 }
  0x60   :  { %v426_v19 = vld [vmem:[%s13848_s1 + $0xc00] sm:$0xff]  ;;  %v8982_v25 = vcombine.high %v298_v17, %v302_v18  ;;  %6479 = vmatprep.subr.bf16.mxu1 %v9118_v20  ;;  %v8981_v32 = vcombine.low %v298_v17, %v302_v18 }
  0x61   :  { %v430_v21 = vld [vmem:[%s13848_s1 + $0xc20] sm:$0xff]  ;;  %6480 = vmatpush1.bf16.msra.mxu1 %v9117_v24  ;;  %v10629_v24 = vld [vmem:[%s13847_s0 + $0x8] sm:$0xff] }
  0x62   :  { %v418_v26 = vld [vmem:[%s13848_s1 + $0xbc0] sm:$0xff]  ;;  %v9110_v63 = vcombine.high %v426_v19, %v430_v21  ;;  %6440 = vmatprep.subr.bf16.mxu0 %v8982_v25  ;;  %v9109_v33 = vcombine.low %v426_v19, %v430_v21 }
  0x63   :  { %v422_v27 = vld [vmem:[%s13848_s1 + $0xbe0] sm:$0xff]  ;;  %6441 = vmatpush1.bf16.msra.mxu0 %v8981_v32 }
  0x64   :  { %v546_v28 = vld [vmem:[%s13848_s1 + $0xfc0] sm:$0xff]  ;;  %v9102_v34 = vcombine.high %v418_v26, %v422_v27  ;;  %6481 = vmatprep.subr.bf16.mxu1 %v9110_v63  ;;  %v9101_v41 = vcombine.low %v418_v26, %v422_v27 }
  0x65   :  { %v550_v31 = vld [vmem:[%s13848_s1 + $0xfe0] sm:$0xff]  ;;  %6482 = vmatpush1.bf16.msra.mxu1 %v9109_v33 }
  0x66   :  { %v410_v35 = vld [vmem:[%s13848_s1 + $0xb80] sm:$0xff]  ;;  %v9230_v38 = vcombine.high %v546_v28, %v550_v31  ;;  %6442 = vmatprep.subr.bf16.mxu0 %v9102_v34  ;;  %v9229_v42 = vcombine.low %v546_v28, %v550_v31  ;;  %v10645_v34 = vrot.slane %v10629_v24, %v10284_v53 }
  0x67   :  { %v414_v36 = vld [vmem:[%s13848_s1 + $0xba0] sm:$0xff]  ;;  %6443 = vmatpush2.bf16.msra.mxu0 %v9101_v41 }
  0x68   :  { %v538_v37 = vld [vmem:[%s13848_s1 + $0xf80] sm:$0xff]  ;;  %v9094_v44 = vcombine.high %v410_v35, %v414_v36  ;;  %6483 = vmatprep.subr.bf16.mxu1 %v9230_v38  ;;  %v9093_v50 = vcombine.low %v410_v35, %v414_v36 }
  0x69   :  { %v542_v40 = vld [vmem:[%s13848_s1 + $0xfa0] sm:$0xff]  ;;  %6484 = vmatpush2.bf16.msra.mxu1 %v9229_v42 }
  0x6a   :  { %v402_v45 = vld [vmem:[%s13848_s1 + $0xb40] sm:$0xff]  ;;  %v9222_v48 = vcombine.high %v538_v37, %v542_v40  ;;  %6444 = vmatprep.subr.bf16.mxu0 %v9094_v44  ;;  %v9221_v51 = vcombine.low %v538_v37, %v542_v40 }
  0x6b   :  { %v406_v46 = vld [vmem:[%s13848_s1 + $0xb60] sm:$0xff]  ;;  %6445 = vmatpush2.bf16.msra.mxu0 %v9093_v50 }
  0x6c   :  { %v530_v47 = vld [vmem:[%s13848_s1 + $0xf40] sm:$0xff]  ;;  %v9086_v52 = vcombine.high %v402_v45, %v406_v46  ;;  %6485 = vmatprep.subr.bf16.mxu1 %v9222_v48  ;;  %v9085_v60 = vcombine.low %v402_v45, %v406_v46  ;;  %v1174_v45 = vcombine.high %v10645_v34, %v10645_v34 }
  0x6d   :  { %v534_v49 = vld [vmem:[%s13848_s1 + $0xf60] sm:$0xff]  ;;  %6486 = vmatpush2.bf16.msra.mxu1 %v9221_v51 }
  0x6e   :  { %v394_v54 = vld [vmem:[%s13848_s1 + $0xb00] sm:$0xff]  ;;  %v9214_v57 = vcombine.high %v530_v47, %v534_v49  ;;  %6446 = vmatprep.subr.bf16.mxu0 %v9086_v52  ;;  %v9213_v61 = vcombine.low %v530_v47, %v534_v49  ;;  %v10663_v47 = vrot.slane %v10423_v10, %v10284_v53 }
  0x6f   :  { %v398_v55 = vld [vmem:[%s13848_s1 + $0xb20] sm:$0xff]  ;;  %6447 = vmatpush2.bf16.msra.mxu0 %v9085_v60 }
  0x70   :  { %v522_v56 = vld [vmem:[%s13848_s1 + $0xf00] sm:$0xff]  ;;  %v9078_v62 = vcombine.high %v394_v54, %v398_v55  ;;  %6487 = vmatprep.subr.bf16.mxu1 %v9214_v57  ;;  %v9077_v5 = vcombine.low %v394_v54, %v398_v55  ;;  %v10678_v55 = vrot.slane %v1174_v45, %v10284_v53 }
  0x71   :  { %v526_v58 = vld [vmem:[%s13848_s1 + $0xf20] sm:$0xff]  ;;  %6488 = vmatpush2.bf16.msra.mxu1 %v9213_v61 }
  0x72   :  { %v386_v0 = vld [vmem:[%s13848_s1 + $0xac0] sm:$0xff]  ;;  %v9206_v3 = vcombine.high %v522_v56, %v526_v58  ;;  %6448 = vmatprep.subr.bf16.mxu0 %v9078_v62  ;;  %v9205_v6 = vcombine.low %v522_v56, %v526_v58  ;;  %v10682_v56 = vcombine.high %v10663_v47, %v10663_v47 }
  0x73   :  { %v390_v1 = vld [vmem:[%s13848_s1 + $0xae0] sm:$0xff]  ;;  %6449 = vmatpush2.bf16.msra.mxu0 %v9077_v5 }
  0x74   :  { %v514_v2 = vld [vmem:[%s13848_s1 + $0xec0] sm:$0xff]  ;;  %v9070_v7 = vcombine.high %v386_v0, %v390_v1  ;;  %6489 = vmatprep.subr.bf16.mxu1 %v9206_v3  ;;  %v9069_v15 = vcombine.low %v386_v0, %v390_v1  ;;  %v10699_v3 = vcombine.high %v10678_v55, %v10678_v55 }
  0x75   :  { %v518_v4 = vld [vmem:[%s13848_s1 + $0xee0] sm:$0xff]  ;;  %6490 = vmatpush2.bf16.msra.mxu1 %v9205_v6 }
  0x76   :  { %v378_v59 = vld [vmem:[%s13848_s1 + $0xa80] sm:$0xff]  ;;  %v9198_v12 = vcombine.high %v514_v2, %v518_v4  ;;  %6450 = vmatprep.subr.bf16.mxu0 %v9070_v7  ;;  %v9197_v17 = vcombine.low %v514_v2, %v518_v4 }
  0x77   :  { %v382_v8 = vld [vmem:[%s13848_s1 + $0xaa0] sm:$0xff]  ;;  %6451 = vmatpush2.bf16.msra.mxu0 %v9069_v15 }
  0x78   :  { %v506_v11 = vld [vmem:[%s13848_s1 + $0xe80] sm:$0xff]  ;;  %v9062_v18 = vcombine.high %v378_v59, %v382_v8  ;;  %6491 = vmatprep.subr.bf16.mxu1 %v9198_v12  ;;  %v9061_v25 = vcombine.low %v378_v59, %v382_v8 }
  0x79   :  { %v510_v14 = vld [vmem:[%s13848_s1 + $0xea0] sm:$0xff]  ;;  %6492 = vmatpush2.bf16.msra.mxu1 %v9197_v17 }
  0x7a   :  { %v370_v16 = vld [vmem:[%s13848_s1 + $0xa40] sm:$0xff]  ;;  %v9190_v23 = vcombine.high %v506_v11, %v510_v14  ;;  %6452 = vmatprep.subr.bf16.mxu0 %v9062_v18  ;;  %v9189_v26 = vcombine.low %v506_v11, %v510_v14 }
  0x7b   :  { %v374_v19 = vld [vmem:[%s13848_s1 + $0xa60] sm:$0xff]  ;;  %6453 = vmatpush2.bf16.msra.mxu0 %v9061_v25 }
  0x7c   :  { %v498_v20 = vld [vmem:[%s13848_s1 + $0xe40] sm:$0xff]  ;;  %v9054_v27 = vcombine.high %v370_v16, %v374_v19  ;;  %6493 = vmatprep.subr.bf16.mxu1 %v9190_v23  ;;  %v9053_v35 = vcombine.low %v370_v16, %v374_v19 }
  0x7d   :  { %v502_v21 = vld [vmem:[%s13848_s1 + $0xe60] sm:$0xff]  ;;  %6494 = vmatpush2.bf16.msra.mxu1 %v9189_v26 }
  0x7e   :  { %v362_v28 = vld [vmem:[%s13848_s1 + $0xa00] sm:$0xff]  ;;  %v9182_v32 = vcombine.high %v498_v20, %v502_v21  ;;  %6454 = vmatprep.subr.bf16.mxu0 %v9054_v27  ;;  %v9181_v36 = vcombine.low %v498_v20, %v502_v21 }
  0x7f   :  { %v366_v63 = vld [vmem:[%s13848_s1 + $0xa20] sm:$0xff]  ;;  %6455 = vmatpush2.bf16.msra.mxu0 %v9053_v35 }
  0x80   :  { %v490_v31 = vld [vmem:[%s13848_s1 + $0xe00] sm:$0xff]  ;;  %v9046_v37 = vcombine.high %v362_v28, %v366_v63  ;;  %6495 = vmatprep.subr.bf16.mxu1 %v9182_v32  ;;  %v9045_v46 = vcombine.low %v362_v28, %v366_v63 }
  0x81   :  { %v494_v33 = vld [vmem:[%s13848_s1 + $0xe20] sm:$0xff]  ;;  %6496 = vmatpush2.bf16.msra.mxu1 %v9181_v36 }
  0x82   :  { %v610_v38 = vld [vmem:[%s13848_s1 + $0x11c0] sm:$0xff]  ;;  %v9174_v42 = vcombine.high %v490_v31, %v494_v33  ;;  %6456 = vmatprep.subr.bf16.mxu0 %v9046_v37  ;;  %v9173_v48 = vcombine.low %v490_v31, %v494_v33 }
  0x83   :  { %v614_v40 = vld [vmem:[%s13848_s1 + $0x11e0] sm:$0xff]  ;;  %6457 = vmatpush2.bf16.msra.mxu0 %v9045_v46 }
  0x84   :  { %v738_v41 = vld [vmem:[%s13848_s1 + $0x15c0] sm:$0xff]  ;;  %v9294_v49 = vcombine.high %v610_v38, %v614_v40  ;;  %6497 = vmatprep.subr.bf16.mxu1 %v9174_v42  ;;  %v9293_v57 = vcombine.low %v610_v38, %v614_v40 }
  0x85   :  { %v742_v44 = vld [vmem:[%s13848_s1 + $0x15e0] sm:$0xff]  ;;  %6498 = vmatpush2.bf16.msra.mxu1 %v9173_v48 }
  0x86   :  { %v602_v50 = vld [vmem:[%s13848_s1 + $0x1180] sm:$0xff]  ;;  %v9422_v54 = vcombine.high %v738_v41, %v742_v44  ;;  %6508 = vmatprep.subr.bf16.mxu0 %v9294_v49  ;;  %v9421_v58 = vcombine.low %v738_v41, %v742_v44  ;;  %6459 = vmatmul.mubr.bf16.vlgmr.msra.gmra.mxu0 %v10663_v47 }
  0x87   :  { %v606_v51 = vld [vmem:[%s13848_s1 + $0x11a0] sm:$0xff]  ;;  %6509 = vmatpush1.bf16.msra.mxu0 %v9293_v57  ;;  %6540 = vmatprep.mubr.bf16.mxu0 %v10678_v55 }
  0x88   :  { %v730_v52 = vld [vmem:[%s13848_s1 + $0x1580] sm:$0xff]  ;;  %v9286_v60 = vcombine.high %v602_v50, %v606_v51  ;;  %6549 = vmatprep.subr.bf16.mxu1 %v9422_v54  ;;  %6500 = vmatmul.mubr.bf16.vlgmr.msra.gmra.mxu1 %v10682_v56  ;;  %v9285_v4 = vcombine.low %v602_v50, %v606_v51 }
  0x89   :  { %v734_v10 = vld [vmem:[%s13848_s1 + $0x15a0] sm:$0xff]  ;;  %6550 = vmatpush1.bf16.msra.mxu1 %v9421_v58  ;;  %6581 = vmatprep.mubr.bf16.mxu1 %v10699_v3 }
  0x8a   :  { %v594_v61 = vld [vmem:[%s13848_s1 + $0x1140] sm:$0xff]  ;;  %v9414_v0 = vcombine.high %v730_v52, %v734_v10  ;;  %6510 = vmatprep.subr.bf16.mxu0 %v9286_v60  ;;  %v9413_v5 = vcombine.low %v730_v52, %v734_v10 }
  0x8b   :  { %v598_v62 = vld [vmem:[%s13848_s1 + $0x1160] sm:$0xff]  ;;  %6511 = vmatpush1.bf16.msra.mxu0 %v9285_v4 }
  0x8c   :  { %v722_v1 = vld [vmem:[%s13848_s1 + $0x1540] sm:$0xff]  ;;  %v9278_v6 = vcombine.high %v594_v61, %v598_v62  ;;  %6551 = vmatprep.subr.bf16.mxu1 %v9414_v0  ;;  %v9277_v14 = vcombine.low %v594_v61, %v598_v62 }
  0x8d   :  { %v726_v2 = vld [vmem:[%s13848_s1 + $0x1560] sm:$0xff]  ;;  %6552 = vmatpush1.bf16.msra.mxu1 %v9413_v5 }
  0x8e   :  { %v586_v7 = vld [vmem:[%s13848_s1 + $0x1100] sm:$0xff]  ;;  %v9406_v11 = vcombine.high %v722_v1, %v726_v2  ;;  %6512 = vmatprep.subr.bf16.mxu0 %v9278_v6  ;;  %v9405_v15 = vcombine.low %v722_v1, %v726_v2 }
  0x8f   :  { %v590_v59 = vld [vmem:[%s13848_s1 + $0x1120] sm:$0xff]  ;;  %6513 = vmatpush1.bf16.msra.mxu0 %v9277_v14 }
  0x90   :  { %v714_v8 = vld [vmem:[%s13848_s1 + $0x1500] sm:$0xff]  ;;  %v9270_v16 = vcombine.high %v586_v7, %v590_v59  ;;  %6553 = vmatprep.subr.bf16.mxu1 %v9406_v11  ;;  %v9269_v23 = vcombine.low %v586_v7, %v590_v59 }
  0x91   :  { %v718_v12 = vld [vmem:[%s13848_s1 + $0x1520] sm:$0xff]  ;;  %6554 = vmatpush1.bf16.msra.mxu1 %v9405_v15 }
  0x92   :  { %v578_v17 = vld [vmem:[%s13848_s1 + $0x10c0] sm:$0xff]  ;;  %v9398_v20 = vcombine.high %v714_v8, %v718_v12  ;;  %6514 = vmatprep.subr.bf16.mxu0 %v9270_v16  ;;  %v9397_v25 = vcombine.low %v714_v8, %v718_v12 }
  0x93   :  { %v582_v18 = vld [vmem:[%s13848_s1 + $0x10e0] sm:$0xff]  ;;  %6515 = vmatpush1.bf16.msra.mxu0 %v9269_v23 }
  0x94   :  { %v706_v19 = vld [vmem:[%s13848_s1 + $0x14c0] sm:$0xff]  ;;  %v9262_v26 = vcombine.high %v578_v17, %v582_v18  ;;  %6555 = vmatprep.subr.bf16.mxu1 %v9398_v20  ;;  %v9261_v33 = vcombine.low %v578_v17, %v582_v18 }
  0x95   :  { %v710_v21 = vld [vmem:[%s13848_s1 + $0x14e0] sm:$0xff]  ;;  %6556 = vmatpush1.bf16.msra.mxu1 %v9397_v25 }
  0x96   :  { %v570_v27 = vld [vmem:[%s13848_s1 + $0x1080] sm:$0xff]  ;;  %v9390_v31 = vcombine.high %v706_v19, %v710_v21  ;;  %6516 = vmatprep.subr.bf16.mxu0 %v9262_v26  ;;  %v9389_v35 = vcombine.low %v706_v19, %v710_v21 }
  0x97   :  { %v574_v28 = vld [vmem:[%s13848_s1 + $0x10a0] sm:$0xff]  ;;  %6517 = vmatpush1.bf16.msra.mxu0 %v9261_v33 }
  0x98   :  { %v698_v63 = vld [vmem:[%s13848_s1 + $0x1480] sm:$0xff]  ;;  %v9254_v36 = vcombine.high %v570_v27, %v574_v28  ;;  %6557 = vmatprep.subr.bf16.mxu1 %v9390_v31  ;;  %v9253_v44 = vcombine.low %v570_v27, %v574_v28 }
  0x99   :  { %v702_v32 = vld [vmem:[%s13848_s1 + $0x14a0] sm:$0xff]  ;;  %6558 = vmatpush1.bf16.msra.mxu1 %v9389_v35 }
  0x9a   :  { %v562_v37 = vld [vmem:[%s13848_s1 + $0x1040] sm:$0xff]  ;;  %v9382_v41 = vcombine.high %v698_v63, %v702_v32  ;;  %6518 = vmatprep.subr.bf16.mxu0 %v9254_v36  ;;  %v9381_v45 = vcombine.low %v698_v63, %v702_v32 }
  0x9b   :  { %v566_v38 = vld [vmem:[%s13848_s1 + $0x1060] sm:$0xff]  ;;  %6519 = vmatpush1.bf16.msra.mxu0 %v9253_v44 }
  0x9c   :  { %v690_v40 = vld [vmem:[%s13848_s1 + $0x1440] sm:$0xff]  ;;  %v9246_v46 = vcombine.high %v562_v37, %v566_v38  ;;  %6559 = vmatprep.subr.bf16.mxu1 %v9382_v41  ;;  %v9245_v54 = vcombine.low %v562_v37, %v566_v38 }
  0x9d   :  { %v694_v42 = vld [vmem:[%s13848_s1 + $0x1460] sm:$0xff]  ;;  %6560 = vmatpush1.bf16.msra.mxu1 %v9381_v45 }
  0x9e   :  { %v554_v48 = vld [vmem:[%s13848_s1 + $0x1000] sm:$0xff]  ;;  %v9374_v51 = vcombine.high %v690_v40, %v694_v42  ;;  %6520 = vmatprep.subr.bf16.mxu0 %v9246_v46  ;;  %v9373_v10 = vcombine.low %v690_v40, %v694_v42 }
  0x9f   :  { %v558_v49 = vld [vmem:[%s13848_s1 + $0x1020] sm:$0xff] }
  0xa0   :  { %v682_v50 = vld [vmem:[%s13848_s1 + $0x1400] sm:$0xff]  ;;  %v9238_v57 = vcombine.high %v554_v48, %v558_v49  ;;  %6561 = vmatprep.subr.bf16.mxu1 %v9374_v51 }
  0xa1   :  { %v686_v52 = vld [vmem:[%s13848_s1 + $0x1420] sm:$0xff] }
  0xa2   :  { %v674_v58 = vld [vmem:[%s13848_s1 + $0x13c0] sm:$0xff]  ;;  %v9366_v60 = vcombine.high %v682_v50, %v686_v52 }
  0xa3   :  { %v678_v61 = vld [vmem:[%s13848_s1 + $0x13e0] sm:$0xff] }
  0xa4   :  { %16 = vsyncpa [#allocation3], 0  ;;  %v802_v62 = vld [vmem:[%s13848_s1 + $0x17c0] sm:$0xff]  ;;  %6521 = vmatpush1.bf16.msra.mxu0 %v9245_v54  ;;  %v9237_v1 = vcombine.low %v554_v48, %v558_v49  ;;  %6562 = vmatpush1.bf16.msra.mxu1 %v9373_v10  ;;  %v9365_v2 = vcombine.low %v682_v50, %v686_v52  ;;  %v9358_v4 = vcombine.high %v674_v58, %v678_v61  ;;  %vm10141_vm0 = vmmov 0  }
  0xa5   :  { %v806_v0 = vld [vmem:[%s13848_s1 + $0x17e0] sm:$0xff]  ;;  %6522 = vmatprep.subr.bf16.mxu0 %v9238_v57  ;;  %6563 = vmatprep.subr.bf16.mxu1 %v9366_v60  ;;  %v9357_v11 = vcombine.low %v674_v58, %v678_v61  ;;  %vm8696_vm4 = vcmask 1041408   ;;  %vm8709_vm5 = vcmask 74752  }
  0xa6   :  { %v9486_v5 = vcombine.high %v802_v62, %v806_v0  ;;  %v666_v6 = vld [vmem:[%s13848_s1 + $0x1380] sm:$0xff]  ;;  %v9485_v12 = vcombine.low %v802_v62, %v806_v0  ;;  %v1159_v62 = vcombine.high %v10629_v24, %v10629_v24 }
  0xa7   :  { %v670_v7 = vld [vmem:[%s13848_s1 + $0x13a0] sm:$0xff] }
  0xa8   :  { %v794_v59 = vld [vmem:[%s13848_s1 + $0x1780] sm:$0xff]  ;;  %6523 = vmatpush1.bf16.msra.mxu0 %v9237_v1  ;;  %6564 = vmatpush1.bf16.msra.mxu1 %v9365_v2  ;;  %v9350_v14 = vcombine.high %v666_v6, %v670_v7  ;;  %v9349_v20 = vcombine.low %v666_v6, %v670_v7 }
  0xa9   :  { %v798_v8 = vld [vmem:[%s13848_s1 + $0x17a0] sm:$0xff]  ;;  %6524 = vmatprep.subr.bf16.mxu0 %v9358_v4  ;;  %6565 = vmatprep.subr.bf16.mxu1 %v9486_v5 }
  0xaa   :  { %v9478_v15 = vcombine.high %v794_v59, %v798_v8  ;;  %v658_v16 = vld [vmem:[%s13848_s1 + $0x1340] sm:$0xff]  ;;  %v9477_v21 = vcombine.low %v794_v59, %v798_v8  ;;  %v10863_v59 = vrot.slane %v1159_v62, %v10284_v53 }
  0xab   :  { %v662_v17 = vld [vmem:[%s13848_s1 + $0x1360] sm:$0xff] }
  0xac   :  { %v786_v18 = vld [vmem:[%s13848_s1 + $0x1740] sm:$0xff]  ;;  %6525 = vmatpush2.bf16.msra.mxu0 %v9357_v11  ;;  %6566 = vmatpush2.bf16.msra.mxu1 %v9485_v12  ;;  %v9342_v23 = vcombine.high %v658_v16, %v662_v17  ;;  %v9341_v31 = vcombine.low %v658_v16, %v662_v17 }
  0xad   :  { %v790_v19 = vld [vmem:[%s13848_s1 + $0x1760] sm:$0xff]  ;;  %6526 = vmatprep.subr.bf16.mxu0 %v9350_v14  ;;  %6567 = vmatprep.subr.bf16.mxu1 %v9478_v15 }
  0xae   :  { %v9470_v25 = vcombine.high %v786_v18, %v790_v19  ;;  %v650_v26 = vld [vmem:[%s13848_s1 + $0x1300] sm:$0xff]  ;;  %v9469_v32 = vcombine.low %v786_v18, %v790_v19  ;;  %v1175_v19 = vcombine.high %v10863_v59, %v10863_v59 }
  0xaf   :  { %v654_v27 = vld [vmem:[%s13848_s1 + $0x1320] sm:$0xff] }
  0xb0   :  { %v778_v28 = vld [vmem:[%s13848_s1 + $0x1700] sm:$0xff]  ;;  %6527 = vmatpush2.bf16.msra.mxu0 %v9349_v20  ;;  %6568 = vmatpush2.bf16.msra.mxu1 %v9477_v21  ;;  %v9334_v33 = vcombine.high %v650_v26, %v654_v27  ;;  %v9333_v41 = vcombine.low %v650_v26, %v654_v27  ;;  %v10881_v21 = vrot.slane %v10645_v34, %v10284_v53 }
  0xb1   :  { %v782_v63 = vld [vmem:[%s13848_s1 + $0x1720] sm:$0xff]  ;;  %6528 = vmatprep.subr.bf16.mxu0 %v9342_v23  ;;  %6569 = vmatprep.subr.bf16.mxu1 %v9470_v25 }
  0xb2   :  { %v9462_v35 = vcombine.high %v778_v28, %v782_v63  ;;  %v642_v36 = vld [vmem:[%s13848_s1 + $0x12c0] sm:$0xff]  ;;  %v9461_v42 = vcombine.low %v778_v28, %v782_v63 }
  0xb3   :  { %v646_v37 = vld [vmem:[%s13848_s1 + $0x12e0] sm:$0xff] }
  0xb4   :  { %v770_v38 = vld [vmem:[%s13848_s1 + $0x16c0] sm:$0xff]  ;;  %6529 = vmatpush2.bf16.msra.mxu0 %v9341_v31  ;;  %6570 = vmatpush2.bf16.msra.mxu1 %v9469_v32  ;;  %v9326_v44 = vcombine.high %v642_v36, %v646_v37  ;;  %v9325_v51 = vcombine.low %v642_v36, %v646_v37  ;;  %v10896_v31 = vrot.slane %v1175_v19, %v10284_v53 }
  0xb5   :  { %v774_v40 = vld [vmem:[%s13848_s1 + $0x16e0] sm:$0xff]  ;;  %6530 = vmatprep.subr.bf16.mxu0 %v9334_v33  ;;  %6571 = vmatprep.subr.bf16.mxu1 %v9462_v35  ;;  %v10900_v32 = vcombine.high %v10881_v21, %v10881_v21 }
  0xb6   :  { %v9454_v45 = vcombine.high %v770_v38, %v774_v40  ;;  %v634_v46 = vld [vmem:[%s13848_s1 + $0x1280] sm:$0xff]  ;;  %v9453_v52 = vcombine.low %v770_v38, %v774_v40 }
  0xb7   :  { %v638_v48 = vld [vmem:[%s13848_s1 + $0x12a0] sm:$0xff] }
  0xb8   :  { %v762_v49 = vld [vmem:[%s13848_s1 + $0x1680] sm:$0xff]  ;;  %6531 = vmatpush2.bf16.msra.mxu0 %v9333_v41  ;;  %6572 = vmatpush2.bf16.msra.mxu1 %v9461_v42  ;;  %v9318_v54 = vcombine.high %v634_v46, %v638_v48  ;;  %v9317_v0 = vcombine.low %v634_v46, %v638_v48 }
  0xb9   :  { %v766_v50 = vld [vmem:[%s13848_s1 + $0x16a0] sm:$0xff]  ;;  %6532 = vmatprep.subr.bf16.mxu0 %v9326_v44  ;;  %6573 = vmatprep.subr.bf16.mxu1 %v9454_v45  ;;  %v10917_v44 = vcombine.high %v10896_v31, %v10896_v31 }
  0xba   :  { %v9446_v10 = vcombine.high %v762_v49, %v766_v50  ;;  %v626_v57 = vld [vmem:[%s13848_s1 + $0x1240] sm:$0xff]  ;;  %v9445_v1 = vcombine.low %v762_v49, %v766_v50 }
  0xbb   :  { %v630_v58 = vld [vmem:[%s13848_s1 + $0x1260] sm:$0xff] }
  0xbc   :  { %v754_v60 = vld [vmem:[%s13848_s1 + $0x1640] sm:$0xff]  ;;  %6533 = vmatpush2.bf16.msra.mxu0 %v9325_v51  ;;  %6574 = vmatpush2.bf16.msra.mxu1 %v9453_v52  ;;  %v9310_v2 = vcombine.high %v626_v57, %v630_v58  ;;  %v9309_v8 = vcombine.low %v626_v57, %v630_v58 }
  0xbd   :  { %v758_v61 = vld [vmem:[%s13848_s1 + $0x1660] sm:$0xff]  ;;  %6534 = vmatprep.subr.bf16.mxu0 %v9318_v54  ;;  %6575 = vmatprep.subr.bf16.mxu1 %v9446_v10 }
  0xbe   :  { %v9438_v4 = vcombine.high %v754_v60, %v758_v61  ;;  %v618_v5 = vld [vmem:[%s13848_s1 + $0x1200] sm:$0xff]  ;;  %v9437_v11 = vcombine.low %v754_v60, %v758_v61 }
  0xbf   :  { %v622_v6 = vld [vmem:[%s13848_s1 + $0x1220] sm:$0xff] }
  0xc0   :  { %v746_v24 = vld [vmem:[%s13848_s1 + $0x1600] sm:$0xff]  ;;  %6535 = vmatpush2.bf16.msra.mxu0 %v9317_v0  ;;  %6576 = vmatpush2.bf16.msra.mxu1 %v9445_v1  ;;  %v9302_v12 = vcombine.high %v618_v5, %v622_v6  ;;  %v9301_v20 = vcombine.low %v618_v5, %v622_v6 }
  0xc1   :  { %v750_v7 = vld [vmem:[%s13848_s1 + $0x1620] sm:$0xff]  ;;  %6536 = vmatprep.subr.bf16.mxu0 %v9310_v2  ;;  %6577 = vmatprep.subr.bf16.mxu1 %v9438_v4 }
  0xc2   :  { %v9430_v14 = vcombine.high %v746_v24, %v750_v7  ;;  %v866_v15 = vld [vmem:[%s13848_s1 + $0x19c0] sm:$0xff]  ;;  %v9429_v23 = vcombine.low %v746_v24, %v750_v7 }
  0xc3   :  { %v870_v16 = vld [vmem:[%s13848_s1 + $0x19e0] sm:$0xff] }
  0xc4   :  { %v994_v17 = vld [vmem:[%s13848_s1 + $0x1dc0] sm:$0xff]  ;;  %6537 = vmatpush2.bf16.msra.mxu0 %v9309_v8  ;;  %6578 = vmatpush2.bf16.msra.mxu1 %v9437_v11  ;;  %v9550_v25 = vcombine.high %v866_v15, %v870_v16  ;;  %v9549_v33 = vcombine.low %v866_v15, %v870_v16 }
  0xc5   :  { %v998_v18 = vld [vmem:[%s13848_s1 + $0x1de0] sm:$0xff]  ;;  %6538 = vmatprep.subr.bf16.mxu0 %v9302_v12  ;;  %6579 = vmatprep.subr.bf16.mxu1 %v9430_v14 }
  0xc6   :  { %v9678_v26 = vcombine.high %v994_v17, %v998_v18  ;;  %v858_v27 = vld [vmem:[%s13848_s1 + $0x1980] sm:$0xff]  ;;  %v9677_v35 = vcombine.low %v994_v17, %v998_v18 }
  0xc7   :  { %v862_v28 = vld [vmem:[%s13848_s1 + $0x19a0] sm:$0xff] }
  0xc8   :  { %v986_v63 = vld [vmem:[%s13848_s1 + $0x1d80] sm:$0xff]  ;;  %6539 = vmatpush2.bf16.msra.mxu0 %v9301_v20  ;;  %6580 = vmatpush2.bf16.msra.mxu1 %v9429_v23  ;;  %v9542_v36 = vcombine.high %v858_v27, %v862_v28  ;;  %v9541_v45 = vcombine.low %v858_v27, %v862_v28 }
  0xc9   :  { %v990_v34 = vld [vmem:[%s13848_s1 + $0x1da0] sm:$0xff]  ;;  %6590 = vmatprep.subr.bf16.mxu0 %v9550_v25  ;;  %6631 = vmatprep.subr.bf16.mxu1 %v9678_v26 }
  0xca   :  { %v9670_v37 = vcombine.high %v986_v63, %v990_v34  ;;  %v850_v38 = vld [vmem:[%s13848_s1 + $0x1940] sm:$0xff]  ;;  %v9669_v46 = vcombine.low %v986_v63, %v990_v34 }
  0xcb   :  { %v854_v40 = vld [vmem:[%s13848_s1 + $0x1960] sm:$0xff]  ;;  %6541 = vmatmul.mubr.bf16.vlgmr.msra.gmra.mxu0 %v10881_v21  ;;  %6582 = vmatmul.mubr.bf16.vlgmr.msra.gmra.mxu1 %v10900_v32 }
  0xcc   :  { %v978_v41 = vld [vmem:[%s13848_s1 + $0x1d40] sm:$0xff]  ;;  %6591 = vmatpush1.bf16.msra.mxu0 %v9549_v33  ;;  %6632 = vmatpush1.bf16.msra.mxu1 %v9677_v35  ;;  %v9534_v48 = vcombine.high %v850_v38, %v854_v40  ;;  %v9533_v10 = vcombine.low %v850_v38, %v854_v40 }
  0xcd   :  { %v982_v42 = vld [vmem:[%s13848_s1 + $0x1d60] sm:$0xff]  ;;  %6592 = vmatprep.subr.bf16.mxu0 %v9542_v36  ;;  %6633 = vmatprep.subr.bf16.mxu1 %v9670_v37 }
  0xce   :  { %v9662_v49 = vcombine.high %v978_v41, %v982_v42  ;;  %v842_v50 = vld [vmem:[%s13848_s1 + $0x1900] sm:$0xff]  ;;  %6622 = vmatprep.mubr.bf16.mxu0 %v10896_v31  ;;  %6663 = vmatprep.mubr.bf16.mxu1 %v10917_v44  ;;  %v9661_v57 = vcombine.low %v978_v41, %v982_v42 }
  0xcf   :  { %v846_v51 = vld [vmem:[%s13848_s1 + $0x1920] sm:$0xff] }
  0xd0   :  { %v970_v52 = vld [vmem:[%s13848_s1 + $0x1d00] sm:$0xff]  ;;  %6593 = vmatpush1.bf16.msra.mxu0 %v9541_v45  ;;  %6634 = vmatpush1.bf16.msra.mxu1 %v9669_v46  ;;  %v9526_v58 = vcombine.high %v842_v50, %v846_v51  ;;  %v9525_v2 = vcombine.low %v842_v50, %v846_v51 }
  0xd1   :  { %v974_v54 = vld [vmem:[%s13848_s1 + $0x1d20] sm:$0xff]  ;;  %6594 = vmatprep.subr.bf16.mxu0 %v9534_v48  ;;  %6635 = vmatprep.subr.bf16.mxu1 %v9662_v49 }
  0xd2   :  { %v9654_v60 = vcombine.high %v970_v52, %v974_v54  ;;  %v834_v61 = vld [vmem:[%s13848_s1 + $0x18c0] sm:$0xff]  ;;  %v9653_v4 = vcombine.low %v970_v52, %v974_v54 }
  0xd3   :  { %v838_v62 = vld [vmem:[%s13848_s1 + $0x18e0] sm:$0xff] }
  0xd4   :  { %v962_v0 = vld [vmem:[%s13848_s1 + $0x1cc0] sm:$0xff]  ;;  %6595 = vmatpush1.bf16.msra.mxu0 %v9533_v10  ;;  %6636 = vmatpush1.bf16.msra.mxu1 %v9661_v57  ;;  %v9518_v5 = vcombine.high %v834_v61, %v838_v62  ;;  %v9517_v12 = vcombine.low %v834_v61, %v838_v62 }
  0xd5   :  { %v966_v1 = vld [vmem:[%s13848_s1 + $0x1ce0] sm:$0xff]  ;;  %6596 = vmatprep.subr.bf16.mxu0 %v9526_v58  ;;  %6637 = vmatprep.subr.bf16.mxu1 %v9654_v60 }
  0xd6   :  { %v9646_v6 = vcombine.high %v962_v0, %v966_v1  ;;  %v826_v24 = vld [vmem:[%s13848_s1 + $0x1880] sm:$0xff]  ;;  %v9645_v14 = vcombine.low %v962_v0, %v966_v1 }
  0xd7   :  { %v830_v7 = vld [vmem:[%s13848_s1 + $0x18a0] sm:$0xff] }
  0xd8   :  { %v954_v8 = vld [vmem:[%s13848_s1 + $0x1c80] sm:$0xff]  ;;  %6597 = vmatpush1.bf16.msra.mxu0 %v9525_v2  ;;  %6638 = vmatpush1.bf16.msra.mxu1 %v9653_v4  ;;  %v9510_v15 = vcombine.high %v826_v24, %v830_v7  ;;  %v9509_v23 = vcombine.low %v826_v24, %v830_v7 }
  0xd9   :  { %v958_v11 = vld [vmem:[%s13848_s1 + $0x1ca0] sm:$0xff]  ;;  %6598 = vmatprep.subr.bf16.mxu0 %v9518_v5  ;;  %6639 = vmatprep.subr.bf16.mxu1 %v9646_v6 }
  0xda   :  { %v9638_v16 = vcombine.high %v954_v8, %v958_v11  ;;  %v818_v17 = vld [vmem:[%s13848_s1 + $0x1840] sm:$0xff]  ;;  %v9637_v25 = vcombine.low %v954_v8, %v958_v11 }
  0xdb   :  { %v822_v18 = vld [vmem:[%s13848_s1 + $0x1860] sm:$0xff] }
  0xdc   :  { %v946_v19 = vld [vmem:[%s13848_s1 + $0x1c40] sm:$0xff]  ;;  %6599 = vmatpush1.bf16.msra.mxu0 %v9517_v12  ;;  %6640 = vmatpush1.bf16.msra.mxu1 %v9645_v14  ;;  %v9502_v26 = vcombine.high %v818_v17, %v822_v18  ;;  %v9501_v35 = vcombine.low %v818_v17, %v822_v18 }
  0xdd   :  { %v950_v20 = vld [vmem:[%s13848_s1 + $0x1c60] sm:$0xff]  ;;  %6600 = vmatprep.subr.bf16.mxu0 %v9510_v15  ;;  %6641 = vmatprep.subr.bf16.mxu1 %v9638_v16 }
  0xde   :  { %v9630_v27 = vcombine.high %v946_v19, %v950_v20  ;;  %v810_v28 = vld [vmem:[%s13848_s1 + $0x1800] sm:$0xff]  ;;  %v9629_v36 = vcombine.low %v946_v19, %v950_v20 }
  0xdf   :  { %v814_v63 = vld [vmem:[%s13848_s1 + $0x1820] sm:$0xff] }
  0xe0   :  { %v938_v34 = vld [vmem:[%s13848_s1 + $0x1c00] sm:$0xff]  ;;  %6601 = vmatpush1.bf16.msra.mxu0 %v9509_v23  ;;  %6642 = vmatpush1.bf16.msra.mxu1 %v9637_v25  ;;  %v9494_v37 = vcombine.high %v810_v28, %v814_v63  ;;  %v9493_v46 = vcombine.low %v810_v28, %v814_v63 }
  0xe1   :  { %v942_v33 = vld [vmem:[%s13848_s1 + $0x1c20] sm:$0xff]  ;;  %6602 = vmatprep.subr.bf16.mxu0 %v9502_v26  ;;  %6643 = vmatprep.subr.bf16.mxu1 %v9630_v27 }
  0xe2   :  { %v9622_v38 = vcombine.high %v938_v34, %v942_v33  ;;  %v930_v40 = vld [vmem:[%s13848_s1 + $0x1bc0] sm:$0xff]  ;;  %v9621_v48 = vcombine.low %v938_v34, %v942_v33 }
  0xe3   :  { %v934_v41 = vld [vmem:[%s13848_s1 + $0x1be0] sm:$0xff] }
  0xe4   :  { %v1058_v42 = vld [vmem:[%s13848_s1 + $0x1fc0] sm:$0xff]  ;;  %6603 = vmatpush1.bf16.msra.mxu0 %v9501_v35  ;;  %6644 = vmatpush1.bf16.msra.mxu1 %v9629_v36  ;;  %v9614_v49 = vcombine.high %v930_v40, %v934_v41  ;;  %v9613_v57 = vcombine.low %v930_v40, %v934_v41 }
  0xe5   :  { %v1062_v45 = vld [vmem:[%s13848_s1 + $0x1fe0] sm:$0xff]  ;;  %6604 = vmatprep.subr.bf16.mxu0 %v9494_v37  ;;  %6645 = vmatprep.subr.bf16.mxu1 %v9622_v38 }
  0xe6   :  { %v9742_v50 = vcombine.high %v1058_v42, %v1062_v45  ;;  %v922_v51 = vld [vmem:[%s13848_s1 + $0x1b80] sm:$0xff]  ;;  %v9741_v58 = vcombine.low %v1058_v42, %v1062_v45 }
  0xe7   :  { %v926_v52 = vld [vmem:[%s13848_s1 + $0x1ba0] sm:$0xff] }
  0xe8   :  { %v1050_v54 = vld [vmem:[%s13848_s1 + $0x1f80] sm:$0xff]  ;;  %6605 = vmatpush1.bf16.msra.mxu0 %v9493_v46  ;;  %6646 = vmatpush1.bf16.msra.mxu1 %v9621_v48  ;;  %v9606_v60 = vcombine.high %v922_v51, %v926_v52  ;;  %v9605_v4 = vcombine.low %v922_v51, %v926_v52 }
  0xe9   :  { %v1054_v10 = vld [vmem:[%s13848_s1 + $0x1fa0] sm:$0xff]  ;;  %6606 = vmatprep.subr.bf16.mxu0 %v9614_v49  ;;  %6647 = vmatprep.subr.bf16.mxu1 %v9742_v50 }
  0xea   :  { %v9734_v61 = vcombine.high %v1050_v54, %v1054_v10  ;;  %v914_v62 = vld [vmem:[%s13848_s1 + $0x1b40] sm:$0xff]  ;;  %v9733_v5 = vcombine.low %v1050_v54, %v1054_v10 }
  0xeb   :  { %v918_v0 = vld [vmem:[%s13848_s1 + $0x1b60] sm:$0xff] }
  0xec   :  { %v1042_v1 = vld [vmem:[%s13848_s1 + $0x1f40] sm:$0xff]  ;;  %6607 = vmatpush2.bf16.msra.mxu0 %v9613_v57  ;;  %6648 = vmatpush2.bf16.msra.mxu1 %v9741_v58  ;;  %v9598_v6 = vcombine.high %v914_v62, %v918_v0  ;;  %v9597_v14 = vcombine.low %v914_v62, %v918_v0  ;;  %v99_v0 = vld [vmem:[%s13848_s1 + $0x1c8] sm:$0xff] }
  0xed   :  { %v1046_v2 = vld [vmem:[%s13848_s1 + $0x1f60] sm:$0xff]  ;;  %6608 = vmatprep.subr.bf16.mxu0 %v9606_v60  ;;  %6649 = vmatprep.subr.bf16.mxu1 %v9734_v61 }
  0xee   :  { %v9726_v24 = vcombine.high %v1042_v1, %v1046_v2  ;;  %v906_v7 = vld [vmem:[%s13848_s1 + $0x1b00] sm:$0xff]  ;;  %v9725_v15 = vcombine.low %v1042_v1, %v1046_v2  ;;  %v103_v1 = vld [vmem:[%s13848_s1 + $0x1e8] sm:$0xff] }
  0xef   :  { %v910_v8 = vld [vmem:[%s13848_s1 + $0x1b20] sm:$0xff]  ;;  %v227_v2 = vld [vmem:[%s13848_s1 + $0x5c8] sm:$0xff] }
  0xf0   :  { %v1034_v11 = vld [vmem:[%s13848_s1 + $0x1f00] sm:$0xff]  ;;  %6609 = vmatpush2.bf16.msra.mxu0 %v9605_v4  ;;  %6650 = vmatpush2.bf16.msra.mxu1 %v9733_v5  ;;  %v9590_v16 = vcombine.high %v906_v7, %v910_v8  ;;  %v9589_v25 = vcombine.low %v906_v7, %v910_v8  ;;  %v231_v4 = vld [vmem:[%s13848_s1 + $0x5e8] sm:$0xff] }
  0xf1   :  { %v1038_v12 = vld [vmem:[%s13848_s1 + $0x1f20] sm:$0xff]  ;;  %6610 = vmatprep.subr.bf16.mxu0 %v9598_v6  ;;  %6651 = vmatprep.subr.bf16.mxu1 %v9726_v24  ;;  %v1070_v6 = vsub.s32 0, %v10269_v43  ;;  %v11093_v24 = vrot.slane %v10863_v59, %v10284_v53  ;;  %v95_v53 = vld [vmem:[%s13848_s1 + $0x1a8] sm:$0xff] }
  0xf2   :  { %v9718_v17 = vcombine.high %v1034_v11, %v1038_v12  ;;  %v898_v18 = vld [vmem:[%s13848_s1 + $0x1ac0] sm:$0xff]  ;;  %v9717_v26 = vcombine.low %v1034_v11, %v1038_v12  ;;  %v8784_v11 = vcombine.high %v99_v0, %v103_v1  ;;  %v8912_v12 = vcombine.high %v227_v2, %v231_v4  ;;  %v219_v59 = vld [vmem:[%s13848_s1 + $0x588] sm:$0xff] }
  0xf3   :  { %v902_v19 = vld [vmem:[%s13848_s1 + $0x1ae0] sm:$0xff] }
  0xf4   :  { %v1026_v20 = vld [vmem:[%s13848_s1 + $0x1ec0] sm:$0xff]  ;;  %6611 = vmatpush2.bf16.msra.mxu0 %v9597_v14  ;;  %6652 = vmatpush2.bf16.msra.mxu1 %v9725_v15  ;;  %v9582_v27 = vcombine.high %v898_v18, %v902_v19  ;;  %v9581_v36 = vcombine.low %v898_v18, %v902_v19  ;;  %v1074_v14 = vsub.s32 1, %v10269_v43  ;;  %v91_v15 = vld [vmem:[%s13848_s1 + $0x188] sm:$0xff]  ;;  %v11113_v18 = vcombine.high %v11093_v24, %v11093_v24 }
  0xf5   :  { %v1030_v23 = vld [vmem:[%s13848_s1 + $0x1ee0] sm:$0xff]  ;;  %6612 = vmatprep.subr.bf16.mxu0 %v9590_v16  ;;  %6653 = vmatprep.subr.bf16.mxu1 %v9718_v17  ;;  %v223_v16 = vld [vmem:[%s13848_s1 + $0x5a8] sm:$0xff]  ;;  %v8783_v19 = vcombine.low %v99_v0, %v103_v1 }
  0xf6   :  { %v9710_v28 = vcombine.high %v1026_v20, %v1030_v23  ;;  %v890_v63 = vld [vmem:[%s13848_s1 + $0x1a80] sm:$0xff]  ;;  %v9709_v37 = vcombine.low %v1026_v20, %v1030_v23  ;;  %v8911_v20 = vcombine.low %v227_v2, %v231_v4  ;;  %v8776_v23 = vcombine.high %v91_v15, %v95_v53  ;;  %v67_v2 = vld [vmem:[%s13848_s1 + $0xc8] sm:$0xff] }
  0xf7   :  { %v894_v34 = vld [vmem:[%s13848_s1 + $0x1aa0] sm:$0xff]  ;;  %v71_v4 = vld [vmem:[%s13848_s1 + $0xe8] sm:$0xff] }
  0xf8   :  { %v1018_v33 = vld [vmem:[%s13848_s1 + $0x1e80] sm:$0xff]  ;;  %6613 = vmatpush2.bf16.msra.mxu0 %v9589_v25  ;;  %6654 = vmatpush2.bf16.msra.mxu1 %v9717_v26  ;;  %v9574_v38 = vcombine.high %v890_v63, %v894_v34  ;;  %v9573_v48 = vcombine.low %v890_v63, %v894_v34  ;;  %v8904_v26 = vcombine.high %v219_v59, %v223_v16  ;;  %v211_v34 = vld [vmem:[%s13848_s1 + $0x548] sm:$0xff] }
  0xf9   :  { %v1022_v35 = vld [vmem:[%s13848_s1 + $0x1ea0] sm:$0xff]  ;;  %6614 = vmatprep.subr.bf16.mxu0 %v9582_v27  ;;  %6655 = vmatprep.subr.bf16.mxu1 %v9710_v28  ;;  %v83_v27 = vld [vmem:[%s13848_s1 + $0x148] sm:$0xff] }
  0xfa   :  { %v9702_v40 = vcombine.high %v1018_v33, %v1022_v35  ;;  %v882_v41 = vld [vmem:[%s13848_s1 + $0x1a40] sm:$0xff]  ;;  %v9701_v49 = vcombine.low %v1018_v33, %v1022_v35  ;;  %v87_v28 = vld [vmem:[%s13848_s1 + $0x168] sm:$0xff] }
  0xfb   :  { %v886_v42 = vld [vmem:[%s13848_s1 + $0x1a60] sm:$0xff]  ;;  %v215_v33 = vld [vmem:[%s13848_s1 + $0x568] sm:$0xff] }
  0xfc   :  { %v1010_v45 = vld [vmem:[%s13848_s1 + $0x1e40] sm:$0xff]  ;;  %6615 = vmatpush2.bf16.msra.mxu0 %v9581_v36  ;;  %6656 = vmatpush2.bf16.msra.mxu1 %v9709_v37  ;;  %v9566_v50 = vcombine.high %v882_v41, %v886_v42  ;;  %v9565_v58 = vcombine.low %v882_v41, %v886_v42  ;;  %v8775_v37 = vcombine.low %v91_v15, %v95_v53  ;;  %v63_v15 = vld [vmem:[%s13848_s1 + $0xa8] sm:$0xff] }
  0xfd   :  { %v1014_v46 = vld [vmem:[%s13848_s1 + $0x1e60] sm:$0xff]  ;;  %6616 = vmatprep.subr.bf16.mxu0 %v9574_v38  ;;  %6657 = vmatprep.subr.bf16.mxu1 %v9702_v40  ;;  %v8903_v40 = vcombine.low %v219_v59, %v223_v16  ;;  %v8768_v41 = vcombine.high %v83_v27, %v87_v28  ;;  %v187_v53 = vld [vmem:[%s13848_s1 + $0x488] sm:$0xff]  ;;  %v8751_v16 = vcombine.low %v67_v2, %v71_v4 }
  0xfe   :  { %v9694_v51 = vcombine.high %v1010_v45, %v1014_v46  ;;  %v874_v52 = vld [vmem:[%s13848_s1 + $0x1a00] sm:$0xff]  ;;  %v9693_v60 = vcombine.low %v1010_v45, %v1014_v46  ;;  %v191_v59 = vld [vmem:[%s13848_s1 + $0x4a8] sm:$0xff] }
  0xff   :  { %v878_v54 = vld [vmem:[%s13848_s1 + $0x1a20] sm:$0xff] }
 0x100   :  { %v1002_v10 = vld [vmem:[%s13848_s1 + $0x1e00] sm:$0xff]  ;;  %6617 = vmatpush2.bf16.msra.mxu0 %v9573_v48  ;;  %6658 = vmatpush2.bf16.msra.mxu1 %v9701_v49  ;;  %v9558_v61 = vcombine.high %v874_v52, %v878_v54  ;;  %v9557_v5 = vcombine.low %v874_v52, %v878_v54  ;;  %v8896_v48 = vcombine.high %v211_v34, %v215_v33  ;;  %v75_v49 = vld [vmem:[%s13848_s1 + $0x108] sm:$0xff] }
 0x101   :  { %v1006_v57 = vld [vmem:[%s13848_s1 + $0x1e20] sm:$0xff]  ;;  %6618 = vmatprep.subr.bf16.mxu0 %v9566_v50  ;;  %6659 = vmatprep.subr.bf16.mxu1 %v9694_v51  ;;  %v79_v50 = vld [vmem:[%s13848_s1 + $0x128] sm:$0xff] }
 0x102   :  { %v9686_v62 = vcombine.high %v1002_v10, %v1006_v57  ;;  %v9685_v7 = vcombine.low %v1002_v10, %v1006_v57  ;;  %v1066_v8 = vld [vmem:[%s13849_s2] sm:$0xff]  ;;  %v203_v52 = vld [vmem:[%s13848_s1 + $0x508] sm:$0xff] }
 0x103   :  { %v1071_v17 = vrot.slane %v1066_v8, %v1070_v6  ;;  %v1075_v25 = vrot.slane %v1066_v8, %v1074_v14  ;;  %v207_v54 = vld [vmem:[%s13848_s1 + $0x528] sm:$0xff] }
 0x104   :  { %6619 = vmatpush2.bf16.msra.mxu0 %v9565_v58  ;;  %6660 = vmatpush2.bf16.msra.mxu1 %v9693_v60  ;;  %v8767_v58 = vcombine.low %v83_v27, %v87_v28  ;;  %v8888_v1 = vcombine.high %v203_v52, %v207_v54  ;;  %v199_v6 = vld [vmem:[%s13848_s1 + $0x4e8] sm:$0xff]  ;;  %v8887_v8 = vcombine.low %v203_v52, %v207_v54 }
 0x105   :  { %6620 = vmatprep.subr.bf16.mxu0 %v9558_v61  ;;  %6661 = vmatprep.subr.bf16.mxu1 %v9686_v62  ;;  %v8895_v61 = vcombine.low %v211_v34, %v215_v33  ;;  %v8760_v62 = vcombine.high %v75_v49, %v79_v50  ;;  %v59_v14 = vld [vmem:[%s13848_s1 + $0x88] sm:$0xff] }
 0x106   :  { %v6378_v63 = vpop.f32.mrf.mxu0  ;;  %v183_v27 = vld [vmem:[%s13848_s1 + $0x468] sm:$0xff]  ;;  %v8743_v28 = vcombine.low %v59_v14, %v63_v15 }
 0x107   :  { %v6379_v35 = vadd.f32 %v6378_v63, %v1071_v17  ;;  %v8871_v63 = vcombine.low %v187_v53, %v191_v59 }
 0x108   :  { %6621 = vmatpush2.bf16.msra.mxu0 %v9557_v5  ;;  %6662 = vmatpush2.bf16.msra.mxu1 %v9685_v7  ;;  %v6419_v36 = vpop.f32.mrf.mxu1  ;;  %v6380_v38 = vpop.f32.mrf.mxu0  ;;  %v195_v5 = vld [vmem:[%s13848_s1 + $0x4c8] sm:$0xff]  ;;  %v8759_v7 = vcombine.low %v75_v49, %v79_v50 }
 0x109   :  { %6672 = vmatprep.subr.bf16.mxu0 %v8784_v11  ;;  %6713 = vmatprep.subr.bf16.mxu1 %v8912_v12  ;;  %v11129_v42 = vadd.f32 %v6419_v36, %v6379_v35  ;;  %v6381_v45 = vadd.f32 %v6380_v38, %v1075_v25  ;;  %v8752_v11 = vcombine.high %v67_v2, %v71_v4  ;;  %v55_v25 = vld [vmem:[%s13848_s1 + $0x68] sm:$0xff] }
 0x10a   :  { %v6421_v46 = vpop.f32.mrf.mxu1  ;;  %v6382_v51 = vpop.f32.mrf.mxu0  ;;  %v8880_v12 = vcombine.high %v195_v5, %v199_v6  ;;  %v8879_v17 = vcombine.low %v195_v5, %v199_v6  ;;  %v43_v35 = vld [vmem:[%s13848_s1 + $0x8] sm:$0xff] }
 0x10b   :  { %6623 = vmatmul.mubr.bf16.vlgmr.msra.gmra.mxu0 %v11093_v24  ;;  %6664 = vmatmul.mubr.bf16.vlgmr.msra.gmra.mxu1 %v11113_v18  ;;  %v11145_v10 = vadd.f32 %v6421_v46, %v6381_v45  ;;  %v47_v36 = vld [vmem:[%s13848_s1 + $0x28] sm:$0xff] }
 0x10c   :  { %6673 = vmatpush1.bf16.msra.mxu0 %v8783_v19  ;;  %6714 = vmatpush1.bf16.msra.mxu1 %v8911_v20  ;;  %v6423_v57 = vpop.f32.mrf.mxu1  ;;  %v6383_v60 = vpop.f32.mrf.mxu0  ;;  %v8744_v19 = vcombine.high %v59_v14, %v63_v15  ;;  %v8872_v20 = vcombine.high %v187_v53, %v191_v59  ;;  %v175_v38 = vld [vmem:[%s13848_s1 + $0x428] sm:$0xff]  ;;  %v8728_v45 = vcombine.high %v43_v35, %v47_v36 }
 0x10d   :  { %6674 = vmatprep.subr.bf16.mxu0 %v8776_v23  ;;  %6715 = vmatprep.subr.bf16.mxu1 %v8904_v26  ;;  %v51_v23 = vld [vmem:[%s13848_s1 + $0x48] sm:$0xff]  ;;  %v8727_v52 = vcombine.low %v43_v35, %v47_v36 }
 0x10e   :  { %6704 = vmatprep.mubr.bf16.mxu0 %v10322_v9  ;;  %6745 = vmatprep.mubr.bf16.mxu1 %v10333_v13  ;;  %v6424_v0 = vpop.f32.mrf.mxu1  ;;  %v179_v26 = vld [vmem:[%s13848_s1 + $0x448] sm:$0xff]  ;;  %v8736_v34 = vcombine.high %v51_v23, %v55_v25 }
 0x10f   :  { %v8864_v33 = vcombine.high %v179_v26, %v183_v27  ;;  %v167_v49 = vld [vmem:[%s13848_s1 + $0x3e8] sm:$0xff] }
 0x110   :  { %6675 = vmatpush1.bf16.msra.mxu0 %v8775_v37  ;;  %6716 = vmatpush1.bf16.msra.mxu1 %v8903_v40  ;;  %v171_v37 = vld [vmem:[%s13848_s1 + $0x408] sm:$0xff]  ;;  %v8735_v40 = vcombine.low %v51_v23, %v55_v25 }
 0x111   :  { %6676 = vmatprep.subr.bf16.mxu0 %v8768_v41  ;;  %6717 = vmatprep.subr.bf16.mxu1 %v8896_v48  ;;  %v8863_v41 = vcombine.low %v179_v26, %v183_v27  ;;  %v8856_v46 = vcombine.high %v171_v37, %v175_v38  ;;  %v163_v48 = vld [vmem:[%s13848_s1 + $0x3c8] sm:$0xff]  ;;  %v8855_v54 = vcombine.low %v171_v37, %v175_v38 }
 0x112   :  { %v291_v50 = vld [vmem:[%s13848_s1 + $0x7c8] sm:$0xff]  ;;  %v8848_v57 = vcombine.high %v163_v48, %v167_v49 }
 0x113   :  { %v295_v51 = vld [vmem:[%s13848_s1 + $0x7e8] sm:$0xff] }
 0x114   :  { %6677 = vmatpush1.bf16.msra.mxu0 %v8767_v58  ;;  %6718 = vmatpush1.bf16.msra.mxu1 %v8895_v61  ;;  %v8976_v58 = vcombine.high %v291_v50, %v295_v51  ;;  %v155_v60 = vld [vmem:[%s13848_s1 + $0x388] sm:$0xff]  ;;  %v8975_v2 = vcombine.low %v291_v50, %v295_v51 }
 0x115   :  { %6678 = vmatprep.subr.bf16.mxu0 %v8760_v62  ;;  %6719 = vmatprep.subr.bf16.mxu1 %v8888_v1  ;;  %v159_v61 = vld [vmem:[%s13848_s1 + $0x3a8] sm:$0xff]  ;;  %v8847_v1 = vcombine.low %v163_v48, %v167_v49 }
 0x116   :  { %v283_v62 = vld [vmem:[%s13848_s1 + $0x788] sm:$0xff]  ;;  %v8840_v4 = vcombine.high %v155_v60, %v159_v61 }
 0x117   :  { %v287_v0 = vld [vmem:[%s13848_s1 + $0x7a8] sm:$0xff] }
 0x118   :  { %6679 = vmatpush1.bf16.msra.mxu0 %v8759_v7  ;;  %6720 = vmatpush1.bf16.msra.mxu1 %v8887_v8  ;;  %v8968_v5 = vcombine.high %v283_v62, %v287_v0  ;;  %v147_v6 = vld [vmem:[%s13848_s1 + $0x348] sm:$0xff]  ;;  %v8967_v14 = vcombine.low %v283_v62, %v287_v0 }
 0x119   :  { %6680 = vmatprep.subr.bf16.mxu0 %v8752_v11  ;;  %6721 = vmatprep.subr.bf16.mxu1 %v8880_v12  ;;  %v151_v7 = vld [vmem:[%s13848_s1 + $0x368] sm:$0xff]  ;;  %v8839_v12 = vcombine.low %v155_v60, %v159_v61 }
 0x11a   :  { %v275_v8 = vld [vmem:[%s13848_s1 + $0x748] sm:$0xff]  ;;  %v8832_v15 = vcombine.high %v147_v6, %v151_v7 }
 0x11b   :  { %v279_v11 = vld [vmem:[%s13848_s1 + $0x768] sm:$0xff] }
 0x11c   :  { %6681 = vmatpush1.bf16.msra.mxu0 %v8751_v16  ;;  %6722 = vmatpush1.bf16.msra.mxu1 %v8879_v17  ;;  %v8960_v53 = vcombine.high %v275_v8, %v279_v11  ;;  %v139_v59 = vld [vmem:[%s13848_s1 + $0x308] sm:$0xff]  ;;  %v8959_v23 = vcombine.low %v275_v8, %v279_v11 }
 0x11d   :  { %6682 = vmatprep.subr.bf16.mxu0 %v8744_v19  ;;  %6723 = vmatprep.subr.bf16.mxu1 %v8872_v20  ;;  %v143_v16 = vld [vmem:[%s13848_s1 + $0x328] sm:$0xff]  ;;  %v8831_v20 = vcombine.low %v147_v6, %v151_v7 }
 0x11e   :  { %v267_v17 = vld [vmem:[%s13848_s1 + $0x708] sm:$0xff]  ;;  %v8824_v25 = vcombine.high %v139_v59, %v143_v16 }
 0x11f   :  { %v271_v19 = vld [vmem:[%s13848_s1 + $0x728] sm:$0xff] }
 0x120   :  { %6683 = vmatpush1.bf16.msra.mxu0 %v8743_v28  ;;  %6724 = vmatpush1.bf16.msra.mxu1 %v8871_v63  ;;  %v8952_v26 = vcombine.high %v267_v17, %v271_v19  ;;  %v131_v27 = vld [vmem:[%s13848_s1 + $0x2c8] sm:$0xff]  ;;  %v8951_v35 = vcombine.low %v267_v17, %v271_v19 }
 0x121   :  { %6684 = vmatprep.subr.bf16.mxu0 %v8736_v34  ;;  %6725 = vmatprep.subr.bf16.mxu1 %v8864_v33  ;;  %v135_v28 = vld [vmem:[%s13848_s1 + $0x2e8] sm:$0xff]  ;;  %v8823_v33 = vcombine.low %v139_v59, %v143_v16 }
 0x122   :  { %v259_v63 = vld [vmem:[%s13848_s1 + $0x6c8] sm:$0xff]  ;;  %v8816_v36 = vcombine.high %v131_v27, %v135_v28 }
 0x123   :  { %v263_v34 = vld [vmem:[%s13848_s1 + $0x6e8] sm:$0xff] }
 0x124   :  { %6685 = vmatpush1.bf16.msra.mxu0 %v8735_v40  ;;  %6726 = vmatpush1.bf16.msra.mxu1 %v8863_v41  ;;  %v8944_v37 = vcombine.high %v259_v63, %v263_v34  ;;  %v123_v38 = vld [vmem:[%s13848_s1 + $0x288] sm:$0xff]  ;;  %v8943_v48 = vcombine.low %v259_v63, %v263_v34 }
 0x125   :  { %6686 = vmatprep.subr.bf16.mxu0 %v8728_v45  ;;  %6727 = vmatprep.subr.bf16.mxu1 %v8856_v46  ;;  %v127_v40 = vld [vmem:[%s13848_s1 + $0x2a8] sm:$0xff]  ;;  %v8815_v46 = vcombine.low %v131_v27, %v135_v28 }
 0x126   :  { %v251_v41 = vld [vmem:[%s13848_s1 + $0x688] sm:$0xff]  ;;  %v8808_v49 = vcombine.high %v123_v38, %v127_v40 }
 0x127   :  { %v255_v45 = vld [vmem:[%s13848_s1 + $0x6a8] sm:$0xff] }
 0x128   :  { %6687 = vmatpush1.bf16.msra.mxu0 %v8727_v52  ;;  %6728 = vmatpush1.bf16.msra.mxu1 %v8855_v54  ;;  %v8936_v50 = vcombine.high %v251_v41, %v255_v45  ;;  %v115_v51 = vld [vmem:[%s13848_s1 + $0x248] sm:$0xff]  ;;  %v8935_v60 = vcombine.low %v251_v41, %v255_v45 }
 0x129   :  { %6688 = vmatprep.subr.bf16.mxu0 %v8848_v57  ;;  %6729 = vmatprep.subr.bf16.mxu1 %v8976_v58  ;;  %v119_v52 = vld [vmem:[%s13848_s1 + $0x268] sm:$0xff]  ;;  %v8807_v58 = vcombine.low %v123_v38, %v127_v40 }
 0x12a   :  { %v243_v54 = vld [vmem:[%s13848_s1 + $0x648] sm:$0xff]  ;;  %v8800_v61 = vcombine.high %v115_v51, %v119_v52 }
 0x12b   :  { %v247_v57 = vld [vmem:[%s13848_s1 + $0x668] sm:$0xff] }
 0x12c   :  { %6689 = vmatpush2.bf16.msra.mxu0 %v8847_v1  ;;  %6730 = vmatpush2.bf16.msra.mxu1 %v8975_v2  ;;  %v8928_v62 = vcombine.high %v243_v54, %v247_v57  ;;  %v107_v0 = vld [vmem:[%s13848_s1 + $0x208] sm:$0xff]  ;;  %v8927_v6 = vcombine.low %v243_v54, %v247_v57 }
 0x12d   :  { %6690 = vmatprep.subr.bf16.mxu0 %v8840_v4  ;;  %6731 = vmatprep.subr.bf16.mxu1 %v8968_v5  ;;  %v111_v1 = vld [vmem:[%s13848_s1 + $0x228] sm:$0xff]  ;;  %v8799_v5 = vcombine.low %v115_v51, %v119_v52 }
 0x12e   :  { %v235_v2 = vld [vmem:[%s13848_s1 + $0x608] sm:$0xff]  ;;  %v8792_v7 = vcombine.high %v107_v0, %v111_v1 }
 0x12f   :  { %v239_v4 = vld [vmem:[%s13848_s1 + $0x628] sm:$0xff] }
 0x130   :  { %6691 = vmatpush2.bf16.msra.mxu0 %v8839_v12  ;;  %6732 = vmatpush2.bf16.msra.mxu1 %v8967_v14  ;;  %v8920_v8 = vcombine.high %v235_v2, %v239_v4  ;;  %v355_v11 = vld [vmem:[%s13848_s1 + $0x9c8] sm:$0xff]  ;;  %v8919_v59 = vcombine.low %v235_v2, %v239_v4 }
 0x131   :  { %6692 = vmatprep.subr.bf16.mxu0 %v8832_v15  ;;  %6733 = vmatprep.subr.bf16.mxu1 %v8960_v53  ;;  %v359_v12 = vld [vmem:[%s13848_s1 + $0x9e8] sm:$0xff]  ;;  %v8791_v53 = vcombine.low %v107_v0, %v111_v1 }
 0x132   :  { %v483_v14 = vld [vmem:[%s13848_s1 + $0xdc8] sm:$0xff]  ;;  %v9040_v16 = vcombine.high %v355_v11, %v359_v12 }
 0x133   :  { %v487_v15 = vld [vmem:[%s13848_s1 + $0xde8] sm:$0xff] }
 0x134   :  { %6693 = vmatpush2.bf16.msra.mxu0 %v8831_v20  ;;  %6734 = vmatpush2.bf16.msra.mxu1 %v8959_v23  ;;  %v9168_v17 = vcombine.high %v483_v14, %v487_v15  ;;  %v347_v19 = vld [vmem:[%s13848_s1 + $0x988] sm:$0xff]  ;;  %v9167_v27 = vcombine.low %v483_v14, %v487_v15 }
 0x135   :  { %6694 = vmatprep.subr.bf16.mxu0 %v8824_v25  ;;  %6735 = vmatprep.subr.bf16.mxu1 %v8952_v26  ;;  %v351_v20 = vld [vmem:[%s13848_s1 + $0x9a8] sm:$0xff]  ;;  %v9039_v26 = vcombine.low %v355_v11, %v359_v12 }
 0x136   :  { %v475_v23 = vld [vmem:[%s13848_s1 + $0xd88] sm:$0xff]  ;;  %v9032_v28 = vcombine.high %v347_v19, %v351_v20  ;;  %v9031_v41 = vcombine.low %v347_v19, %v351_v20 }
 0x137   :  { %v479_v25 = vld [vmem:[%s13848_s1 + $0xda8] sm:$0xff] }
 0x138   :  { %6695 = vmatpush2.bf16.msra.mxu0 %v8823_v33  ;;  %6736 = vmatpush2.bf16.msra.mxu1 %v8951_v35  ;;  %v9160_v63 = vcombine.high %v475_v23, %v479_v25  ;;  %v339_v34 = vld [vmem:[%s13848_s1 + $0x948] sm:$0xff] }
 0x139   :  { %6696 = vmatprep.subr.bf16.mxu0 %v8816_v36  ;;  %6737 = vmatprep.subr.bf16.mxu1 %v8944_v37  ;;  %v343_v33 = vld [vmem:[%s13848_s1 + $0x968] sm:$0xff] }
 0x13a   :  { %v467_v36 = vld [vmem:[%s13848_s1 + $0xd48] sm:$0xff] }
 0x13b   :  { %v471_v37 = vld [vmem:[%s13848_s1 + $0xd68] sm:$0xff] }
 0x13c   :  { %6697 = vmatpush2.bf16.msra.mxu0 %v8815_v46  ;;  %6738 = vmatpush2.bf16.msra.mxu1 %v8943_v48  ;;  %v9159_v46 = vcombine.low %v475_v23, %v479_v25  ;;  %v9024_v48 = vcombine.high %v339_v34, %v343_v33  ;;  %v9152_v52 = vcombine.high %v467_v36, %v471_v37  ;;  %v335_v54 = vld [vmem:[%s13848_s1 + $0x928] sm:$0xff] }
 0x13d   :  { %6698 = vmatprep.subr.bf16.mxu0 %v8808_v49  ;;  %6739 = vmatprep.subr.bf16.mxu1 %v8936_v50  ;;  %v9151_v1 = vcombine.low %v467_v36, %v471_v37  ;;  %v455_v11 = vld [vmem:[%s13848_s1 + $0xce8] sm:$0xff] }
 0x13e   :  { %v447_v19 = vld [vmem:[%s13848_s1 + $0xca8] sm:$0xff] }
 0x140   :  { %6699 = vmatpush2.bf16.msra.mxu0 %v8807_v58  ;;  %6740 = vmatpush2.bf16.msra.mxu1 %v8935_v60  ;;  %v459_v58 = vld [vmem:[%s13848_s1 + $0xd08] sm:$0xff] }
 0x141   :  { %6700 = vmatprep.subr.bf16.mxu0 %v8800_v61  ;;  %6741 = vmatprep.subr.bf16.mxu1 %v8928_v62  ;;  %v9023_v62 = vcombine.low %v339_v34, %v343_v33  ;;  %v439_v34 = vld [vmem:[%s13848_s1 + $0xc68] sm:$0xff] }
 0x144   :  { %6701 = vmatpush2.bf16.msra.mxu0 %v8799_v5  ;;  %6742 = vmatpush2.bf16.msra.mxu1 %v8927_v6  ;;  %v323_v6 = vld [vmem:[%s13848_s1 + $0x8c8] sm:$0xff] }
 0x145   :  { %6702 = vmatprep.subr.bf16.mxu0 %v8792_v7  ;;  %6743 = vmatprep.subr.bf16.mxu1 %v8920_v8  ;;  %v327_v7 = vld [vmem:[%s13848_s1 + $0x8e8] sm:$0xff] }
 0x146   :  { %v6460_v35 = vpop.f32.mrf.mxu0  ;;  %v451_v8 = vld [vmem:[%s13848_s1 + $0xcc8] sm:$0xff]  ;;  %v9008_v15 = vcombine.high %v323_v6, %v327_v7  ;;  %v9007_v20 = vcombine.low %v323_v6, %v327_v7 }
 0x147   :  { %v6461_v38 = vadd.f32 %v6460_v35, %v11129_v42  ;;  %v331_v42 = vld [vmem:[%s13848_s1 + $0x908] sm:$0xff]  ;;  %v9135_v23 = vcombine.low %v451_v8, %v455_v11 }
 0x148   :  { %6703 = vmatpush2.bf16.msra.mxu0 %v8791_v53  ;;  %6744 = vmatpush2.bf16.msra.mxu1 %v8919_v59  ;;  %v6501_v40 = vpop.f32.mrf.mxu1  ;;  %v6462_v45 = vpop.f32.mrf.mxu0  ;;  %v9016_v2 = vcombine.high %v331_v42, %v335_v54  ;;  %v9015_v12 = vcombine.low %v331_v42, %v335_v54  ;;  %v9136_v53 = vcombine.high %v451_v8, %v455_v11  ;;  %v315_v59 = vld [vmem:[%s13848_s1 + $0x888] sm:$0xff] }
 0x149   :  { %6754 = vmatprep.subr.bf16.mxu0 %v9040_v16  ;;  %6795 = vmatprep.subr.bf16.mxu1 %v9168_v17  ;;  %v11330_v49 = vadd.f32 %v6501_v40, %v6461_v38  ;;  %v6463_v50 = vadd.f32 %v6462_v45, %v11145_v10  ;;  %v463_v10 = vld [vmem:[%s13848_s1 + $0xd28] sm:$0xff] }
 0x14a   :  { %v6503_v51 = vpop.f32.mrf.mxu1  ;;  %v6464_v57 = vpop.f32.mrf.mxu0  ;;  %v9144_v5 = vcombine.high %v459_v58, %v463_v10  ;;  %v9143_v14 = vcombine.low %v459_v58, %v463_v10  ;;  %v319_v16 = vld [vmem:[%s13848_s1 + $0x8a8] sm:$0xff] }
 0x14b   :  { %6705 = vmatmul.mubr.bf16.vlgmr.msra.gmra.mxu0 %v10441_v22  ;;  %6746 = vmatmul.mubr.bf16.vlgmr.msra.gmra.mxu1 %v10460_v30  ;;  %v11347_v60 = vadd.f32 %v6503_v51, %v6463_v50  ;;  %v443_v17 = vld [vmem:[%s13848_s1 + $0xc88] sm:$0xff]  ;;  %v9000_v25 = vcombine.high %v315_v59, %v319_v16  ;;  %v8999_v33 = vcombine.low %v315_v59, %v319_v16 }
 0x14c   :  { %6755 = vmatpush1.bf16.msra.mxu0 %v9039_v26  ;;  %6796 = vmatpush1.bf16.msra.mxu1 %v9167_v27  ;;  %v6505_v61 = vpop.f32.mrf.mxu1  ;;  %v6465_v0 = vpop.f32.mrf.mxu0  ;;  %v9128_v26 = vcombine.high %v443_v17, %v447_v19  ;;  %v307_v27 = vld [vmem:[%s13848_s1 + $0x848] sm:$0xff]  ;;  %v9127_v35 = vcombine.low %v443_v17, %v447_v19 }
 0x14d   :  { %6756 = vmatprep.subr.bf16.mxu0 %v9032_v28  ;;  %6797 = vmatprep.subr.bf16.mxu1 %v9160_v63  ;;  %v311_v28 = vld [vmem:[%s13848_s1 + $0x868] sm:$0xff] }
 0x14e   :  { %6786 = vmatprep.mubr.bf16.mxu0 %v10456_v29  ;;  %6827 = vmatprep.mubr.bf16.mxu1 %v10477_v39  ;;  %v6506_v4 = vpop.f32.mrf.mxu1  ;;  %v435_v63 = vld [vmem:[%s13848_s1 + $0xc48] sm:$0xff]  ;;  %v8992_v36 = vcombine.high %v307_v27, %v311_v28 }
 0x14f   :  { %v9120_v37 = vcombine.high %v435_v63, %v439_v34  ;;  %v299_v38 = vld [vmem:[%s13848_s1 + $0x808] sm:$0xff] }
 0x150   :  { %6757 = vmatpush1.bf16.msra.mxu0 %v9031_v41  ;;  %6798 = vmatpush1.bf16.msra.mxu1 %v9159_v46  ;;  %v303_v40 = vld [vmem:[%s13848_s1 + $0x828] sm:$0xff]  ;;  %v8991_v46 = vcombine.low %v307_v27, %v311_v28 }
 0x151   :  { %6758 = vmatprep.subr.bf16.mxu0 %v9024_v48  ;;  %6799 = vmatprep.subr.bf16.mxu1 %v9152_v52  ;;  %v427_v41 = vld [vmem:[%s13848_s1 + $0xc08] sm:$0xff]  ;;  %v9119_v48 = vcombine.low %v435_v63, %v439_v34  ;;  %v8984_v50 = vcombine.high %v299_v38, %v303_v40  ;;  %v8983_v58 = vcombine.low %v299_v38, %v303_v40 }
 0x152   :  { %v431_v45 = vld [vmem:[%s13848_s1 + $0xc28] sm:$0xff] }
 0x153   :  { %v9112_v51 = vcombine.high %v427_v41, %v431_v45  ;;  %v419_v52 = vld [vmem:[%s13848_s1 + $0xbc8] sm:$0xff]  ;;  %v9111_v10 = vcombine.low %v427_v41, %v431_v45 }
 0x154   :  { %6759 = vmatpush1.bf16.msra.mxu0 %v9023_v62  ;;  %6800 = vmatpush1.bf16.msra.mxu1 %v9151_v1  ;;  %v423_v42 = vld [vmem:[%s13848_s1 + $0xbe8] sm:$0xff] }
 0x155   :  { %6760 = vmatprep.subr.bf16.mxu0 %v9016_v2  ;;  %6801 = vmatprep.subr.bf16.mxu1 %v9144_v5  ;;  %v547_v54 = vld [vmem:[%s13848_s1 + $0xfc8] sm:$0xff]  ;;  %v9104_v61 = vcombine.high %v419_v52, %v423_v42  ;;  %v9103_v5 = vcombine.low %v419_v52, %v423_v42 }
 0x156   :  { %v551_v57 = vld [vmem:[%s13848_s1 + $0xfe8] sm:$0xff] }
 0x157   :  { %v9232_v62 = vcombine.high %v547_v54, %v551_v57  ;;  %v411_v0 = vld [vmem:[%s13848_s1 + $0xb88] sm:$0xff]  ;;  %v9231_v6 = vcombine.low %v547_v54, %v551_v57 }
 0x158   :  { %6761 = vmatpush1.bf16.msra.mxu0 %v9015_v12  ;;  %6802 = vmatpush1.bf16.msra.mxu1 %v9143_v14  ;;  %v415_v1 = vld [vmem:[%s13848_s1 + $0xba8] sm:$0xff] }
 0x159   :  { %6762 = vmatprep.subr.bf16.mxu0 %v9008_v15  ;;  %6803 = vmatprep.subr.bf16.mxu1 %v9136_v53  ;;  %v539_v2 = vld [vmem:[%s13848_s1 + $0xf88] sm:$0xff]  ;;  %v9096_v7 = vcombine.high %v411_v0, %v415_v1  ;;  %v9095_v53 = vcombine.low %v411_v0, %v415_v1 }
 0x15a   :  { %v543_v4 = vld [vmem:[%s13848_s1 + $0xfa8] sm:$0xff] }
 0x15b   :  { %v9224_v8 = vcombine.high %v539_v2, %v543_v4  ;;  %v403_v11 = vld [vmem:[%s13848_s1 + $0xb48] sm:$0xff]  ;;  %v9223_v59 = vcombine.low %v539_v2, %v543_v4 }
 0x15c   :  { %6763 = vmatpush1.bf16.msra.mxu0 %v9007_v20  ;;  %6804 = vmatpush1.bf16.msra.mxu1 %v9135_v23  ;;  %v407_v12 = vld [vmem:[%s13848_s1 + $0xb68] sm:$0xff] }
 0x15d   :  { %6764 = vmatprep.subr.bf16.mxu0 %v9000_v25  ;;  %6805 = vmatprep.subr.bf16.mxu1 %v9128_v26  ;;  %v531_v14 = vld [vmem:[%s13848_s1 + $0xf48] sm:$0xff]  ;;  %v9088_v16 = vcombine.high %v403_v11, %v407_v12  ;;  %v9087_v26 = vcombine.low %v403_v11, %v407_v12 }
 0x15e   :  { %v535_v15 = vld [vmem:[%s13848_s1 + $0xf68] sm:$0xff] }
 0x15f   :  { %v9216_v17 = vcombine.high %v531_v14, %v535_v15  ;;  %v395_v19 = vld [vmem:[%s13848_s1 + $0xb08] sm:$0xff]  ;;  %v9215_v27 = vcombine.low %v531_v14, %v535_v15 }
 0x160   :  { %6765 = vmatpush1.bf16.msra.mxu0 %v8999_v33  ;;  %6806 = vmatpush1.bf16.msra.mxu1 %v9127_v35  ;;  %v399_v20 = vld [vmem:[%s13848_s1 + $0xb28] sm:$0xff] }
 0x161   :  { %6766 = vmatprep.subr.bf16.mxu0 %v8992_v36  ;;  %6807 = vmatprep.subr.bf16.mxu1 %v9120_v37  ;;  %v523_v23 = vld [vmem:[%s13848_s1 + $0xf08] sm:$0xff]  ;;  %v9080_v28 = vcombine.high %v395_v19, %v399_v20  ;;  %v9079_v37 = vcombine.low %v395_v19, %v399_v20 }
 0x162   :  { %v527_v25 = vld [vmem:[%s13848_s1 + $0xf28] sm:$0xff] }
 0x163   :  { %v9208_v63 = vcombine.high %v523_v23, %v527_v25  ;;  %v387_v34 = vld [vmem:[%s13848_s1 + $0xac8] sm:$0xff]  ;;  %v9207_v38 = vcombine.low %v523_v23, %v527_v25 }
 0x164   :  { %6767 = vmatpush1.bf16.msra.mxu0 %v8991_v46  ;;  %6808 = vmatpush1.bf16.msra.mxu1 %v9119_v48  ;;  %v391_v33 = vld [vmem:[%s13848_s1 + $0xae8] sm:$0xff] }
 0x165   :  { %6768 = vmatprep.subr.bf16.mxu0 %v8984_v50  ;;  %6809 = vmatprep.subr.bf16.mxu1 %v9112_v51  ;;  %v515_v35 = vld [vmem:[%s13848_s1 + $0xec8] sm:$0xff]  ;;  %v9072_v40 = vcombine.high %v387_v34, %v391_v33  ;;  %v9071_v51 = vcombine.low %v387_v34, %v391_v33 }
 0x166   :  { %v519_v36 = vld [vmem:[%s13848_s1 + $0xee8] sm:$0xff] }
 0x167   :  { %v9200_v41 = vcombine.high %v515_v35, %v519_v36  ;;  %v379_v45 = vld [vmem:[%s13848_s1 + $0xa88] sm:$0xff]  ;;  %v9199_v52 = vcombine.low %v515_v35, %v519_v36 }
 0x168   :  { %6769 = vmatpush1.bf16.msra.mxu0 %v8983_v58  ;;  %6810 = vmatpush1.bf16.msra.mxu1 %v9111_v10  ;;  %v383_v46 = vld [vmem:[%s13848_s1 + $0xaa8] sm:$0xff] }
 0x169   :  { %6770 = vmatprep.subr.bf16.mxu0 %v9104_v61  ;;  %6811 = vmatprep.subr.bf16.mxu1 %v9232_v62  ;;  %v507_v48 = vld [vmem:[%s13848_s1 + $0xe88] sm:$0xff]  ;;  %v9064_v42 = vcombine.high %v379_v45, %v383_v46  ;;  %v9063_v62 = vcombine.low %v379_v45, %v383_v46 }
 0x16a   :  { %v511_v50 = vld [vmem:[%s13848_s1 + $0xea8] sm:$0xff] }
 0x16b   :  { %v9192_v54 = vcombine.high %v507_v48, %v511_v50  ;;  %v371_v57 = vld [vmem:[%s13848_s1 + $0xa48] sm:$0xff]  ;;  %v9191_v0 = vcombine.low %v507_v48, %v511_v50 }
 0x16c   :  { %6771 = vmatpush2.bf16.msra.mxu0 %v9103_v5  ;;  %6812 = vmatpush2.bf16.msra.mxu1 %v9231_v6  ;;  %v375_v58 = vld [vmem:[%s13848_s1 + $0xa68] sm:$0xff] }
 0x16d   :  { %6772 = vmatprep.subr.bf16.mxu0 %v9096_v7  ;;  %6813 = vmatprep.subr.bf16.mxu1 %v9224_v8  ;;  %v499_v10 = vld [vmem:[%s13848_s1 + $0xe48] sm:$0xff]  ;;  %v9056_v1 = vcombine.high %v371_v57, %v375_v58  ;;  %v9055_v8 = vcombine.low %v371_v57, %v375_v58 }
 0x16e   :  { %v503_v61 = vld [vmem:[%s13848_s1 + $0xe68] sm:$0xff] }
 0x16f   :  { %v9184_v2 = vcombine.high %v499_v10, %v503_v61  ;;  %v363_v4 = vld [vmem:[%s13848_s1 + $0xa08] sm:$0xff]  ;;  %v9183_v11 = vcombine.low %v499_v10, %v503_v61 }
 0x170   :  { %6773 = vmatpush2.bf16.msra.mxu0 %v9095_v53  ;;  %6814 = vmatpush2.bf16.msra.mxu1 %v9223_v59  ;;  %v367_v5 = vld [vmem:[%s13848_s1 + $0xa28] sm:$0xff] }
 0x171   :  { %6774 = vmatprep.subr.bf16.mxu0 %v9088_v16  ;;  %6815 = vmatprep.subr.bf16.mxu1 %v9216_v17  ;;  %v491_v6 = vld [vmem:[%s13848_s1 + $0xe08] sm:$0xff]  ;;  %v9048_v12 = vcombine.high %v363_v4, %v367_v5  ;;  %v9047_v17 = vcombine.low %v363_v4, %v367_v5 }
 0x172   :  { %v495_v7 = vld [vmem:[%s13848_s1 + $0xe28] sm:$0xff] }
 0x173   :  { %v9176_v14 = vcombine.high %v491_v6, %v495_v7  ;;  %v611_v15 = vld [vmem:[%s13848_s1 + $0x11c8] sm:$0xff]  ;;  %v9175_v19 = vcombine.low %v491_v6, %v495_v7 }
 0x174   :  { %6775 = vmatpush2.bf16.msra.mxu0 %v9087_v26  ;;  %6816 = vmatpush2.bf16.msra.mxu1 %v9215_v27  ;;  %v615_v53 = vld [vmem:[%s13848_s1 + $0x11e8] sm:$0xff] }
 0x175   :  { %6776 = vmatprep.subr.bf16.mxu0 %v9080_v28  ;;  %6817 = vmatprep.subr.bf16.mxu1 %v9208_v63  ;;  %v739_v59 = vld [vmem:[%s13848_s1 + $0x15c8] sm:$0xff]  ;;  %v9296_v20 = vcombine.high %v611_v15, %v615_v53  ;;  %v9295_v63 = vcombine.low %v611_v15, %v615_v53 }
 0x176   :  { %v743_v16 = vld [vmem:[%s13848_s1 + $0x15e8] sm:$0xff] }
 0x177   :  { %v9424_v23 = vcombine.high %v739_v59, %v743_v16  ;;  %v603_v25 = vld [vmem:[%s13848_s1 + $0x1188] sm:$0xff]  ;;  %v9423_v34 = vcombine.low %v739_v59, %v743_v16 }
 0x178   :  { %6777 = vmatpush2.bf16.msra.mxu0 %v9079_v37  ;;  %6818 = vmatpush2.bf16.msra.mxu1 %v9207_v38  ;;  %v607_v26 = vld [vmem:[%s13848_s1 + $0x11a8] sm:$0xff] }
 0x179   :  { %6778 = vmatprep.subr.bf16.mxu0 %v9072_v40  ;;  %6819 = vmatprep.subr.bf16.mxu1 %v9200_v41  ;;  %v731_v27 = vld [vmem:[%s13848_s1 + $0x1588] sm:$0xff]  ;;  %v9288_v33 = vcombine.high %v603_v25, %v607_v26  ;;  %v9287_v48 = vcombine.low %v603_v25, %v607_v26 }
 0x17a   :  { %v735_v28 = vld [vmem:[%s13848_s1 + $0x15a8] sm:$0xff] }
 0x17b   :  { %v9416_v35 = vcombine.high %v731_v27, %v735_v28  ;;  %v595_v36 = vld [vmem:[%s13848_s1 + $0x1148] sm:$0xff] }
 0x17c   :  { %6779 = vmatpush2.bf16.msra.mxu0 %v9071_v51  ;;  %6820 = vmatpush2.bf16.msra.mxu1 %v9199_v52  ;;  %v599_v37 = vld [vmem:[%s13848_s1 + $0x1168] sm:$0xff]  ;;  %v9415_v51 = vcombine.low %v731_v27, %v735_v28 }
 0x17d   :  { %6780 = vmatprep.subr.bf16.mxu0 %v9064_v42  ;;  %6821 = vmatprep.subr.bf16.mxu1 %v9192_v54  ;;  %v723_v40 = vld [vmem:[%s13848_s1 + $0x1548] sm:$0xff]  ;;  %v9280_v52 = vcombine.high %v595_v36, %v599_v37 }
 0x17e   :  { %v727_v41 = vld [vmem:[%s13848_s1 + $0x1568] sm:$0xff] }
 0x17f   :  { %v9408_v58 = vcombine.high %v723_v40, %v727_v41  ;;  %v591_v10 = vld [vmem:[%s13848_s1 + $0x1128] sm:$0xff]  ;;  %v9407_v5 = vcombine.low %v723_v40, %v727_v41 }
 0x180   :  { %6781 = vmatpush2.bf16.msra.mxu0 %v9063_v62  ;;  %6822 = vmatpush2.bf16.msra.mxu1 %v9191_v0  ;;  %v715_v62 = vld [vmem:[%s13848_s1 + $0x1508] sm:$0xff] }
 0x181   :  { %6782 = vmatprep.subr.bf16.mxu0 %v9056_v1  ;;  %6823 = vmatprep.subr.bf16.mxu1 %v9184_v2  ;;  %v9279_v2 = vcombine.low %v595_v36, %v599_v37  ;;  %v711_v15 = vld [vmem:[%s13848_s1 + $0x14e8] sm:$0xff] }
 0x182   :  { %v703_v25 = vld [vmem:[%s13848_s1 + $0x14a8] sm:$0xff] }
 0x183   :  { %v695_v36 = vld [vmem:[%s13848_s1 + $0x1468] sm:$0xff] }
 0x184   :  { %6783 = vmatpush2.bf16.msra.mxu0 %v9055_v8  ;;  %6824 = vmatpush2.bf16.msra.mxu1 %v9183_v11  ;;  %v579_v11 = vld [vmem:[%s13848_s1 + $0x10c8] sm:$0xff] }
 0x185   :  { %6784 = vmatprep.subr.bf16.mxu0 %v9048_v12  ;;  %6825 = vmatprep.subr.bf16.mxu1 %v9176_v14  ;;  %v583_v12 = vld [vmem:[%s13848_s1 + $0x10e8] sm:$0xff] }
 0x186   :  { %v707_v14 = vld [vmem:[%s13848_s1 + $0x14c8] sm:$0xff]  ;;  %v9264_v16 = vcombine.high %v579_v11, %v583_v12  ;;  %v9263_v26 = vcombine.low %v579_v11, %v583_v12 }
 0x187   :  { %v9391_v27 = vcombine.low %v707_v14, %v711_v15 }
 0x188   :  { %6785 = vmatpush2.bf16.msra.mxu0 %v9047_v17  ;;  %6826 = vmatpush2.bf16.msra.mxu1 %v9175_v19  ;;  %v9392_v17 = vcombine.high %v707_v14, %v711_v15  ;;  %v571_v19 = vld [vmem:[%s13848_s1 + $0x1088] sm:$0xff] }
 0x189   :  { %6836 = vmatprep.subr.bf16.mxu0 %v9296_v20  ;;  %6877 = vmatprep.subr.bf16.mxu1 %v9424_v23  ;;  %v575_v20 = vld [vmem:[%s13848_s1 + $0x10a8] sm:$0xff] }
 0x18a   :  { %v699_v23 = vld [vmem:[%s13848_s1 + $0x1488] sm:$0xff]  ;;  %v9256_v28 = vcombine.high %v571_v19, %v575_v20  ;;  %v9255_v37 = vcombine.low %v571_v19, %v575_v20 }
 0x18b   :  { %v6542_v38 = vpop.f32.mrf.mxu0  ;;  %6787 = vmatmul.mubr.bf16.vlgmr.msra.gmra.mxu0 %v10663_v47  ;;  %v6583_v46 = vpop.f32.mrf.mxu1  ;;  %6828 = vmatmul.mubr.bf16.vlgmr.msra.gmra.mxu1 %v10682_v56  ;;  %v659_v15 = vld [vmem:[%s13848_s1 + $0x1348] sm:$0xff] }
 0x18c   :  { %v6543_v45 = vadd.f32 %v6542_v38, %v11330_v49  ;;  %6837 = vmatpush1.bf16.msra.mxu0 %v9295_v63  ;;  %6878 = vmatpush1.bf16.msra.mxu1 %v9423_v34  ;;  %v587_v49 = vld [vmem:[%s13848_s1 + $0x1108] sm:$0xff]  ;;  %v9384_v63 = vcombine.high %v699_v23, %v703_v25  ;;  %v9383_v38 = vcombine.low %v699_v23, %v703_v25 }
 0x18d   :  { %v6544_v50 = vpop.f32.mrf.mxu0  ;;  %6838 = vmatprep.subr.bf16.mxu0 %v9288_v33  ;;  %v6585_v57 = vpop.f32.mrf.mxu1  ;;  %6879 = vmatprep.subr.bf16.mxu1 %v9416_v35  ;;  %v9272_v6 = vcombine.high %v587_v49, %v591_v10  ;;  %v9271_v53 = vcombine.low %v587_v49, %v591_v10  ;;  %v563_v34 = vld [vmem:[%s13848_s1 + $0x1048] sm:$0xff] }
 0x18e   :  { %v11532_v42 = vadd.f32 %v6583_v46, %v6543_v45  ;;  %v6545_v54 = vadd.f32 %v6544_v50, %v11347_v60  ;;  %6868 = vmatprep.mubr.bf16.mxu0 %v10678_v55  ;;  %v719_v60 = vld [vmem:[%s13848_s1 + $0x1528] sm:$0xff]  ;;  %6909 = vmatprep.mubr.bf16.mxu1 %v10699_v3 }
 0x18f   :  { %v6546_v61 = vpop.f32.mrf.mxu0  ;;  %v6587_v1 = vpop.f32.mrf.mxu1  ;;  %v9400_v8 = vcombine.high %v715_v62, %v719_v60  ;;  %v9399_v59 = vcombine.low %v715_v62, %v719_v60  ;;  %v567_v33 = vld [vmem:[%s13848_s1 + $0x1068] sm:$0xff] }
 0x190   :  { %v11549_v0 = vadd.f32 %v6585_v57, %v6545_v54  ;;  %6839 = vmatpush1.bf16.msra.mxu0 %v9287_v48  ;;  %6880 = vmatpush1.bf16.msra.mxu1 %v9415_v51  ;;  %v691_v35 = vld [vmem:[%s13848_s1 + $0x1448] sm:$0xff]  ;;  %v9248_v40 = vcombine.high %v563_v34, %v567_v33  ;;  %v9247_v51 = vcombine.low %v563_v34, %v567_v33 }
 0x191   :  { %v6547_v4 = vpop.f32.mrf.mxu0  ;;  %6840 = vmatprep.subr.bf16.mxu0 %v9280_v52  ;;  %v6588_v7 = vpop.f32.mrf.mxu1  ;;  %6881 = vmatprep.subr.bf16.mxu1 %v9408_v58  ;;  %v9376_v41 = vcombine.high %v691_v35, %v695_v36  ;;  %v555_v45 = vld [vmem:[%s13848_s1 + $0x1008] sm:$0xff]  ;;  %v9375_v52 = vcombine.low %v691_v35, %v695_v36 }
 0x192   :  { %v559_v46 = vld [vmem:[%s13848_s1 + $0x1028] sm:$0xff] }
 0x193   :  { %v683_v48 = vld [vmem:[%s13848_s1 + $0x1408] sm:$0xff]  ;;  %v9240_v54 = vcombine.high %v555_v45, %v559_v46  ;;  %v9239_v62 = vcombine.low %v555_v45, %v559_v46 }
 0x194   :  { %6841 = vmatpush1.bf16.msra.mxu0 %v9279_v2  ;;  %6882 = vmatpush1.bf16.msra.mxu1 %v9407_v5  ;;  %v687_v50 = vld [vmem:[%s13848_s1 + $0x1428] sm:$0xff] }
 0x195   :  { %6842 = vmatprep.subr.bf16.mxu0 %v9272_v6  ;;  %6883 = vmatprep.subr.bf16.mxu1 %v9400_v8  ;;  %v9368_v57 = vcombine.high %v683_v48, %v687_v50  ;;  %v675_v58 = vld [vmem:[%s13848_s1 + $0x13c8] sm:$0xff]  ;;  %v9367_v60 = vcombine.low %v683_v48, %v687_v50 }
 0x196   :  { %v679_v49 = vld [vmem:[%s13848_s1 + $0x13e8] sm:$0xff] }
 0x197   :  { %v803_v10 = vld [vmem:[%s13848_s1 + $0x17c8] sm:$0xff]  ;;  %v9360_v1 = vcombine.high %v675_v58, %v679_v49  ;;  %v9359_v8 = vcombine.low %v675_v58, %v679_v49 }
 0x198   :  { %6843 = vmatpush1.bf16.msra.mxu0 %v9271_v53  ;;  %6884 = vmatpush1.bf16.msra.mxu1 %v9399_v59  ;;  %v807_v61 = vld [vmem:[%s13848_s1 + $0x17e8] sm:$0xff] }
 0x199   :  { %6844 = vmatprep.subr.bf16.mxu0 %v9264_v16  ;;  %6885 = vmatprep.subr.bf16.mxu1 %v9392_v17  ;;  %v9488_v2 = vcombine.high %v803_v10, %v807_v61  ;;  %v667_v4 = vld [vmem:[%s13848_s1 + $0x1388] sm:$0xff]  ;;  %v9487_v11 = vcombine.low %v803_v10, %v807_v61 }
 0x19a   :  { %v671_v5 = vld [vmem:[%s13848_s1 + $0x13a8] sm:$0xff] }
 0x19b   :  { %v795_v6 = vld [vmem:[%s13848_s1 + $0x1788] sm:$0xff]  ;;  %v9352_v12 = vcombine.high %v667_v4, %v671_v5  ;;  %v9351_v17 = vcombine.low %v667_v4, %v671_v5 }
 0x19c   :  { %6845 = vmatpush1.bf16.msra.mxu0 %v9263_v26  ;;  %6886 = vmatpush1.bf16.msra.mxu1 %v9391_v27  ;;  %v799_v7 = vld [vmem:[%s13848_s1 + $0x17a8] sm:$0xff] }
 0x19d   :  { %6846 = vmatprep.subr.bf16.mxu0 %v9256_v28  ;;  %6887 = vmatprep.subr.bf16.mxu1 %v9384_v63  ;;  %v9480_v14 = vcombine.high %v795_v6, %v799_v7  ;;  %v663_v53 = vld [vmem:[%s13848_s1 + $0x1368] sm:$0xff]  ;;  %v9479_v19 = vcombine.low %v795_v6, %v799_v7 }
 0x19e   :  { %v787_v59 = vld [vmem:[%s13848_s1 + $0x1748] sm:$0xff]  ;;  %v9344_v20 = vcombine.high %v659_v15, %v663_v53  ;;  %v9343_v63 = vcombine.low %v659_v15, %v663_v53 }
 0x19f   :  { %v791_v16 = vld [vmem:[%s13848_s1 + $0x1768] sm:$0xff] }
 0x1a0   :  { %6847 = vmatpush1.bf16.msra.mxu0 %v9255_v37  ;;  %6888 = vmatpush1.bf16.msra.mxu1 %v9383_v38  ;;  %v9472_v23 = vcombine.high %v787_v59, %v791_v16  ;;  %v651_v25 = vld [vmem:[%s13848_s1 + $0x1308] sm:$0xff]  ;;  %v9471_v34 = vcombine.low %v787_v59, %v791_v16 }
 0x1a1   :  { %6848 = vmatprep.subr.bf16.mxu0 %v9248_v40  ;;  %6889 = vmatprep.subr.bf16.mxu1 %v9376_v41  ;;  %v655_v26 = vld [vmem:[%s13848_s1 + $0x1328] sm:$0xff] }
 0x1a2   :  { %v779_v27 = vld [vmem:[%s13848_s1 + $0x1708] sm:$0xff]  ;;  %v9336_v33 = vcombine.high %v651_v25, %v655_v26  ;;  %v9335_v41 = vcombine.low %v651_v25, %v655_v26 }
 0x1a3   :  { %v783_v28 = vld [vmem:[%s13848_s1 + $0x1728] sm:$0xff] }
 0x1a4   :  { %6849 = vmatpush1.bf16.msra.mxu0 %v9247_v51  ;;  %6890 = vmatpush1.bf16.msra.mxu1 %v9375_v52  ;;  %v9464_v35 = vcombine.high %v779_v27, %v783_v28  ;;  %v643_v36 = vld [vmem:[%s13848_s1 + $0x12c8] sm:$0xff]  ;;  %v9463_v45 = vcombine.low %v779_v27, %v783_v28 }
 0x1a5   :  { %6850 = vmatprep.subr.bf16.mxu0 %v9240_v54  ;;  %6891 = vmatprep.subr.bf16.mxu1 %v9368_v57  ;;  %v647_v37 = vld [vmem:[%s13848_s1 + $0x12e8] sm:$0xff] }
 0x1a6   :  { %v771_v38 = vld [vmem:[%s13848_s1 + $0x16c8] sm:$0xff]  ;;  %v9328_v46 = vcombine.high %v643_v36, %v647_v37  ;;  %v9327_v57 = vcombine.low %v643_v36, %v647_v37 }
 0x1a7   :  { %v775_v40 = vld [vmem:[%s13848_s1 + $0x16e8] sm:$0xff] }
 0x1a8   :  { %6851 = vmatpush1.bf16.msra.mxu0 %v9239_v62  ;;  %6892 = vmatpush1.bf16.msra.mxu1 %v9367_v60  ;;  %v9456_v48 = vcombine.high %v771_v38, %v775_v40  ;;  %v635_v50 = vld [vmem:[%s13848_s1 + $0x1288] sm:$0xff]  ;;  %v9455_v58 = vcombine.low %v771_v38, %v775_v40 }
 0x1a9   :  { %6852 = vmatprep.subr.bf16.mxu0 %v9360_v1  ;;  %6893 = vmatprep.subr.bf16.mxu1 %v9488_v2  ;;  %v639_v51 = vld [vmem:[%s13848_s1 + $0x12a8] sm:$0xff] }
 0x1aa   :  { %v763_v52 = vld [vmem:[%s13848_s1 + $0x1688] sm:$0xff]  ;;  %v9320_v49 = vcombine.high %v635_v50, %v639_v51  ;;  %v9319_v2 = vcombine.low %v635_v50, %v639_v51 }
 0x1ab   :  { %v767_v54 = vld [vmem:[%s13848_s1 + $0x16a8] sm:$0xff] }
 0x1ac   :  { %6853 = vmatpush2.bf16.msra.mxu0 %v9359_v8  ;;  %6894 = vmatpush2.bf16.msra.mxu1 %v9487_v11  ;;  %v9448_v10 = vcombine.high %v763_v52, %v767_v54  ;;  %v627_v61 = vld [vmem:[%s13848_s1 + $0x1248] sm:$0xff]  ;;  %v9447_v4 = vcombine.low %v763_v52, %v767_v54 }
 0x1ad   :  { %6854 = vmatprep.subr.bf16.mxu0 %v9352_v12  ;;  %6895 = vmatprep.subr.bf16.mxu1 %v9480_v14  ;;  %v631_v62 = vld [vmem:[%s13848_s1 + $0x1268] sm:$0xff] }
 0x1ae   :  { %v755_v60 = vld [vmem:[%s13848_s1 + $0x1648] sm:$0xff]  ;;  %v9312_v5 = vcombine.high %v627_v61, %v631_v62  ;;  %v9311_v14 = vcombine.low %v627_v61, %v631_v62 }
 0x1af   :  { %v759_v1 = vld [vmem:[%s13848_s1 + $0x1668] sm:$0xff] }
 0x1b0   :  { %6855 = vmatpush2.bf16.msra.mxu0 %v9351_v17  ;;  %6896 = vmatpush2.bf16.msra.mxu1 %v9479_v19  ;;  %v9440_v6 = vcombine.high %v755_v60, %v759_v1  ;;  %v619_v7 = vld [vmem:[%s13848_s1 + $0x1208] sm:$0xff]  ;;  %v9439_v15 = vcombine.low %v755_v60, %v759_v1 }
 0x1b1   :  { %6856 = vmatprep.subr.bf16.mxu0 %v9344_v20  ;;  %6897 = vmatprep.subr.bf16.mxu1 %v9472_v23  ;;  %v623_v8 = vld [vmem:[%s13848_s1 + $0x1228] sm:$0xff] }
 0x1b2   :  { %v747_v11 = vld [vmem:[%s13848_s1 + $0x1608] sm:$0xff]  ;;  %v9304_v53 = vcombine.high %v619_v7, %v623_v8  ;;  %v9303_v23 = vcombine.low %v619_v7, %v623_v8 }
 0x1b3   :  { %v751_v12 = vld [vmem:[%s13848_s1 + $0x1628] sm:$0xff] }
 0x1b4   :  { %6857 = vmatpush2.bf16.msra.mxu0 %v9343_v63  ;;  %6898 = vmatpush2.bf16.msra.mxu1 %v9471_v34  ;;  %v9432_v59 = vcombine.high %v747_v11, %v751_v12  ;;  %v867_v16 = vld [vmem:[%s13848_s1 + $0x19c8] sm:$0xff]  ;;  %v9431_v25 = vcombine.low %v747_v11, %v751_v12 }
 0x1b5   :  { %6858 = vmatprep.subr.bf16.mxu0 %v9336_v33  ;;  %6899 = vmatprep.subr.bf16.mxu1 %v9464_v35  ;;  %v871_v17 = vld [vmem:[%s13848_s1 + $0x19e8] sm:$0xff] }
 0x1b6   :  { %v995_v19 = vld [vmem:[%s13848_s1 + $0x1dc8] sm:$0xff]  ;;  %v9552_v26 = vcombine.high %v867_v16, %v871_v17  ;;  %v9551_v35 = vcombine.low %v867_v16, %v871_v17 }
 0x1b7   :  { %v999_v20 = vld [vmem:[%s13848_s1 + $0x1de8] sm:$0xff] }
 0x1b8   :  { %6859 = vmatpush2.bf16.msra.mxu0 %v9335_v41  ;;  %6900 = vmatpush2.bf16.msra.mxu1 %v9463_v45  ;;  %v9680_v27 = vcombine.high %v995_v19, %v999_v20  ;;  %v859_v28 = vld [vmem:[%s13848_s1 + $0x1988] sm:$0xff]  ;;  %v9679_v36 = vcombine.low %v995_v19, %v999_v20 }
 0x1b9   :  { %6860 = vmatprep.subr.bf16.mxu0 %v9328_v46  ;;  %6901 = vmatprep.subr.bf16.mxu1 %v9456_v48  ;;  %v863_v63 = vld [vmem:[%s13848_s1 + $0x19a8] sm:$0xff] }
 0x1ba   :  { %v987_v34 = vld [vmem:[%s13848_s1 + $0x1d88] sm:$0xff]  ;;  %v9544_v37 = vcombine.high %v859_v28, %v863_v63  ;;  %v9543_v52 = vcombine.low %v859_v28, %v863_v63 }
 0x1bb   :  { %v991_v33 = vld [vmem:[%s13848_s1 + $0x1da8] sm:$0xff] }
 0x1bc   :  { %6861 = vmatpush2.bf16.msra.mxu0 %v9327_v57  ;;  %6902 = vmatpush2.bf16.msra.mxu1 %v9455_v58  ;;  %v9672_v38 = vcombine.high %v987_v34, %v991_v33  ;;  %v851_v40 = vld [vmem:[%s13848_s1 + $0x1948] sm:$0xff]  ;;  %v9671_v57 = vcombine.low %v987_v34, %v991_v33 }
 0x1bd   :  { %6862 = vmatprep.subr.bf16.mxu0 %v9320_v49  ;;  %6903 = vmatprep.subr.bf16.mxu1 %v9448_v10  ;;  %v855_v41 = vld [vmem:[%s13848_s1 + $0x1968] sm:$0xff] }
 0x1be   :  { %v979_v46 = vld [vmem:[%s13848_s1 + $0x1d48] sm:$0xff]  ;;  %v9536_v58 = vcombine.high %v851_v40, %v855_v41 }
 0x1bf   :  { %v983_v48 = vld [vmem:[%s13848_s1 + $0x1d68] sm:$0xff] }
 0x1c0   :  { %6863 = vmatpush2.bf16.msra.mxu0 %v9319_v2  ;;  %6904 = vmatpush2.bf16.msra.mxu1 %v9447_v4  ;;  %v9664_v62 = vcombine.high %v979_v46, %v983_v48  ;;  %v847_v60 = vld [vmem:[%s13848_s1 + $0x1928] sm:$0xff]  ;;  %v9663_v8 = vcombine.low %v979_v46, %v983_v48 }
 0x1c1   :  { %6864 = vmatprep.subr.bf16.mxu0 %v9312_v5  ;;  %6905 = vmatprep.subr.bf16.mxu1 %v9440_v6  ;;  %v971_v2 = vld [vmem:[%s13848_s1 + $0x1d08] sm:$0xff]  ;;  %v9535_v6 = vcombine.low %v851_v40, %v855_v41 }
 0x1c2   :  { %v967_v16 = vld [vmem:[%s13848_s1 + $0x1ce8] sm:$0xff] }
 0x1c3   :  { %v959_v28 = vld [vmem:[%s13848_s1 + $0x1ca8] sm:$0xff] }
 0x1c4   :  { %6865 = vmatpush2.bf16.msra.mxu0 %v9311_v14  ;;  %6906 = vmatpush2.bf16.msra.mxu1 %v9439_v15  ;;  %v835_v15 = vld [vmem:[%s13848_s1 + $0x18c8] sm:$0xff] }
 0x1c5   :  { %6866 = vmatprep.subr.bf16.mxu0 %v9304_v53  ;;  %6907 = vmatprep.subr.bf16.mxu1 %v9432_v59  ;;  %v839_v53 = vld [vmem:[%s13848_s1 + $0x18e8] sm:$0xff] }
 0x1c6   :  { %v963_v59 = vld [vmem:[%s13848_s1 + $0x1cc8] sm:$0xff]  ;;  %v9520_v20 = vcombine.high %v835_v15, %v839_v53  ;;  %v9519_v63 = vcombine.low %v835_v15, %v839_v53 }
 0x1c7   :  { %v9647_v34 = vcombine.low %v963_v59, %v967_v16  ;;  %v951_v40 = vld [vmem:[%s13848_s1 + $0x1c68] sm:$0xff] }
 0x1c8   :  { %6867 = vmatpush2.bf16.msra.mxu0 %v9303_v23  ;;  %6908 = vmatpush2.bf16.msra.mxu1 %v9431_v25  ;;  %v9648_v23 = vcombine.high %v963_v59, %v967_v16  ;;  %v827_v25 = vld [vmem:[%s13848_s1 + $0x1888] sm:$0xff] }
 0x1c9   :  { %6918 = vmatprep.subr.bf16.mxu0 %v9552_v26  ;;  %6959 = vmatprep.subr.bf16.mxu1 %v9680_v27  ;;  %v831_v26 = vld [vmem:[%s13848_s1 + $0x18a8] sm:$0xff] }
 0x1ca   :  { %v955_v27 = vld [vmem:[%s13848_s1 + $0x1c88] sm:$0xff]  ;;  %v9512_v33 = vcombine.high %v827_v25, %v831_v26  ;;  %v9511_v41 = vcombine.low %v827_v25, %v831_v26 }
 0x1cb   :  { %v6624_v45 = vpop.f32.mrf.mxu0  ;;  %6869 = vmatmul.mubr.bf16.vlgmr.msra.gmra.mxu0 %v10881_v21  ;;  %v6665_v51 = vpop.f32.mrf.mxu1  ;;  %6910 = vmatmul.mubr.bf16.vlgmr.msra.gmra.mxu1 %v10900_v32  ;;  %v915_v16 = vld [vmem:[%s13848_s1 + $0x1b48] sm:$0xff] }
 0x1cc   :  { %v6625_v50 = vadd.f32 %v6624_v45, %v11532_v42  ;;  %6919 = vmatpush1.bf16.msra.mxu0 %v9551_v35  ;;  %6960 = vmatpush1.bf16.msra.mxu1 %v9679_v36  ;;  %v843_v42 = vld [vmem:[%s13848_s1 + $0x1908] sm:$0xff]  ;;  %v9640_v35 = vcombine.high %v955_v27, %v959_v28  ;;  %v9639_v45 = vcombine.low %v955_v27, %v959_v28 }
 0x1cd   :  { %v6626_v54 = vpop.f32.mrf.mxu0  ;;  %6920 = vmatprep.subr.bf16.mxu0 %v9544_v37  ;;  %v6667_v61 = vpop.f32.mrf.mxu1  ;;  %6961 = vmatprep.subr.bf16.mxu1 %v9672_v38  ;;  %v9528_v11 = vcombine.high %v843_v42, %v847_v60  ;;  %v9527_v17 = vcombine.low %v843_v42, %v847_v60  ;;  %v819_v36 = vld [vmem:[%s13848_s1 + $0x1848] sm:$0xff] }
 0x1ce   :  { %v11734_v49 = vadd.f32 %v6665_v51, %v6625_v50  ;;  %v6627_v10 = vadd.f32 %v6626_v54, %v11549_v0  ;;  %6950 = vmatprep.mubr.bf16.mxu0 %v10896_v31  ;;  %v975_v0 = vld [vmem:[%s13848_s1 + $0x1d28] sm:$0xff]  ;;  %6991 = vmatprep.mubr.bf16.mxu1 %v10917_v44 }
 0x1cf   :  { %v6628_v1 = vpop.f32.mrf.mxu0  ;;  %v6669_v5 = vpop.f32.mrf.mxu1  ;;  %v9656_v14 = vcombine.high %v971_v2, %v975_v0  ;;  %v9655_v19 = vcombine.low %v971_v2, %v975_v0  ;;  %v823_v37 = vld [vmem:[%s13848_s1 + $0x1868] sm:$0xff] }
 0x1d0   :  { %v11751_v4 = vadd.f32 %v6667_v61, %v6627_v10  ;;  %6921 = vmatpush1.bf16.msra.mxu0 %v9543_v52  ;;  %6962 = vmatpush1.bf16.msra.mxu1 %v9671_v57  ;;  %v947_v38 = vld [vmem:[%s13848_s1 + $0x1c48] sm:$0xff]  ;;  %v9504_v46 = vcombine.high %v819_v36, %v823_v37  ;;  %v9503_v57 = vcombine.low %v819_v36, %v823_v37 }
 0x1d1   :  { %v6629_v7 = vpop.f32.mrf.mxu0  ;;  %6922 = vmatprep.subr.bf16.mxu0 %v9536_v58  ;;  %v6670_v12 = vpop.f32.mrf.mxu1  ;;  %6963 = vmatprep.subr.bf16.mxu1 %v9664_v62  ;;  %v9632_v48 = vcombine.high %v947_v38, %v951_v40  ;;  %v811_v50 = vld [vmem:[%s13848_s1 + $0x1808] sm:$0xff]  ;;  %v9631_v58 = vcombine.low %v947_v38, %v951_v40 }
 0x1d2   :  { %v815_v51 = vld [vmem:[%s13848_s1 + $0x1828] sm:$0xff] }
 0x1d3   :  { %v939_v52 = vld [vmem:[%s13848_s1 + $0x1c08] sm:$0xff]  ;;  %v9496_v10 = vcombine.high %v811_v50, %v815_v51  ;;  %v9495_v2 = vcombine.low %v811_v50, %v815_v51 }
 0x1d4   :  { %6923 = vmatpush1.bf16.msra.mxu0 %v9535_v6  ;;  %6964 = vmatpush1.bf16.msra.mxu1 %v9663_v8  ;;  %v943_v54 = vld [vmem:[%s13848_s1 + $0x1c28] sm:$0xff] }
 0x1d5   :  { %6924 = vmatprep.subr.bf16.mxu0 %v9528_v11  ;;  %6965 = vmatprep.subr.bf16.mxu1 %v9656_v14  ;;  %v9624_v61 = vcombine.high %v939_v52, %v943_v54  ;;  %v931_v62 = vld [vmem:[%s13848_s1 + $0x1bc8] sm:$0xff]  ;;  %v9623_v0 = vcombine.low %v939_v52, %v943_v54 }
 0x1d6   :  { %v935_v42 = vld [vmem:[%s13848_s1 + $0x1be8] sm:$0xff] }
 0x1d7   :  { %v1059_v60 = vld [vmem:[%s13848_s1 + $0x1fc8] sm:$0xff]  ;;  %v9616_v5 = vcombine.high %v931_v62, %v935_v42  ;;  %v9615_v14 = vcombine.low %v931_v62, %v935_v42 }
 0x1d8   :  { %6925 = vmatpush1.bf16.msra.mxu0 %v9527_v17  ;;  %6966 = vmatpush1.bf16.msra.mxu1 %v9655_v19  ;;  %v1063_v1 = vld [vmem:[%s13848_s1 + $0x1fe8] sm:$0xff] }
 0x1d9   :  { %6926 = vmatprep.subr.bf16.mxu0 %v9520_v20  ;;  %6967 = vmatprep.subr.bf16.mxu1 %v9648_v23  ;;  %v9744_v6 = vcombine.high %v1059_v60, %v1063_v1  ;;  %v923_v7 = vld [vmem:[%s13848_s1 + $0x1b88] sm:$0xff]  ;;  %v9743_v15 = vcombine.low %v1059_v60, %v1063_v1 }
 0x1da   :  { %v927_v8 = vld [vmem:[%s13848_s1 + $0x1ba8] sm:$0xff] }
 0x1db   :  { %v1051_v11 = vld [vmem:[%s13848_s1 + $0x1f88] sm:$0xff]  ;;  %v9608_v53 = vcombine.high %v923_v7, %v927_v8  ;;  %v9607_v23 = vcombine.low %v923_v7, %v927_v8 }
 0x1dc   :  { %6927 = vmatpush1.bf16.msra.mxu0 %v9519_v63  ;;  %6968 = vmatpush1.bf16.msra.mxu1 %v9647_v34  ;;  %v1055_v12 = vld [vmem:[%s13848_s1 + $0x1fa8] sm:$0xff] }
 0x1dd   :  { %6928 = vmatprep.subr.bf16.mxu0 %v9512_v33  ;;  %6969 = vmatprep.subr.bf16.mxu1 %v9640_v35  ;;  %v9736_v59 = vcombine.high %v1051_v11, %v1055_v12  ;;  %v919_v17 = vld [vmem:[%s13848_s1 + $0x1b68] sm:$0xff]  ;;  %v9735_v25 = vcombine.low %v1051_v11, %v1055_v12 }
 0x1de   :  { %v1043_v19 = vld [vmem:[%s13848_s1 + $0x1f48] sm:$0xff]  ;;  %v9600_v26 = vcombine.high %v915_v16, %v919_v17  ;;  %v9599_v35 = vcombine.low %v915_v16, %v919_v17 }
 0x1df   :  { %v1047_v20 = vld [vmem:[%s13848_s1 + $0x1f68] sm:$0xff] }
 0x1e0   :  { %6929 = vmatpush1.bf16.msra.mxu0 %v9511_v41  ;;  %6970 = vmatpush1.bf16.msra.mxu1 %v9639_v45  ;;  %v9728_v27 = vcombine.high %v1043_v19, %v1047_v20  ;;  %v907_v28 = vld [vmem:[%s13848_s1 + $0x1b08] sm:$0xff]  ;;  %v9727_v36 = vcombine.low %v1043_v19, %v1047_v20  ;;  %v100_v20 = vld [vmem:[%s13848_s1 + $0x1d0] sm:$0xff] }
 0x1e1   :  { %6930 = vmatprep.subr.bf16.mxu0 %v9504_v46  ;;  %6971 = vmatprep.subr.bf16.mxu1 %v9632_v48  ;;  %v911_v63 = vld [vmem:[%s13848_s1 + $0x1b28] sm:$0xff] }
 0x1e2   :  { %v1035_v34 = vld [vmem:[%s13848_s1 + $0x1f08] sm:$0xff]  ;;  %v9592_v37 = vcombine.high %v907_v28, %v911_v63  ;;  %v9591_v48 = vcombine.low %v907_v28, %v911_v63  ;;  %v1078_v28 = vsub.s32 2, %v10269_v43 }
 0x1e3   :  { %v1039_v33 = vld [vmem:[%s13848_s1 + $0x1f28] sm:$0xff] }
 0x1e4   :  { %6931 = vmatpush1.bf16.msra.mxu0 %v9503_v57  ;;  %6972 = vmatpush1.bf16.msra.mxu1 %v9631_v58  ;;  %v9720_v38 = vcombine.high %v1035_v34, %v1039_v33  ;;  %v899_v40 = vld [vmem:[%s13848_s1 + $0x1ac8] sm:$0xff]  ;;  %v9719_v50 = vcombine.low %v1035_v34, %v1039_v33 }
 0x1e5   :  { %6932 = vmatprep.subr.bf16.mxu0 %v9496_v10  ;;  %6973 = vmatprep.subr.bf16.mxu1 %v9624_v61  ;;  %v903_v41 = vld [vmem:[%s13848_s1 + $0x1ae8] sm:$0xff] }
 0x1e6   :  { %v1027_v45 = vld [vmem:[%s13848_s1 + $0x1ec8] sm:$0xff]  ;;  %v9584_v51 = vcombine.high %v899_v40, %v903_v41  ;;  %v9583_v61 = vcombine.low %v899_v40, %v903_v41  ;;  %v224_v40 = vld [vmem:[%s13848_s1 + $0x5b0] sm:$0xff]  ;;  %v10114_v41 = vld [vmem:[%s13849_s2] sm:$0xff] }
 0x1e7   :  { %v1031_v46 = vld [vmem:[%s13848_s1 + $0x1ee8] sm:$0xff] }
 0x1e8   :  { %6933 = vmatpush1.bf16.msra.mxu0 %v9495_v2  ;;  %6974 = vmatpush1.bf16.msra.mxu1 %v9623_v0  ;;  %v9712_v52 = vcombine.high %v1027_v45, %v1031_v46  ;;  %v891_v54 = vld [vmem:[%s13848_s1 + $0x1a88] sm:$0xff]  ;;  %v9711_v62 = vcombine.low %v1027_v45, %v1031_v46  ;;  %v1079_v45 = vrot.slane %v10114_v41, %v1078_v28  ;;  %v72_v28 = vld [vmem:[%s13848_s1 + $0xf0] sm:$0xff] }
 0x1e9   :  { %6934 = vmatprep.subr.bf16.mxu0 %v9616_v5  ;;  %6975 = vmatprep.subr.bf16.mxu1 %v9744_v6  ;;  %v895_v57 = vld [vmem:[%s13848_s1 + $0x1aa8] sm:$0xff] }
 0x1ea   :  { %v1019_v58 = vld [vmem:[%s13848_s1 + $0x1e88] sm:$0xff]  ;;  %v9576_v42 = vcombine.high %v891_v54, %v895_v57  ;;  %v9575_v6 = vcombine.low %v891_v54, %v895_v57  ;;  %v84_v54 = vld [vmem:[%s13848_s1 + $0x150] sm:$0xff] }
 0x1eb   :  { %v1023_v10 = vld [vmem:[%s13848_s1 + $0x1ea8] sm:$0xff]  ;;  %v88_v57 = vld [vmem:[%s13848_s1 + $0x170] sm:$0xff] }
 0x1ec   :  { %6935 = vmatpush2.bf16.msra.mxu0 %v9615_v14  ;;  %6976 = vmatpush2.bf16.msra.mxu1 %v9743_v15  ;;  %v9704_v60 = vcombine.high %v1019_v58, %v1023_v10  ;;  %v883_v1 = vld [vmem:[%s13848_s1 + $0x1a48] sm:$0xff]  ;;  %v9703_v7 = vcombine.low %v1019_v58, %v1023_v10  ;;  %v212_v10 = vld [vmem:[%s13848_s1 + $0x550] sm:$0xff] }
 0x1ed   :  { %6936 = vmatprep.subr.bf16.mxu0 %v9608_v53  ;;  %6977 = vmatprep.subr.bf16.mxu1 %v9736_v59  ;;  %v887_v2 = vld [vmem:[%s13848_s1 + $0x1a68] sm:$0xff] }
 0x1ee   :  { %v1011_v0 = vld [vmem:[%s13848_s1 + $0x1e48] sm:$0xff]  ;;  %v9568_v8 = vcombine.high %v883_v1, %v887_v2  ;;  %v9567_v59 = vcombine.low %v883_v1, %v887_v2 }
 0x1ef   :  { %v1015_v5 = vld [vmem:[%s13848_s1 + $0x1e68] sm:$0xff] }
 0x1f0   :  { %6937 = vmatpush2.bf16.msra.mxu0 %v9607_v23  ;;  %6978 = vmatpush2.bf16.msra.mxu1 %v9735_v25  ;;  %v9696_v11 = vcombine.high %v1011_v0, %v1015_v5  ;;  %v875_v12 = vld [vmem:[%s13848_s1 + $0x1a08] sm:$0xff]  ;;  %v9695_v16 = vcombine.low %v1011_v0, %v1015_v5  ;;  %v104_v23 = vld [vmem:[%s13848_s1 + $0x1f0] sm:$0xff]  ;;  %v8770_v0 = vcombine.high %v84_v54, %v88_v57 }
 0x1f1   :  { %6938 = vmatprep.subr.bf16.mxu0 %v9600_v26  ;;  %6979 = vmatprep.subr.bf16.mxu1 %v9728_v27  ;;  %v879_v14 = vld [vmem:[%s13848_s1 + $0x1a28] sm:$0xff]  ;;  %v228_v25 = vld [vmem:[%s13848_s1 + $0x5d0] sm:$0xff]  ;;  %v8786_v34 = vcombine.high %v100_v20, %v104_v23  ;;  %v8785_v46 = vcombine.low %v100_v20, %v104_v23 }
 0x1f2   :  { %v1003_v15 = vld [vmem:[%s13848_s1 + $0x1e08] sm:$0xff]  ;;  %v9560_v17 = vcombine.high %v875_v12, %v879_v14  ;;  %v232_v26 = vld [vmem:[%s13848_s1 + $0x5f0] sm:$0xff]  ;;  %v9559_v27 = vcombine.low %v875_v12, %v879_v14 }
 0x1f3   :  { %v1007_v53 = vld [vmem:[%s13848_s1 + $0x1e28] sm:$0xff]  ;;  %v8914_v33 = vcombine.high %v228_v25, %v232_v26  ;;  %v80_v12 = vld [vmem:[%s13848_s1 + $0x130] sm:$0xff] }
 0x1f4   :  { %6939 = vmatpush2.bf16.msra.mxu0 %v9599_v35  ;;  %6980 = vmatpush2.bf16.msra.mxu1 %v9727_v36  ;;  %v9688_v19 = vcombine.high %v1003_v15, %v1007_v53  ;;  %v9687_v63 = vcombine.low %v1003_v15, %v1007_v53  ;;  %v1082_v35 = vsub.s32 3, %v10269_v43  ;;  %v92_v36 = vld [vmem:[%s13848_s1 + $0x190] sm:$0xff] }
 0x1f5   :  { %6940 = vmatprep.subr.bf16.mxu0 %v9592_v37  ;;  %6981 = vmatprep.subr.bf16.mxu1 %v9720_v38  ;;  %v96_v37 = vld [vmem:[%s13848_s1 + $0x1b0] sm:$0xff] }
 0x1f6   :  { %v220_v38 = vld [vmem:[%s13848_s1 + $0x590] sm:$0xff] }
 0x1f7   :  { %v8905_v2 = vcombine.low %v220_v38, %v224_v40  ;;  %v204_v15 = vld [vmem:[%s13848_s1 + $0x510] sm:$0xff] }
 0x1f8   :  { %6941 = vmatpush2.bf16.msra.mxu0 %v9591_v48  ;;  %6982 = vmatpush2.bf16.msra.mxu1 %v9719_v50  ;;  %v8913_v48 = vcombine.low %v228_v25, %v232_v26  ;;  %v8778_v50 = vcombine.high %v92_v36, %v96_v37  ;;  %v208_v53 = vld [vmem:[%s13848_s1 + $0x530] sm:$0xff] }
 0x1f9   :  { %6942 = vmatprep.subr.bf16.mxu0 %v9584_v51  ;;  %6983 = vmatprep.subr.bf16.mxu1 %v9712_v52  ;;  %v1083_v51 = vrot.slane %v10114_v41, %v1082_v35  ;;  %v8906_v52 = vcombine.high %v220_v38, %v224_v40  ;;  %v8890_v26 = vcombine.high %v204_v15, %v208_v53  ;;  %v60_v38 = vld [vmem:[%s13848_s1 + $0x90] sm:$0xff] }
 0x1fa   :  { %v8889_v35 = vcombine.low %v204_v15, %v208_v53  ;;  %v64_v40 = vld [vmem:[%s13848_s1 + $0xb0] sm:$0xff] }
 0x1fb   :  { %v188_v41 = vld [vmem:[%s13848_s1 + $0x490] sm:$0xff] }
 0x1fc   :  { %6943 = vmatpush2.bf16.msra.mxu0 %v9583_v61  ;;  %6984 = vmatpush2.bf16.msra.mxu1 %v9711_v62  ;;  %v216_v61 = vld [vmem:[%s13848_s1 + $0x570] sm:$0xff] }
 0x1fd   :  { %6944 = vmatprep.subr.bf16.mxu0 %v9576_v42  ;;  %6985 = vmatprep.subr.bf16.mxu1 %v9704_v60  ;;  %v8777_v60 = vcombine.low %v92_v36, %v96_v37  ;;  %v8897_v20 = vcombine.low %v212_v10, %v216_v61  ;;  %v292_v15 = vld [vmem:[%s13848_s1 + $0x7d0] sm:$0xff] }
 0x1fe   :  { %v296_v53 = vld [vmem:[%s13848_s1 + $0x7f0] sm:$0xff] }
 0x200   :  { %6945 = vmatpush2.bf16.msra.mxu0 %v9575_v6  ;;  %6986 = vmatpush2.bf16.msra.mxu1 %v9703_v7 }
 0x201   :  { %6946 = vmatprep.subr.bf16.mxu0 %v9568_v8  ;;  %6987 = vmatprep.subr.bf16.mxu1 %v9696_v11  ;;  %v8898_v8 = vcombine.high %v212_v10, %v216_v61  ;;  %v76_v11 = vld [vmem:[%s13848_s1 + $0x110] sm:$0xff]  ;;  %v8745_v10 = vcombine.low %v60_v38, %v64_v40 }
 0x202   :  { %v8762_v23 = vcombine.high %v76_v11, %v80_v12 }
 0x204   :  { %6947 = vmatpush2.bf16.msra.mxu0 %v9567_v59  ;;  %6988 = vmatpush2.bf16.msra.mxu1 %v9695_v16 }
 0x205   :  { %6948 = vmatprep.subr.bf16.mxu0 %v9560_v17  ;;  %6989 = vmatprep.subr.bf16.mxu1 %v9688_v19  ;;  %v8769_v17 = vcombine.low %v84_v54, %v88_v57  ;;  %v56_v54 = vld [vmem:[%s13848_s1 + $0x70] sm:$0xff] }
 0x206   :  { %v180_v57 = vld [vmem:[%s13848_s1 + $0x450] sm:$0xff] }
 0x208   :  { %6949 = vmatpush2.bf16.msra.mxu0 %v9559_v27  ;;  %6990 = vmatpush2.bf16.msra.mxu1 %v9687_v63  ;;  %v68_v27 = vld [vmem:[%s13848_s1 + $0xd0] sm:$0xff] }
 0x209   :  { %7000 = vmatprep.subr.bf16.mxu0 %v8786_v34  ;;  %7041 = vmatprep.subr.bf16.mxu1 %v8914_v33  ;;  %v196_v63 = vld [vmem:[%s13848_s1 + $0x4d0] sm:$0xff]  ;;  %v8761_v33 = vcombine.low %v76_v11, %v80_v12  ;;  %v8754_v36 = vcombine.high %v68_v27, %v72_v28 }
 0x20a   :  { %v200_v34 = vld [vmem:[%s13848_s1 + $0x4f0] sm:$0xff] }
 0x20b   :  { %v6706_v58 = vpop.f32.mrf.mxu0  ;;  %6951 = vmatmul.mubr.bf16.vlgmr.msra.gmra.mxu0 %v11093_v24  ;;  %v6747_v42 = vpop.f32.mrf.mxu1  ;;  %6992 = vmatmul.mubr.bf16.vlgmr.msra.gmra.mxu1 %v11113_v18  ;;  %v8882_v37 = vcombine.high %v196_v63, %v200_v34  ;;  %v164_v12 = vld [vmem:[%s13848_s1 + $0x3d0] sm:$0xff] }
 0x20c   :  { %v6707_v62 = vadd.f32 %v6706_v58, %v1079_v45  ;;  %7001 = vmatpush1.bf16.msra.mxu0 %v8785_v46  ;;  %7042 = vmatpush1.bf16.msra.mxu1 %v8913_v48  ;;  %v192_v45 = vld [vmem:[%s13848_s1 + $0x4b0] sm:$0xff]  ;;  %v8753_v46 = vcombine.low %v68_v27, %v72_v28  ;;  %v8881_v48 = vcombine.low %v196_v63, %v200_v34 }
 0x20d   :  { %v6708_v1 = vpop.f32.mrf.mxu0  ;;  %7002 = vmatprep.subr.bf16.mxu0 %v8778_v50  ;;  %v6749_v7 = vpop.f32.mrf.mxu1  ;;  %7043 = vmatprep.subr.bf16.mxu1 %v8906_v52  ;;  %v8746_v50 = vcombine.high %v60_v38, %v64_v40  ;;  %v52_v52 = vld [vmem:[%s13848_s1 + $0x50] sm:$0xff]  ;;  %v8873_v61 = vcombine.low %v188_v41, %v192_v45  ;;  %v8977_v63 = vcombine.low %v292_v15, %v296_v53 }
 0x20e   :  { %v11940_v5 = vadd.f32 %v6747_v42, %v6707_v62  ;;  %v6709_v6 = vadd.f32 %v6708_v1, %v1083_v51  ;;  %7032 = vmatprep.mubr.bf16.mxu0 %v10322_v9  ;;  %7073 = vmatprep.mubr.bf16.mxu1 %v10333_v13  ;;  %v8874_v51 = vcombine.high %v188_v41, %v192_v45  ;;  %v184_v58 = vld [vmem:[%s13848_s1 + $0x470] sm:$0xff] }
 0x20f   :  { %v6710_v14 = vpop.f32.mrf.mxu0  ;;  %v6751_v16 = vpop.f32.mrf.mxu1  ;;  %v8738_v62 = vcombine.high %v52_v52, %v56_v54  ;;  %v8866_v42 = vcombine.high %v180_v57, %v184_v58  ;;  %v48_v1 = vld [vmem:[%s13848_s1 + $0x30] sm:$0xff] }
 0x210   :  { %v11956_v59 = vadd.f32 %v6749_v7, %v6709_v6  ;;  %7003 = vmatpush1.bf16.msra.mxu0 %v8777_v60  ;;  %7044 = vmatpush1.bf16.msra.mxu1 %v8905_v2  ;;  %v44_v60 = vld [vmem:[%s13848_s1 + $0x10] sm:$0xff]  ;;  %v8737_v6 = vcombine.low %v52_v52, %v56_v54  ;;  %v8865_v7 = vcombine.low %v180_v57, %v184_v58 }
 0x211   :  { %v6711_v19 = vpop.f32.mrf.mxu0  ;;  %7004 = vmatprep.subr.bf16.mxu0 %v8770_v0  ;;  %v6752_v25 = vpop.f32.mrf.mxu1  ;;  %7045 = vmatprep.subr.bf16.mxu1 %v8898_v8  ;;  %v172_v2 = vld [vmem:[%s13848_s1 + $0x410] sm:$0xff]  ;;  %v8730_v8 = vcombine.high %v44_v60, %v48_v1  ;;  %v8729_v16 = vcombine.low %v44_v60, %v48_v1 }
 0x212   :  { %v176_v0 = vld [vmem:[%s13848_s1 + $0x430] sm:$0xff] }
 0x213   :  { %v8858_v11 = vcombine.high %v172_v2, %v176_v0  ;;  %v168_v14 = vld [vmem:[%s13848_s1 + $0x3f0] sm:$0xff] }
 0x214   :  { %7005 = vmatpush1.bf16.msra.mxu0 %v8769_v17  ;;  %7046 = vmatpush1.bf16.msra.mxu1 %v8897_v20  ;;  %v8857_v17 = vcombine.low %v172_v2, %v176_v0  ;;  %v8850_v19 = vcombine.high %v164_v12, %v168_v14  ;;  %v8978_v20 = vcombine.high %v292_v15, %v296_v53  ;;  %v160_v25 = vld [vmem:[%s13848_s1 + $0x3b0] sm:$0xff] }
 0x215   :  { %7006 = vmatprep.subr.bf16.mxu0 %v8762_v23  ;;  %7047 = vmatprep.subr.bf16.mxu1 %v8890_v26  ;;  %v156_v23 = vld [vmem:[%s13848_s1 + $0x390] sm:$0xff]  ;;  %v8849_v28 = vcombine.low %v164_v12, %v168_v14 }
 0x216   :  { %v284_v26 = vld [vmem:[%s13848_s1 + $0x790] sm:$0xff]  ;;  %v8842_v34 = vcombine.high %v156_v23, %v160_v25  ;;  %v8841_v40 = vcombine.low %v156_v23, %v160_v25 }
 0x217   :  { %v288_v27 = vld [vmem:[%s13848_s1 + $0x7b0] sm:$0xff] }
 0x218   :  { %7007 = vmatpush1.bf16.msra.mxu0 %v8761_v33  ;;  %7048 = vmatpush1.bf16.msra.mxu1 %v8889_v35  ;;  %v8970_v33 = vcombine.high %v284_v26, %v288_v27  ;;  %v148_v35 = vld [vmem:[%s13848_s1 + $0x350] sm:$0xff]  ;;  %v8969_v41 = vcombine.low %v284_v26, %v288_v27 }
 0x219   :  { %7008 = vmatprep.subr.bf16.mxu0 %v8754_v36  ;;  %7049 = vmatprep.subr.bf16.mxu1 %v8882_v37  ;;  %v152_v36 = vld [vmem:[%s13848_s1 + $0x370] sm:$0xff] }
 0x21a   :  { %v276_v37 = vld [vmem:[%s13848_s1 + $0x750] sm:$0xff]  ;;  %v8834_v45 = vcombine.high %v148_v35, %v152_v36  ;;  %v8833_v54 = vcombine.low %v148_v35, %v152_v36 }
 0x21b   :  { %v280_v38 = vld [vmem:[%s13848_s1 + $0x770] sm:$0xff] }
 0x21c   :  { %7009 = vmatpush1.bf16.msra.mxu0 %v8753_v46  ;;  %7050 = vmatpush1.bf16.msra.mxu1 %v8881_v48  ;;  %v8962_v46 = vcombine.high %v276_v37, %v280_v38  ;;  %v140_v48 = vld [vmem:[%s13848_s1 + $0x310] sm:$0xff]  ;;  %v8961_v57 = vcombine.low %v276_v37, %v280_v38 }
 0x21d   :  { %7010 = vmatprep.subr.bf16.mxu0 %v8746_v50  ;;  %7051 = vmatprep.subr.bf16.mxu1 %v8874_v51  ;;  %v144_v50 = vld [vmem:[%s13848_s1 + $0x330] sm:$0xff] }
 0x21e   :  { %v268_v51 = vld [vmem:[%s13848_s1 + $0x710] sm:$0xff]  ;;  %v8826_v58 = vcombine.high %v140_v48, %v144_v50  ;;  %v8825_v1 = vcombine.low %v140_v48, %v144_v50 }
 0x21f   :  { %v272_v52 = vld [vmem:[%s13848_s1 + $0x730] sm:$0xff] }
 0x220   :  { %7011 = vmatpush1.bf16.msra.mxu0 %v8745_v10  ;;  %7052 = vmatpush1.bf16.msra.mxu1 %v8873_v61  ;;  %v8954_v10 = vcombine.high %v268_v51, %v272_v52  ;;  %v132_v61 = vld [vmem:[%s13848_s1 + $0x2d0] sm:$0xff]  ;;  %v8953_v2 = vcombine.low %v268_v51, %v272_v52 }
 0x221   :  { %7012 = vmatprep.subr.bf16.mxu0 %v8738_v62  ;;  %7053 = vmatprep.subr.bf16.mxu1 %v8866_v42  ;;  %v136_v62 = vld [vmem:[%s13848_s1 + $0x2f0] sm:$0xff] }
 0x222   :  { %v260_v42 = vld [vmem:[%s13848_s1 + $0x6d0] sm:$0xff]  ;;  %v8818_v0 = vcombine.high %v132_v61, %v136_v62  ;;  %v8817_v14 = vcombine.low %v132_v61, %v136_v62 }
 0x223   :  { %v264_v60 = vld [vmem:[%s13848_s1 + $0x6f0] sm:$0xff] }
 0x224   :  { %7013 = vmatpush1.bf16.msra.mxu0 %v8737_v6  ;;  %7054 = vmatpush1.bf16.msra.mxu1 %v8865_v7  ;;  %v8946_v6 = vcombine.high %v260_v42, %v264_v60  ;;  %v124_v7 = vld [vmem:[%s13848_s1 + $0x290] sm:$0xff]  ;;  %v8945_v15 = vcombine.low %v260_v42, %v264_v60 }
 0x225   :  { %7014 = vmatprep.subr.bf16.mxu0 %v8730_v8  ;;  %7055 = vmatprep.subr.bf16.mxu1 %v8858_v11  ;;  %v128_v8 = vld [vmem:[%s13848_s1 + $0x2b0] sm:$0xff] }
 0x226   :  { %v252_v11 = vld [vmem:[%s13848_s1 + $0x690] sm:$0xff]  ;;  %v8810_v53 = vcombine.high %v124_v7, %v128_v8  ;;  %v8809_v25 = vcombine.low %v124_v7, %v128_v8 }
 0x227   :  { %v256_v12 = vld [vmem:[%s13848_s1 + $0x6b0] sm:$0xff] }
 0x228   :  { %7015 = vmatpush1.bf16.msra.mxu0 %v8729_v16  ;;  %7056 = vmatpush1.bf16.msra.mxu1 %v8857_v17  ;;  %v8938_v16 = vcombine.high %v252_v11, %v256_v12  ;;  %v116_v17 = vld [vmem:[%s13848_s1 + $0x250] sm:$0xff]  ;;  %v8937_v26 = vcombine.low %v252_v11, %v256_v12 }
 0x229   :  { %7016 = vmatprep.subr.bf16.mxu0 %v8850_v19  ;;  %7057 = vmatprep.subr.bf16.mxu1 %v8978_v20  ;;  %v120_v19 = vld [vmem:[%s13848_s1 + $0x270] sm:$0xff] }
 0x22a   :  { %v244_v20 = vld [vmem:[%s13848_s1 + $0x650] sm:$0xff]  ;;  %v8802_v27 = vcombine.high %v116_v17, %v120_v19  ;;  %v8801_v36 = vcombine.low %v116_v17, %v120_v19 }
 0x22b   :  { %v248_v23 = vld [vmem:[%s13848_s1 + $0x670] sm:$0xff] }
 0x22c   :  { %7017 = vmatpush2.bf16.msra.mxu0 %v8849_v28  ;;  %7058 = vmatpush2.bf16.msra.mxu1 %v8977_v63  ;;  %v8930_v28 = vcombine.high %v244_v20, %v248_v23  ;;  %v108_v63 = vld [vmem:[%s13848_s1 + $0x210] sm:$0xff]  ;;  %v8929_v37 = vcombine.low %v244_v20, %v248_v23 }
 0x22d   :  { %7018 = vmatprep.subr.bf16.mxu0 %v8842_v34  ;;  %7059 = vmatprep.subr.bf16.mxu1 %v8970_v33  ;;  %v112_v34 = vld [vmem:[%s13848_s1 + $0x230] sm:$0xff] }
 0x22e   :  { %v236_v33 = vld [vmem:[%s13848_s1 + $0x610] sm:$0xff]  ;;  %v8794_v38 = vcombine.high %v108_v63, %v112_v34  ;;  %v8793_v50 = vcombine.low %v108_v63, %v112_v34 }
 0x22f   :  { %v240_v35 = vld [vmem:[%s13848_s1 + $0x630] sm:$0xff] }
 0x230   :  { %7019 = vmatpush2.bf16.msra.mxu0 %v8841_v40  ;;  %7060 = vmatpush2.bf16.msra.mxu1 %v8969_v41  ;;  %v8922_v40 = vcombine.high %v236_v33, %v240_v35  ;;  %v356_v41 = vld [vmem:[%s13848_s1 + $0x9d0] sm:$0xff]  ;;  %v8921_v51 = vcombine.low %v236_v33, %v240_v35 }
 0x231   :  { %7020 = vmatprep.subr.bf16.mxu0 %v8834_v45  ;;  %7061 = vmatprep.subr.bf16.mxu1 %v8962_v46  ;;  %v360_v45 = vld [vmem:[%s13848_s1 + $0x9f0] sm:$0xff] }
 0x232   :  { %v484_v46 = vld [vmem:[%s13848_s1 + $0xdd0] sm:$0xff]  ;;  %v9042_v52 = vcombine.high %v356_v41, %v360_v45  ;;  %v9041_v62 = vcombine.low %v356_v41, %v360_v45 }
 0x233   :  { %v488_v48 = vld [vmem:[%s13848_s1 + $0xdf0] sm:$0xff] }
 0x234   :  { %7021 = vmatpush2.bf16.msra.mxu0 %v8833_v54  ;;  %7062 = vmatpush2.bf16.msra.mxu1 %v8961_v57  ;;  %v9170_v54 = vcombine.high %v484_v46, %v488_v48  ;;  %v348_v57 = vld [vmem:[%s13848_s1 + $0x990] sm:$0xff]  ;;  %v9169_v42 = vcombine.low %v484_v46, %v488_v48 }
 0x235   :  { %7022 = vmatprep.subr.bf16.mxu0 %v8826_v58  ;;  %7063 = vmatprep.subr.bf16.mxu1 %v8954_v10  ;;  %v352_v58 = vld [vmem:[%s13848_s1 + $0x9b0] sm:$0xff] }
 0x236   :  { %v476_v10 = vld [vmem:[%s13848_s1 + $0xd90] sm:$0xff]  ;;  %v9034_v60 = vcombine.high %v348_v57, %v352_v58 }
 0x237   :  { %v480_v61 = vld [vmem:[%s13848_s1 + $0xdb0] sm:$0xff] }
 0x238   :  { %7023 = vmatpush2.bf16.msra.mxu0 %v8825_v1  ;;  %7064 = vmatpush2.bf16.msra.mxu1 %v8953_v2  ;;  %v9162_v1 = vcombine.high %v476_v10, %v480_v61  ;;  %v340_v2 = vld [vmem:[%s13848_s1 + $0x950] sm:$0xff] }
 0x239   :  { %7024 = vmatprep.subr.bf16.mxu0 %v8818_v0  ;;  %7065 = vmatprep.subr.bf16.mxu1 %v8946_v6  ;;  %v344_v0 = vld [vmem:[%s13848_s1 + $0x970] sm:$0xff] }
 0x23a   :  { %v468_v7 = vld [vmem:[%s13848_s1 + $0xd50] sm:$0xff]  ;;  %v9025_v34 = vcombine.low %v340_v2, %v344_v0 }
 0x23b   :  { %v472_v8 = vld [vmem:[%s13848_s1 + $0xd70] sm:$0xff] }
 0x23c   :  { %7025 = vmatpush2.bf16.msra.mxu0 %v8817_v14  ;;  %7066 = vmatpush2.bf16.msra.mxu1 %v8945_v15  ;;  %v9033_v14 = vcombine.low %v348_v57, %v352_v58  ;;  %v9154_v23 = vcombine.high %v468_v7, %v472_v8  ;;  %v9153_v35 = vcombine.low %v468_v7, %v472_v8  ;;  %v328_v41 = vld [vmem:[%s13848_s1 + $0x8f0] sm:$0xff] }
 0x23d   :  { %7026 = vmatprep.subr.bf16.mxu0 %v8810_v53  ;;  %7067 = vmatprep.subr.bf16.mxu1 %v8938_v16  ;;  %v9161_v53 = vcombine.low %v476_v10, %v480_v61  ;;  %v9026_v16 = vcombine.high %v340_v2, %v344_v0  ;;  %v452_v45 = vld [vmem:[%s13848_s1 + $0xcd0] sm:$0xff] }
 0x23e   :  { %v456_v46 = vld [vmem:[%s13848_s1 + $0xcf0] sm:$0xff] }
 0x23f   :  { %v320_v57 = vld [vmem:[%s13848_s1 + $0x8b0] sm:$0xff] }
 0x240   :  { %7027 = vmatpush2.bf16.msra.mxu0 %v8809_v25  ;;  %7068 = vmatpush2.bf16.msra.mxu1 %v8937_v26  ;;  %v336_v25 = vld [vmem:[%s13848_s1 + $0x930] sm:$0xff] }
 0x241   :  { %7028 = vmatprep.subr.bf16.mxu0 %v8802_v27  ;;  %7069 = vmatprep.subr.bf16.mxu1 %v8930_v28  ;;  %v460_v27 = vld [vmem:[%s13848_s1 + $0xd10] sm:$0xff] }
 0x242   :  { %v444_v58 = vld [vmem:[%s13848_s1 + $0xc90] sm:$0xff] }
 0x243   :  { %v448_v10 = vld [vmem:[%s13848_s1 + $0xcb0] sm:$0xff] }
 0x244   :  { %7029 = vmatpush2.bf16.msra.mxu0 %v8801_v36  ;;  %7070 = vmatpush2.bf16.msra.mxu1 %v8929_v37  ;;  %v312_v2 = vld [vmem:[%s13848_s1 + $0x870] sm:$0xff]  ;;  %v9129_v8 = vcombine.low %v444_v58, %v448_v10 }
 0x245   :  { %7030 = vmatprep.subr.bf16.mxu0 %v8794_v38  ;;  %7071 = vmatprep.subr.bf16.mxu1 %v8922_v40  ;;  %v324_v40 = vld [vmem:[%s13848_s1 + $0x8d0] sm:$0xff] }
 0x246   :  { %v9009_v61 = vcombine.low %v324_v40, %v328_v41  ;;  %v436_v0 = vld [vmem:[%s13848_s1 + $0xc50] sm:$0xff] }
 0x248   :  { %7031 = vmatpush2.bf16.msra.mxu0 %v8793_v50  ;;  %7072 = vmatpush2.bf16.msra.mxu1 %v8921_v51  ;;  %v9010_v51 = vcombine.high %v324_v40, %v328_v41  ;;  %v544_v40 = vld [vmem:[%s13848_s1 + $0xfb0] sm:$0xff] }
 0x249   :  { %7082 = vmatprep.subr.bf16.mxu0 %v9042_v52  ;;  %7123 = vmatprep.subr.bf16.mxu1 %v9170_v54  ;;  %v9138_v52 = vcombine.high %v452_v45, %v456_v46  ;;  %v316_v54 = vld [vmem:[%s13848_s1 + $0x890] sm:$0xff] }
 0x24a   :  { %v9001_v7 = vcombine.low %v316_v54, %v320_v57 }
 0x24b   :  { %v6788_v6 = vpop.f32.mrf.mxu0  ;;  %7033 = vmatmul.mubr.bf16.vlgmr.msra.gmra.mxu0 %v10441_v22  ;;  %v6829_v12 = vpop.f32.mrf.mxu1  ;;  %7074 = vmatmul.mubr.bf16.vlgmr.msra.gmra.mxu1 %v10460_v30 }
 0x24c   :  { %v6789_v11 = vadd.f32 %v6788_v6, %v11940_v5  ;;  %7083 = vmatpush1.bf16.msra.mxu0 %v9041_v62  ;;  %7124 = vmatpush1.bf16.msra.mxu1 %v9169_v42  ;;  %v332_v5 = vld [vmem:[%s13848_s1 + $0x910] sm:$0xff]  ;;  %v9137_v62 = vcombine.low %v452_v45, %v456_v46  ;;  %v9002_v42 = vcombine.high %v316_v54, %v320_v57 }
 0x24d   :  { %v6790_v15 = vpop.f32.mrf.mxu0  ;;  %7084 = vmatprep.subr.bf16.mxu0 %v9034_v60  ;;  %v6831_v20 = vpop.f32.mrf.mxu1  ;;  %7125 = vmatprep.subr.bf16.mxu1 %v9162_v1  ;;  %v9018_v36 = vcombine.high %v332_v5, %v336_v25  ;;  %v9017_v48 = vcombine.low %v332_v5, %v336_v25  ;;  %v9130_v60 = vcombine.high %v444_v58, %v448_v10  ;;  %v308_v1 = vld [vmem:[%s13848_s1 + $0x850] sm:$0xff] }
 0x24e   :  { %v12141_v17 = vadd.f32 %v6829_v12, %v6789_v11  ;;  %v6791_v19 = vadd.f32 %v6790_v15, %v11956_v59  ;;  %7114 = vmatprep.mubr.bf16.mxu0 %v10456_v29  ;;  %v464_v59 = vld [vmem:[%s13848_s1 + $0xd30] sm:$0xff]  ;;  %7155 = vmatprep.mubr.bf16.mxu1 %v10477_v39  ;;  %v8994_v11 = vcombine.high %v308_v1, %v312_v2 }
 0x24f   :  { %v6792_v26 = vpop.f32.mrf.mxu0  ;;  %v6833_v63 = vpop.f32.mrf.mxu1  ;;  %v9146_v38 = vcombine.high %v460_v27, %v464_v59  ;;  %v9145_v50 = vcombine.low %v460_v27, %v464_v59  ;;  %v440_v6 = vld [vmem:[%s13848_s1 + $0xc70] sm:$0xff] }
 0x250   :  { %v12158_v28 = vadd.f32 %v6831_v20, %v6791_v19  ;;  %7085 = vmatpush1.bf16.msra.mxu0 %v9033_v14  ;;  %7126 = vmatpush1.bf16.msra.mxu1 %v9161_v53  ;;  %v9122_v12 = vcombine.high %v436_v0, %v440_v6  ;;  %v300_v14 = vld [vmem:[%s13848_s1 + $0x810] sm:$0xff]  ;;  %v8993_v19 = vcombine.low %v308_v1, %v312_v2 }
 0x251   :  { %v6793_v33 = vpop.f32.mrf.mxu0  ;;  %7086 = vmatprep.subr.bf16.mxu0 %v9026_v16  ;;  %v6834_v37 = vpop.f32.mrf.mxu1  ;;  %7127 = vmatprep.subr.bf16.mxu1 %v9154_v23  ;;  %v304_v15 = vld [vmem:[%s13848_s1 + $0x830] sm:$0xff]  ;;  %v9121_v20 = vcombine.low %v436_v0, %v440_v6 }
 0x252   :  { %v428_v53 = vld [vmem:[%s13848_s1 + $0xc10] sm:$0xff]  ;;  %v8986_v23 = vcombine.high %v300_v14, %v304_v15  ;;  %v8985_v63 = vcombine.low %v300_v14, %v304_v15 }
 0x253   :  { %v432_v16 = vld [vmem:[%s13848_s1 + $0xc30] sm:$0xff] }
 0x254   :  { %7087 = vmatpush1.bf16.msra.mxu0 %v9025_v34  ;;  %7128 = vmatpush1.bf16.msra.mxu1 %v9153_v35  ;;  %v9114_v5 = vcombine.high %v428_v53, %v432_v16  ;;  %v420_v25 = vld [vmem:[%s13848_s1 + $0xbd0] sm:$0xff]  ;;  %v9113_v34 = vcombine.low %v428_v53, %v432_v16 }
 0x255   :  { %7088 = vmatprep.subr.bf16.mxu0 %v9018_v36  ;;  %7129 = vmatprep.subr.bf16.mxu1 %v9146_v38  ;;  %v424_v26 = vld [vmem:[%s13848_s1 + $0xbf0] sm:$0xff] }
 0x256   :  { %v548_v27 = vld [vmem:[%s13848_s1 + $0xfd0] sm:$0xff]  ;;  %v9106_v33 = vcombine.high %v420_v25, %v424_v26  ;;  %v9105_v41 = vcombine.low %v420_v25, %v424_v26 }
 0x257   :  { %v552_v59 = vld [vmem:[%s13848_s1 + $0xff0] sm:$0xff] }
 0x258   :  { %7089 = vmatpush1.bf16.msra.mxu0 %v9017_v48  ;;  %7130 = vmatpush1.bf16.msra.mxu1 %v9145_v50  ;;  %v9234_v35 = vcombine.high %v548_v27, %v552_v59  ;;  %v412_v36 = vld [vmem:[%s13848_s1 + $0xb90] sm:$0xff]  ;;  %v9233_v45 = vcombine.low %v548_v27, %v552_v59 }
 0x259   :  { %7090 = vmatprep.subr.bf16.mxu0 %v9010_v51  ;;  %7131 = vmatprep.subr.bf16.mxu1 %v9138_v52  ;;  %v416_v37 = vld [vmem:[%s13848_s1 + $0xbb0] sm:$0xff] }
 0x25a   :  { %v540_v38 = vld [vmem:[%s13848_s1 + $0xf90] sm:$0xff]  ;;  %v9098_v46 = vcombine.high %v412_v36, %v416_v37  ;;  %v9097_v57 = vcombine.low %v412_v36, %v416_v37 }
 0x25b   :  { %v9226_v48 = vcombine.high %v540_v38, %v544_v40  ;;  %v404_v50 = vld [vmem:[%s13848_s1 + $0xb50] sm:$0xff]  ;;  %v9225_v58 = vcombine.low %v540_v38, %v544_v40 }
 0x25c   :  { %7091 = vmatpush1.bf16.msra.mxu0 %v9009_v61  ;;  %7132 = vmatpush1.bf16.msra.mxu1 %v9137_v62  ;;  %v408_v51 = vld [vmem:[%s13848_s1 + $0xb70] sm:$0xff] }
 0x25d   :  { %7092 = vmatprep.subr.bf16.mxu0 %v9002_v42  ;;  %7133 = vmatprep.subr.bf16.mxu1 %v9130_v60  ;;  %v532_v52 = vld [vmem:[%s13848_s1 + $0xf50] sm:$0xff]  ;;  %v9090_v10 = vcombine.high %v404_v50, %v408_v51  ;;  %v9089_v2 = vcombine.low %v404_v50, %v408_v51 }
 0x25e   :  { %v536_v54 = vld [vmem:[%s13848_s1 + $0xf70] sm:$0xff] }
 0x25f   :  { %v9218_v61 = vcombine.high %v532_v52, %v536_v54  ;;  %v396_v62 = vld [vmem:[%s13848_s1 + $0xb10] sm:$0xff]  ;;  %v9217_v0 = vcombine.low %v532_v52, %v536_v54 }
 0x260   :  { %7093 = vmatpush1.bf16.msra.mxu0 %v9001_v7  ;;  %7134 = vmatpush1.bf16.msra.mxu1 %v9129_v8  ;;  %v400_v42 = vld [vmem:[%s13848_s1 + $0xb30] sm:$0xff] }
 0x261   :  { %7094 = vmatprep.subr.bf16.mxu0 %v8994_v11  ;;  %7135 = vmatprep.subr.bf16.mxu1 %v9122_v12  ;;  %v524_v60 = vld [vmem:[%s13848_s1 + $0xf10] sm:$0xff]  ;;  %v9082_v6 = vcombine.high %v396_v62, %v400_v42  ;;  %v9081_v15 = vcombine.low %v396_v62, %v400_v42 }
 0x262   :  { %v528_v1 = vld [vmem:[%s13848_s1 + $0xf30] sm:$0xff] }
 0x263   :  { %v9210_v7 = vcombine.high %v524_v60, %v528_v1  ;;  %v388_v8 = vld [vmem:[%s13848_s1 + $0xad0] sm:$0xff]  ;;  %v9209_v53 = vcombine.low %v524_v60, %v528_v1 }
 0x264   :  { %7095 = vmatpush1.bf16.msra.mxu0 %v8993_v19  ;;  %7136 = vmatpush1.bf16.msra.mxu1 %v9121_v20  ;;  %v392_v11 = vld [vmem:[%s13848_s1 + $0xaf0] sm:$0xff] }
 0x265   :  { %7096 = vmatprep.subr.bf16.mxu0 %v8986_v23  ;;  %7137 = vmatprep.subr.bf16.mxu1 %v9114_v5  ;;  %v516_v12 = vld [vmem:[%s13848_s1 + $0xed0] sm:$0xff]  ;;  %v9074_v16 = vcombine.high %v388_v8, %v392_v11  ;;  %v9073_v26 = vcombine.low %v388_v8, %v392_v11 }
 0x266   :  { %v520_v14 = vld [vmem:[%s13848_s1 + $0xef0] sm:$0xff] }
 0x267   :  { %v9202_v19 = vcombine.high %v516_v12, %v520_v14  ;;  %v380_v20 = vld [vmem:[%s13848_s1 + $0xa90] sm:$0xff]  ;;  %v9201_v27 = vcombine.low %v516_v12, %v520_v14 }
 0x268   :  { %7097 = vmatpush1.bf16.msra.mxu0 %v8985_v63  ;;  %7138 = vmatpush1.bf16.msra.mxu1 %v9113_v34  ;;  %v384_v23 = vld [vmem:[%s13848_s1 + $0xab0] sm:$0xff] }
 0x269   :  { %7098 = vmatprep.subr.bf16.mxu0 %v9106_v33  ;;  %7139 = vmatprep.subr.bf16.mxu1 %v9234_v35  ;;  %v508_v5 = vld [vmem:[%s13848_s1 + $0xe90] sm:$0xff]  ;;  %v9066_v59 = vcombine.high %v380_v20, %v384_v23  ;;  %v9065_v37 = vcombine.low %v380_v20, %v384_v23 }
 0x26a   :  { %v512_v25 = vld [vmem:[%s13848_s1 + $0xeb0] sm:$0xff] }
 0x26b   :  { %v9194_v63 = vcombine.high %v508_v5, %v512_v25  ;;  %v372_v34 = vld [vmem:[%s13848_s1 + $0xa50] sm:$0xff]  ;;  %v9193_v38 = vcombine.low %v508_v5, %v512_v25 }
 0x26c   :  { %7099 = vmatpush2.bf16.msra.mxu0 %v9105_v41  ;;  %7140 = vmatpush2.bf16.msra.mxu1 %v9233_v45  ;;  %v376_v33 = vld [vmem:[%s13848_s1 + $0xa70] sm:$0xff] }
 0x26d   :  { %7100 = vmatprep.subr.bf16.mxu0 %v9098_v46  ;;  %7141 = vmatprep.subr.bf16.mxu1 %v9226_v48  ;;  %v500_v35 = vld [vmem:[%s13848_s1 + $0xe50] sm:$0xff]  ;;  %v9058_v40 = vcombine.high %v372_v34, %v376_v33  ;;  %v9057_v51 = vcombine.low %v372_v34, %v376_v33 }
 0x26e   :  { %v504_v36 = vld [vmem:[%s13848_s1 + $0xe70] sm:$0xff] }
 0x26f   :  { %v9186_v41 = vcombine.high %v500_v35, %v504_v36  ;;  %v364_v45 = vld [vmem:[%s13848_s1 + $0xa10] sm:$0xff]  ;;  %v9185_v52 = vcombine.low %v500_v35, %v504_v36 }
 0x270   :  { %7101 = vmatpush2.bf16.msra.mxu0 %v9097_v57  ;;  %7142 = vmatpush2.bf16.msra.mxu1 %v9225_v58  ;;  %v368_v46 = vld [vmem:[%s13848_s1 + $0xa30] sm:$0xff] }
 0x271   :  { %7102 = vmatprep.subr.bf16.mxu0 %v9090_v10  ;;  %7143 = vmatprep.subr.bf16.mxu1 %v9218_v61  ;;  %v492_v48 = vld [vmem:[%s13848_s1 + $0xe10] sm:$0xff]  ;;  %v9050_v54 = vcombine.high %v364_v45, %v368_v46  ;;  %v9049_v42 = vcombine.low %v364_v45, %v368_v46 }
 0x272   :  { %v496_v50 = vld [vmem:[%s13848_s1 + $0xe30] sm:$0xff] }
 0x273   :  { %v9178_v57 = vcombine.high %v492_v48, %v496_v50  ;;  %v612_v58 = vld [vmem:[%s13848_s1 + $0x11d0] sm:$0xff]  ;;  %v9177_v60 = vcombine.low %v492_v48, %v496_v50 }
 0x274   :  { %7103 = vmatpush2.bf16.msra.mxu0 %v9089_v2  ;;  %7144 = vmatpush2.bf16.msra.mxu1 %v9217_v0  ;;  %v616_v10 = vld [vmem:[%s13848_s1 + $0x11f0] sm:$0xff] }
 0x275   :  { %7104 = vmatprep.subr.bf16.mxu0 %v9082_v6  ;;  %7145 = vmatprep.subr.bf16.mxu1 %v9210_v7  ;;  %v740_v61 = vld [vmem:[%s13848_s1 + $0x15d0] sm:$0xff]  ;;  %v9298_v1 = vcombine.high %v612_v58, %v616_v10  ;;  %v9297_v11 = vcombine.low %v612_v58, %v616_v10 }
 0x276   :  { %v744_v62 = vld [vmem:[%s13848_s1 + $0x15f0] sm:$0xff] }
 0x277   :  { %v9426_v2 = vcombine.high %v740_v61, %v744_v62  ;;  %v604_v0 = vld [vmem:[%s13848_s1 + $0x1190] sm:$0xff]  ;;  %v9425_v12 = vcombine.low %v740_v61, %v744_v62 }
 0x278   :  { %7105 = vmatpush2.bf16.msra.mxu0 %v9081_v15  ;;  %7146 = vmatpush2.bf16.msra.mxu1 %v9209_v53  ;;  %v608_v6 = vld [vmem:[%s13848_s1 + $0x11b0] sm:$0xff] }
 0x279   :  { %7106 = vmatprep.subr.bf16.mxu0 %v9074_v16  ;;  %7147 = vmatprep.subr.bf16.mxu1 %v9202_v19  ;;  %v732_v7 = vld [vmem:[%s13848_s1 + $0x1590] sm:$0xff]  ;;  %v9290_v14 = vcombine.high %v604_v0, %v608_v6 }
 0x27a   :  { %v736_v8 = vld [vmem:[%s13848_s1 + $0x15b0] sm:$0xff] }
 0x27b   :  { %v9418_v15 = vcombine.high %v732_v7, %v736_v8  ;;  %v596_v53 = vld [vmem:[%s13848_s1 + $0x1150] sm:$0xff] }
 0x27c   :  { %7107 = vmatpush2.bf16.msra.mxu0 %v9073_v26  ;;  %7148 = vmatpush2.bf16.msra.mxu1 %v9201_v27  ;;  %v600_v16 = vld [vmem:[%s13848_s1 + $0x1170] sm:$0xff]  ;;  %v9289_v26 = vcombine.low %v604_v0, %v608_v6 }
 0x27d   :  { %7108 = vmatprep.subr.bf16.mxu0 %v9066_v59  ;;  %7149 = vmatprep.subr.bf16.mxu1 %v9194_v63  ;;  %v724_v20 = vld [vmem:[%s13848_s1 + $0x1550] sm:$0xff]  ;;  %v9417_v59 = vcombine.low %v732_v7, %v736_v8  ;;  %v9282_v63 = vcombine.high %v596_v53, %v600_v16  ;;  %v9281_v46 = vcombine.low %v596_v53, %v600_v16 }
 0x27e   :  { %v728_v23 = vld [vmem:[%s13848_s1 + $0x1570] sm:$0xff] }
 0x27f   :  { %v9410_v36 = vcombine.high %v724_v20, %v728_v23  ;;  %v9409_v50 = vcombine.low %v724_v20, %v728_v23  ;;  %v584_v58 = vld [vmem:[%s13848_s1 + $0x10f0] sm:$0xff] }
 0x280   :  { %7109 = vmatpush2.bf16.msra.mxu0 %v9065_v37  ;;  %7150 = vmatpush2.bf16.msra.mxu1 %v9193_v38  ;;  %v592_v37 = vld [vmem:[%s13848_s1 + $0x1130] sm:$0xff] }
 0x281   :  { %7110 = vmatprep.subr.bf16.mxu0 %v9058_v40  ;;  %7151 = vmatprep.subr.bf16.mxu1 %v9186_v41  ;;  %v716_v40 = vld [vmem:[%s13848_s1 + $0x1510] sm:$0xff] }
 0x282   :  { %v708_v10 = vld [vmem:[%s13848_s1 + $0x14d0] sm:$0xff] }
 0x283   :  { %v712_v61 = vld [vmem:[%s13848_s1 + $0x14f0] sm:$0xff] }
 0x284   :  { %7111 = vmatpush2.bf16.msra.mxu0 %v9057_v51  ;;  %7152 = vmatpush2.bf16.msra.mxu1 %v9185_v52  ;;  %v576_v0 = vld [vmem:[%s13848_s1 + $0x10b0] sm:$0xff] }
 0x285   :  { %7112 = vmatprep.subr.bf16.mxu0 %v9050_v54  ;;  %7153 = vmatprep.subr.bf16.mxu1 %v9178_v57  ;;  %v580_v57 = vld [vmem:[%s13848_s1 + $0x10d0] sm:$0xff] }
 0x286   :  { %v700_v6 = vld [vmem:[%s13848_s1 + $0x1490] sm:$0xff]  ;;  %v9265_v8 = vcombine.low %v580_v57, %v584_v58 }
 0x287   :  { %v704_v7 = vld [vmem:[%s13848_s1 + $0x14b0] sm:$0xff] }
 0x288   :  { %7113 = vmatpush2.bf16.msra.mxu0 %v9049_v42  ;;  %7154 = vmatpush2.bf16.msra.mxu1 %v9177_v60  ;;  %v9266_v60 = vcombine.high %v580_v57, %v584_v58  ;;  %v568_v53 = vld [vmem:[%s13848_s1 + $0x1070] sm:$0xff]  ;;  %v9385_v23 = vcombine.low %v700_v6, %v704_v7 }
 0x289   :  { %7164 = vmatprep.subr.bf16.mxu0 %v9298_v1  ;;  %7205 = vmatprep.subr.bf16.mxu1 %v9426_v2  ;;  %v9394_v1 = vcombine.high %v708_v10, %v712_v61  ;;  %v572_v2 = vld [vmem:[%s13848_s1 + $0x1090] sm:$0xff] }
 0x28a   :  { %v692_v16 = vld [vmem:[%s13848_s1 + $0x1450] sm:$0xff]  ;;  %v9257_v20 = vcombine.low %v572_v2, %v576_v0 }
 0x28b   :  { %v6870_v19 = vpop.f32.mrf.mxu0  ;;  %7115 = vmatmul.mubr.bf16.vlgmr.msra.gmra.mxu0 %v10663_v47  ;;  %v6911_v25 = vpop.f32.mrf.mxu1  ;;  %7156 = vmatmul.mubr.bf16.vlgmr.msra.gmra.mxu1 %v10682_v56  ;;  %v800_v57 = vld [vmem:[%s13848_s1 + $0x17b0] sm:$0xff] }
 0x28c   :  { %v6871_v5 = vadd.f32 %v6870_v19, %v12141_v17  ;;  %7165 = vmatpush1.bf16.msra.mxu0 %v9297_v11  ;;  %7206 = vmatpush1.bf16.msra.mxu1 %v9425_v12  ;;  %v588_v17 = vld [vmem:[%s13848_s1 + $0x1110] sm:$0xff]  ;;  %v9393_v11 = vcombine.low %v708_v10, %v712_v61  ;;  %v9258_v12 = vcombine.high %v572_v2, %v576_v0 }
 0x28d   :  { %v6872_v27 = vpop.f32.mrf.mxu0  ;;  %7166 = vmatprep.subr.bf16.mxu0 %v9290_v14  ;;  %v6913_v35 = vpop.f32.mrf.mxu1  ;;  %7207 = vmatprep.subr.bf16.mxu1 %v9418_v15  ;;  %v9274_v51 = vcombine.high %v588_v17, %v592_v37  ;;  %v9273_v62 = vcombine.low %v588_v17, %v592_v37  ;;  %v9386_v14 = vcombine.high %v700_v6, %v704_v7  ;;  %v564_v15 = vld [vmem:[%s13848_s1 + $0x1050] sm:$0xff] }
 0x28e   :  { %v12343_v34 = vadd.f32 %v6911_v25, %v6871_v5  ;;  %v6873_v33 = vadd.f32 %v6872_v27, %v12158_v28  ;;  %7196 = vmatprep.mubr.bf16.mxu0 %v10678_v55  ;;  %v720_v28 = vld [vmem:[%s13848_s1 + $0x1530] sm:$0xff]  ;;  %7237 = vmatprep.mubr.bf16.mxu1 %v10699_v3  ;;  %v9250_v5 = vcombine.high %v564_v15, %v568_v53 }
 0x28f   :  { %v6874_v38 = vpop.f32.mrf.mxu0  ;;  %v6915_v45 = vpop.f32.mrf.mxu1  ;;  %v9402_v54 = vcombine.high %v716_v40, %v720_v28  ;;  %v9401_v42 = vcombine.low %v716_v40, %v720_v28  ;;  %v696_v19 = vld [vmem:[%s13848_s1 + $0x1470] sm:$0xff] }
 0x290   :  { %v12360_v41 = vadd.f32 %v6913_v35, %v6873_v33  ;;  %7167 = vmatpush1.bf16.msra.mxu0 %v9289_v26  ;;  %7208 = vmatpush1.bf16.msra.mxu1 %v9417_v59  ;;  %v9378_v25 = vcombine.high %v692_v16, %v696_v19  ;;  %v556_v26 = vld [vmem:[%s13848_s1 + $0x1010] sm:$0xff]  ;;  %v9249_v33 = vcombine.low %v564_v15, %v568_v53 }
 0x291   :  { %v6875_v48 = vpop.f32.mrf.mxu0  ;;  %7168 = vmatprep.subr.bf16.mxu0 %v9282_v63  ;;  %v6916_v52 = vpop.f32.mrf.mxu1  ;;  %7209 = vmatprep.subr.bf16.mxu1 %v9410_v36  ;;  %v560_v27 = vld [vmem:[%s13848_s1 + $0x1030] sm:$0xff]  ;;  %v9377_v35 = vcombine.low %v692_v16, %v696_v19 }
 0x292   :  { %v684_v59 = vld [vmem:[%s13848_s1 + $0x1410] sm:$0xff]  ;;  %v9242_v36 = vcombine.high %v556_v26, %v560_v27  ;;  %v9241_v45 = vcombine.low %v556_v26, %v560_v27 }
 0x293   :  { %v688_v63 = vld [vmem:[%s13848_s1 + $0x1430] sm:$0xff] }
 0x294   :  { %7169 = vmatpush1.bf16.msra.mxu0 %v9281_v46  ;;  %7210 = vmatpush1.bf16.msra.mxu1 %v9409_v50  ;;  %v9370_v17 = vcombine.high %v684_v59, %v688_v63  ;;  %v676_v37 = vld [vmem:[%s13848_s1 + $0x13d0] sm:$0xff]  ;;  %v9369_v46 = vcombine.low %v684_v59, %v688_v63 }
 0x295   :  { %7170 = vmatprep.subr.bf16.mxu0 %v9274_v51  ;;  %7211 = vmatprep.subr.bf16.mxu1 %v9402_v54  ;;  %v680_v38 = vld [vmem:[%s13848_s1 + $0x13f0] sm:$0xff] }
 0x296   :  { %v804_v40 = vld [vmem:[%s13848_s1 + $0x17d0] sm:$0xff]  ;;  %v9362_v48 = vcombine.high %v676_v37, %v680_v38  ;;  %v9361_v58 = vcombine.low %v676_v37, %v680_v38 }
 0x297   :  { %v808_v28 = vld [vmem:[%s13848_s1 + $0x17f0] sm:$0xff] }
 0x298   :  { %7171 = vmatpush1.bf16.msra.mxu0 %v9273_v62  ;;  %7212 = vmatpush1.bf16.msra.mxu1 %v9401_v42  ;;  %v9490_v50 = vcombine.high %v804_v40, %v808_v28  ;;  %v668_v51 = vld [vmem:[%s13848_s1 + $0x1390] sm:$0xff]  ;;  %v9489_v10 = vcombine.low %v804_v40, %v808_v28 }
 0x299   :  { %7172 = vmatprep.subr.bf16.mxu0 %v9266_v60  ;;  %7213 = vmatprep.subr.bf16.mxu1 %v9394_v1  ;;  %v672_v52 = vld [vmem:[%s13848_s1 + $0x13b0] sm:$0xff] }
 0x29a   :  { %v796_v54 = vld [vmem:[%s13848_s1 + $0x1790] sm:$0xff]  ;;  %v9354_v61 = vcombine.high %v668_v51, %v672_v52  ;;  %v9353_v0 = vcombine.low %v668_v51, %v672_v52 }
 0x29b   :  { %v9482_v62 = vcombine.high %v796_v54, %v800_v57  ;;  %v660_v42 = vld [vmem:[%s13848_s1 + $0x1350] sm:$0xff]  ;;  %v9481_v6 = vcombine.low %v796_v54, %v800_v57 }
 0x29c   :  { %7173 = vmatpush1.bf16.msra.mxu0 %v9265_v8  ;;  %7214 = vmatpush1.bf16.msra.mxu1 %v9393_v11  ;;  %v664_v60 = vld [vmem:[%s13848_s1 + $0x1370] sm:$0xff] }
 0x29d   :  { %7174 = vmatprep.subr.bf16.mxu0 %v9258_v12  ;;  %7215 = vmatprep.subr.bf16.mxu1 %v9386_v14  ;;  %v788_v1 = vld [vmem:[%s13848_s1 + $0x1750] sm:$0xff]  ;;  %v9346_v7 = vcombine.high %v660_v42, %v664_v60  ;;  %v9345_v53 = vcombine.low %v660_v42, %v664_v60 }
 0x29e   :  { %v792_v2 = vld [vmem:[%s13848_s1 + $0x1770] sm:$0xff] }
 0x29f   :  { %v9474_v8 = vcombine.high %v788_v1, %v792_v2  ;;  %v652_v11 = vld [vmem:[%s13848_s1 + $0x1310] sm:$0xff]  ;;  %v9473_v16 = vcombine.low %v788_v1, %v792_v2 }
 0x2a0   :  { %7175 = vmatpush1.bf16.msra.mxu0 %v9257_v20  ;;  %7216 = vmatpush1.bf16.msra.mxu1 %v9385_v23  ;;  %v656_v12 = vld [vmem:[%s13848_s1 + $0x1330] sm:$0xff] }
 0x2a1   :  { %7176 = vmatprep.subr.bf16.mxu0 %v9250_v5  ;;  %7217 = vmatprep.subr.bf16.mxu1 %v9378_v25  ;;  %v780_v14 = vld [vmem:[%s13848_s1 + $0x1710] sm:$0xff]  ;;  %v9338_v19 = vcombine.high %v652_v11, %v656_v12  ;;  %v9337_v27 = vcombine.low %v652_v11, %v656_v12 }
 0x2a2   :  { %v784_v15 = vld [vmem:[%s13848_s1 + $0x1730] sm:$0xff] }
 0x2a3   :  { %v9466_v20 = vcombine.high %v780_v14, %v784_v15  ;;  %v644_v23 = vld [vmem:[%s13848_s1 + $0x12d0] sm:$0xff]  ;;  %v9465_v59 = vcombine.low %v780_v14, %v784_v15 }
 0x2a4   :  { %7177 = vmatpush1.bf16.msra.mxu0 %v9249_v33  ;;  %7218 = vmatpush1.bf16.msra.mxu1 %v9377_v35  ;;  %v648_v5 = vld [vmem:[%s13848_s1 + $0x12f0] sm:$0xff] }
 0x2a5   :  { %7178 = vmatprep.subr.bf16.mxu0 %v9242_v36  ;;  %7219 = vmatprep.subr.bf16.mxu1 %v9370_v17  ;;  %v772_v25 = vld [vmem:[%s13848_s1 + $0x16d0] sm:$0xff]  ;;  %v9330_v63 = vcombine.high %v644_v23, %v648_v5  ;;  %v9329_v38 = vcombine.low %v644_v23, %v648_v5 }
 0x2a6   :  { %v776_v26 = vld [vmem:[%s13848_s1 + $0x16f0] sm:$0xff] }
 0x2a7   :  { %v9458_v33 = vcombine.high %v772_v25, %v776_v26  ;;  %v636_v35 = vld [vmem:[%s13848_s1 + $0x1290] sm:$0xff]  ;;  %v9457_v40 = vcombine.low %v772_v25, %v776_v26 }
 0x2a8   :  { %7179 = vmatpush1.bf16.msra.mxu0 %v9241_v45  ;;  %7220 = vmatpush1.bf16.msra.mxu1 %v9369_v46  ;;  %v640_v36 = vld [vmem:[%s13848_s1 + $0x12b0] sm:$0xff] }
 0x2a9   :  { %7180 = vmatprep.subr.bf16.mxu0 %v9362_v48  ;;  %7221 = vmatprep.subr.bf16.mxu1 %v9490_v50  ;;  %v764_v17 = vld [vmem:[%s13848_s1 + $0x1690] sm:$0xff]  ;;  %v9322_v28 = vcombine.high %v636_v35, %v640_v36  ;;  %v9321_v52 = vcombine.low %v636_v35, %v640_v36 }
 0x2aa   :  { %v768_v37 = vld [vmem:[%s13848_s1 + $0x16b0] sm:$0xff] }
 0x2ab   :  { %v9450_v45 = vcombine.high %v764_v17, %v768_v37  ;;  %v628_v46 = vld [vmem:[%s13848_s1 + $0x1250] sm:$0xff]  ;;  %v9449_v54 = vcombine.low %v764_v17, %v768_v37 }
 0x2ac   :  { %7181 = vmatpush2.bf16.msra.mxu0 %v9361_v58  ;;  %7222 = vmatpush2.bf16.msra.mxu1 %v9489_v10  ;;  %v632_v48 = vld [vmem:[%s13848_s1 + $0x1270] sm:$0xff] }
 0x2ad   :  { %7182 = vmatprep.subr.bf16.mxu0 %v9354_v61  ;;  %7223 = vmatprep.subr.bf16.mxu1 %v9482_v62  ;;  %v756_v50 = vld [vmem:[%s13848_s1 + $0x1650] sm:$0xff]  ;;  %v9314_v57 = vcombine.high %v628_v46, %v632_v48  ;;  %v9313_v60 = vcombine.low %v628_v46, %v632_v48 }
 0x2ae   :  { %v760_v51 = vld [vmem:[%s13848_s1 + $0x1670] sm:$0xff] }
 0x2af   :  { %v9442_v58 = vcombine.high %v756_v50, %v760_v51  ;;  %v620_v10 = vld [vmem:[%s13848_s1 + $0x1210] sm:$0xff]  ;;  %v9441_v1 = vcombine.low %v756_v50, %v760_v51 }
 0x2b0   :  { %7183 = vmatpush2.bf16.msra.mxu0 %v9353_v0  ;;  %7224 = vmatpush2.bf16.msra.mxu1 %v9481_v6  ;;  %v624_v61 = vld [vmem:[%s13848_s1 + $0x1230] sm:$0xff] }
 0x2b1   :  { %7184 = vmatprep.subr.bf16.mxu0 %v9346_v7  ;;  %7225 = vmatprep.subr.bf16.mxu1 %v9474_v8  ;;  %v748_v62 = vld [vmem:[%s13848_s1 + $0x1610] sm:$0xff]  ;;  %v9306_v2 = vcombine.high %v620_v10, %v624_v61  ;;  %v9305_v12 = vcombine.low %v620_v10, %v624_v61 }
 0x2b2   :  { %v752_v42 = vld [vmem:[%s13848_s1 + $0x1630] sm:$0xff] }
 0x2b3   :  { %v9434_v0 = vcombine.high %v748_v62, %v752_v42  ;;  %v868_v6 = vld [vmem:[%s13848_s1 + $0x19d0] sm:$0xff]  ;;  %v9433_v14 = vcombine.low %v748_v62, %v752_v42 }
 0x2b4   :  { %7185 = vmatpush2.bf16.msra.mxu0 %v9345_v53  ;;  %7226 = vmatpush2.bf16.msra.mxu1 %v9473_v16  ;;  %v872_v7 = vld [vmem:[%s13848_s1 + $0x19f0] sm:$0xff] }
 0x2b5   :  { %7186 = vmatprep.subr.bf16.mxu0 %v9338_v19  ;;  %7227 = vmatprep.subr.bf16.mxu1 %v9466_v20  ;;  %v996_v8 = vld [vmem:[%s13848_s1 + $0x1dd0] sm:$0xff]  ;;  %v9554_v15 = vcombine.high %v868_v6, %v872_v7  ;;  %v9553_v5 = vcombine.low %v868_v6, %v872_v7 }
 0x2b6   :  { %v1000_v11 = vld [vmem:[%s13848_s1 + $0x1df0] sm:$0xff] }
 0x2b7   :  { %v9682_v53 = vcombine.high %v996_v8, %v1000_v11  ;;  %v860_v16 = vld [vmem:[%s13848_s1 + $0x1990] sm:$0xff]  ;;  %v9681_v25 = vcombine.low %v996_v8, %v1000_v11 }
 0x2b8   :  { %7187 = vmatpush2.bf16.msra.mxu0 %v9337_v27  ;;  %7228 = vmatpush2.bf16.msra.mxu1 %v9465_v59  ;;  %v864_v19 = vld [vmem:[%s13848_s1 + $0x19b0] sm:$0xff] }
 0x2b9   :  { %7188 = vmatprep.subr.bf16.mxu0 %v9330_v63  ;;  %7229 = vmatprep.subr.bf16.mxu1 %v9458_v33  ;;  %v988_v20 = vld [vmem:[%s13848_s1 + $0x1d90] sm:$0xff]  ;;  %v9546_v26 = vcombine.high %v860_v16, %v864_v19 }
 0x2ba   :  { %v992_v23 = vld [vmem:[%s13848_s1 + $0x1db0] sm:$0xff] }
 0x2bb   :  { %v9674_v27 = vcombine.high %v988_v20, %v992_v23  ;;  %v852_v59 = vld [vmem:[%s13848_s1 + $0x1950] sm:$0xff] }
 0x2bc   :  { %7189 = vmatpush2.bf16.msra.mxu0 %v9329_v38  ;;  %7230 = vmatpush2.bf16.msra.mxu1 %v9457_v40  ;;  %v856_v63 = vld [vmem:[%s13848_s1 + $0x1970] sm:$0xff]  ;;  %v9545_v38 = vcombine.low %v860_v16, %v864_v19 }
 0x2bd   :  { %7190 = vmatprep.subr.bf16.mxu0 %v9322_v28  ;;  %7231 = vmatprep.subr.bf16.mxu1 %v9450_v45  ;;  %v980_v35 = vld [vmem:[%s13848_s1 + $0x1d50] sm:$0xff]  ;;  %v9673_v28 = vcombine.low %v988_v20, %v992_v23  ;;  %v9538_v45 = vcombine.high %v852_v59, %v856_v63  ;;  %v9537_v61 = vcombine.low %v852_v59, %v856_v63 }
 0x2be   :  { %v984_v36 = vld [vmem:[%s13848_s1 + $0x1d70] sm:$0xff] }
 0x2bf   :  { %v9666_v51 = vcombine.high %v980_v35, %v984_v36  ;;  %v9665_v42 = vcombine.low %v980_v35, %v984_v36  ;;  %v840_v6 = vld [vmem:[%s13848_s1 + $0x18f0] sm:$0xff] }
 0x2c0   :  { %7191 = vmatpush2.bf16.msra.mxu0 %v9321_v52  ;;  %7232 = vmatpush2.bf16.msra.mxu1 %v9449_v54  ;;  %v848_v52 = vld [vmem:[%s13848_s1 + $0x1930] sm:$0xff] }
 0x2c1   :  { %7192 = vmatprep.subr.bf16.mxu0 %v9314_v57  ;;  %7233 = vmatprep.subr.bf16.mxu1 %v9442_v58  ;;  %v972_v57 = vld [vmem:[%s13848_s1 + $0x1d10] sm:$0xff] }
 0x2c2   :  { %v964_v7 = vld [vmem:[%s13848_s1 + $0x1cd0] sm:$0xff] }
 0x2c3   :  { %v968_v8 = vld [vmem:[%s13848_s1 + $0x1cf0] sm:$0xff] }
 0x2c4   :  { %7193 = vmatpush2.bf16.msra.mxu0 %v9313_v60  ;;  %7234 = vmatpush2.bf16.msra.mxu1 %v9441_v1  ;;  %v832_v16 = vld [vmem:[%s13848_s1 + $0x18b0] sm:$0xff] }
 0x2c5   :  { %7194 = vmatprep.subr.bf16.mxu0 %v9306_v2  ;;  %7235 = vmatprep.subr.bf16.mxu1 %v9434_v0  ;;  %v836_v0 = vld [vmem:[%s13848_s1 + $0x18d0] sm:$0xff] }
 0x2c6   :  { %v956_v19 = vld [vmem:[%s13848_s1 + $0x1c90] sm:$0xff]  ;;  %v9521_v23 = vcombine.low %v836_v0, %v840_v6 }
 0x2c7   :  { %v960_v20 = vld [vmem:[%s13848_s1 + $0x1cb0] sm:$0xff] }
 0x2c8   :  { %7195 = vmatpush2.bf16.msra.mxu0 %v9305_v12  ;;  %7236 = vmatpush2.bf16.msra.mxu1 %v9433_v14  ;;  %v9522_v14 = vcombine.high %v836_v0, %v840_v6  ;;  %v824_v59 = vld [vmem:[%s13848_s1 + $0x1870] sm:$0xff]  ;;  %v9641_v36 = vcombine.low %v956_v19, %v960_v20 }
 0x2c9   :  { %7246 = vmatprep.subr.bf16.mxu0 %v9554_v15  ;;  %7287 = vmatprep.subr.bf16.mxu1 %v9682_v53  ;;  %v9650_v15 = vcombine.high %v964_v7, %v968_v8  ;;  %v828_v53 = vld [vmem:[%s13848_s1 + $0x1890] sm:$0xff] }
 0x2ca   :  { %v948_v63 = vld [vmem:[%s13848_s1 + $0x1c50] sm:$0xff]  ;;  %v9513_v35 = vcombine.low %v828_v53, %v832_v16 }
 0x2cb   :  { %v6952_v33 = vpop.f32.mrf.mxu0  ;;  %7197 = vmatmul.mubr.bf16.vlgmr.msra.gmra.mxu0 %v10881_v21  ;;  %v6993_v37 = vpop.f32.mrf.mxu1  ;;  %7238 = vmatmul.mubr.bf16.vlgmr.msra.gmra.mxu1 %v10900_v32  ;;  %v1056_v0 = vld [vmem:[%s13848_s1 + $0x1fb0] sm:$0xff] }
 0x2cc   :  { %v6953_v17 = vadd.f32 %v6952_v33, %v12343_v34  ;;  %7247 = vmatpush1.bf16.msra.mxu0 %v9553_v5  ;;  %7288 = vmatpush1.bf16.msra.mxu1 %v9681_v25  ;;  %v844_v34 = vld [vmem:[%s13848_s1 + $0x1910] sm:$0xff]  ;;  %v9649_v5 = vcombine.low %v964_v7, %v968_v8  ;;  %v9514_v25 = vcombine.high %v828_v53, %v832_v16 }
 0x2cd   :  { %v6954_v40 = vpop.f32.mrf.mxu0  ;;  %7248 = vmatprep.subr.bf16.mxu0 %v9546_v26  ;;  %v6995_v50 = vpop.f32.mrf.mxu1  ;;  %7289 = vmatprep.subr.bf16.mxu1 %v9674_v27  ;;  %v9530_v60 = vcombine.high %v844_v34, %v848_v52  ;;  %v9529_v11 = vcombine.low %v844_v34, %v848_v52  ;;  %v9642_v26 = vcombine.high %v956_v19, %v960_v20  ;;  %v820_v27 = vld [vmem:[%s13848_s1 + $0x1850] sm:$0xff] }
 0x2ce   :  { %v12545_v46 = vadd.f32 %v6993_v37, %v6953_v17  ;;  %v6955_v48 = vadd.f32 %v6954_v40, %v12360_v41  ;;  %7278 = vmatprep.mubr.bf16.mxu0 %v10896_v31  ;;  %v976_v41 = vld [vmem:[%s13848_s1 + $0x1d30] sm:$0xff]  ;;  %7319 = vmatprep.mubr.bf16.mxu1 %v10917_v44  ;;  %v9506_v17 = vcombine.high %v820_v27, %v824_v59 }
 0x2cf   :  { %v6956_v54 = vpop.f32.mrf.mxu0  ;;  %v6997_v10 = vpop.f32.mrf.mxu1  ;;  %v9658_v2 = vcombine.high %v972_v57, %v976_v41  ;;  %v9657_v12 = vcombine.low %v972_v57, %v976_v41  ;;  %v952_v33 = vld [vmem:[%s13848_s1 + $0x1c70] sm:$0xff] }
 0x2d0   :  { %v12562_v58 = vadd.f32 %v6995_v50, %v6955_v48  ;;  %7249 = vmatpush1.bf16.msra.mxu0 %v9545_v38  ;;  %7290 = vmatpush1.bf16.msra.mxu1 %v9673_v28  ;;  %v9634_v37 = vcombine.high %v948_v63, %v952_v33  ;;  %v812_v38 = vld [vmem:[%s13848_s1 + $0x1810] sm:$0xff]  ;;  %v9505_v48 = vcombine.low %v820_v27, %v824_v59 }
 0x2d1   :  { %v6957_v62 = vpop.f32.mrf.mxu0  ;;  %7250 = vmatprep.subr.bf16.mxu0 %v9538_v45  ;;  %v6998_v1 = vpop.f32.mrf.mxu1  ;;  %7291 = vmatprep.subr.bf16.mxu1 %v9666_v51  ;;  %v816_v40 = vld [vmem:[%s13848_s1 + $0x1830] sm:$0xff]  ;;  %v9633_v50 = vcombine.low %v948_v63, %v952_v33 }
 0x2d2   :  { %v940_v28 = vld [vmem:[%s13848_s1 + $0x1c10] sm:$0xff]  ;;  %v9498_v51 = vcombine.high %v812_v38, %v816_v40  ;;  %v9497_v10 = vcombine.low %v812_v38, %v816_v40 }
 0x2d3   :  { %v944_v45 = vld [vmem:[%s13848_s1 + $0x1c30] sm:$0xff] }
 0x2d4   :  { %7251 = vmatpush1.bf16.msra.mxu0 %v9537_v61  ;;  %7292 = vmatpush1.bf16.msra.mxu1 %v9665_v42  ;;  %v9626_v34 = vcombine.high %v940_v28, %v944_v45  ;;  %v932_v52 = vld [vmem:[%s13848_s1 + $0x1bd0] sm:$0xff]  ;;  %v9625_v61 = vcombine.low %v940_v28, %v944_v45 }
 0x2d5   :  { %7252 = vmatprep.subr.bf16.mxu0 %v9530_v60  ;;  %7293 = vmatprep.subr.bf16.mxu1 %v9658_v2  ;;  %v936_v54 = vld [vmem:[%s13848_s1 + $0x1bf0] sm:$0xff] }
 0x2d6   :  { %v1060_v57 = vld [vmem:[%s13848_s1 + $0x1fd0] sm:$0xff]  ;;  %v9618_v62 = vcombine.high %v932_v52, %v936_v54  ;;  %v9617_v6 = vcombine.low %v932_v52, %v936_v54 }
 0x2d7   :  { %v1064_v41 = vld [vmem:[%s13848_s1 + $0x1ff0] sm:$0xff] }
 0x2d8   :  { %7253 = vmatpush1.bf16.msra.mxu0 %v9529_v11  ;;  %7294 = vmatpush1.bf16.msra.mxu1 %v9657_v12  ;;  %v9746_v42 = vcombine.high %v1060_v57, %v1064_v41  ;;  %v924_v60 = vld [vmem:[%s13848_s1 + $0x1b90] sm:$0xff]  ;;  %v9745_v7 = vcombine.low %v1060_v57, %v1064_v41 }
 0x2d9   :  { %7254 = vmatprep.subr.bf16.mxu0 %v9522_v14  ;;  %7295 = vmatprep.subr.bf16.mxu1 %v9650_v15  ;;  %v928_v1 = vld [vmem:[%s13848_s1 + $0x1bb0] sm:$0xff] }
 0x2da   :  { %v1052_v2 = vld [vmem:[%s13848_s1 + $0x1f90] sm:$0xff]  ;;  %v9610_v8 = vcombine.high %v924_v60, %v928_v1  ;;  %v9609_v16 = vcombine.low %v924_v60, %v928_v1 }
 0x2db   :  { %v9738_v11 = vcombine.high %v1052_v2, %v1056_v0  ;;  %v916_v12 = vld [vmem:[%s13848_s1 + $0x1b50] sm:$0xff]  ;;  %v9737_v19 = vcombine.low %v1052_v2, %v1056_v0 }
 0x2dc   :  { %7255 = vmatpush1.bf16.msra.mxu0 %v9521_v23  ;;  %7296 = vmatpush1.bf16.msra.mxu1 %v9649_v5  ;;  %v920_v14 = vld [vmem:[%s13848_s1 + $0x1b70] sm:$0xff] }
 0x2dd   :  { %7256 = vmatprep.subr.bf16.mxu0 %v9514_v25  ;;  %7297 = vmatprep.subr.bf16.mxu1 %v9642_v26  ;;  %v1044_v15 = vld [vmem:[%s13848_s1 + $0x1f50] sm:$0xff]  ;;  %v9602_v20 = vcombine.high %v916_v12, %v920_v14  ;;  %v9601_v59 = vcombine.low %v916_v12, %v920_v14 }
 0x2de   :  { %v1048_v53 = vld [vmem:[%s13848_s1 + $0x1f70] sm:$0xff] }
 0x2df   :  { %v9730_v23 = vcombine.high %v1044_v15, %v1048_v53  ;;  %v908_v5 = vld [vmem:[%s13848_s1 + $0x1b10] sm:$0xff]  ;;  %v9729_v63 = vcombine.low %v1044_v15, %v1048_v53 }
 0x2e0   :  { %7257 = vmatpush1.bf16.msra.mxu0 %v9513_v35  ;;  %7298 = vmatpush1.bf16.msra.mxu1 %v9641_v36  ;;  %v912_v25 = vld [vmem:[%s13848_s1 + $0x1b30] sm:$0xff] }
 0x2e1   :  { %7258 = vmatprep.subr.bf16.mxu0 %v9506_v17  ;;  %7299 = vmatprep.subr.bf16.mxu1 %v9634_v37  ;;  %v1036_v26 = vld [vmem:[%s13848_s1 + $0x1f10] sm:$0xff]  ;;  %v9594_v33 = vcombine.high %v908_v5, %v912_v25  ;;  %v9593_v40 = vcombine.low %v908_v5, %v912_v25  ;;  %v233_v5 = vld [vmem:[%s13848_s1 + $0x5f8] sm:$0xff] }
 0x2e2   :  { %v1040_v27 = vld [vmem:[%s13848_s1 + $0x1f30] sm:$0xff] }
 0x2e3   :  { %v9722_v35 = vcombine.high %v1036_v26, %v1040_v27  ;;  %v900_v36 = vld [vmem:[%s13848_s1 + $0x1ad0] sm:$0xff]  ;;  %v9721_v28 = vcombine.low %v1036_v26, %v1040_v27  ;;  %v1086_v26 = vsub.s32 4, %v10269_v43 }
 0x2e4   :  { %7259 = vmatpush1.bf16.msra.mxu0 %v9505_v48  ;;  %7300 = vmatpush1.bf16.msra.mxu1 %v9633_v50  ;;  %v904_v17 = vld [vmem:[%s13848_s1 + $0x1af0] sm:$0xff] }
 0x2e5   :  { %7260 = vmatprep.subr.bf16.mxu0 %v9498_v51  ;;  %7301 = vmatprep.subr.bf16.mxu1 %v9626_v34  ;;  %v1028_v37 = vld [vmem:[%s13848_s1 + $0x1ed0] sm:$0xff]  ;;  %v9586_v45 = vcombine.high %v900_v36, %v904_v17  ;;  %v9585_v54 = vcombine.low %v900_v36, %v904_v17  ;;  %v97_v36 = vld [vmem:[%s13848_s1 + $0x1b8] sm:$0xff] }
 0x2e6   :  { %v1032_v38 = vld [vmem:[%s13848_s1 + $0x1ef0] sm:$0xff]  ;;  %v221_v17 = vld [vmem:[%s13848_s1 + $0x598] sm:$0xff] }
 0x2e7   :  { %v9714_v48 = vcombine.high %v1028_v37, %v1032_v38  ;;  %v892_v50 = vld [vmem:[%s13848_s1 + $0x1a90] sm:$0xff]  ;;  %v9713_v57 = vcombine.low %v1028_v37, %v1032_v38  ;;  %v225_v37 = vld [vmem:[%s13848_s1 + $0x5b8] sm:$0xff]  ;;  %v10115_v38 = vld [vmem:[%s13849_s2] sm:$0xff] }
 0x2e8   :  { %7261 = vmatpush1.bf16.msra.mxu0 %v9497_v10  ;;  %7302 = vmatpush1.bf16.msra.mxu1 %v9625_v61  ;;  %v896_v51 = vld [vmem:[%s13848_s1 + $0x1ab0] sm:$0xff] }
 0x2e9   :  { %7262 = vmatprep.subr.bf16.mxu0 %v9618_v62  ;;  %7303 = vmatprep.subr.bf16.mxu1 %v9746_v42  ;;  %v1020_v34 = vld [vmem:[%s13848_s1 + $0x1e90] sm:$0xff]  ;;  %v9578_v41 = vcombine.high %v892_v50, %v896_v51  ;;  %v9577_v1 = vcombine.low %v892_v50, %v896_v51  ;;  %v8908_v51 = vcombine.high %v221_v17, %v225_v37 }
 0x2ea   :  { %v1024_v52 = vld [vmem:[%s13848_s1 + $0x1eb0] sm:$0xff] }
 0x2eb   :  { %v9706_v10 = vcombine.high %v1020_v34, %v1024_v52  ;;  %v884_v61 = vld [vmem:[%s13848_s1 + $0x1a50] sm:$0xff]  ;;  %v9705_v2 = vcombine.low %v1020_v34, %v1024_v52  ;;  %v85_v34 = vld [vmem:[%s13848_s1 + $0x158] sm:$0xff] }
 0x2ec   :  { %7263 = vmatpush2.bf16.msra.mxu0 %v9617_v6  ;;  %7304 = vmatpush2.bf16.msra.mxu1 %v9745_v7  ;;  %v888_v62 = vld [vmem:[%s13848_s1 + $0x1a70] sm:$0xff]  ;;  %v89_v52 = vld [vmem:[%s13848_s1 + $0x178] sm:$0xff] }
 0x2ed   :  { %7264 = vmatprep.subr.bf16.mxu0 %v9610_v8  ;;  %7305 = vmatprep.subr.bf16.mxu1 %v9738_v11  ;;  %v1012_v42 = vld [vmem:[%s13848_s1 + $0x1e50] sm:$0xff]  ;;  %v9570_v0 = vcombine.high %v884_v61, %v888_v62  ;;  %v9569_v14 = vcombine.low %v884_v61, %v888_v62 }
 0x2ee   :  { %v1016_v60 = vld [vmem:[%s13848_s1 + $0x1e70] sm:$0xff] }
 0x2ef   :  { %v9698_v6 = vcombine.high %v1012_v42, %v1016_v60  ;;  %v876_v7 = vld [vmem:[%s13848_s1 + $0x1a10] sm:$0xff]  ;;  %v9697_v15 = vcombine.low %v1012_v42, %v1016_v60  ;;  %v8907_v60 = vcombine.low %v221_v17, %v225_v37  ;;  %v61_v17 = vld [vmem:[%s13848_s1 + $0x98] sm:$0xff] }
 0x2f0   :  { %7265 = vmatpush2.bf16.msra.mxu0 %v9609_v16  ;;  %7306 = vmatpush2.bf16.msra.mxu1 %v9737_v19  ;;  %v880_v8 = vld [vmem:[%s13848_s1 + $0x1a30] sm:$0xff]  ;;  %v101_v19 = vld [vmem:[%s13848_s1 + $0x1d8] sm:$0xff] }
 0x2f1   :  { %7266 = vmatprep.subr.bf16.mxu0 %v9602_v20  ;;  %7307 = vmatprep.subr.bf16.mxu1 %v9730_v23  ;;  %v1004_v11 = vld [vmem:[%s13848_s1 + $0x1e10] sm:$0xff]  ;;  %v9562_v53 = vcombine.high %v876_v7, %v880_v8  ;;  %v105_v20 = vld [vmem:[%s13848_s1 + $0x1f8] sm:$0xff]  ;;  %v9561_v25 = vcombine.low %v876_v7, %v880_v8 }
 0x2f2   :  { %v1008_v12 = vld [vmem:[%s13848_s1 + $0x1e30] sm:$0xff]  ;;  %v229_v23 = vld [vmem:[%s13848_s1 + $0x5d8] sm:$0xff] }
 0x2f3   :  { %v9690_v16 = vcombine.high %v1004_v11, %v1008_v12  ;;  %v9689_v27 = vcombine.low %v1004_v11, %v1008_v12  ;;  %v77_v8 = vld [vmem:[%s13848_s1 + $0x118] sm:$0xff] }
 0x2f4   :  { %7267 = vmatpush2.bf16.msra.mxu0 %v9601_v59  ;;  %7308 = vmatpush2.bf16.msra.mxu1 %v9729_v63  ;;  %v8788_v59 = vcombine.high %v101_v19, %v105_v20  ;;  %v8916_v63 = vcombine.high %v229_v23, %v233_v5  ;;  %v81_v11 = vld [vmem:[%s13848_s1 + $0x138] sm:$0xff] }
 0x2f5   :  { %7268 = vmatprep.subr.bf16.mxu0 %v9594_v33  ;;  %7309 = vmatprep.subr.bf16.mxu1 %v9722_v35  ;;  %v1090_v33 = vsub.s32 5, %v10269_v43  ;;  %v93_v35 = vld [vmem:[%s13848_s1 + $0x198] sm:$0xff] }
 0x2f6   :  { %v8779_v62 = vcombine.low %v93_v35, %v97_v36  ;;  %v65_v37 = vld [vmem:[%s13848_s1 + $0xb8] sm:$0xff] }
 0x2f7   :  { %v1091_v50 = vrot.slane %v10115_v38, %v1090_v33 }
 0x2f8   :  { %7269 = vmatpush2.bf16.msra.mxu0 %v9593_v40  ;;  %7310 = vmatpush2.bf16.msra.mxu1 %v9721_v28  ;;  %v1087_v40 = vrot.slane %v10115_v38, %v1086_v26  ;;  %v8787_v28 = vcombine.low %v101_v19, %v105_v20  ;;  %v8771_v19 = vcombine.low %v85_v34, %v89_v52  ;;  %v69_v26 = vld [vmem:[%s13848_s1 + $0xd8] sm:$0xff] }
 0x2f9   :  { %7270 = vmatprep.subr.bf16.mxu0 %v9586_v45  ;;  %7311 = vmatprep.subr.bf16.mxu1 %v9714_v48  ;;  %v8915_v45 = vcombine.low %v229_v23, %v233_v5  ;;  %v8780_v48 = vcombine.high %v93_v35, %v97_v36  ;;  %v8764_v23 = vcombine.high %v77_v8, %v81_v11  ;;  %v189_v38 = vld [vmem:[%s13848_s1 + $0x498] sm:$0xff] }
 0x2fc   :  { %7271 = vmatpush2.bf16.msra.mxu0 %v9585_v54  ;;  %7312 = vmatpush2.bf16.msra.mxu1 %v9713_v57  ;;  %v213_v57 = vld [vmem:[%s13848_s1 + $0x558] sm:$0xff] }
 0x2fd   :  { %7272 = vmatprep.subr.bf16.mxu0 %v9578_v41  ;;  %7313 = vmatprep.subr.bf16.mxu1 %v9706_v10  ;;  %v217_v41 = vld [vmem:[%s13848_s1 + $0x578] sm:$0xff] }
 0x2fe   :  { %v8900_v7 = vcombine.high %v213_v57, %v217_v41 }
 0x300   :  { %7273 = vmatpush2.bf16.msra.mxu0 %v9577_v1  ;;  %7314 = vmatpush2.bf16.msra.mxu1 %v9705_v2  ;;  %v8772_v1 = vcombine.high %v85_v34, %v89_v52  ;;  %v57_v34 = vld [vmem:[%s13848_s1 + $0x78] sm:$0xff] }
 0x301   :  { %7274 = vmatprep.subr.bf16.mxu0 %v9570_v0  ;;  %7315 = vmatprep.subr.bf16.mxu1 %v9698_v6  ;;  %v181_v52 = vld [vmem:[%s13848_s1 + $0x458] sm:$0xff] }
 0x304   :  { %7275 = vmatpush2.bf16.msra.mxu0 %v9569_v14  ;;  %7316 = vmatpush2.bf16.msra.mxu1 %v9697_v15  ;;  %v205_v14 = vld [vmem:[%s13848_s1 + $0x518] sm:$0xff] }
 0x305   :  { %7276 = vmatprep.subr.bf16.mxu0 %v9562_v53  ;;  %7317 = vmatprep.subr.bf16.mxu1 %v9690_v16  ;;  %v209_v15 = vld [vmem:[%s13848_s1 + $0x538] sm:$0xff] }
 0x306   :  { %v8891_v33 = vcombine.low %v205_v14, %v209_v15 }
 0x308   :  { %7277 = vmatpush2.bf16.msra.mxu0 %v9561_v25  ;;  %7318 = vmatpush2.bf16.msra.mxu1 %v9689_v27  ;;  %v8892_v25 = vcombine.high %v205_v14, %v209_v15  ;;  %v197_v27 = vld [vmem:[%s13848_s1 + $0x4d8] sm:$0xff] }
 0x309   :  { %7328 = vmatprep.subr.bf16.mxu0 %v8788_v59  ;;  %7369 = vmatprep.subr.bf16.mxu1 %v8916_v63  ;;  %v201_v59 = vld [vmem:[%s13848_s1 + $0x4f8] sm:$0xff]  ;;  %v8763_v63 = vcombine.low %v77_v8, %v81_v11 }
 0x30a   :  { %v8884_v36 = vcombine.high %v197_v27, %v201_v59  ;;  %v165_v11 = vld [vmem:[%s13848_s1 + $0x3d8] sm:$0xff] }
 0x30b   :  { %v7034_v54 = vpop.f32.mrf.mxu0  ;;  %7279 = vmatmul.mubr.bf16.vlgmr.msra.gmra.mxu0 %v11093_v24  ;;  %v7075_v61 = vpop.f32.mrf.mxu1  ;;  %7320 = vmatmul.mubr.bf16.vlgmr.msra.gmra.mxu1 %v11113_v18  ;;  %v293_v14 = vld [vmem:[%s13848_s1 + $0x7d8] sm:$0xff] }
 0x30c   :  { %v7035_v10 = vadd.f32 %v7034_v54, %v1087_v40  ;;  %7329 = vmatpush1.bf16.msra.mxu0 %v8787_v28  ;;  %7370 = vmatpush1.bf16.msra.mxu1 %v8915_v45  ;;  %v193_v40 = vld [vmem:[%s13848_s1 + $0x4b8] sm:$0xff]  ;;  %v8883_v45 = vcombine.low %v197_v27, %v201_v59 }
 0x30d   :  { %v7036_v42 = vpop.f32.mrf.mxu0  ;;  %7330 = vmatprep.subr.bf16.mxu0 %v8780_v48  ;;  %v7077_v6 = vpop.f32.mrf.mxu1  ;;  %7371 = vmatprep.subr.bf16.mxu1 %v8908_v51  ;;  %v8748_v48 = vcombine.high %v61_v17, %v65_v37  ;;  %v53_v51 = vld [vmem:[%s13848_s1 + $0x58] sm:$0xff] }
 0x30e   :  { %v12751_v2 = vadd.f32 %v7075_v61, %v7035_v10  ;;  %v7037_v0 = vadd.f32 %v7036_v42, %v1091_v50  ;;  %7360 = vmatprep.mubr.bf16.mxu0 %v10322_v9  ;;  %7401 = vmatprep.mubr.bf16.mxu1 %v10333_v13  ;;  %v8899_v9 = vcombine.low %v213_v57, %v217_v41  ;;  %v73_v13 = vld [vmem:[%s13848_s1 + $0xf8] sm:$0xff] }
 0x30f   :  { %v7038_v12 = vpop.f32.mrf.mxu0  ;;  %v7079_v16 = vpop.f32.mrf.mxu1  ;;  %v8756_v35 = vcombine.high %v69_v26, %v73_v13  ;;  %v8755_v28 = vcombine.low %v69_v26, %v73_v13  ;;  %v8876_v50 = vcombine.high %v189_v38, %v193_v40  ;;  %v185_v54 = vld [vmem:[%s13848_s1 + $0x478] sm:$0xff]  ;;  %v8747_v57 = vcombine.low %v61_v17, %v65_v37 }
 0x310   :  { %v12767_v53 = vadd.f32 %v7077_v6, %v7037_v0  ;;  %7331 = vmatpush1.bf16.msra.mxu0 %v8779_v62  ;;  %7372 = vmatpush1.bf16.msra.mxu1 %v8907_v60  ;;  %v8875_v41 = vcombine.low %v189_v38, %v193_v40  ;;  %v8740_v10 = vcombine.high %v53_v51, %v57_v34  ;;  %v45_v62 = vld [vmem:[%s13848_s1 + $0x18] sm:$0xff] }
 0x311   :  { %v7039_v20 = vpop.f32.mrf.mxu0  ;;  %7332 = vmatprep.subr.bf16.mxu0 %v8772_v1  ;;  %v7080_v5 = vpop.f32.mrf.mxu1  ;;  %7373 = vmatprep.subr.bf16.mxu1 %v8900_v7  ;;  %v8868_v61 = vcombine.high %v181_v52, %v185_v54  ;;  %v49_v42 = vld [vmem:[%s13848_s1 + $0x38] sm:$0xff]  ;;  %v8739_v0 = vcombine.low %v53_v51, %v57_v34  ;;  %v8867_v6 = vcombine.low %v181_v52, %v185_v54 }
 0x312   :  { %v173_v60 = vld [vmem:[%s13848_s1 + $0x418] sm:$0xff]  ;;  %v8732_v7 = vcombine.high %v45_v62, %v49_v42  ;;  %v8731_v16 = vcombine.low %v45_v62, %v49_v42 }
 0x313   :  { %v177_v1 = vld [vmem:[%s13848_s1 + $0x438] sm:$0xff] }
 0x314   :  { %7333 = vmatpush1.bf16.msra.mxu0 %v8771_v19  ;;  %7374 = vmatpush1.bf16.msra.mxu1 %v8899_v9  ;;  %v8860_v8 = vcombine.high %v173_v60, %v177_v1  ;;  %v169_v12 = vld [vmem:[%s13848_s1 + $0x3f8] sm:$0xff]  ;;  %v8859_v19 = vcombine.low %v173_v60, %v177_v1 }
 0x315   :  { %7334 = vmatprep.subr.bf16.mxu0 %v8764_v23  ;;  %7375 = vmatprep.subr.bf16.mxu1 %v8892_v25  ;;  %v297_v15 = vld [vmem:[%s13848_s1 + $0x7f8] sm:$0xff]  ;;  %v8852_v20 = vcombine.high %v165_v11, %v169_v12  ;;  %v8851_v13 = vcombine.low %v165_v11, %v169_v12 }
 0x316   :  { %v8980_v9 = vcombine.high %v293_v14, %v297_v15  ;;  %v157_v23 = vld [vmem:[%s13848_s1 + $0x398] sm:$0xff]  ;;  %v8979_v27 = vcombine.low %v293_v14, %v297_v15 }
 0x317   :  { %v161_v5 = vld [vmem:[%s13848_s1 + $0x3b8] sm:$0xff] }
 0x318   :  { %7335 = vmatpush1.bf16.msra.mxu0 %v8763_v63  ;;  %7376 = vmatpush1.bf16.msra.mxu1 %v8891_v33  ;;  %v285_v25 = vld [vmem:[%s13848_s1 + $0x798] sm:$0xff]  ;;  %v8844_v59 = vcombine.high %v157_v23, %v161_v5  ;;  %v8843_v37 = vcombine.low %v157_v23, %v161_v5 }
 0x319   :  { %7336 = vmatprep.subr.bf16.mxu0 %v8756_v35  ;;  %7377 = vmatprep.subr.bf16.mxu1 %v8884_v36  ;;  %v289_v26 = vld [vmem:[%s13848_s1 + $0x7b8] sm:$0xff] }
 0x31a   :  { %v8972_v63 = vcombine.high %v285_v25, %v289_v26  ;;  %v149_v33 = vld [vmem:[%s13848_s1 + $0x358] sm:$0xff]  ;;  %v8971_v38 = vcombine.low %v285_v25, %v289_v26 }
 0x31b   :  { %v153_v35 = vld [vmem:[%s13848_s1 + $0x378] sm:$0xff] }
 0x31c   :  { %7337 = vmatpush1.bf16.msra.mxu0 %v8755_v28  ;;  %7378 = vmatpush1.bf16.msra.mxu1 %v8883_v45  ;;  %v277_v36 = vld [vmem:[%s13848_s1 + $0x758] sm:$0xff]  ;;  %v8836_v40 = vcombine.high %v149_v33, %v153_v35  ;;  %v8835_v34 = vcombine.low %v149_v33, %v153_v35 }
 0x31d   :  { %7338 = vmatprep.subr.bf16.mxu0 %v8748_v48  ;;  %7379 = vmatprep.subr.bf16.mxu1 %v8876_v50  ;;  %v281_v17 = vld [vmem:[%s13848_s1 + $0x778] sm:$0xff] }
 0x31e   :  { %v8964_v28 = vcombine.high %v277_v36, %v281_v17  ;;  %v141_v45 = vld [vmem:[%s13848_s1 + $0x318] sm:$0xff]  ;;  %v8963_v52 = vcombine.low %v277_v36, %v281_v17 }
 0x31f   :  { %v145_v48 = vld [vmem:[%s13848_s1 + $0x338] sm:$0xff] }
 0x320   :  { %7339 = vmatpush1.bf16.msra.mxu0 %v8747_v57  ;;  %7380 = vmatpush1.bf16.msra.mxu1 %v8875_v41  ;;  %v269_v50 = vld [vmem:[%s13848_s1 + $0x718] sm:$0xff]  ;;  %v8828_v54 = vcombine.high %v141_v45, %v145_v48  ;;  %v8827_v42 = vcombine.low %v141_v45, %v145_v48 }
 0x321   :  { %7340 = vmatprep.subr.bf16.mxu0 %v8740_v10  ;;  %7381 = vmatprep.subr.bf16.mxu1 %v8868_v61  ;;  %v273_v51 = vld [vmem:[%s13848_s1 + $0x738] sm:$0xff] }
 0x322   :  { %v8956_v57 = vcombine.high %v269_v50, %v273_v51  ;;  %v133_v41 = vld [vmem:[%s13848_s1 + $0x2d8] sm:$0xff]  ;;  %v8955_v60 = vcombine.low %v269_v50, %v273_v51 }
 0x323   :  { %v137_v10 = vld [vmem:[%s13848_s1 + $0x2f8] sm:$0xff] }
 0x324   :  { %7341 = vmatpush1.bf16.msra.mxu0 %v8739_v0  ;;  %7382 = vmatpush1.bf16.msra.mxu1 %v8867_v6  ;;  %v261_v61 = vld [vmem:[%s13848_s1 + $0x6d8] sm:$0xff]  ;;  %v8820_v1 = vcombine.high %v133_v41, %v137_v10  ;;  %v8819_v12 = vcombine.low %v133_v41, %v137_v10 }
 0x325   :  { %7342 = vmatprep.subr.bf16.mxu0 %v8732_v7  ;;  %7383 = vmatprep.subr.bf16.mxu1 %v8860_v8  ;;  %v265_v62 = vld [vmem:[%s13848_s1 + $0x6f8] sm:$0xff] }
 0x326   :  { %v8948_v0 = vcombine.high %v261_v61, %v265_v62  ;;  %v125_v6 = vld [vmem:[%s13848_s1 + $0x298] sm:$0xff]  ;;  %v8947_v14 = vcombine.low %v261_v61, %v265_v62 }
 0x327   :  { %v129_v7 = vld [vmem:[%s13848_s1 + $0x2b8] sm:$0xff] }
 0x328   :  { %7343 = vmatpush1.bf16.msra.mxu0 %v8731_v16  ;;  %7384 = vmatpush1.bf16.msra.mxu1 %v8859_v19  ;;  %v253_v8 = vld [vmem:[%s13848_s1 + $0x698] sm:$0xff]  ;;  %v8812_v15 = vcombine.high %v125_v6, %v129_v7  ;;  %v8811_v5 = vcombine.low %v125_v6, %v129_v7 }
 0x329   :  { %7344 = vmatprep.subr.bf16.mxu0 %v8852_v20  ;;  %7385 = vmatprep.subr.bf16.mxu1 %v8980_v9  ;;  %v257_v11 = vld [vmem:[%s13848_s1 + $0x6b8] sm:$0xff] }
 0x32a   :  { %v8940_v16 = vcombine.high %v253_v8, %v257_v11  ;;  %v117_v19 = vld [vmem:[%s13848_s1 + $0x258] sm:$0xff]  ;;  %v8939_v25 = vcombine.low %v253_v8, %v257_v11 }
 0x32b   :  { %v121_v20 = vld [vmem:[%s13848_s1 + $0x278] sm:$0xff] }
 0x32c   :  { %7345 = vmatpush2.bf16.msra.mxu0 %v8851_v13  ;;  %7386 = vmatpush2.bf16.msra.mxu1 %v8979_v27  ;;  %v245_v9 = vld [vmem:[%s13848_s1 + $0x658] sm:$0xff]  ;;  %v8804_v26 = vcombine.high %v117_v19, %v121_v20  ;;  %v8803_v35 = vcombine.low %v117_v19, %v121_v20 }
 0x32d   :  { %7346 = vmatprep.subr.bf16.mxu0 %v8844_v59  ;;  %7387 = vmatprep.subr.bf16.mxu1 %v8972_v63  ;;  %v249_v23 = vld [vmem:[%s13848_s1 + $0x678] sm:$0xff] }
 0x32e   :  { %v8932_v13 = vcombine.high %v245_v9, %v249_v23  ;;  %v109_v27 = vld [vmem:[%s13848_s1 + $0x218] sm:$0xff]  ;;  %v8931_v36 = vcombine.low %v245_v9, %v249_v23 }
 0x32f   :  { %v113_v59 = vld [vmem:[%s13848_s1 + $0x238] sm:$0xff] }
 0x330   :  { %7347 = vmatpush2.bf16.msra.mxu0 %v8843_v37  ;;  %7388 = vmatpush2.bf16.msra.mxu1 %v8971_v38  ;;  %v237_v63 = vld [vmem:[%s13848_s1 + $0x618] sm:$0xff]  ;;  %v8796_v17 = vcombine.high %v109_v27, %v113_v59  ;;  %v8795_v48 = vcombine.low %v109_v27, %v113_v59 }
 0x331   :  { %7348 = vmatprep.subr.bf16.mxu0 %v8836_v40  ;;  %7389 = vmatprep.subr.bf16.mxu1 %v8964_v28  ;;  %v241_v33 = vld [vmem:[%s13848_s1 + $0x638] sm:$0xff] }
 0x332   :  { %v8924_v37 = vcombine.high %v237_v63, %v241_v33  ;;  %v357_v38 = vld [vmem:[%s13848_s1 + $0x9d8] sm:$0xff]  ;;  %v8923_v50 = vcombine.low %v237_v63, %v241_v33 }
 0x333   :  { %v361_v40 = vld [vmem:[%s13848_s1 + $0x9f8] sm:$0xff] }
 0x334   :  { %7349 = vmatpush2.bf16.msra.mxu0 %v8835_v34  ;;  %7390 = vmatpush2.bf16.msra.mxu1 %v8963_v52  ;;  %v485_v28 = vld [vmem:[%s13848_s1 + $0xdd8] sm:$0xff]  ;;  %v9044_v51 = vcombine.high %v357_v38, %v361_v40  ;;  %v9043_v10 = vcombine.low %v357_v38, %v361_v40 }
 0x335   :  { %7350 = vmatprep.subr.bf16.mxu0 %v8828_v54  ;;  %7391 = vmatprep.subr.bf16.mxu1 %v8956_v57  ;;  %v489_v45 = vld [vmem:[%s13848_s1 + $0xdf8] sm:$0xff] }
 0x336   :  { %v9172_v34 = vcombine.high %v485_v28, %v489_v45  ;;  %v349_v52 = vld [vmem:[%s13848_s1 + $0x998] sm:$0xff]  ;;  %v9171_v61 = vcombine.low %v485_v28, %v489_v45 }
 0x337   :  { %v353_v54 = vld [vmem:[%s13848_s1 + $0x9b8] sm:$0xff] }
 0x338   :  { %7351 = vmatpush2.bf16.msra.mxu0 %v8827_v42  ;;  %7392 = vmatpush2.bf16.msra.mxu1 %v8955_v60  ;;  %v477_v57 = vld [vmem:[%s13848_s1 + $0xd98] sm:$0xff]  ;;  %v9036_v62 = vcombine.high %v349_v52, %v353_v54 }
 0x339   :  { %7352 = vmatprep.subr.bf16.mxu0 %v8820_v1  ;;  %7393 = vmatprep.subr.bf16.mxu1 %v8948_v0  ;;  %v481_v41 = vld [vmem:[%s13848_s1 + $0xdb8] sm:$0xff] }
 0x33a   :  { %v9164_v42 = vcombine.high %v477_v57, %v481_v41  ;;  %v341_v60 = vld [vmem:[%s13848_s1 + $0x958] sm:$0xff] }
 0x33b   :  { %v345_v1 = vld [vmem:[%s13848_s1 + $0x978] sm:$0xff] }
 0x33c   :  { %7353 = vmatpush2.bf16.msra.mxu0 %v8819_v12  ;;  %7394 = vmatpush2.bf16.msra.mxu1 %v8947_v14  ;;  %v469_v6 = vld [vmem:[%s13848_s1 + $0xd58] sm:$0xff]  ;;  %v9035_v12 = vcombine.low %v349_v52, %v353_v54 }
 0x33d   :  { %7354 = vmatprep.subr.bf16.mxu0 %v8812_v15  ;;  %7395 = vmatprep.subr.bf16.mxu1 %v8940_v16  ;;  %v473_v7 = vld [vmem:[%s13848_s1 + $0xd78] sm:$0xff]  ;;  %v9163_v15 = vcombine.low %v477_v57, %v481_v41 }
 0x33e   :  { %v9156_v9 = vcombine.high %v469_v6, %v473_v7  ;;  %v317_v45 = vld [vmem:[%s13848_s1 + $0x898] sm:$0xff] }
 0x33f   :  { %v309_v41 = vld [vmem:[%s13848_s1 + $0x858] sm:$0xff] }
 0x340   :  { %7355 = vmatpush2.bf16.msra.mxu0 %v8811_v5  ;;  %7396 = vmatpush2.bf16.msra.mxu1 %v8939_v25  ;;  %v461_v5 = vld [vmem:[%s13848_s1 + $0xd18] sm:$0xff] }
 0x341   :  { %7356 = vmatprep.subr.bf16.mxu0 %v8804_v26  ;;  %7397 = vmatprep.subr.bf16.mxu1 %v8932_v13  ;;  %v9027_v13 = vcombine.low %v341_v60, %v345_v1 }
 0x344   :  { %7357 = vmatpush2.bf16.msra.mxu0 %v8803_v35  ;;  %7398 = vmatpush2.bf16.msra.mxu1 %v8931_v36  ;;  %v325_v35 = vld [vmem:[%s13848_s1 + $0x8d8] sm:$0xff] }
 0x345   :  { %7358 = vmatprep.subr.bf16.mxu0 %v8796_v17  ;;  %7399 = vmatprep.subr.bf16.mxu1 %v8924_v37  ;;  %v453_v36 = vld [vmem:[%s13848_s1 + $0xcd8] sm:$0xff] }
 0x346   :  { %v457_v17 = vld [vmem:[%s13848_s1 + $0xcf8] sm:$0xff] }
 0x347   :  { %v9140_v28 = vcombine.high %v453_v36, %v457_v17  ;;  %v9139_v52 = vcombine.low %v453_v36, %v457_v17  ;;  %v409_v36 = vld [vmem:[%s13848_s1 + $0xb78] sm:$0xff] }
 0x348   :  { %7359 = vmatpush2.bf16.msra.mxu0 %v8795_v48  ;;  %7400 = vmatpush2.bf16.msra.mxu1 %v8923_v50  ;;  %v321_v48 = vld [vmem:[%s13848_s1 + $0x8b8] sm:$0xff] }
 0x349   :  { %7410 = vmatprep.subr.bf16.mxu0 %v9044_v51  ;;  %7451 = vmatprep.subr.bf16.mxu1 %v9172_v34  ;;  %v445_v50 = vld [vmem:[%s13848_s1 + $0xc98] sm:$0xff]  ;;  %v9004_v54 = vcombine.high %v317_v45, %v321_v48 }
 0x34a   :  { %v449_v51 = vld [vmem:[%s13848_s1 + $0xcb8] sm:$0xff] }
 0x34b   :  { %v7116_v0 = vpop.f32.mrf.mxu0  ;;  %7361 = vmatmul.mubr.bf16.vlgmr.msra.gmra.mxu0 %v10441_v22  ;;  %v7157_v11 = vpop.f32.mrf.mxu1  ;;  %7402 = vmatmul.mubr.bf16.vlgmr.msra.gmra.mxu1 %v10460_v30  ;;  %v9028_v22 = vcombine.high %v341_v60, %v345_v1  ;;  %v337_v30 = vld [vmem:[%s13848_s1 + $0x938] sm:$0xff]  ;;  %v9132_v57 = vcombine.high %v445_v50, %v449_v51  ;;  %v9131_v60 = vcombine.low %v445_v50, %v449_v51 }
 0x34c   :  { %v7117_v8 = vadd.f32 %v7116_v0, %v12751_v2  ;;  %7411 = vmatpush1.bf16.msra.mxu0 %v9043_v10  ;;  %7452 = vmatpush1.bf16.msra.mxu1 %v9171_v61  ;;  %v333_v2 = vld [vmem:[%s13848_s1 + $0x918] sm:$0xff] }
 0x34d   :  { %v7118_v14 = vpop.f32.mrf.mxu0  ;;  %7412 = vmatprep.subr.bf16.mxu0 %v9036_v62  ;;  %v7159_v20 = vpop.f32.mrf.mxu1  ;;  %7453 = vmatprep.subr.bf16.mxu1 %v9164_v42  ;;  %v9020_v59 = vcombine.high %v333_v2, %v337_v30  ;;  %v9019_v37 = vcombine.low %v333_v2, %v337_v30  ;;  %v313_v10 = vld [vmem:[%s13848_s1 + $0x878] sm:$0xff]  ;;  %v9003_v42 = vcombine.low %v317_v45, %v321_v48 }
 0x34e   :  { %v12952_v16 = vadd.f32 %v7157_v11, %v7117_v8  ;;  %v7119_v19 = vadd.f32 %v7118_v14, %v12767_v53  ;;  %7442 = vmatprep.mubr.bf16.mxu0 %v10456_v29  ;;  %v465_v53 = vld [vmem:[%s13848_s1 + $0xd38] sm:$0xff]  ;;  %7483 = vmatprep.mubr.bf16.mxu1 %v10477_v39  ;;  %v9155_v29 = vcombine.low %v469_v6, %v473_v7 }
 0x34f   :  { %v7120_v23 = vpop.f32.mrf.mxu0  ;;  %v7161_v26 = vpop.f32.mrf.mxu1  ;;  %v9148_v33 = vcombine.high %v461_v5, %v465_v53  ;;  %v329_v39 = vld [vmem:[%s13848_s1 + $0x8f8] sm:$0xff]  ;;  %v9147_v38 = vcombine.low %v461_v5, %v465_v53  ;;  %v8996_v1 = vcombine.high %v309_v41, %v313_v10 }
 0x350   :  { %v12969_v25 = vadd.f32 %v7159_v20, %v7119_v19  ;;  %7413 = vmatpush1.bf16.msra.mxu0 %v9035_v12  ;;  %7454 = vmatpush1.bf16.msra.mxu1 %v9163_v15  ;;  %v9012_v40 = vcombine.high %v325_v35, %v329_v39  ;;  %v9011_v34 = vcombine.low %v325_v35, %v329_v39  ;;  %v437_v61 = vld [vmem:[%s13848_s1 + $0xc58] sm:$0xff] }
 0x351   :  { %v7121_v27 = vpop.f32.mrf.mxu0  ;;  %7414 = vmatprep.subr.bf16.mxu0 %v9028_v22  ;;  %v7162_v63 = vpop.f32.mrf.mxu1  ;;  %7455 = vmatprep.subr.bf16.mxu1 %v9156_v9  ;;  %v441_v62 = vld [vmem:[%s13848_s1 + $0xc78] sm:$0xff]  ;;  %v8995_v12 = vcombine.low %v309_v41, %v313_v10 }
 0x352   :  { %v9124_v0 = vcombine.high %v437_v61, %v441_v62  ;;  %v301_v6 = vld [vmem:[%s13848_s1 + $0x818] sm:$0xff]  ;;  %v9123_v14 = vcombine.low %v437_v61, %v441_v62 }
 0x353   :  { %v305_v7 = vld [vmem:[%s13848_s1 + $0x838] sm:$0xff] }
 0x354   :  { %7415 = vmatpush1.bf16.msra.mxu0 %v9027_v13  ;;  %7456 = vmatpush1.bf16.msra.mxu1 %v9155_v29  ;;  %v429_v8 = vld [vmem:[%s13848_s1 + $0xc18] sm:$0xff]  ;;  %v8988_v15 = vcombine.high %v301_v6, %v305_v7  ;;  %v8987_v30 = vcombine.low %v301_v6, %v305_v7 }
 0x355   :  { %7416 = vmatprep.subr.bf16.mxu0 %v9020_v59  ;;  %7457 = vmatprep.subr.bf16.mxu1 %v9148_v33  ;;  %v433_v11 = vld [vmem:[%s13848_s1 + $0xc38] sm:$0xff] }
 0x356   :  { %v9116_v22 = vcombine.high %v429_v8, %v433_v11  ;;  %v421_v19 = vld [vmem:[%s13848_s1 + $0xbd8] sm:$0xff]  ;;  %v9115_v23 = vcombine.low %v429_v8, %v433_v11 }
 0x357   :  { %v425_v20 = vld [vmem:[%s13848_s1 + $0xbf8] sm:$0xff] }
 0x358   :  { %7417 = vmatpush1.bf16.msra.mxu0 %v9019_v37  ;;  %7458 = vmatpush1.bf16.msra.mxu1 %v9147_v38  ;;  %v549_v9 = vld [vmem:[%s13848_s1 + $0xfd8] sm:$0xff]  ;;  %v9108_v5 = vcombine.high %v421_v19, %v425_v20  ;;  %v9107_v59 = vcombine.low %v421_v19, %v425_v20 }
 0x359   :  { %7418 = vmatprep.subr.bf16.mxu0 %v9012_v40  ;;  %7459 = vmatprep.subr.bf16.mxu1 %v9140_v28  ;;  %v553_v2 = vld [vmem:[%s13848_s1 + $0xff8] sm:$0xff] }
 0x35a   :  { %v9236_v53 = vcombine.high %v549_v9, %v553_v2  ;;  %v413_v26 = vld [vmem:[%s13848_s1 + $0xb98] sm:$0xff]  ;;  %v9235_v63 = vcombine.low %v549_v9, %v553_v2 }
 0x35b   :  { %v417_v13 = vld [vmem:[%s13848_s1 + $0xbb8] sm:$0xff] }
 0x35c   :  { %7419 = vmatpush1.bf16.msra.mxu0 %v9011_v34  ;;  %7460 = vmatpush1.bf16.msra.mxu1 %v9139_v52  ;;  %v541_v27 = vld [vmem:[%s13848_s1 + $0xf98] sm:$0xff]  ;;  %v9100_v33 = vcombine.high %v413_v26, %v417_v13  ;;  %v9099_v38 = vcombine.low %v413_v26, %v417_v13 }
 0x35d   :  { %7420 = vmatprep.subr.bf16.mxu0 %v9004_v54  ;;  %7461 = vmatprep.subr.bf16.mxu1 %v9132_v57  ;;  %v545_v29 = vld [vmem:[%s13848_s1 + $0xfb8] sm:$0xff] }
 0x35e   :  { %v9228_v35 = vcombine.high %v541_v27, %v545_v29  ;;  %v405_v39 = vld [vmem:[%s13848_s1 + $0xb58] sm:$0xff]  ;;  %v9227_v40 = vcombine.low %v541_v27, %v545_v29 }
 0x35f   :  { %v533_v17 = vld [vmem:[%s13848_s1 + $0xf58] sm:$0xff]  ;;  %v9092_v28 = vcombine.high %v405_v39, %v409_v36  ;;  %v9091_v52 = vcombine.low %v405_v39, %v409_v36 }
 0x360   :  { %7421 = vmatpush1.bf16.msra.mxu0 %v9003_v42  ;;  %7462 = vmatpush1.bf16.msra.mxu1 %v9131_v60  ;;  %v537_v37 = vld [vmem:[%s13848_s1 + $0xf78] sm:$0xff] }
 0x361   :  { %7422 = vmatprep.subr.bf16.mxu0 %v8996_v1  ;;  %7463 = vmatprep.subr.bf16.mxu1 %v9124_v0  ;;  %v9220_v45 = vcombine.high %v533_v17, %v537_v37  ;;  %v397_v48 = vld [vmem:[%s13848_s1 + $0xb18] sm:$0xff]  ;;  %v9219_v54 = vcombine.low %v533_v17, %v537_v37 }
 0x362   :  { %v401_v50 = vld [vmem:[%s13848_s1 + $0xb38] sm:$0xff] }
 0x363   :  { %v525_v51 = vld [vmem:[%s13848_s1 + $0xf18] sm:$0xff]  ;;  %v9084_v57 = vcombine.high %v397_v48, %v401_v50  ;;  %v9083_v60 = vcombine.low %v397_v48, %v401_v50 }
 0x364   :  { %7423 = vmatpush1.bf16.msra.mxu0 %v8995_v12  ;;  %7464 = vmatpush1.bf16.msra.mxu1 %v9123_v14  ;;  %v529_v34 = vld [vmem:[%s13848_s1 + $0xf38] sm:$0xff] }
 0x365   :  { %7424 = vmatprep.subr.bf16.mxu0 %v8988_v15  ;;  %7465 = vmatprep.subr.bf16.mxu1 %v9116_v22  ;;  %v9212_v41 = vcombine.high %v525_v51, %v529_v34  ;;  %v389_v10 = vld [vmem:[%s13848_s1 + $0xad8] sm:$0xff]  ;;  %v9211_v1 = vcombine.low %v525_v51, %v529_v34 }
 0x366   :  { %v393_v61 = vld [vmem:[%s13848_s1 + $0xaf8] sm:$0xff] }
 0x367   :  { %v517_v62 = vld [vmem:[%s13848_s1 + $0xed8] sm:$0xff]  ;;  %v9076_v0 = vcombine.high %v389_v10, %v393_v61  ;;  %v9075_v14 = vcombine.low %v389_v10, %v393_v61 }
 0x368   :  { %7425 = vmatpush1.bf16.msra.mxu0 %v8987_v30  ;;  %7466 = vmatpush1.bf16.msra.mxu1 %v9115_v23  ;;  %v521_v42 = vld [vmem:[%s13848_s1 + $0xef8] sm:$0xff] }
 0x369   :  { %7426 = vmatprep.subr.bf16.mxu0 %v9108_v5  ;;  %7467 = vmatprep.subr.bf16.mxu1 %v9236_v53  ;;  %v9204_v6 = vcombine.high %v517_v62, %v521_v42  ;;  %v381_v7 = vld [vmem:[%s13848_s1 + $0xa98] sm:$0xff]  ;;  %v9203_v15 = vcombine.low %v517_v62, %v521_v42 }
 0x36a   :  { %v385_v8 = vld [vmem:[%s13848_s1 + $0xab8] sm:$0xff] }
 0x36b   :  { %v509_v11 = vld [vmem:[%s13848_s1 + $0xe98] sm:$0xff]  ;;  %v9068_v22 = vcombine.high %v381_v7, %v385_v8  ;;  %v9067_v23 = vcombine.low %v381_v7, %v385_v8 }
 0x36c   :  { %7427 = vmatpush2.bf16.msra.mxu0 %v9107_v59  ;;  %7468 = vmatpush2.bf16.msra.mxu1 %v9235_v63  ;;  %v513_v12 = vld [vmem:[%s13848_s1 + $0xeb8] sm:$0xff] }
 0x36d   :  { %7428 = vmatprep.subr.bf16.mxu0 %v9100_v33  ;;  %7469 = vmatprep.subr.bf16.mxu1 %v9228_v35  ;;  %v9196_v19 = vcombine.high %v509_v11, %v513_v12  ;;  %v373_v20 = vld [vmem:[%s13848_s1 + $0xa58] sm:$0xff]  ;;  %v9195_v5 = vcombine.low %v509_v11, %v513_v12 }
 0x36e   :  { %v377_v9 = vld [vmem:[%s13848_s1 + $0xa78] sm:$0xff] }
 0x36f   :  { %v501_v2 = vld [vmem:[%s13848_s1 + $0xe58] sm:$0xff]  ;;  %v9060_v53 = vcombine.high %v373_v20, %v377_v9  ;;  %v9059_v63 = vcombine.low %v373_v20, %v377_v9 }
 0x370   :  { %7429 = vmatpush2.bf16.msra.mxu0 %v9099_v38  ;;  %7470 = vmatpush2.bf16.msra.mxu1 %v9227_v40  ;;  %v505_v30 = vld [vmem:[%s13848_s1 + $0xe78] sm:$0xff] }
 0x371   :  { %7430 = vmatprep.subr.bf16.mxu0 %v9092_v28  ;;  %7471 = vmatprep.subr.bf16.mxu1 %v9220_v45  ;;  %v9188_v26 = vcombine.high %v501_v2, %v505_v30  ;;  %v365_v13 = vld [vmem:[%s13848_s1 + $0xa18] sm:$0xff]  ;;  %v9187_v33 = vcombine.low %v501_v2, %v505_v30 }
 0x372   :  { %v369_v27 = vld [vmem:[%s13848_s1 + $0xa38] sm:$0xff] }
 0x373   :  { %v493_v29 = vld [vmem:[%s13848_s1 + $0xe18] sm:$0xff]  ;;  %v9052_v35 = vcombine.high %v365_v13, %v369_v27  ;;  %v9051_v40 = vcombine.low %v365_v13, %v369_v27 }
 0x374   :  { %7431 = vmatpush2.bf16.msra.mxu0 %v9091_v52  ;;  %7472 = vmatpush2.bf16.msra.mxu1 %v9219_v54  ;;  %v497_v59 = vld [vmem:[%s13848_s1 + $0xe38] sm:$0xff] }
 0x375   :  { %7432 = vmatprep.subr.bf16.mxu0 %v9084_v57  ;;  %7473 = vmatprep.subr.bf16.mxu1 %v9212_v41  ;;  %v9180_v39 = vcombine.high %v493_v29, %v497_v59  ;;  %v613_v36 = vld [vmem:[%s13848_s1 + $0x11d8] sm:$0xff]  ;;  %v9179_v28 = vcombine.low %v493_v29, %v497_v59 }
 0x376   :  { %v617_v17 = vld [vmem:[%s13848_s1 + $0x11f8] sm:$0xff] }
 0x377   :  { %v741_v37 = vld [vmem:[%s13848_s1 + $0x15d8] sm:$0xff]  ;;  %v9300_v45 = vcombine.high %v613_v36, %v617_v17  ;;  %v9299_v54 = vcombine.low %v613_v36, %v617_v17 }
 0x378   :  { %7433 = vmatpush2.bf16.msra.mxu0 %v9083_v60  ;;  %7474 = vmatpush2.bf16.msra.mxu1 %v9211_v1  ;;  %v745_v38 = vld [vmem:[%s13848_s1 + $0x15f8] sm:$0xff] }
 0x379   :  { %7434 = vmatprep.subr.bf16.mxu0 %v9076_v0  ;;  %7475 = vmatprep.subr.bf16.mxu1 %v9204_v6  ;;  %v9428_v48 = vcombine.high %v741_v37, %v745_v38  ;;  %v605_v50 = vld [vmem:[%s13848_s1 + $0x1198] sm:$0xff]  ;;  %v9427_v57 = vcombine.low %v741_v37, %v745_v38 }
 0x37a   :  { %v609_v51 = vld [vmem:[%s13848_s1 + $0x11b8] sm:$0xff] }
 0x37b   :  { %v733_v34 = vld [vmem:[%s13848_s1 + $0x1598] sm:$0xff]  ;;  %v9292_v41 = vcombine.high %v605_v50, %v609_v51  ;;  %v9291_v7 = vcombine.low %v605_v50, %v609_v51 }
 0x37c   :  { %7435 = vmatpush2.bf16.msra.mxu0 %v9075_v14  ;;  %7476 = vmatpush2.bf16.msra.mxu1 %v9203_v15  ;;  %v737_v52 = vld [vmem:[%s13848_s1 + $0x15b8] sm:$0xff] }
 0x37d   :  { %7436 = vmatprep.subr.bf16.mxu0 %v9068_v22  ;;  %7477 = vmatprep.subr.bf16.mxu1 %v9196_v19  ;;  %v9420_v10 = vcombine.high %v733_v34, %v737_v52  ;;  %v597_v61 = vld [vmem:[%s13848_s1 + $0x1158] sm:$0xff]  ;;  %v9419_v11 = vcombine.low %v733_v34, %v737_v52 }
 0x37e   :  { %v601_v62 = vld [vmem:[%s13848_s1 + $0x1178] sm:$0xff] }
 0x37f   :  { %v725_v60 = vld [vmem:[%s13848_s1 + $0x1558] sm:$0xff]  ;;  %v9283_v30 = vcombine.low %v597_v61, %v601_v62 }
 0x380   :  { %7437 = vmatpush2.bf16.msra.mxu0 %v9067_v23  ;;  %7478 = vmatpush2.bf16.msra.mxu1 %v9195_v5  ;;  %v729_v1 = vld [vmem:[%s13848_s1 + $0x1578] sm:$0xff] }
 0x381   :  { %7438 = vmatprep.subr.bf16.mxu0 %v9060_v53  ;;  %7479 = vmatprep.subr.bf16.mxu1 %v9188_v26  ;;  %v9412_v22 = vcombine.high %v725_v60, %v729_v1  ;;  %v717_v20 = vld [vmem:[%s13848_s1 + $0x1518] sm:$0xff] }
 0x382   :  { %v581_v13 = vld [vmem:[%s13848_s1 + $0x10d8] sm:$0xff] }
 0x383   :  { %v709_v27 = vld [vmem:[%s13848_s1 + $0x14d8] sm:$0xff] }
 0x384   :  { %7439 = vmatpush2.bf16.msra.mxu0 %v9059_v63  ;;  %7480 = vmatpush2.bf16.msra.mxu1 %v9187_v33  ;;  %v713_v29 = vld [vmem:[%s13848_s1 + $0x14f8] sm:$0xff] }
 0x385   :  { %7440 = vmatprep.subr.bf16.mxu0 %v9052_v35  ;;  %7481 = vmatprep.subr.bf16.mxu1 %v9180_v39  ;;  %v9396_v35 = vcombine.high %v709_v27, %v713_v29  ;;  %v573_v39 = vld [vmem:[%s13848_s1 + $0x1098] sm:$0xff] }
 0x386   :  { %v577_v36 = vld [vmem:[%s13848_s1 + $0x10b8] sm:$0xff] }
 0x387   :  { %v701_v17 = vld [vmem:[%s13848_s1 + $0x1498] sm:$0xff]  ;;  %v9259_v52 = vcombine.low %v573_v39, %v577_v36 }
 0x388   :  { %7441 = vmatpush2.bf16.msra.mxu0 %v9051_v40  ;;  %7482 = vmatpush2.bf16.msra.mxu1 %v9179_v28  ;;  %v705_v37 = vld [vmem:[%s13848_s1 + $0x14b8] sm:$0xff]  ;;  %v9395_v40 = vcombine.low %v709_v27, %v713_v29  ;;  %v9260_v28 = vcombine.high %v573_v39, %v577_v36 }
 0x389   :  { %7492 = vmatprep.subr.bf16.mxu0 %v9300_v45  ;;  %7533 = vmatprep.subr.bf16.mxu1 %v9428_v48  ;;  %v9388_v45 = vcombine.high %v701_v17, %v705_v37  ;;  %v565_v48 = vld [vmem:[%s13848_s1 + $0x1058] sm:$0xff] }
 0x38a   :  { %v569_v50 = vld [vmem:[%s13848_s1 + $0x1078] sm:$0xff] }
 0x38b   :  { %v7198_v42 = vpop.f32.mrf.mxu0  ;;  %7443 = vmatmul.mubr.bf16.vlgmr.msra.gmra.mxu0 %v10663_v47  ;;  %v7239_v6 = vpop.f32.mrf.mxu1  ;;  %7484 = vmatmul.mubr.bf16.vlgmr.msra.gmra.mxu1 %v10682_v56  ;;  %v9284_v47 = vcombine.high %v597_v61, %v601_v62  ;;  %v593_v56 = vld [vmem:[%s13848_s1 + $0x1138] sm:$0xff] }
 0x38c   :  { %v7199_v0 = vadd.f32 %v7198_v42, %v12952_v16  ;;  %7493 = vmatpush1.bf16.msra.mxu0 %v9299_v54  ;;  %7534 = vmatpush1.bf16.msra.mxu1 %v9427_v57  ;;  %v589_v16 = vld [vmem:[%s13848_s1 + $0x1118] sm:$0xff]  ;;  %v9387_v54 = vcombine.low %v701_v17, %v705_v37  ;;  %v9252_v57 = vcombine.high %v565_v48, %v569_v50 }
 0x38d   :  { %v7200_v8 = vpop.f32.mrf.mxu0  ;;  %7494 = vmatprep.subr.bf16.mxu0 %v9292_v41  ;;  %v7241_v15 = vpop.f32.mrf.mxu1  ;;  %7535 = vmatprep.subr.bf16.mxu1 %v9420_v10  ;;  %v9276_v5 = vcombine.high %v589_v16, %v593_v56  ;;  %v9275_v59 = vcombine.low %v589_v16, %v593_v56  ;;  %v693_v51 = vld [vmem:[%s13848_s1 + $0x1458] sm:$0xff] }
 0x38e   :  { %v13154_v12 = vadd.f32 %v7239_v6, %v7199_v0  ;;  %v7201_v14 = vadd.f32 %v7200_v8, %v12969_v25  ;;  %7524 = vmatprep.mubr.bf16.mxu0 %v10678_v55  ;;  %v721_v25 = vld [vmem:[%s13848_s1 + $0x1538] sm:$0xff]  ;;  %7565 = vmatprep.mubr.bf16.mxu1 %v10699_v3  ;;  %v9411_v55 = vcombine.low %v725_v60, %v729_v1 }
 0x38f   :  { %v7202_v19 = vpop.f32.mrf.mxu0  ;;  %v7243_v2 = vpop.f32.mrf.mxu1  ;;  %v9404_v26 = vcombine.high %v717_v20, %v721_v25  ;;  %v585_v3 = vld [vmem:[%s13848_s1 + $0x10f8] sm:$0xff]  ;;  %v9403_v63 = vcombine.low %v717_v20, %v721_v25  ;;  %v9251_v60 = vcombine.low %v565_v48, %v569_v50 }
 0x390   :  { %v13171_v9 = vadd.f32 %v7241_v15, %v7201_v14  ;;  %7495 = vmatpush1.bf16.msra.mxu0 %v9291_v7  ;;  %7536 = vmatpush1.bf16.msra.mxu1 %v9419_v11  ;;  %v9268_v33 = vcombine.high %v581_v13, %v585_v3  ;;  %v9267_v38 = vcombine.low %v581_v13, %v585_v3  ;;  %v697_v34 = vld [vmem:[%s13848_s1 + $0x1478] sm:$0xff] }
 0x391   :  { %v7203_v23 = vpop.f32.mrf.mxu0  ;;  %7496 = vmatprep.subr.bf16.mxu0 %v9284_v47  ;;  %v7244_v53 = vpop.f32.mrf.mxu1  ;;  %7537 = vmatprep.subr.bf16.mxu1 %v9412_v22  ;;  %v9380_v41 = vcombine.high %v693_v51, %v697_v34  ;;  %v557_v10 = vld [vmem:[%s13848_s1 + $0x1018] sm:$0xff]  ;;  %v9379_v1 = vcombine.low %v693_v51, %v697_v34 }
 0x392   :  { %v561_v61 = vld [vmem:[%s13848_s1 + $0x1038] sm:$0xff] }
 0x393   :  { %v685_v62 = vld [vmem:[%s13848_s1 + $0x1418] sm:$0xff]  ;;  %v9244_v0 = vcombine.high %v557_v10, %v561_v61  ;;  %v9243_v14 = vcombine.low %v557_v10, %v561_v61 }
 0x394   :  { %7497 = vmatpush1.bf16.msra.mxu0 %v9283_v30  ;;  %7538 = vmatpush1.bf16.msra.mxu1 %v9411_v55  ;;  %v689_v42 = vld [vmem:[%s13848_s1 + $0x1438] sm:$0xff] }
 0x395   :  { %7498 = vmatprep.subr.bf16.mxu0 %v9276_v5  ;;  %7539 = vmatprep.subr.bf16.mxu1 %v9404_v26  ;;  %v9372_v6 = vcombine.high %v685_v62, %v689_v42  ;;  %v677_v7 = vld [vmem:[%s13848_s1 + $0x13d8] sm:$0xff]  ;;  %v9371_v15 = vcombine.low %v685_v62, %v689_v42 }
 0x396   :  { %v681_v8 = vld [vmem:[%s13848_s1 + $0x13f8] sm:$0xff] }
 0x397   :  { %v805_v11 = vld [vmem:[%s13848_s1 + $0x17d8] sm:$0xff]  ;;  %v9364_v22 = vcombine.high %v677_v7, %v681_v8  ;;  %v9363_v2 = vcombine.low %v677_v7, %v681_v8 }
 0x398   :  { %7499 = vmatpush1.bf16.msra.mxu0 %v9275_v59  ;;  %7540 = vmatpush1.bf16.msra.mxu1 %v9403_v63  ;;  %v809_v47 = vld [vmem:[%s13848_s1 + $0x17f8] sm:$0xff] }
 0x399   :  { %7500 = vmatprep.subr.bf16.mxu0 %v9268_v33  ;;  %7541 = vmatprep.subr.bf16.mxu1 %v9396_v35  ;;  %v9492_v16 = vcombine.high %v805_v11, %v809_v47  ;;  %v669_v56 = vld [vmem:[%s13848_s1 + $0x1398] sm:$0xff]  ;;  %v9491_v30 = vcombine.low %v805_v11, %v809_v47 }
 0x39a   :  { %v673_v19 = vld [vmem:[%s13848_s1 + $0x13b8] sm:$0xff] }
 0x39b   :  { %v797_v20 = vld [vmem:[%s13848_s1 + $0x1798] sm:$0xff]  ;;  %v9356_v23 = vcombine.high %v669_v56, %v673_v19  ;;  %v9355_v3 = vcombine.low %v669_v56, %v673_v19 }
 0x39c   :  { %7501 = vmatpush1.bf16.msra.mxu0 %v9267_v38  ;;  %7542 = vmatpush1.bf16.msra.mxu1 %v9395_v40  ;;  %v801_v25 = vld [vmem:[%s13848_s1 + $0x17b8] sm:$0xff] }
 0x39d   :  { %7502 = vmatprep.subr.bf16.mxu0 %v9260_v28  ;;  %7543 = vmatprep.subr.bf16.mxu1 %v9388_v45  ;;  %v9484_v55 = vcombine.high %v797_v20, %v801_v25  ;;  %v661_v5 = vld [vmem:[%s13848_s1 + $0x1358] sm:$0xff]  ;;  %v9483_v27 = vcombine.low %v797_v20, %v801_v25 }
 0x39e   :  { %v665_v53 = vld [vmem:[%s13848_s1 + $0x1378] sm:$0xff] }
 0x39f   :  { %v789_v26 = vld [vmem:[%s13848_s1 + $0x1758] sm:$0xff]  ;;  %v9348_v29 = vcombine.high %v661_v5, %v665_v53  ;;  %v9347_v36 = vcombine.low %v661_v5, %v665_v53 }
 0x3a0   :  { %7503 = vmatpush1.bf16.msra.mxu0 %v9259_v52  ;;  %7544 = vmatpush1.bf16.msra.mxu1 %v9387_v54  ;;  %v793_v13 = vld [vmem:[%s13848_s1 + $0x1778] sm:$0xff] }
 0x3a1   :  { %7504 = vmatprep.subr.bf16.mxu0 %v9252_v57  ;;  %7545 = vmatprep.subr.bf16.mxu1 %v9380_v41  ;;  %v9476_v59 = vcombine.high %v789_v26, %v793_v13  ;;  %v653_v63 = vld [vmem:[%s13848_s1 + $0x1318] sm:$0xff]  ;;  %v9475_v17 = vcombine.low %v789_v26, %v793_v13 }
 0x3a2   :  { %v657_v33 = vld [vmem:[%s13848_s1 + $0x1338] sm:$0xff] }
 0x3a3   :  { %v781_v35 = vld [vmem:[%s13848_s1 + $0x1718] sm:$0xff]  ;;  %v9340_v37 = vcombine.high %v653_v63, %v657_v33  ;;  %v9339_v50 = vcombine.low %v653_v63, %v657_v33 }
 0x3a4   :  { %7505 = vmatpush1.bf16.msra.mxu0 %v9251_v60  ;;  %7546 = vmatpush1.bf16.msra.mxu1 %v9379_v1  ;;  %v785_v39 = vld [vmem:[%s13848_s1 + $0x1738] sm:$0xff] }
 0x3a5   :  { %7506 = vmatprep.subr.bf16.mxu0 %v9244_v0  ;;  %7547 = vmatprep.subr.bf16.mxu1 %v9372_v6  ;;  %v9468_v38 = vcombine.high %v781_v35, %v785_v39  ;;  %v645_v40 = vld [vmem:[%s13848_s1 + $0x12d8] sm:$0xff]  ;;  %v9467_v51 = vcombine.low %v781_v35, %v785_v39 }
 0x3a6   :  { %v649_v28 = vld [vmem:[%s13848_s1 + $0x12f8] sm:$0xff] }
 0x3a7   :  { %v773_v45 = vld [vmem:[%s13848_s1 + $0x16d8] sm:$0xff]  ;;  %v9332_v34 = vcombine.high %v645_v40, %v649_v28  ;;  %v9331_v61 = vcombine.low %v645_v40, %v649_v28 }
 0x3a8   :  { %7507 = vmatpush1.bf16.msra.mxu0 %v9243_v14  ;;  %7548 = vmatpush1.bf16.msra.mxu1 %v9371_v15  ;;  %v777_v48 = vld [vmem:[%s13848_s1 + $0x16f8] sm:$0xff] }
 0x3a9   :  { %7508 = vmatprep.subr.bf16.mxu0 %v9364_v22  ;;  %7549 = vmatprep.subr.bf16.mxu1 %v9492_v16  ;;  %v9460_v52 = vcombine.high %v773_v45, %v777_v48  ;;  %v637_v54 = vld [vmem:[%s13848_s1 + $0x1298] sm:$0xff]  ;;  %v9459_v62 = vcombine.low %v773_v45, %v777_v48 }
 0x3aa   :  { %v641_v57 = vld [vmem:[%s13848_s1 + $0x12b8] sm:$0xff] }
 0x3ab   :  { %v765_v41 = vld [vmem:[%s13848_s1 + $0x1698] sm:$0xff]  ;;  %v9324_v42 = vcombine.high %v637_v54, %v641_v57  ;;  %v9323_v8 = vcombine.low %v637_v54, %v641_v57 }
 0x3ac   :  { %7509 = vmatpush2.bf16.msra.mxu0 %v9363_v2  ;;  %7550 = vmatpush2.bf16.msra.mxu1 %v9491_v30  ;;  %v769_v10 = vld [vmem:[%s13848_s1 + $0x16b8] sm:$0xff] }
 0x3ad   :  { %7510 = vmatprep.subr.bf16.mxu0 %v9356_v23  ;;  %7551 = vmatprep.subr.bf16.mxu1 %v9484_v55  ;;  %v9452_v60 = vcombine.high %v765_v41, %v769_v10  ;;  %v629_v1 = vld [vmem:[%s13848_s1 + $0x1258] sm:$0xff]  ;;  %v9451_v11 = vcombine.low %v765_v41, %v769_v10 }
 0x3ae   :  { %v633_v0 = vld [vmem:[%s13848_s1 + $0x1278] sm:$0xff] }
 0x3af   :  { %v757_v6 = vld [vmem:[%s13848_s1 + $0x1658] sm:$0xff]  ;;  %v9316_v47 = vcombine.high %v629_v1, %v633_v0  ;;  %v9315_v19 = vcombine.low %v629_v1, %v633_v0 }
 0x3b0   :  { %7511 = vmatpush2.bf16.msra.mxu0 %v9355_v3  ;;  %7552 = vmatpush2.bf16.msra.mxu1 %v9483_v27  ;;  %v761_v7 = vld [vmem:[%s13848_s1 + $0x1678] sm:$0xff] }
 0x3b1   :  { %7512 = vmatprep.subr.bf16.mxu0 %v9348_v29  ;;  %7553 = vmatprep.subr.bf16.mxu1 %v9476_v59  ;;  %v9444_v14 = vcombine.high %v757_v6, %v761_v7  ;;  %v621_v15 = vld [vmem:[%s13848_s1 + $0x1218] sm:$0xff]  ;;  %v9443_v20 = vcombine.low %v757_v6, %v761_v7 }
 0x3b2   :  { %v625_v22 = vld [vmem:[%s13848_s1 + $0x1238] sm:$0xff] }
 0x3b3   :  { %v749_v16 = vld [vmem:[%s13848_s1 + $0x1618] sm:$0xff]  ;;  %v9308_v25 = vcombine.high %v621_v15, %v625_v22  ;;  %v9307_v53 = vcombine.low %v621_v15, %v625_v22 }
 0x3b4   :  { %7513 = vmatpush2.bf16.msra.mxu0 %v9347_v36  ;;  %7554 = vmatpush2.bf16.msra.mxu1 %v9475_v17  ;;  %v753_v56 = vld [vmem:[%s13848_s1 + $0x1638] sm:$0xff] }
 0x3b5   :  { %7514 = vmatprep.subr.bf16.mxu0 %v9340_v37  ;;  %7555 = vmatprep.subr.bf16.mxu1 %v9468_v38  ;;  %v9436_v2 = vcombine.high %v749_v16, %v753_v56  ;;  %v869_v30 = vld [vmem:[%s13848_s1 + $0x19d8] sm:$0xff]  ;;  %v9435_v26 = vcombine.low %v749_v16, %v753_v56 }
 0x3b6   :  { %v873_v23 = vld [vmem:[%s13848_s1 + $0x19f8] sm:$0xff] }
 0x3b7   :  { %v997_v55 = vld [vmem:[%s13848_s1 + $0x1dd8] sm:$0xff]  ;;  %v9556_v13 = vcombine.high %v869_v30, %v873_v23  ;;  %v9555_v33 = vcombine.low %v869_v30, %v873_v23 }
 0x3b8   :  { %7515 = vmatpush2.bf16.msra.mxu0 %v9339_v50  ;;  %7556 = vmatpush2.bf16.msra.mxu1 %v9467_v51  ;;  %v1001_v5 = vld [vmem:[%s13848_s1 + $0x1df8] sm:$0xff] }
 0x3b9   :  { %7516 = vmatprep.subr.bf16.mxu0 %v9332_v34  ;;  %7557 = vmatprep.subr.bf16.mxu1 %v9460_v52  ;;  %v9684_v3 = vcombine.high %v997_v55, %v1001_v5  ;;  %v861_v27 = vld [vmem:[%s13848_s1 + $0x1998] sm:$0xff]  ;;  %v9683_v35 = vcombine.low %v997_v55, %v1001_v5 }
 0x3ba   :  { %v865_v29 = vld [vmem:[%s13848_s1 + $0x19b8] sm:$0xff] }
 0x3bb   :  { %v989_v59 = vld [vmem:[%s13848_s1 + $0x1d98] sm:$0xff]  ;;  %v9548_v39 = vcombine.high %v861_v27, %v865_v29  ;;  %v9547_v50 = vcombine.low %v861_v27, %v865_v29 }
 0x3bc   :  { %7517 = vmatpush2.bf16.msra.mxu0 %v9331_v61  ;;  %7558 = vmatpush2.bf16.msra.mxu1 %v9459_v62  ;;  %v993_v63 = vld [vmem:[%s13848_s1 + $0x1db8] sm:$0xff] }
 0x3bd   :  { %7518 = vmatprep.subr.bf16.mxu0 %v9324_v42  ;;  %7559 = vmatprep.subr.bf16.mxu1 %v9452_v60  ;;  %v9676_v36 = vcombine.high %v989_v59, %v993_v63  ;;  %v853_v17 = vld [vmem:[%s13848_s1 + $0x1958] sm:$0xff]  ;;  %v9675_v34 = vcombine.low %v989_v59, %v993_v63 }
 0x3be   :  { %v857_v37 = vld [vmem:[%s13848_s1 + $0x1978] sm:$0xff] }
 0x3bf   :  { %v981_v40 = vld [vmem:[%s13848_s1 + $0x1d58] sm:$0xff]  ;;  %v9539_v60 = vcombine.low %v853_v17, %v857_v37 }
 0x3c0   :  { %7519 = vmatpush2.bf16.msra.mxu0 %v9323_v8  ;;  %7560 = vmatpush2.bf16.msra.mxu1 %v9451_v11  ;;  %v985_v28 = vld [vmem:[%s13848_s1 + $0x1d78] sm:$0xff] }
 0x3c1   :  { %7520 = vmatprep.subr.bf16.mxu0 %v9316_v47  ;;  %7561 = vmatprep.subr.bf16.mxu1 %v9444_v14  ;;  %v9668_v41 = vcombine.high %v981_v40, %v985_v28  ;;  %v973_v61 = vld [vmem:[%s13848_s1 + $0x1d18] sm:$0xff] }
 0x3c2   :  { %v837_v8 = vld [vmem:[%s13848_s1 + $0x18d8] sm:$0xff] }
 0x3c3   :  { %v965_v11 = vld [vmem:[%s13848_s1 + $0x1cd8] sm:$0xff] }
 0x3c4   :  { %7521 = vmatpush2.bf16.msra.mxu0 %v9315_v19  ;;  %7562 = vmatpush2.bf16.msra.mxu1 %v9443_v20  ;;  %v969_v47 = vld [vmem:[%s13848_s1 + $0x1cf8] sm:$0xff] }
 0x3c5   :  { %7522 = vmatprep.subr.bf16.mxu0 %v9308_v25  ;;  %7563 = vmatprep.subr.bf16.mxu1 %v9436_v2  ;;  %v9652_v16 = vcombine.high %v965_v11, %v969_v47  ;;  %v829_v56 = vld [vmem:[%s13848_s1 + $0x1898] sm:$0xff]  ;;  %v9651_v30 = vcombine.low %v965_v11, %v969_v47 }
 0x3c6   :  { %v833_v19 = vld [vmem:[%s13848_s1 + $0x18b8] sm:$0xff] }
 0x3c7   :  { %v957_v20 = vld [vmem:[%s13848_s1 + $0x1c98] sm:$0xff]  ;;  %v9516_v23 = vcombine.high %v829_v56, %v833_v19 }
 0x3c8   :  { %7523 = vmatpush2.bf16.msra.mxu0 %v9307_v53  ;;  %7564 = vmatpush2.bf16.msra.mxu1 %v9435_v26  ;;  %v961_v25 = vld [vmem:[%s13848_s1 + $0x1cb8] sm:$0xff] }
 0x3c9   :  { %7574 = vmatprep.subr.bf16.mxu0 %v9556_v13  ;;  %7615 = vmatprep.subr.bf16.mxu1 %v9684_v3  ;;  %v9644_v55 = vcombine.high %v957_v20, %v961_v25  ;;  %v821_v5 = vld [vmem:[%s13848_s1 + $0x1858] sm:$0xff]  ;;  %v9515_v3 = vcombine.low %v829_v56, %v833_v19  ;;  %v9643_v27 = vcombine.low %v957_v20, %v961_v25 }
 0x3ca   :  { %v825_v53 = vld [vmem:[%s13848_s1 + $0x1878] sm:$0xff] }
 0x3cb   :  { %v7280_v38 = vpop.f32.mrf.mxu0  ;;  %7525 = vmatmul.mubr.bf16.vlgmr.msra.gmra.mxu0 %v10881_v21  ;;  %v7321_v48 = vpop.f32.mrf.mxu1  ;;  %7566 = vmatmul.mubr.bf16.vlgmr.msra.gmra.mxu1 %v10900_v32  ;;  %v9540_v21 = vcombine.high %v853_v17, %v857_v37  ;;  %v849_v32 = vld [vmem:[%s13848_s1 + $0x1938] sm:$0xff]  ;;  %v9508_v29 = vcombine.high %v821_v5, %v825_v53 }
 0x3cc   :  { %v7281_v45 = vadd.f32 %v7280_v38, %v13154_v12  ;;  %7575 = vmatpush1.bf16.msra.mxu0 %v9555_v33  ;;  %7616 = vmatpush1.bf16.msra.mxu1 %v9683_v35  ;;  %v845_v12 = vld [vmem:[%s13848_s1 + $0x1918] sm:$0xff] }
 0x3cd   :  { %v7282_v51 = vpop.f32.mrf.mxu0  ;;  %7576 = vmatprep.subr.bf16.mxu0 %v9548_v39  ;;  %v7323_v57 = vpop.f32.mrf.mxu1  ;;  %7617 = vmatprep.subr.bf16.mxu1 %v9676_v36  ;;  %v9532_v0 = vcombine.high %v845_v12, %v849_v32  ;;  %v9531_v14 = vcombine.low %v845_v12, %v849_v32  ;;  %v949_v26 = vld [vmem:[%s13848_s1 + $0x1c58] sm:$0xff]  ;;  %v9507_v36 = vcombine.low %v821_v5, %v825_v53 }
 0x3ce   :  { %v13356_v52 = vadd.f32 %v7321_v48, %v7281_v45  ;;  %v7283_v54 = vadd.f32 %v7282_v51, %v13171_v9  ;;  %7606 = vmatprep.mubr.bf16.mxu0 %v10896_v31  ;;  %v977_v9 = vld [vmem:[%s13848_s1 + $0x1d38] sm:$0xff]  ;;  %7647 = vmatprep.mubr.bf16.mxu1 %v10917_v44  ;;  %v9667_v31 = vcombine.low %v981_v40, %v985_v28 }
 0x3cf   :  { %v7284_v10 = vpop.f32.mrf.mxu0  ;;  %v7325_v42 = vpop.f32.mrf.mxu1  ;;  %v9660_v7 = vcombine.high %v973_v61, %v977_v9  ;;  %v841_v44 = vld [vmem:[%s13848_s1 + $0x18f8] sm:$0xff]  ;;  %v9659_v15 = vcombine.low %v973_v61, %v977_v9 }
 0x3d0   :  { %v13373_v62 = vadd.f32 %v7323_v57, %v7283_v54  ;;  %7577 = vmatpush1.bf16.msra.mxu0 %v9547_v50  ;;  %7618 = vmatpush1.bf16.msra.mxu1 %v9675_v34  ;;  %v9524_v22 = vcombine.high %v837_v8, %v841_v44  ;;  %v9523_v2 = vcombine.low %v837_v8, %v841_v44  ;;  %v953_v13 = vld [vmem:[%s13848_s1 + $0x1c78] sm:$0xff] }
 0x3d1   :  { %v7285_v1 = vpop.f32.mrf.mxu0  ;;  %7578 = vmatprep.subr.bf16.mxu0 %v9540_v21  ;;  %v7326_v6 = vpop.f32.mrf.mxu1  ;;  %7619 = vmatprep.subr.bf16.mxu1 %v9668_v41  ;;  %v9636_v59 = vcombine.high %v949_v26, %v953_v13  ;;  %v813_v63 = vld [vmem:[%s13848_s1 + $0x1818] sm:$0xff]  ;;  %v9635_v17 = vcombine.low %v949_v26, %v953_v13 }
 0x3d2   :  { %v817_v33 = vld [vmem:[%s13848_s1 + $0x1838] sm:$0xff] }
 0x3d3   :  { %v941_v35 = vld [vmem:[%s13848_s1 + $0x1c18] sm:$0xff]  ;;  %v9500_v37 = vcombine.high %v813_v63, %v817_v33  ;;  %v9499_v50 = vcombine.low %v813_v63, %v817_v33 }
 0x3d4   :  { %7579 = vmatpush1.bf16.msra.mxu0 %v9539_v60  ;;  %7620 = vmatpush1.bf16.msra.mxu1 %v9667_v31  ;;  %v945_v39 = vld [vmem:[%s13848_s1 + $0x1c38] sm:$0xff] }
 0x3d5   :  { %7580 = vmatprep.subr.bf16.mxu0 %v9532_v0  ;;  %7621 = vmatprep.subr.bf16.mxu1 %v9660_v7  ;;  %v9628_v38 = vcombine.high %v941_v35, %v945_v39  ;;  %v933_v40 = vld [vmem:[%s13848_s1 + $0x1bd8] sm:$0xff]  ;;  %v9627_v51 = vcombine.low %v941_v35, %v945_v39 }
 0x3d6   :  { %v937_v28 = vld [vmem:[%s13848_s1 + $0x1bf8] sm:$0xff] }
 0x3d7   :  { %v1061_v45 = vld [vmem:[%s13848_s1 + $0x1fd8] sm:$0xff]  ;;  %v9620_v34 = vcombine.high %v933_v40, %v937_v28  ;;  %v9619_v32 = vcombine.low %v933_v40, %v937_v28 }
 0x3d8   :  { %7581 = vmatpush1.bf16.msra.mxu0 %v9531_v14  ;;  %7622 = vmatpush1.bf16.msra.mxu1 %v9659_v15  ;;  %v1065_v48 = vld [vmem:[%s13848_s1 + $0x1ff8] sm:$0xff] }
 0x3d9   :  { %7582 = vmatprep.subr.bf16.mxu0 %v9524_v22  ;;  %7623 = vmatprep.subr.bf16.mxu1 %v9652_v16  ;;  %v9748_v21 = vcombine.high %v1061_v45, %v1065_v48  ;;  %v925_v54 = vld [vmem:[%s13848_s1 + $0x1b98] sm:$0xff]  ;;  %v9747_v10 = vcombine.low %v1061_v45, %v1065_v48 }
 0x3da   :  { %v929_v57 = vld [vmem:[%s13848_s1 + $0x1bb8] sm:$0xff] }
 0x3db   :  { %v1053_v41 = vld [vmem:[%s13848_s1 + $0x1f98] sm:$0xff]  ;;  %v9612_v61 = vcombine.high %v925_v54, %v929_v57  ;;  %v9611_v0 = vcombine.low %v925_v54, %v929_v57 }
 0x3dc   :  { %7583 = vmatpush1.bf16.msra.mxu0 %v9523_v2  ;;  %7624 = vmatpush1.bf16.msra.mxu1 %v9651_v30  ;;  %v1057_v12 = vld [vmem:[%s13848_s1 + $0x1fb8] sm:$0xff] }
 0x3dd   :  { %7584 = vmatprep.subr.bf16.mxu0 %v9516_v23  ;;  %7625 = vmatprep.subr.bf16.mxu1 %v9644_v55  ;;  %v9740_v9 = vcombine.high %v1053_v41, %v1057_v12  ;;  %v917_v42 = vld [vmem:[%s13848_s1 + $0x1b58] sm:$0xff]  ;;  %v9739_v6 = vcombine.low %v1053_v41, %v1057_v12  ;;  %v1094_v41 = vsub.s32 6, %v10269_v43 }
 0x3de   :  { %v921_v60 = vld [vmem:[%s13848_s1 + $0x1b78] sm:$0xff] }
 0x3df   :  { %v1045_v1 = vld [vmem:[%s13848_s1 + $0x1f58] sm:$0xff]  ;;  %v9604_v7 = vcombine.high %v917_v42, %v921_v60  ;;  %v9603_v15 = vcombine.low %v917_v42, %v921_v60  ;;  %v7659_v42 = vmax.f32 %v12562_v58, 0.0  ;;  %v10116_v60 = vld [vmem:[%s13849_s2] sm:$0xff]  ;;  %v10026_v58 = vld [vmem:[%s13850_s3 + $0x70] sm:$0xff]  }
 0x3e0   :  { %7585 = vmatpush1.bf16.msra.mxu0 %v9515_v3  ;;  %7626 = vmatpush1.bf16.msra.mxu1 %v9643_v27  ;;  %v1049_v31 = vld [vmem:[%s13848_s1 + $0x1f78] sm:$0xff] }
 0x3e1   :  { %7586 = vmatprep.subr.bf16.mxu0 %v9508_v29  ;;  %7627 = vmatprep.subr.bf16.mxu1 %v9636_v59  ;;  %v9732_v8 = vcombine.high %v1045_v1, %v1049_v31  ;;  %v909_v44 = vld [vmem:[%s13848_s1 + $0x1b18] sm:$0xff]  ;;  %v9731_v22 = vcombine.low %v1045_v1, %v1049_v31  ;;  %v1095_v1 = vrot.slane %v10116_v60, %v1094_v41  ;;  %v10056_v41 = vld [vmem:[%s13850_s3 + $0x170] sm:$0xff]  }
 0x3e2   :  { %v913_v11 = vld [vmem:[%s13848_s1 + $0x1b38] sm:$0xff] }
 0x3e3   :  { %v1037_v47 = vld [vmem:[%s13848_s1 + $0x1f18] sm:$0xff]  ;;  %v9596_v16 = vcombine.high %v909_v44, %v913_v11  ;;  %v9595_v30 = vcombine.low %v909_v44, %v913_v11 }
 0x3e4   :  { %7587 = vmatpush1.bf16.msra.mxu0 %v9507_v36  ;;  %7628 = vmatpush1.bf16.msra.mxu1 %v9635_v17  ;;  %v1041_v14 = vld [vmem:[%s13848_s1 + $0x1f38] sm:$0xff] }
 0x3e5   :  { %7588 = vmatprep.subr.bf16.mxu0 %v9500_v37  ;;  %7629 = vmatprep.subr.bf16.mxu1 %v9628_v38  ;;  %v9724_v56 = vcombine.high %v1037_v47, %v1041_v14  ;;  %v901_v19 = vld [vmem:[%s13848_s1 + $0x1ad8] sm:$0xff]  ;;  %v9723_v23 = vcombine.low %v1037_v47, %v1041_v14  ;;  %v10028_v47 = vld [vmem:[%s13850_s3 + $0x30] sm:$0xff]  }
 0x3e6   :  { %v905_v20 = vld [vmem:[%s13848_s1 + $0x1af8] sm:$0xff] }
 0x3e7   :  { %v1029_v25 = vld [vmem:[%s13848_s1 + $0x1ed8] sm:$0xff]  ;;  %v9588_v55 = vcombine.high %v901_v19, %v905_v20  ;;  %v9587_v27 = vcombine.low %v901_v19, %v905_v20 }
 0x3e8   :  { %7589 = vmatpush1.bf16.msra.mxu0 %v9499_v50  ;;  %7630 = vmatpush1.bf16.msra.mxu1 %v9627_v51  ;;  %v1033_v2 = vld [vmem:[%s13848_s1 + $0x1ef8] sm:$0xff] }
 0x3e9   :  { %7590 = vmatprep.subr.bf16.mxu0 %v9620_v34  ;;  %7631 = vmatprep.subr.bf16.mxu1 %v9748_v21  ;;  %v9716_v5 = vcombine.high %v1029_v25, %v1033_v2  ;;  %v893_v53 = vld [vmem:[%s13848_s1 + $0x1a98] sm:$0xff]  ;;  %v9715_v29 = vcombine.low %v1029_v25, %v1033_v2  ;;  %v10032_v2 = vld [vmem:[%s13850_s3 + $0x28] sm:$0xff]  }
 0x3ea   :  { %v897_v26 = vld [vmem:[%s13848_s1 + $0x1ab8] sm:$0xff] }
 0x3eb   :  { %v1021_v13 = vld [vmem:[%s13848_s1 + $0x1e98] sm:$0xff]  ;;  %v9580_v59 = vcombine.high %v893_v53, %v897_v26  ;;  %v9579_v17 = vcombine.low %v893_v53, %v897_v26  ;;  %v10035_v53 = vld [vmem:[%s13850_s3 + $0xe0] sm:$0xff]  }
 0x3ec   :  { %7591 = vmatpush2.bf16.msra.mxu0 %v9619_v32  ;;  %7632 = vmatpush2.bf16.msra.mxu1 %v9747_v10  ;;  %v1025_v3 = vld [vmem:[%s13848_s1 + $0x1eb8] sm:$0xff]  ;;  %v10036_v26 = vld [vmem:[%s13850_s3 + $0x20] sm:$0xff]  }
 0x3ed   :  { %7592 = vmatprep.subr.bf16.mxu0 %v9612_v61  ;;  %7633 = vmatprep.subr.bf16.mxu1 %v9740_v9  ;;  %v9708_v63 = vcombine.high %v1021_v13, %v1025_v3  ;;  %v885_v33 = vld [vmem:[%s13848_s1 + $0x1a58] sm:$0xff]  ;;  %v9707_v37 = vcombine.low %v1021_v13, %v1025_v3  ;;  %v1098_v61 = vsub.s32 7, %v10269_v43  ;;  %v7657_v9 = vmax.f32 %v11751_v4, 0.0  ;;  %v10037_v13 = vld [vmem:[%s13850_s3 + $0xa0] sm:$0xff]  }
 0x3ee   :  { %v889_v35 = vld [vmem:[%s13848_s1 + $0x1a78] sm:$0xff] }
 0x3ef   :  { %v1013_v39 = vld [vmem:[%s13848_s1 + $0x1e58] sm:$0xff]  ;;  %v9572_v38 = vcombine.high %v885_v33, %v889_v35  ;;  %v9571_v51 = vcombine.low %v885_v33, %v889_v35  ;;  %v1099_v4 = vrot.slane %v10116_v60, %v1098_v61  ;;  %v10043_v33 = vld [vmem:[%s13850_s3 + $0xd0] sm:$0xff]   ;;  %v10058_v61 = vld [vmem:[%s13850_s3 + $0x168] sm:$0xff]  }
 0x3f0   :  { %7593 = vmatpush2.bf16.msra.mxu0 %v9611_v0  ;;  %7634 = vmatpush2.bf16.msra.mxu1 %v9739_v6  ;;  %v1017_v36 = vld [vmem:[%s13848_s1 + $0x1e78] sm:$0xff]  ;;  %v7665_v0 = vpack.c.bf16 %v7657_v9, %v7657_v9  ;;  %v10044_v35 = vld [vmem:[%s13850_s3 + $0x10] sm:$0xff]   ;;  %v10059_v60 = vld [vmem:[%s13850_s3 + $0x128] sm:$0xff]  }
 0x3f1   :  { %7594 = vmatprep.subr.bf16.mxu0 %v9604_v7  ;;  %7635 = vmatprep.subr.bf16.mxu1 %v9732_v8  ;;  %v9700_v40 = vcombine.high %v1013_v39, %v1017_v36  ;;  %v877_v28 = vld [vmem:[%s13848_s1 + $0x1a18] sm:$0xff]  ;;  %v9699_v34 = vcombine.low %v1013_v39, %v1017_v36  ;;  %v10027_v7 = vld [vmem:[%s13850_s3 + $0xf0] sm:$0xff]   ;;  %v7667_v8 = vpack.c.bf16 %v7659_v42, %v7659_v42  ;;  %v10046_v36 = vld [vmem:[%s13850_s3 + $0x48] sm:$0xff]  }
 0x3f2   :  { %v881_v45 = vld [vmem:[%s13848_s1 + $0x1a38] sm:$0xff]  ;;  %v10045_v39 = vld [vmem:[%s13850_s3 + $0x90] sm:$0xff]   ;;  %v10074_v42 = vld [vmem:[%s13850_s3 + $0x1e8] sm:$0xff]  }
 0x3f3   :  { %v1005_v48 = vld [vmem:[%s13848_s1 + $0x1e18] sm:$0xff]  ;;  %v9564_v21 = vcombine.high %v877_v28, %v881_v45  ;;  %v9563_v57 = vcombine.low %v877_v28, %v881_v45  ;;  %v10051_v28 = vld [vmem:[%s13850_s3 + $0xc0] sm:$0xff]   ;;  %v10073_v9 = vld [vmem:[%s13850_s3 + $0x1b0] sm:$0xff]  }
 0x3f4   :  { %7595 = vmatpush2.bf16.msra.mxu0 %v9603_v15  ;;  %7636 = vmatpush2.bf16.msra.mxu1 %v9731_v22  ;;  %v1009_v50 = vld [vmem:[%s13848_s1 + $0x1e38] sm:$0xff]  ;;  %v10030_v15 = vld [vmem:[%s13850_s3 + $0x68] sm:$0xff]   ;;  %v10052_v45 = vld [vmem:[%s13850_s3] sm:$0xff]  }
 0x3f5   :  { %7596 = vmatprep.subr.bf16.mxu0 %v9596_v16  ;;  %7637 = vmatprep.subr.bf16.mxu1 %v9724_v56  ;;  %v9692_v54 = vcombine.high %v1005_v48, %v1009_v50  ;;  %v9691_v12 = vcombine.low %v1005_v48, %v1009_v50  ;;  %v10022_v32 = vld [vmem:[%s13850_s3 + $0x78] sm:$0xff]   ;;  %v10031_v56 = vld [vmem:[%s13850_s3 + $0xe8] sm:$0xff]   ;;  %v7656_v48 = vmax.f32 %v11734_v49, 0.0  ;;  %v10053_v50 = vld [vmem:[%s13850_s3 + $0x80] sm:$0xff]  }
 0x3f6   :  { %v10023_v10 = vld [vmem:[%s13850_s3 + $0xf8] sm:$0xff]  }
 0x3f7   :  { %v10024_v31 = vld [vmem:[%s13850_s3 + $0x38] sm:$0xff]  }
 0x3f8   :  { %7597 = vmatpush2.bf16.msra.mxu0 %v9595_v30  ;;  %7638 = vmatpush2.bf16.msra.mxu1 %v9723_v23  ;;  %v10025_v43 = vld [vmem:[%s13850_s3 + $0xb8] sm:$0xff]   ;;  %v10033_v23 = vld [vmem:[%s13850_s3 + $0xa8] sm:$0xff]  }
 0x3f9   :  { %7598 = vmatprep.subr.bf16.mxu0 %v9588_v55  ;;  %7639 = vmatprep.subr.bf16.mxu1 %v9716_v5  ;;  %v10034_v55 = vld [vmem:[%s13850_s3 + $0x60] sm:$0xff]   ;;  %v10038_v3 = vld [vmem:[%s13850_s3 + $0x58] sm:$0xff]  }
 0x3fa   :  { %v10055_v49 = vld [vmem:[%s13850_s3 + $0x138] sm:$0xff]  }
 0x3fc   :  { %7599 = vmatpush2.bf16.msra.mxu0 %v9587_v27  ;;  %7640 = vmatpush2.bf16.msra.mxu1 %v9715_v29  ;;  %v10039_v27 = vld [vmem:[%s13850_s3 + $0xd8] sm:$0xff]  }
 0x3fd   :  { %7600 = vmatprep.subr.bf16.mxu0 %v9580_v59  ;;  %7641 = vmatprep.subr.bf16.mxu1 %v9708_v63  ;;  %v10040_v29 = vld [vmem:[%s13850_s3 + $0x18] sm:$0xff]   ;;  %v10042_v63 = vld [vmem:[%s13850_s3 + $0x50] sm:$0xff]  }
 0x3fe   :  { %v10041_v59 = vld [vmem:[%s13850_s3 + $0x98] sm:$0xff]  }
 0x400   :  { %7601 = vmatpush2.bf16.msra.mxu0 %v9579_v17  ;;  %7642 = vmatpush2.bf16.msra.mxu1 %v9707_v37  ;;  %v10047_v17 = vld [vmem:[%s13850_s3 + $0xc8] sm:$0xff]  }
 0x401   :  { %7602 = vmatprep.subr.bf16.mxu0 %v9572_v38  ;;  %7643 = vmatprep.subr.bf16.mxu1 %v9700_v40  ;;  %v10048_v37 = vld [vmem:[%s13850_s3 + $0x8] sm:$0xff]   ;;  %v10050_v40 = vld [vmem:[%s13850_s3 + $0x40] sm:$0xff]  }
 0x402   :  { %v10049_v38 = vld [vmem:[%s13850_s3 + $0x88] sm:$0xff]  }
 0x404   :  { %7603 = vmatpush2.bf16.msra.mxu0 %v9571_v51  ;;  %7644 = vmatpush2.bf16.msra.mxu1 %v9699_v34  ;;  %v10054_v51 = vld [vmem:[%s13850_s3 + $0x178] sm:$0xff]   ;;  %v7658_v34 = vmax.f32 %v12545_v46, 0.0 }
 0x405   :  { %7604 = vmatprep.subr.bf16.mxu0 %v9564_v21  ;;  %7645 = vmatprep.subr.bf16.mxu1 %v9692_v54  ;;  %v10070_v21 = vld [vmem:[%s13850_s3 + $0x1f8] sm:$0xff]   ;;  %v7661_v54 = vmax.f32 %v13373_v62, 0.0  ;;  %v10072_v62 = vld [vmem:[%s13850_s3 + $0x1f0] sm:$0xff]  }
 0x406   :  { %v7666_v46 = vpack.c.bf16 %v7658_v34, %v7658_v34  ;;  %v10089_v34 = vld [vmem:[%s13852_s5 + $0x20] sm:$0xff]  }
 0x408   :  { %7605 = vmatpush2.bf16.msra.mxu0 %v9563_v57  ;;  %7646 = vmatpush2.bf16.msra.mxu1 %v9691_v12  ;;  %v7664_v57 = vpack.c.bf16 %v7656_v48, %v7656_v48  ;;  %v10071_v12 = vld [vmem:[%s13850_s3 + $0x1b8] sm:$0xff]   ;;  %v10140_v48 = vmov 0.0  }
 0x409   :  { %9841 = vmatprep.subr.bf16.mxu0 %v10022_v32  ;;  %9863 = vmatprep.subr.bf16.mxu1 %v10023_v10  ;;  %v7669_v32 = vpack.c.bf16 %v7661_v54, %v7661_v54  ;;  %v10057_v10 = vld [vmem:[%s13850_s3 + $0x130] sm:$0xff]  }
 0x40b   :  { %v7362_v6 = vpop.f32.mrf.mxu0  ;;  %7607 = vmatmul.mubr.bf16.vlgmr.msra.gmra.mxu0 %v11093_v24  ;;  %v7403_v11 = vpop.f32.mrf.mxu1  ;;  %7648 = vmatmul.mubr.bf16.vlgmr.msra.gmra.mxu1 %v11113_v18  ;;  %v10029_v24 = vld [vmem:[%s13850_s3 + $0xb0] sm:$0xff]  }
 0x40c   :  { %v7363_v44 = vadd.f32 %v7362_v6, %v1095_v1  ;;  %9842 = vmatpush3.bf16.msra.mxu0 %v10024_v31  ;;  %8223 = vmatprep.mubr.bf16.mxu0 %v7665_v0  ;;  %v10060_v1 = vld [vmem:[%s13850_s3 + $0x160] sm:$0xff]   ;;  %v10075_v31 = vld [vmem:[%s13850_s3 + $0x1a8] sm:$0xff]   ;;  %v10078_v6 = vld [vmem:[%s13850_s3 + $0x1d8] sm:$0xff]  }
 0x40d   :  { %9864 = vmatpush3.bf16.msra.mxu1 %v10025_v43  ;;  %v7364_v14 = vpop.f32.mrf.mxu0  ;;  %8263 = vmatprep.mubr.bf16.mxu1 %v7667_v8  ;;  %v7405_v16 = vpop.f32.mrf.mxu1  ;;  %v10076_v43 = vld [vmem:[%s13850_s3 + $0x1e0] sm:$0xff]   ;;  %v10064_v8 = vld [vmem:[%s13850_s3 + $0x150] sm:$0xff]  }
 0x40e   :  { %v13555_v22 = vadd.f32 %v7403_v11, %v7363_v44  ;;  %v7365_v18 = vadd.f32 %v7364_v14, %v1099_v4  ;;  %9843 = vmatprep.subr.bf16.mxu0 %v10026_v58  ;;  %9865 = vmatprep.subr.bf16.mxu1 %v10027_v7  ;;  %v10061_v4 = vld [vmem:[%s13850_s3 + $0x120] sm:$0xff]   ;;  %v10062_v58 = vld [vmem:[%s13850_s3 + $0x158] sm:$0xff]   ;;  %v10065_v11 = vld [vmem:[%s13850_s3 + $0x110] sm:$0xff]  }
 0x40f   :  { %v7366_v19 = vpop.f32.mrf.mxu0  ;;  %v7407_v25 = vpop.f32.mrf.mxu1  ;;  %v10077_v0 = vld [vmem:[%s13850_s3 + $0x1a0] sm:$0xff]   ;;  %v10063_v7 = vld [vmem:[%s13850_s3 + $0x118] sm:$0xff]   ;;  %v10067_v14 = vld [vmem:[%s13850_s3 + $0x108] sm:$0xff]  }
 0x410   :  { %v13560_v20 = vadd.f32 %v7405_v16, %v7365_v18  ;;  %9844 = vmatpush3.bf16.msra.mxu0 %v10028_v47  ;;  %v10079_v44 = vld [vmem:[%s13850_s3 + $0x198] sm:$0xff]   ;;  %v10066_v47 = vld [vmem:[%s13850_s3 + $0x148] sm:$0xff]   ;;  %v7660_v18 = vmax.f32 %v13356_v52, 0.0  ;;  %v10080_v19 = vld [vmem:[%s13850_s3 + $0x1d0] sm:$0xff]  }
 0x411   :  { %9866 = vmatpush3.bf16.msra.mxu1 %v10029_v24  ;;  %v7367_v30 = vpop.f32.mrf.mxu0  ;;  %9845 = vmatprep.subr.bf16.mxu0 %v10030_v15  ;;  %v7408_v5 = vpop.f32.mrf.mxu1  ;;  %v10068_v24 = vld [vmem:[%s13850_s3 + $0x140] sm:$0xff]  }
 0x412   :  { %9867 = vmatprep.subr.bf16.mxu1 %v10031_v56  ;;  %v10069_v15 = vld [vmem:[%s13850_s3 + $0x100] sm:$0xff]   ;;  %v7668_v16 = vpack.c.bf16 %v7660_v18, %v7660_v18  ;;  %v10081_v30 = vld [vmem:[%s13850_s3 + $0x190] sm:$0xff]  }
 0x414   :  { %9846 = vmatpush3.bf16.msra.mxu0 %v10032_v2 }
 0x415   :  { %9868 = vmatpush3.bf16.msra.mxu1 %v10033_v23  ;;  %9847 = vmatprep.subr.bf16.mxu0 %v10034_v55 }
 0x416   :  { %9869 = vmatprep.subr.bf16.mxu1 %v10035_v53 }
 0x418   :  { %9848 = vmatpush3.bf16.msra.mxu0 %v10036_v26  ;;  %v10082_v26 = vld [vmem:[%s13850_s3 + $0x1c8] sm:$0xff]  }
 0x419   :  { %9870 = vmatpush3.bf16.msra.mxu1 %v10037_v13  ;;  %9849 = vmatprep.subr.bf16.mxu0 %v10038_v3 }
 0x41a   :  { %9871 = vmatprep.subr.bf16.mxu1 %v10039_v27 }
 0x41c   :  { %9850 = vmatpush3.bf16.msra.mxu0 %v10040_v29 }
 0x41d   :  { %9872 = vmatpush3.bf16.msra.mxu1 %v10041_v59  ;;  %9851 = vmatprep.subr.bf16.mxu0 %v10042_v63  ;;  %v10085_v59 = vld [vmem:[%s13850_s3 + $0x180] sm:$0xff]  }
 0x41e   :  { %9873 = vmatprep.subr.bf16.mxu1 %v10043_v33 }
 0x420   :  { %9852 = vmatpush3.bf16.msra.mxu0 %v10044_v35 }
 0x421   :  { %9874 = vmatpush3.bf16.msra.mxu1 %v10045_v39  ;;  %9853 = vmatprep.subr.bf16.mxu0 %v10046_v36 }
 0x422   :  { %9875 = vmatprep.subr.bf16.mxu1 %v10047_v17 }
 0x424   :  { %9854 = vmatpush3.bf16.msra.mxu0 %v10048_v37 }
 0x425   :  { %9876 = vmatpush3.bf16.msra.mxu1 %v10049_v38  ;;  %9855 = vmatprep.subr.bf16.mxu0 %v10050_v40 }
 0x426   :  { %9877 = vmatprep.subr.bf16.mxu1 %v10051_v28  ;;  %v10086_v28 = vld [vmem:[%s13852_s5 + $0x38] sm:$0xff]  }
 0x428   :  { %9856 = vmatpush3.bf16.msra.mxu0 %v10052_v45 }
 0x429   :  { %9878 = vmatpush3.bf16.msra.mxu1 %v10053_v50  ;;  %9885 = vmatprep.subr.bf16.mxu0 %v10054_v51  ;;  %v10087_v50 = vld [vmem:[%s13852_s5 + $0x30] sm:$0xff]   ;;  %v10088_v51 = vld [vmem:[%s13852_s5 + $0x28] sm:$0xff]  }
 0x42a   :  { %9907 = vmatprep.subr.bf16.mxu1 %v10070_v21  ;;  %v10090_v21 = vld [vmem:[%s13852_s5 + $0x18] sm:$0xff]  }
 0x42b   :  { %8224 = vmatmul.mubr.bf16.vlgmr.msra.gmra.mxu0 %v7664_v57 }
 0x42c   :  { %8264 = vmatmul.mubr.bf16.vlgmr.msra.gmra.mxu1 %v7666_v46  ;;  %9886 = vmatpush3.bf16.msra.mxu0 %v10055_v49 }
 0x42d   :  { %8303 = vmatprep.mubr.bf16.mxu0 %v7669_v32  ;;  %9887 = vmatprep.subr.bf16.mxu0 %v10056_v41 }
 0x42e   :  { %9908 = vmatpush3.bf16.msra.mxu1 %v10071_v12 }
 0x42f   :  { %9909 = vmatprep.subr.bf16.mxu1 %v10072_v62 }
 0x430   :  { %9888 = vmatpush3.bf16.msra.mxu0 %v10057_v10 }
 0x431   :  { %9889 = vmatprep.subr.bf16.mxu0 %v10058_v61 }
 0x432   :  { %9910 = vmatpush3.bf16.msra.mxu1 %v10073_v9 }
 0x433   :  { %9911 = vmatprep.subr.bf16.mxu1 %v10074_v42 }
 0x434   :  { %9890 = vmatpush3.bf16.msra.mxu0 %v10059_v60 }
 0x435   :  { %9891 = vmatprep.subr.bf16.mxu0 %v10060_v1 }
 0x436   :  { %9912 = vmatpush3.bf16.msra.mxu1 %v10075_v31 }
 0x437   :  { %9913 = vmatprep.subr.bf16.mxu1 %v10076_v43 }
 0x438   :  { %9892 = vmatpush3.bf16.msra.mxu0 %v10061_v4 }
 0x439   :  { %9893 = vmatprep.subr.bf16.mxu0 %v10062_v58 }
 0x43a   :  { %9914 = vmatpush3.bf16.msra.mxu1 %v10077_v0 }
 0x43b   :  { %9915 = vmatprep.subr.bf16.mxu1 %v10078_v6 }
 0x43c   :  { %9894 = vmatpush3.bf16.msra.mxu0 %v10063_v7  ;;  %v9749_v7 = vld [vmem:[%s13851_s4] ss:$0 sm:$0xff] }
 0x43d   :  { %9895 = vmatprep.subr.bf16.mxu0 %v10064_v8 }
 0x43e   :  { %9916 = vmatpush3.bf16.msra.mxu1 %v10079_v44 }
 0x43f   :  { %9917 = vmatprep.subr.bf16.mxu1 %v10080_v19 }
 0x440   :  { %9896 = vmatpush3.bf16.msra.mxu0 %v10065_v11 }
 0x441   :  { %9897 = vmatprep.subr.bf16.mxu0 %v10066_v47 }
 0x442   :  { %9918 = vmatpush3.bf16.msra.mxu1 %v10081_v30 }
 0x443   :  { %9919 = vmatprep.subr.bf16.mxu1 %v10082_v26  ;;  %v10094_v26 = vld [vmem:[%s13854_s7 + $0x38] sm:$0xff]  }
 0x444   :  { %9898 = vmatpush3.bf16.msra.mxu0 %v10067_v14 }
 0x445   :  { %9899 = vmatprep.subr.bf16.mxu0 %v10068_v24 }
 0x448   :  { %9900 = vmatpush3.bf16.msra.mxu0 %v10069_v15 }
 0x449   :  { %9956 = vmatprep.subr.bf16.mxu0 %v10140_v48 }
 0x44b   :  { %v7444_v56 = vpop.f32.mrf.mxu0  ;;  %8304 = vmatmul.mubr.bf16.vlgmr.msra.gmra.mxu0 %v7668_v16  ;;  %v7485_v2 = vpop.f32.mrf.mxu1 }
 0x44c   :  { %v7445_v25 = vadd.f32 %v7444_v56, %v13555_v22  ;;  %v10083_v22 = vld [vmem:[%s13850_s3 + $0x188] sm:$0xff]   ;;  %9957 = vmatpush3.bf16.msra.mxu0 %v10086_v28  ;;  %9972 = vmatprep.mubr.msk.bf16.mxu0 %vm10141_vm0, %v10140_v48  ;;  %v10102_v28 = vld [vmem:[%s13856_s9 + $0x38] sm:$0xff]  }
 0x44d   :  { %v7446_v23 = vpop.f32.mrf.mxu0  ;;  %v7487_v5 = vpop.f32.mrf.mxu1  ;;  %9920 = vmatpush3.bf16.msra.mxu1 %v10083_v22  ;;  %9958 = vmatprep.subr.bf16.mxu0 %v10140_v48  ;;  %v10097_v22 = vld [vmem:[%s13854_s7 + $0x20] sm:$0xff]  }
 0x44e   :  { %v7486_v55 = vadd.f32 %v7485_v2, %v7445_v25  ;;  %v7447_v52 = vadd.f32 %v7446_v23, %v13560_v20  ;;  %v10084_v20 = vld [vmem:[%s13850_s3 + $0x1c0] sm:$0xff]  }
 0x44f   :  { %v7448_v53 = vpop.f32.mrf.mxu0  ;;  %v7489_v3 = vpop.f32.mrf.mxu1  ;;  %9921 = vmatprep.subr.bf16.mxu1 %v10084_v20 }
 0x450   :  { %v7488_v13 = vadd.f32 %v7487_v5, %v7447_v52  ;;  %9959 = vmatpush3.bf16.msra.mxu0 %v10087_v50  ;;  %v10091_v52 = vld [vmem:[%s13852_s5 + $0x10] sm:$0xff]   ;;  %v10092_v5 = vld [vmem:[%s13852_s5 + $0x8] sm:$0xff]   ;;  %v10093_v53 = vld [vmem:[%s13852_s5] sm:$0xff]  }
 0x451   :  { %v7449_v27 = vpop.f32.mrf.mxu0  ;;  %v7490_v29 = vpop.f32.mrf.mxu1  ;;  %9922 = vmatpush3.bf16.msra.mxu1 %v10085_v59  ;;  %9960 = vmatprep.subr.bf16.mxu0 %v10140_v48  ;;  %v10096_v3 = vld [vmem:[%s13854_s7 + $0x28] sm:$0xff]  }
 0x452   :  { %9976 = vmatprep.subr.bf16.mxu1 %v10140_v48  ;;  %v10098_v27 = vld [vmem:[%s13854_s7 + $0x18] sm:$0xff]   ;;  %v10099_v29 = vld [vmem:[%s13854_s7 + $0x10] sm:$0xff]   ;;  %v10104_v50 = vld [vmem:[%s13856_s9 + $0x28] sm:$0xff]  }
 0x454   :  { %9961 = vmatpush3.bf16.msra.mxu0 %v10088_v51  ;;  %v10105_v51 = vld [vmem:[%s13856_s9 + $0x20] sm:$0xff]  }
 0x455   :  { %9962 = vmatprep.subr.bf16.mxu0 %v10140_v48 }
 0x458   :  { %9963 = vmatpush3.bf16.msra.mxu0 %v10089_v34  ;;  %v10106_v34 = vld [vmem:[%s13856_s9 + $0x18] sm:$0xff]  }
 0x459   :  { %9964 = vmatprep.subr.bf16.mxu0 %v10140_v48 }
 0x45c   :  { %9965 = vmatpush3.bf16.msra.mxu0 %v10090_v21  ;;  %v10107_v21 = vld [vmem:[%s13856_s9 + $0x10] sm:$0xff]  }
 0x45d   :  { %9966 = vmatprep.subr.bf16.mxu0 %v10140_v48 }
 0x460   :  { %9967 = vmatpush3.bf16.msra.mxu0 %v10091_v52 }
 0x461   :  { %9968 = vmatprep.subr.bf16.mxu0 %v10140_v48 }
 0x464   :  { %9969 = vmatpush3.bf16.msra.mxu0 %v10092_v5 }
 0x465   :  { %9970 = vmatprep.subr.bf16.mxu0 %v10140_v48 }
 0x468   :  { %9971 = vmatpush3.bf16.msra.mxu0 %v10093_v53 }
 0x469   :  { %9996 = vmatprep.subr.bf16.mxu0 %v10140_v48 }
 0x48b   :  { %v7526_v63 = vpop.f32.mrf.mxu0  ;;  %v7567_v35 = vpop.f32.mrf.mxu1 }
 0x48c   :  { %v7527_v33 = vadd.f32 %v7526_v63, %v7486_v55 }
 0x48d   :  { %v7528_v39 = vpop.f32.mrf.mxu0  ;;  %v7569_v17 = vpop.f32.mrf.mxu1 }
 0x48e   :  { %v7568_v36 = vadd.f32 %v7567_v35, %v7527_v33  ;;  %v7529_v54 = vadd.f32 %v7528_v39, %v7488_v13  ;;  %v10095_v13 = vld [vmem:[%s13854_s7 + $0x30] sm:$0xff]  }
 0x48f   :  { %v7530_v37 = vpop.f32.mrf.mxu0  ;;  %v7571_v38 = vpop.f32.mrf.mxu1 }
 0x490   :  { %v7570_v57 = vadd.f32 %v7569_v17, %v7529_v54  ;;  %v10100_v38 = vld [vmem:[%s13854_s7 + $0x8] sm:$0xff]   ;;  %v9814_v54 = vld [vmem:[%s13853_s6] ss:$0 sm:$0xff] }
 0x491   :  { %v7531_v40 = vpop.f32.mrf.mxu0  ;;  %v7572_v45 = vpop.f32.mrf.mxu1 }
 0x492   :  { %v10101_v40 = vld [vmem:[%s13854_s7] sm:$0xff]   ;;  %v10103_v45 = vld [vmem:[%s13856_s9 + $0x30] sm:$0xff]  }
 0x4cb   :  { %v7608_v49 = vpop.f32.mrf.mxu0  ;;  %v7649_v46 = vpop.f32.mrf.mxu1 }
 0x4cc   :  { %v7609_v41 = vadd.f32 %v7608_v49, %v7568_v36 }
 0x4cd   :  { %v7610_v12 = vpop.f32.mrf.mxu0  ;;  %v7651_v10 = vpop.f32.mrf.mxu1 }
 0x4ce   :  { %v7650_v32 = vadd.f32 %v7649_v46, %v7609_v41  ;;  %v7611_v62 = vadd.f32 %v7610_v12, %v7570_v57 }
 0x4cf   :  { %v7612_v61 = vpop.f32.mrf.mxu0  ;;  %v7653_v42 = vpop.f32.mrf.mxu1 }
 0x4d0   :  { %v7652_v9 = vadd.f32 %v7651_v10, %v7611_v62  ;;  %v7662_v60 = vmax.f32 %v7650_v32, 0.0  ;;  %v10108_v61 = vld [vmem:[%s13856_s9 + $0x8] sm:$0xff]   ;;  %v9823_v42 = vld [vmem:[%s13855_s8] ss:$0 sm:$0xff]  ;;  %s10142_s8 = smov [#allocation2]  }
 0x4d1   :  { %v7613_v1 = vpop.f32.mrf.mxu0  ;;  %v7654_v43 = vpop.f32.mrf.mxu1 }
 0x4d2   :  { %v7663_v31 = vmax.f32 %v7652_v9, 0.0  ;;  %v7670_v58 = vpack.c.bf16 %v7662_v60, %v7662_v60  ;;  %v10109_v9 = vld [vmem:[%s13856_s9] sm:$0xff]   ;;  %s8717_s9 = sshll.u32 %s10142_s8, 4  ;;  %s8718_s9 = int_to_ptr.vmem [resolvable:$true] %s8717_s9 }
 0x4d3   :  { %p10122_p1 = scmp.lt.s32.totalorder %s8718_s9, %s8718_s9 }
 0x4d4   :  { %v7671_v4 = vpack.c.bf16 %v7663_v31, %v7663_v31 }
 0x4d6   :  { %8343 = vmatprep.mubr.bf16.mxu1 %v7671_v4 }
 0x4d7   :  { %8344 = vmatmul.mubr.bf16.vlgmr.msra.gmra.mxu1 %v7670_v58 }
 0x4d8   :  { %9992 = vmatprep.mubr.msk.bf16.mxu1 %vm10141_vm0, %v10140_v48  ;;  %9977 = vmatpush3.bf16.msra.mxu1 %v10094_v26 }
 0x4d9   :  { %9978 = vmatprep.subr.bf16.mxu1 %v10140_v48 }
 0x4dc   :  { %9979 = vmatpush3.bf16.msra.mxu1 %v10095_v13 }
 0x4dd   :  { %9980 = vmatprep.subr.bf16.mxu1 %v10140_v48 }
 0x4e0   :  { %9981 = vmatpush3.bf16.msra.mxu1 %v10096_v3 }
 0x4e1   :  { %9982 = vmatprep.subr.bf16.mxu1 %v10140_v48 }
 0x4e4   :  { %9983 = vmatpush3.bf16.msra.mxu1 %v10097_v22 }
 0x4e5   :  { %9984 = vmatprep.subr.bf16.mxu1 %v10140_v48 }
 0x4e8   :  { %9985 = vmatpush3.bf16.msra.mxu1 %v10098_v27 }
 0x4e9   :  { %9986 = vmatprep.subr.bf16.mxu1 %v10140_v48 }
 0x4eb   :  { %v9857_v0 = vpop.f32.mrf.mxu0 }
 0x4ec   :  { %v9879_v6 = vpop.f32.mrf.mxu1  ;;  %9987 = vmatpush3.bf16.msra.mxu1 %v10099_v29 }
 0x4ed   :  { %v9858_v8 = vpop.f32.mrf.mxu0  ;;  %9988 = vmatprep.subr.bf16.mxu1 %v10140_v48 }
 0x4ee   :  { %v9859_v44 = vadd.f32 %v9858_v8, %v9857_v0  ;;  %v9880_v11 = vpop.f32.mrf.mxu1 }
 0x4ef   :  { %v9881_v47 = vadd.f32 %v9880_v11, %v9879_v6  ;;  %v9860_v14 = vpop.f32.mrf.mxu0 }
 0x4f0   :  { %v8226_v24 = vadd.f32 %v9859_v44, %v9749_v7  ;;  %v9882_v15 = vpop.f32.mrf.mxu1  ;;  %9989 = vmatpush3.bf16.msra.mxu1 %v10100_v38 }
 0x4f1   :  { %v9861_v18 = vpop.f32.mrf.mxu0  ;;  %9990 = vmatprep.subr.bf16.mxu1 %v10140_v48 }
 0x4f2   :  { %v8266_v16 = vadd.f32 %v9881_v47, %v8226_v24  ;;  %v9883_v56 = vpop.f32.mrf.mxu1 }
 0x4f4   :  { %9991 = vmatpush3.bf16.msra.mxu1 %v10101_v40 }
 0x50b   :  { %v9901_v19 = vpop.f32.mrf.mxu0 }
 0x50d   :  { %v9902_v25 = vpop.f32.mrf.mxu0 }
 0x50e   :  { %v9903_v2 = vadd.f32 %v9902_v25, %v9901_v19 }
 0x50f   :  { %v9904_v30 = vpop.f32.mrf.mxu0 }
 0x510   :  { %v8306_v23 = vadd.f32 %v9903_v2, %v8266_v16 }
 0x511   :  { %v9905_v55 = vpop.f32.mrf.mxu0 }
 0x597   :  { %v9923_v20 = vpop.f32.mrf.mxu1 }
 0x599   :  { %v9924_v59 = vpop.f32.mrf.mxu1 }
 0x59a   :  { %v9925_v63 = vadd.f32 %v9924_v59, %v9923_v20 }
 0x59b   :  { %v9926_v33 = vpop.f32.mrf.mxu1 }
 0x59c   :  { %v8346_v35 = vadd.f32 %v9925_v63, %v8306_v23 }
 0x59d   :  { %v9927_v39 = vpop.f32.mrf.mxu1 }
 0x59e   :  { %vm8351_vm1 = vcmp.gt.f32.partialorder %v8346_v35, 0.0  ;;  %v8352_v36 = vmul.f32 0.2, %v8346_v35 }
 0x5a0   :  { %v8353_v17 = vsel %vm8351_vm1, %v8346_v35, %v8352_v36 }
 0x5a1   :  { %v8354_v37 = vpack.c.bf16 %v8353_v17, %v8353_v17 }
 0x5a3   :  { %9973 = vmatmul.mubr.bf16.vlgmr.msra.gmra.mxu0 %v8354_v37 }
 0x5a4   :  { %10012 = vmatprep.mubr.msk.bf16.mxu0 %vm10141_vm0, %v10140_v48  ;;  %9997 = vmatpush3.bf16.msra.mxu0 %v10102_v28 }
 0x5a5   :  { %9998 = vmatprep.subr.bf16.mxu0 %v10140_v48 }
 0x5a8   :  { %9999 = vmatpush3.bf16.msra.mxu0 %v10103_v45 }
 0x5a9   :  { %10000 = vmatprep.subr.bf16.mxu0 %v10140_v48 }
 0x5ac   :  { %10001 = vmatpush3.bf16.msra.mxu0 %v10104_v50 }
 0x5ad   :  { %10002 = vmatprep.subr.bf16.mxu0 %v10140_v48 }
 0x5b0   :  { %10003 = vmatpush3.bf16.msra.mxu0 %v10105_v51 }
 0x5b1   :  { %10004 = vmatprep.subr.bf16.mxu0 %v10140_v48 }
 0x5b4   :  { %10005 = vmatpush3.bf16.msra.mxu0 %v10106_v34 }
 0x5b5   :  { %10006 = vmatprep.subr.bf16.mxu0 %v10140_v48 }
 0x5b8   :  { %10007 = vmatpush3.bf16.msra.mxu0 %v10107_v21 }
 0x5b9   :  { %10008 = vmatprep.subr.bf16.mxu0 %v10140_v48 }
 0x5bc   :  { %10009 = vmatpush3.bf16.msra.mxu0 %v10108_v61 }
 0x5bd   :  { %10010 = vmatprep.subr.bf16.mxu0 %v10140_v48  ;;  %v9832_v48 = vld [vmem:[%s13857_s10] ss:$0 sm:$0xff]  ;;  %s10117_s10 = scalar_lea.vmem %s8718_s9, 32 }
 0x5be   :  { %p10118_p0 = scmp.ne.s32.totalorder %s8718_s9, %s10117_s10  ;;  %p10123_p2 = scmp.lt.s32.totalorder %s10117_s10, %s10117_s10 }
 0x5c0   :  { %10011 = vmatpush3.bf16.msra.mxu0 %v10109_v9  ;;  %p10124_p3 = por %p10123_p2, %p10122_p1 }
 0x5c2   :  { %p10125_p4 = pnand %p10124_p3, %p10118_p0 }
 0x663   :  { %v8460_v49 = vpop.f32.mrf.mxu0 }
 0x664   :  { %v8461_v57 = vadd.f32 %v9814_v54, %v8460_v49 }
 0x665   :  { %v9974_v41 = vpop.f32.mrf.mxu0 }
 0x666   :  { %vm8466_vm2 = vcmp.gt.f32.partialorder %v8461_v57, 0.0  ;;  %v8467_v46 = vmul.f32 0.2, %v8461_v57 }
 0x667   :  { %v8463_v12 = vpop.f32.mrf.mxu0 }
 0x668   :  { %v8468_v32 = vsel %vm8466_vm2, %v8461_v57, %v8467_v46 }
 0x669   :  { %v8469_v62 = vpack.c.bf16 %v8468_v32, %v8468_v32  ;;  %v9975_v10 = vpop.f32.mrf.mxu0 }
 0x66b   :  { %9993 = vmatmul.mubr.bf16.vlgmr.msra.gmra.mxu1 %v8469_v62 }
 0x72b   :  { %v8575_v60 = vpop.f32.mrf.mxu1 }
 0x72c   :  { %v8576_v1 = vadd.f32 %v9823_v42, %v8575_v60 }
 0x72d   :  { %v9994_v31 = vpop.f32.mrf.mxu1 }
 0x72e   :  { %vm8581_vm3 = vcmp.gt.f32.partialorder %v8576_v1, 0.0  ;;  %v8582_v43 = vmul.f32 0.2, %v8576_v1 }
 0x72f   :  { %v8578_v4 = vpop.f32.mrf.mxu1 }
 0x730   :  { %v8583_v58 = vsel %vm8581_vm3, %v8576_v1, %v8582_v43 }
 0x731   :  { %v8584_v0 = vpack.c.bf16 %v8583_v58, %v8583_v58  ;;  %v9995_v6 = vpop.f32.mrf.mxu1 }
 0x733   :  { %10013 = vmatmul.mubr.bf16.vlgmr.msra.gmra.mxu0 %v8584_v0 }
 0x7f3   :  { %v8690_v7 = vpop.f32.mrf.mxu0 }
 0x7f4   :  { %v8691_v8 = vadd.f32 %v9832_v48, %v8690_v7 }
 0x7f5   :  { %v10014_v44 = vpop.f32.mrf.mxu0 }
 0x7f6   :  { %v8697_v11 = vsel %vm8696_vm4, %v8691_v8, -inf }
 0x7f7   :  { %8698 = vmax.xlane.f32.xlu0 %v8697_v11  ;;  %v8693_v47 = vpop.f32.mrf.mxu0 }
 0x7f9   :  { %v10015_v14 = vpop.f32.mrf.mxu0 }
 0x880   :  { %v8699_v24 = vpop.xlane.xlu0 %8698 }
 0x881   :  { %v8700_v15 = vsub.f32 %v8691_v8, %v8699_v24 }
 0x883   :  { %v8701_v18 = vmul.f32 1.442695, %v8700_v15 }
 0x885   :  { %10110 = vpow2.f32 %v8701_v18 }
 0x892   :  { %v10111_v16 = vpop.eup %10110 }
 0x893   :  { %v8703_v56 = vsel %vm8696_vm4, %v10111_v16, 0.0 }
 0x894   :  { %8704 = vadd.xlane.f32.xlu0 %v8703_v56 }
 0x91d   :  { %v8705_v19 = vpop.xlane.xlu0 %8704 }
 0x91e   :  { %10112 = vlog2.f32 %v8705_v19 }
 0x92b   :  { %v10113_v25 = vpop.eup %10112 }
 0x92c   :  { %v8707_v2 = vmul.f32 0.6931472, %v10113_v25 }
 0x92e   :  { %v8708_v30 = vsub.f32 %v8700_v15, %v8707_v2 }
 0x930   :  { %8710 = vst.msk [vmem:[#allocation2] sm:$0x3] %vm8709_vm5, %v8708_v30 }
 0x931   :  { %10128 = shalt.err (!%p10125_p4)
}
 0x932   :  { %8720 = dma.vmem_to_hbm [thread:$0]  %s8718_s9, 32, %s13858_s11, [#allocation3]  }
 0x933   :  { %10137 = dma.done.wait [#allocation3], 32  }
 0x934   :  { %10138 = vsyncadd [#allocation3], 4294967264 }
 0x935   :  { %8724 = vsyncpa [#allocation3], 1 }

</bundles_post_ra>
